<compile_context>
chip_gen: v7x
topology: tpu7x:2x2x1
jax: 0.10.0
libtpu: 0.0.40
codegen_flags: <defaults>
</compile_context>

<pallas_src>
import functools

import jax
import jax.numpy as jnp
from jax.experimental import pallas as pl
from jax.experimental.pallas import tpu as pltpu


# ----------------------------------------------------------------------------
# Kernel 1: fused conv-as-matmul + bias + ReLU + 2x2/stride-2 max-pool
#   grid = (row_tiles, 4); axis 1 iterates the 4 positions of each 2x2 pooling
#   window and keeps a running max in a VMEM accumulator (output written once).
# ----------------------------------------------------------------------------
def _conv_relu_pool_kernel(x_ref, w_ref, b_ref, o_ref, acc_ref):
    w = pl.program_id(1)
    y = jnp.dot(x_ref[0], w_ref[...], preferred_element_type=jnp.float32)
    y = jnp.maximum(y + b_ref[...], 0.0)

    @pl.when(w == 0)
    def _():
        acc_ref[...] = y

    @pl.when(w > 0)
    def _():
        acc_ref[...] = jnp.maximum(acc_ref[...], y)

    @pl.when(w == pl.num_programs(1) - 1)
    def _():
        o_ref[...] = acc_ref[...].astype(o_ref.dtype)


def _conv_row_tile(rows, k, bytes_per_elem=2, budget=2 << 20):
    """Largest multiple-of-16 divisor of `rows` whose x-block fits `budget`;
    falls back to the full dim (exempt from the 8/128 block-shape rule)."""
    if rows * k * bytes_per_elem <= budget:
        return rows
    best = rows
    for t in range(16, rows, 16):
        if rows % t == 0 and t * k * bytes_per_elem <= budget:
            best = t
    return best


def conv5x5_relu_pool(x_nhwc, w_packed, b_packed):
    """5x5 conv (stride 1, pad 2) + bias + ReLU + 2x2 max-pool, all in one kernel.

    x_nhwc:   (N, H, W, Cin) bf16, H and W even
    w_packed: (25*Cin, Cout)  bf16, rows ordered (kh, kw, cin)
    b_packed: (1, Cout)       f32
    returns:  (N, H//2, W//2, Cout) bf16
    """
    N, H, W, Cin = x_nhwc.shape
    K, Cout = w_packed.shape
    assert K == 25 * Cin and H % 2 == 0 and W % 2 == 0
    PH, PW = H // 2, W // 2
    R = N * PH * PW

    # im2col (bf16), grouped by pooling-window position:
    #   g[wy*2 + wx, n*PH*PW + ph*PW + pw, :] = patch at (oh=2*ph+wy, ow=2*pw+wx)
    xp = jnp.pad(x_nhwc, ((0, 0), (2, 2), (2, 2), (0, 0)))
    cols = [xp[:, kh:kh + H, kw:kw + W, :] for kh in range(5) for kw in range(5)]
    patches = jnp.concatenate(cols, axis=-1)                       # (N, H, W, 25*Cin)
    g = patches.reshape(N, PH, 2, PW, 2, K).transpose(2, 4, 0, 1, 3, 5)
    g = g.reshape(4, R, K)
    # TODO(synk): stream the 25 conv taps inside the kernel (manual DMA over shifted
    # windows) to avoid materializing the 25x im2col in HBM at large batch sizes.

    tm = _conv_row_tile(R, K)
    out = pl.pallas_call(
        _conv_relu_pool_kernel,
        out_shape=jax.ShapeDtypeStruct((R, Cout), jnp.bfloat16),
        grid_spec=pltpu.PrefetchScalarGridSpec(
            num_scalar_prefetch=0,
            grid=(R // tm, 4),
            in_specs=[
                pl.BlockSpec((1, tm, K), lambda i, w: (w, i, 0)),
                pl.BlockSpec((K, Cout), lambda i, w: (0, 0)),
                pl.BlockSpec((1, Cout), lambda i, w: (0, 0)),
            ],
            out_specs=pl.BlockSpec((tm, Cout), lambda i, w: (i, 0)),
            scratch_shapes=[pltpu.VMEM((tm, Cout), jnp.float32)],
        ),
        compiler_params=pltpu.CompilerParams(
            dimension_semantics=("parallel", "arbitrary")),
    )(g, w_packed, b_packed)
    return out.reshape(N, PH, PW, Cout)


# ----------------------------------------------------------------------------
# Kernel 2: fully-connected layer  y = act(x @ W + b), single full-K block
# ----------------------------------------------------------------------------
def _linear_kernel(x_ref, w_ref, b_ref, o_ref, *, relu):
    y = jnp.dot(x_ref[...].astype(jnp.bfloat16), w_ref[...],
                preferred_element_type=jnp.float32)
    y = y + b_ref[...]
    if relu:
        y = jnp.maximum(y, 0.0)
    o_ref[...] = y.astype(o_ref.dtype)


def linear(x, w_packed, b_packed, *, relu, out_dtype=jnp.bfloat16, tn=256):
    M, K = x.shape
    Kw, N = w_packed.shape
    assert K == Kw and b_packed.shape == (1, N)
    if N % tn != 0:
        tn = N                      # full-dim block (exempt from 128 alignment)
    return pl.pallas_call(
        functools.partial(_linear_kernel, relu=relu),
        out_shape=jax.ShapeDtypeStruct((M, N), out_dtype),
        grid_spec=pltpu.PrefetchScalarGridSpec(
            num_scalar_prefetch=0,
            grid=(N // tn,),
            in_specs=[
                pl.BlockSpec((M, K), lambda j: (0, 0)),     # full M, full K: one k-step
                pl.BlockSpec((K, tn), lambda j: (0, j)),
                pl.BlockSpec((1, tn), lambda j: (0, j)),
            ],
            out_specs=pl.BlockSpec((M, tn), lambda j: (0, j)),
        ),
        compiler_params=pltpu.CompilerParams(
            dimension_semantics=("parallel",)),
    )(x, w_packed, b_packed)


# ----------------------------------------------------------------------------
# Parameters (deterministic, PyTorch-default-style uniform init) + one-time packing
# ----------------------------------------------------------------------------
def init_params(key):
    ks = jax.random.split(key, 10)

    def u(k, shape, fan_in):
        bound = 1.0 / jnp.sqrt(float(fan_in))
        return jax.random.uniform(k, shape, jnp.float32, -bound, bound)

    return {
        "conv1_w": u(ks[0], (32, 1, 5, 5), 1 * 25),          # torch OIHW
        "conv1_b": u(ks[1], (32,), 1 * 25),
        "conv2_w": u(ks[2], (64, 32, 5, 5), 32 * 25),
        "conv2_b": u(ks[3], (64,), 32 * 25),
        "fc1_w": u(ks[4], (1024, 64 * 7 * 7), 64 * 7 * 7),   # torch (out, in)
        "fc1_b": u(ks[5], (1024,), 64 * 7 * 7),
        "fc2_w": u(ks[6], (512, 1024), 1024),
        "fc2_b": u(ks[7], (512,), 1024),
        "fc3_w": u(ks[8], (10, 512), 512),
        "fc3_b": u(ks[9], (10,), 512),
    }


def pack_params(params):
    """One-time repack of torch-layout params into matmul-ready bf16 weights + f32 biases."""
    def bf(a):
        return a.astype(jnp.bfloat16)

    c1w = bf(params["conv1_w"].transpose(2, 3, 1, 0).reshape(25 * 1, 32))
    c2w = bf(params["conv2_w"].transpose(2, 3, 1, 0).reshape(25 * 32, 64))
    # fc1 columns permuted from torch's (c, h, w) flatten order to NHWC (h, w, c) order,
    # so the flatten after conv2 is a plain reshape of the NHWC activation.
    f1w = bf(params["fc1_w"].reshape(1024, 64, 7, 7)
             .transpose(2, 3, 1, 0).reshape(64 * 7 * 7, 1024))
    f2w = bf(params["fc2_w"].T)
    f3w = bf(params["fc3_w"].T)
    asb = lambda b: b.reshape(1, -1).astype(jnp.float32)
    return {"c1w": c1w, "c1b": asb(params["conv1_b"]),
            "c2w": c2w, "c2b": asb(params["conv2_b"]),
            "f1w": f1w, "f1b": asb(params["fc1_b"]),
            "f2w": f2w, "f2b": asb(params["fc2_b"]),
            "f3w": f3w, "f3b": asb(params["fc3_b"])}


# ----------------------------------------------------------------------------
# CNN forward (Pallas)
# ----------------------------------------------------------------------------
@jax.jit
def cnn_forward(packed, x_nchw):
    N = x_nchw.shape[0]
    x = jnp.transpose(x_nchw, (0, 2, 3, 1)).astype(jnp.bfloat16)       # NCHW -> NHWC
    y1 = conv5x5_relu_pool(x, packed["c1w"], packed["c1b"])            # (N, 14, 14, 32)
    y2 = conv5x5_relu_pool(y1, packed["c2w"], packed["c2b"])           # (N,  7,  7, 64)
    # Flatten: fc1 weights were pre-permuted to NHWC order, so this reshape matches
    # torch's x.view(-1, 64*7*7) exactly (no activation transpose needed).
    flat = y2.reshape(N, 7 * 7 * 64)
    h = linear(flat, packed["f1w"], packed["f1b"], relu=True)
    h = linear(h, packed["f2w"], packed["f2b"], relu=True)
    out = linear(h, packed["f3w"], packed["f3b"], relu=False, out_dtype=jnp.float32)
    # torch forward calls self.dp(x) but discards the result -> no-op on the output.
    return out


# pure-JAX reference (f32 math with bf16-rounded weights, matching what the kernel stores)
def cnn_reference(params, x_nchw):
    def bf(a):
        return a.astype(jnp.bfloat16).astype(jnp.float32)

    def conv(x, w, b):
        y = jax.lax.conv_general_dilated(
            x, bf(w), window_strides=(1, 1), padding=((2, 2), (2, 2)),
            dimension_numbers=("NCHW", "OIHW", "NCHW"))
        return y + b[None, :, None, None]

    def pool(x):
        return jax.lax.reduce_window(x, -jnp.inf, jax.lax.max,
                                     (1, 1, 2, 2), (1, 1, 2, 2), "VALID")

    x = x_nchw.astype(jnp.float32)
    x = pool(jax.nn.relu(conv(x, params["conv1_w"], params["conv1_b"])))
    x = pool(jax.nn.relu(conv(x, params["conv2_w"], params["conv2_b"])))
    x = x.reshape(x.shape[0], -1)
    x = jax.nn.relu(x @ bf(params["fc1_w"]).T + params["fc1_b"])
    x = jax.nn.relu(x @ bf(params["fc2_w"]).T + params["fc2_b"])
    return x @ bf(params["fc3_w"]).T + params["fc3_b"]


if __name__ == "__main__":
    key = jax.random.PRNGKey(0)
    pkey, xkey = jax.random.split(key)
    params = init_params(pkey)
    packed = pack_params(params)          # one-time weight repack, outside the forward pass
    # MNIST-sized input implied by the module (fc1 expects 64*7*7 after two 2x pools).
    x = jax.random.normal(xkey, (2, 1, 28, 28), jnp.float32)           # NCHW, like torch

    out = jax.block_until_ready(cnn_forward(packed, x))
    ref = jax.block_until_ready(cnn_reference(params, x))
    assert out.shape == (2, 10), out.shape
    max_err = float(jnp.max(jnp.abs(out - ref)))
    assert jnp.allclose(out, ref, atol=1e-2, rtol=1e-2), max_err
    print("KERNEL_OK")
</pallas_src>

<mosaic_0001>
module attributes {stable_mosaic.version = 11 : i64} {
  func.func @_conv_relu_pool_kernel(%arg0: i32, %arg1: i32, %arg2: memref<1x392x25xbf16, #tpu.memory_space<vmem>>, %arg3: memref<25x32xbf16, #tpu.memory_space<vmem>>, %arg4: memref<1x32xf32, #tpu.memory_space<vmem>>, %arg5: memref<392x32xbf16, #tpu.memory_space<vmem>>, %arg6: memref<392x32xf32, #tpu.memory_space<vmem>>) attributes {dimension_semantics = [#tpu.dimension_semantics<parallel>, #tpu.dimension_semantics<arbitrary>], iteration_bounds = array<i64: 1, 4>, scalar_prefetch = 0 : i64, scratch_operands = 1 : i64, tpu.core_type = #tpu.core_type<tc>, window_params = [{transform_indices = @transform_0, window_bounds = array<i64: 1, 392, 25>}, {pipeline_mode = #tpu.pipeline_mode<synchronous>, transform_indices = @transform_1, window_bounds = array<i64: 25, 32>}, {pipeline_mode = #tpu.pipeline_mode<synchronous>, transform_indices = @transform_2, window_bounds = array<i64: 1, 32>}, {transform_indices = @transform_3, window_bounds = array<i64: 392, 32>}]} {
    %c0 = arith.constant 0 : index
    %c0_0 = arith.constant 0 : index
    %c0_1 = arith.constant 0 : index
    %0 = vector.load %arg2[%c0, %c0_0, %c0_1] : memref<1x392x25xbf16, #tpu.memory_space<vmem>>, vector<1x392x25xbf16>
    %1 = vector.shape_cast %0 : vector<1x392x25xbf16> to vector<392x25xbf16>
    %c0_2 = arith.constant 0 : index
    %c0_3 = arith.constant 0 : index
    %2 = vector.load %arg3[%c0_2, %c0_3] : memref<25x32xbf16, #tpu.memory_space<vmem>>, vector<25x32xbf16>
    %cst = arith.constant dense<0.000000e+00> : vector<392x32xf32>
    %3 = tpu.matmul %1, %2, %cst {dimension_numbers = #tpu.dot_dimension_numbers<[1], [0], [0], [1], [0, 0, 1, 1], [], []>} : vector<392x25xbf16>, vector<25x32xbf16>, vector<392x32xf32> -> vector<392x32xf32>
    %c0_4 = arith.constant 0 : index
    %c0_5 = arith.constant 0 : index
    %4 = vector.load %arg4[%c0_4, %c0_5] : memref<1x32xf32, #tpu.memory_space<vmem>>, vector<1x32xf32>
    %5 = vector.broadcast %4 : vector<1x32xf32> to vector<392x32xf32>
    %6 = arith.addf %3, %5 : vector<392x32xf32>
    %cst_6 = arith.constant 0.000000e+00 : f32
    %7 = vector.broadcast %cst_6 : f32 to vector<392x32xf32>
    %8 = arith.maximumf %6, %7 : vector<392x32xf32>
    %c0_i32 = arith.constant 0 : i32
    %9 = arith.cmpi eq, %arg1, %c0_i32 : i32
    %10 = arith.extui %9 : i1 to i32
    %c0_i32_7 = arith.constant 0 : i32
    %11 = arith.cmpi ne, %10, %c0_i32_7 : i32
    scf.if %11 {
      %c0_11 = arith.constant 0 : index
      %c0_12 = arith.constant 0 : index
      %18 = vector.load %arg6[%c0_11, %c0_12] : memref<392x32xf32, #tpu.memory_space<vmem>>, vector<392x32xf32>
      tpu.vector_store %arg6[%c0_11, %c0_12], %8 {strides = array<i32>} : memref<392x32xf32, #tpu.memory_space<vmem>>, vector<392x32xf32>,
    } else {
    }
    %c0_i32_8 = arith.constant 0 : i32
    %12 = arith.cmpi sgt, %arg1, %c0_i32_8 : i32
    %13 = arith.extui %12 : i1 to i32
    %c0_i32_9 = arith.constant 0 : i32
    %14 = arith.cmpi ne, %13, %c0_i32_9 : i32
    scf.if %14 {
      %c0_11 = arith.constant 0 : index
      %c0_12 = arith.constant 0 : index
      %18 = vector.load %arg6[%c0_11, %c0_12] : memref<392x32xf32, #tpu.memory_space<vmem>>, vector<392x32xf32>
      %19 = arith.maximumf %18, %8 : vector<392x32xf32>
      %c0_13 = arith.constant 0 : index
      %c0_14 = arith.constant 0 : index
      %20 = vector.load %arg6[%c0_13, %c0_14] : memref<392x32xf32, #tpu.memory_space<vmem>>, vector<392x32xf32>
      tpu.vector_store %arg6[%c0_13, %c0_14], %19 {strides = array<i32>} : memref<392x32xf32, #tpu.memory_space<vmem>>, vector<392x32xf32>,
    } else {
    }
    %c3_i32 = arith.constant 3 : i32
    %15 = arith.cmpi eq, %arg1, %c3_i32 : i32
    %16 = arith.extui %15 : i1 to i32
    %c0_i32_10 = arith.constant 0 : i32
    %17 = arith.cmpi ne, %16, %c0_i32_10 : i32
    scf.if %17 {
      %c0_11 = arith.constant 0 : index
      %c0_12 = arith.constant 0 : index
      %18 = vector.load %arg6[%c0_11, %c0_12] : memref<392x32xf32, #tpu.memory_space<vmem>>, vector<392x32xf32>
      %19 = arith.truncf %18 : vector<392x32xf32> to vector<392x32xbf16>
      %c0_13 = arith.constant 0 : index
      %c0_14 = arith.constant 0 : index
      %20 = vector.load %arg5[%c0_13, %c0_14] : memref<392x32xbf16, #tpu.memory_space<vmem>>, vector<392x32xbf16>
      tpu.vector_store %arg5[%c0_13, %c0_14], %19 {strides = array<i32>} : memref<392x32xbf16, #tpu.memory_space<vmem>>, vector<392x32xbf16>,
    } else {
    }
    return
  }
  func.func @transform_0(%arg0: i32, %arg1: i32) -> (i32, i32, i32) {
    %c0_i32 = arith.constant 0 : i32
    %c0_i32_0 = arith.constant 0 : i32
    return %arg1, %arg0, %c0_i32 : i32, i32, i32
  }
  func.func @transform_1(%arg0: i32, %arg1: i32) -> (i32, i32) {
    %c0_i32 = arith.constant 0 : i32
    %c0_i32_0 = arith.constant 0 : i32
    %c0_i32_1 = arith.constant 0 : i32
    return %c0_i32, %c0_i32_0 : i32, i32
  }
  func.func @transform_2(%arg0: i32, %arg1: i32) -> (i32, i32) {
    %c0_i32 = arith.constant 0 : i32
    %c0_i32_0 = arith.constant 0 : i32
    %c0_i32_1 = arith.constant 0 : i32
    return %c0_i32, %c0_i32_0 : i32, i32
  }
  func.func @transform_3(%arg0: i32, %arg1: i32) -> (i32, i32) {
    %c0_i32 = arith.constant 0 : i32
    %c0_i32_0 = arith.constant 0 : i32
    return %arg0, %c0_i32 : i32, i32
  }
}

module attributes {stable_mosaic.version = 11 : i64} {
  func.func @_conv_relu_pool_kernel(%arg0: i32, %arg1: i32, %arg2: memref<1x98x800xbf16, #tpu.memory_space<vmem>>, %arg3: memref<800x64xbf16, #tpu.memory_space<vmem>>, %arg4: memref<1x64xf32, #tpu.memory_space<vmem>>, %arg5: memref<98x64xbf16, #tpu.memory_space<vmem>>, %arg6: memref<98x64xf32, #tpu.memory_space<vmem>>) attributes {dimension_semantics = [#tpu.dimension_semantics<parallel>, #tpu.dimension_semantics<arbitrary>], iteration_bounds = array<i64: 1, 4>, scalar_prefetch = 0 : i64, scratch_operands = 1 : i64, tpu.core_type = #tpu.core_type<tc>, window_params = [{transform_indices = @transform_0, window_bounds = array<i64: 1, 98, 800>}, {pipeline_mode = #tpu.pipeline_mode<synchronous>, transform_indices = @transform_1, window_bounds = array<i64: 800, 64>}, {pipeline_mode = #tpu.pipeline_mode<synchronous>, transform_indices = @transform_2, window_bounds = array<i64: 1, 64>}, {transform_indices = @transform_3, window_bounds = array<i64: 98, 64>}]} {
    %c0 = arith.constant 0 : index
    %c0_0 = arith.constant 0 : index
    %c0_1 = arith.constant 0 : index
    %0 = vector.load %arg2[%c0, %c0_0, %c0_1] : memref<1x98x800xbf16, #tpu.memory_space<vmem>>, vector<1x98x800xbf16>
    %1 = vector.shape_cast %0 : vector<1x98x800xbf16> to vector<98x800xbf16>
    %c0_2 = arith.constant 0 : index
    %c0_3 = arith.constant 0 : index
    %2 = vector.load %arg3[%c0_2, %c0_3] : memref<800x64xbf16, #tpu.memory_space<vmem>>, vector<800x64xbf16>
    %cst = arith.constant dense<0.000000e+00> : vector<98x64xf32>
    %3 = tpu.matmul %1, %2, %cst {dimension_numbers = #tpu.dot_dimension_numbers<[1], [0], [0], [1], [0, 0, 1, 1], [], []>} : vector<98x800xbf16>, vector<800x64xbf16>, vector<98x64xf32> -> vector<98x64xf32>
    %c0_4 = arith.constant 0 : index
    %c0_5 = arith.constant 0 : index
    %4 = vector.load %arg4[%c0_4, %c0_5] : memref<1x64xf32, #tpu.memory_space<vmem>>, vector<1x64xf32>
    %5 = vector.broadcast %4 : vector<1x64xf32> to vector<98x64xf32>
    %6 = arith.addf %3, %5 : vector<98x64xf32>
    %cst_6 = arith.constant 0.000000e+00 : f32
    %7 = vector.broadcast %cst_6 : f32 to vector<98x64xf32>
    %8 = arith.maximumf %6, %7 : vector<98x64xf32>
    %c0_i32 = arith.constant 0 : i32
    %9 = arith.cmpi eq, %arg1, %c0_i32 : i32
    %10 = arith.extui %9 : i1 to i32
    %c0_i32_7 = arith.constant 0 : i32
    %11 = arith.cmpi ne, %10, %c0_i32_7 : i32
    scf.if %11 {
      %c0_11 = arith.constant 0 : index
      %c0_12 = arith.constant 0 : index
      %18 = vector.load %arg6[%c0_11, %c0_12] : memref<98x64xf32, #tpu.memory_space<vmem>>, vector<98x64xf32>
      tpu.vector_store %arg6[%c0_11, %c0_12], %8 {strides = array<i32>} : memref<98x64xf32, #tpu.memory_space<vmem>>, vector<98x64xf32>,
    } else {
    }
    %c0_i32_8 = arith.constant 0 : i32
    %12 = arith.cmpi sgt, %arg1, %c0_i32_8 : i32
    %13 = arith.extui %12 : i1 to i32
    %c0_i32_9 = arith.constant 0 : i32
    %14 = arith.cmpi ne, %13, %c0_i32_9 : i32
    scf.if %14 {
      %c0_11 = arith.constant 0 : index
      %c0_12 = arith.constant 0 : index
      %18 = vector.load %arg6[%c0_11, %c0_12] : memref<98x64xf32, #tpu.memory_space<vmem>>, vector<98x64xf32>
      %19 = arith.maximumf %18, %8 : vector<98x64xf32>
      %c0_13 = arith.constant 0 : index
      %c0_14 = arith.constant 0 : index
      %20 = vector.load %arg6[%c0_13, %c0_14] : memref<98x64xf32, #tpu.memory_space<vmem>>, vector<98x64xf32>
      tpu.vector_store %arg6[%c0_13, %c0_14], %19 {strides = array<i32>} : memref<98x64xf32, #tpu.memory_space<vmem>>, vector<98x64xf32>,
    } else {
    }
    %c3_i32 = arith.constant 3 : i32
    %15 = arith.cmpi eq, %arg1, %c3_i32 : i32
    %16 = arith.extui %15 : i1 to i32
    %c0_i32_10 = arith.constant 0 : i32
    %17 = arith.cmpi ne, %16, %c0_i32_10 : i32
    scf.if %17 {
      %c0_11 = arith.constant 0 : index
      %c0_12 = arith.constant 0 : index
      %18 = vector.load %arg6[%c0_11, %c0_12] : memref<98x64xf32, #tpu.memory_space<vmem>>, vector<98x64xf32>
      %19 = arith.truncf %18 : vector<98x64xf32> to vector<98x64xbf16>
      %c0_13 = arith.constant 0 : index
      %c0_14 = arith.constant 0 : index
      %20 = vector.load %arg5[%c0_13, %c0_14] : memref<98x64xbf16, #tpu.memory_space<vmem>>, vector<98x64xbf16>
      tpu.vector_store %arg5[%c0_13, %c0_14], %19 {strides = array<i32>} : memref<98x64xbf16, #tpu.memory_space<vmem>>, vector<98x64xbf16>,
    } else {
    }
    return
  }
  func.func @transform_0(%arg0: i32, %arg1: i32) -> (i32, i32, i32) {
    %c0_i32 = arith.constant 0 : i32
    %c0_i32_0 = arith.constant 0 : i32
    return %arg1, %arg0, %c0_i32 : i32, i32, i32
  }
  func.func @transform_1(%arg0: i32, %arg1: i32) -> (i32, i32) {
    %c0_i32 = arith.constant 0 : i32
    %c0_i32_0 = arith.constant 0 : i32
    %c0_i32_1 = arith.constant 0 : i32
    return %c0_i32, %c0_i32_0 : i32, i32
  }
  func.func @transform_2(%arg0: i32, %arg1: i32) -> (i32, i32) {
    %c0_i32 = arith.constant 0 : i32
    %c0_i32_0 = arith.constant 0 : i32
    %c0_i32_1 = arith.constant 0 : i32
    return %c0_i32, %c0_i32_0 : i32, i32
  }
  func.func @transform_3(%arg0: i32, %arg1: i32) -> (i32, i32) {
    %c0_i32 = arith.constant 0 : i32
    %c0_i32_0 = arith.constant 0 : i32
    return %arg0, %c0_i32 : i32, i32
  }
}

module attributes {stable_mosaic.version = 11 : i64} {
  func.func @_linear_kernel(%arg0: i32, %arg1: memref<2x3136xbf16, #tpu.memory_space<vmem>>, %arg2: memref<3136x256xbf16, #tpu.memory_space<vmem>>, %arg3: memref<1x256xf32, #tpu.memory_space<vmem>>, %arg4: memref<2x256xbf16, #tpu.memory_space<vmem>>) attributes {dimension_semantics = [#tpu.dimension_semantics<parallel>], iteration_bounds = array<i64: 4>, scalar_prefetch = 0 : i64, scratch_operands = 0 : i64, tpu.core_type = #tpu.core_type<tc>, window_params = [{pipeline_mode = #tpu.pipeline_mode<synchronous>, transform_indices = @transform_0, window_bounds = array<i64: 2, 3136>}, {transform_indices = @transform_1, window_bounds = array<i64: 3136, 256>}, {transform_indices = @transform_2, window_bounds = array<i64: 1, 256>}, {transform_indices = @transform_3, window_bounds = array<i64: 2, 256>}]} {
    %c0 = arith.constant 0 : index
    %c0_0 = arith.constant 0 : index
    %0 = vector.load %arg1[%c0, %c0_0] : memref<2x3136xbf16, #tpu.memory_space<vmem>>, vector<2x3136xbf16>
    %c0_1 = arith.constant 0 : index
    %c0_2 = arith.constant 0 : index
    %1 = vector.load %arg2[%c0_1, %c0_2] : memref<3136x256xbf16, #tpu.memory_space<vmem>>, vector<3136x256xbf16>
    %cst = arith.constant dense<0.000000e+00> : vector<2x256xf32>
    %2 = tpu.matmul %0, %1, %cst {dimension_numbers = #tpu.dot_dimension_numbers<[1], [0], [0], [1], [0, 0, 1, 1], [], []>} : vector<2x3136xbf16>, vector<3136x256xbf16>, vector<2x256xf32> -> vector<2x256xf32>
    %c0_3 = arith.constant 0 : index
    %c0_4 = arith.constant 0 : index
    %3 = vector.load %arg3[%c0_3, %c0_4] : memref<1x256xf32, #tpu.memory_space<vmem>>, vector<1x256xf32>
    %4 = vector.broadcast %3 : vector<1x256xf32> to vector<2x256xf32>
    %5 = arith.addf %2, %4 : vector<2x256xf32>
    %cst_5 = arith.constant 0.000000e+00 : f32
    %6 = vector.broadcast %cst_5 : f32 to vector<2x256xf32>
    %7 = arith.maximumf %5, %6 : vector<2x256xf32>
    %8 = arith.truncf %7 : vector<2x256xf32> to vector<2x256xbf16>
    %c0_6 = arith.constant 0 : index
    %c0_7 = arith.constant 0 : index
    %9 = vector.load %arg4[%c0_6, %c0_7] : memref<2x256xbf16, #tpu.memory_space<vmem>>, vector<2x256xbf16>
    tpu.vector_store %arg4[%c0_6, %c0_7], %8 {strides = array<i32>} : memref<2x256xbf16, #tpu.memory_space<vmem>>, vector<2x256xbf16>,
    return
  }
  func.func @transform_0(%arg0: i32) -> (i32, i32) {
    %c0_i32 = arith.constant 0 : i32
    %c0_i32_0 = arith.constant 0 : i32
    %c0_i32_1 = arith.constant 0 : i32
    return %c0_i32, %c0_i32_0 : i32, i32
  }
  func.func @transform_1(%arg0: i32) -> (i32, i32) {
    %c0_i32 = arith.constant 0 : i32
    %c0_i32_0 = arith.constant 0 : i32
    return %c0_i32, %arg0 : i32, i32
  }
  func.func @transform_2(%arg0: i32) -> (i32, i32) {
    %c0_i32 = arith.constant 0 : i32
    %c0_i32_0 = arith.constant 0 : i32
    return %c0_i32, %arg0 : i32, i32
  }
  func.func @transform_3(%arg0: i32) -> (i32, i32) {
    %c0_i32 = arith.constant 0 : i32
    %c0_i32_0 = arith.constant 0 : i32
    return %c0_i32, %arg0 : i32, i32
  }
}

module attributes {stable_mosaic.version = 11 : i64} {
  func.func @_linear_kernel(%arg0: i32, %arg1: memref<2x1024xbf16, #tpu.memory_space<vmem>>, %arg2: memref<1024x256xbf16, #tpu.memory_space<vmem>>, %arg3: memref<1x256xf32, #tpu.memory_space<vmem>>, %arg4: memref<2x256xbf16, #tpu.memory_space<vmem>>) attributes {dimension_semantics = [#tpu.dimension_semantics<parallel>], iteration_bounds = array<i64: 2>, scalar_prefetch = 0 : i64, scratch_operands = 0 : i64, tpu.core_type = #tpu.core_type<tc>, window_params = [{pipeline_mode = #tpu.pipeline_mode<synchronous>, transform_indices = @transform_0, window_bounds = array<i64: 2, 1024>}, {transform_indices = @transform_1, window_bounds = array<i64: 1024, 256>}, {transform_indices = @transform_2, window_bounds = array<i64: 1, 256>}, {transform_indices = @transform_3, window_bounds = array<i64: 2, 256>}]} {
    %c0 = arith.constant 0 : index
    %c0_0 = arith.constant 0 : index
    %0 = vector.load %arg1[%c0, %c0_0] : memref<2x1024xbf16, #tpu.memory_space<vmem>>, vector<2x1024xbf16>
    %c0_1 = arith.constant 0 : index
    %c0_2 = arith.constant 0 : index
    %1 = vector.load %arg2[%c0_1, %c0_2] : memref<1024x256xbf16, #tpu.memory_space<vmem>>, vector<1024x256xbf16>
    %cst = arith.constant dense<0.000000e+00> : vector<2x256xf32>
    %2 = tpu.matmul %0, %1, %cst {dimension_numbers = #tpu.dot_dimension_numbers<[1], [0], [0], [1], [0, 0, 1, 1], [], []>} : vector<2x1024xbf16>, vector<1024x256xbf16>, vector<2x256xf32> -> vector<2x256xf32>
    %c0_3 = arith.constant 0 : index
    %c0_4 = arith.constant 0 : index
    %3 = vector.load %arg3[%c0_3, %c0_4] : memref<1x256xf32, #tpu.memory_space<vmem>>, vector<1x256xf32>
    %4 = vector.broadcast %3 : vector<1x256xf32> to vector<2x256xf32>
    %5 = arith.addf %2, %4 : vector<2x256xf32>
    %cst_5 = arith.constant 0.000000e+00 : f32
    %6 = vector.broadcast %cst_5 : f32 to vector<2x256xf32>
    %7 = arith.maximumf %5, %6 : vector<2x256xf32>
    %8 = arith.truncf %7 : vector<2x256xf32> to vector<2x256xbf16>
    %c0_6 = arith.constant 0 : index
    %c0_7 = arith.constant 0 : index
    %9 = vector.load %arg4[%c0_6, %c0_7] : memref<2x256xbf16, #tpu.memory_space<vmem>>, vector<2x256xbf16>
    tpu.vector_store %arg4[%c0_6, %c0_7], %8 {strides = array<i32>} : memref<2x256xbf16, #tpu.memory_space<vmem>>, vector<2x256xbf16>,
    return
  }
  func.func @transform_0(%arg0: i32) -> (i32, i32) {
    %c0_i32 = arith.constant 0 : i32
    %c0_i32_0 = arith.constant 0 : i32
    %c0_i32_1 = arith.constant 0 : i32
    return %c0_i32, %c0_i32_0 : i32, i32
  }
  func.func @transform_1(%arg0: i32) -> (i32, i32) {
    %c0_i32 = arith.constant 0 : i32
    %c0_i32_0 = arith.constant 0 : i32
    return %c0_i32, %arg0 : i32, i32
  }
  func.func @transform_2(%arg0: i32) -> (i32, i32) {
    %c0_i32 = arith.constant 0 : i32
    %c0_i32_0 = arith.constant 0 : i32
    return %c0_i32, %arg0 : i32, i32
  }
  func.func @transform_3(%arg0: i32) -> (i32, i32) {
    %c0_i32 = arith.constant 0 : i32
    %c0_i32_0 = arith.constant 0 : i32
    return %c0_i32, %arg0 : i32, i32
  }
}

module attributes {stable_mosaic.version = 11 : i64} {
  func.func @_linear_kernel(%arg0: i32, %arg1: memref<2x512xbf16, #tpu.memory_space<vmem>>, %arg2: memref<512x10xbf16, #tpu.memory_space<vmem>>, %arg3: memref<1x10xf32, #tpu.memory_space<vmem>>, %arg4: memref<2x10xf32, #tpu.memory_space<vmem>>) attributes {dimension_semantics = [#tpu.dimension_semantics<parallel>], iteration_bounds = array<i64: 1>, scalar_prefetch = 0 : i64, scratch_operands = 0 : i64, tpu.core_type = #tpu.core_type<tc>, window_params = [{pipeline_mode = #tpu.pipeline_mode<synchronous>, transform_indices = @transform_0, window_bounds = array<i64: 2, 512>}, {transform_indices = @transform_1, window_bounds = array<i64: 512, 10>}, {transform_indices = @transform_2, window_bounds = array<i64: 1, 10>}, {transform_indices = @transform_3, window_bounds = array<i64: 2, 10>}]} {
    %c0 = arith.constant 0 : index
    %c0_0 = arith.constant 0 : index
    %0 = vector.load %arg1[%c0, %c0_0] : memref<2x512xbf16, #tpu.memory_space<vmem>>, vector<2x512xbf16>
    %c0_1 = arith.constant 0 : index
    %c0_2 = arith.constant 0 : index
    %1 = vector.load %arg2[%c0_1, %c0_2] : memref<512x10xbf16, #tpu.memory_space<vmem>>, vector<512x10xbf16>
    %cst = arith.constant dense<0.000000e+00> : vector<2x10xf32>
    %2 = tpu.matmul %0, %1, %cst {dimension_numbers = #tpu.dot_dimension_numbers<[1], [0], [0], [1], [0, 0, 1, 1], [], []>} : vector<2x512xbf16>, vector<512x10xbf16>, vector<2x10xf32> -> vector<2x10xf32>
    %c0_3 = arith.constant 0 : index
    %c0_4 = arith.constant 0 : index
    %3 = vector.load %arg3[%c0_3, %c0_4] : memref<1x10xf32, #tpu.memory_space<vmem>>, vector<1x10xf32>
    %4 = vector.broadcast %3 : vector<1x10xf32> to vector<2x10xf32>
    %5 = arith.addf %2, %4 : vector<2x10xf32>
    %c0_5 = arith.constant 0 : index
    %c0_6 = arith.constant 0 : index
    %6 = vector.load %arg4[%c0_5, %c0_6] : memref<2x10xf32, #tpu.memory_space<vmem>>, vector<2x10xf32>
    tpu.vector_store %arg4[%c0_5, %c0_6], %5 {strides = array<i32>} : memref<2x10xf32, #tpu.memory_space<vmem>>, vector<2x10xf32>,
    return
  }
  func.func @transform_0(%arg0: i32) -> (i32, i32) {
    %c0_i32 = arith.constant 0 : i32
    %c0_i32_0 = arith.constant 0 : i32
    %c0_i32_1 = arith.constant 0 : i32
    return %c0_i32, %c0_i32_0 : i32, i32
  }
  func.func @transform_1(%arg0: i32) -> (i32, i32) {
    %c0_i32 = arith.constant 0 : i32
    %c0_i32_0 = arith.constant 0 : i32
    return %c0_i32, %arg0 : i32, i32
  }
  func.func @transform_2(%arg0: i32) -> (i32, i32) {
    %c0_i32 = arith.constant 0 : i32
    %c0_i32_0 = arith.constant 0 : i32
    return %c0_i32, %arg0 : i32, i32
  }
  func.func @transform_3(%arg0: i32) -> (i32, i32) {
    %c0_i32 = arith.constant 0 : i32
    %c0_i32_0 = arith.constant 0 : i32
    return %c0_i32, %arg0 : i32, i32
  }
}

</mosaic_0001>

<bundles_post_ra>
// kernel: cnn_forward.5
= control target key start
LH: loop header
LB: loop body
LE: loop exit
PB: predicated region body
PF: predicated region fallthrough
CT: control target
= control target key end

     0   :  { %s1733_s12 = smov 0   ;;  %s1735_s13 = smov 0   ;;  %s2573_s0 = inlined_call_operand.vmem [shape: bf16[4,392,25], index: 0, kind: input, shape index: {}]   ;;  %s2574_s1 = inlined_call_operand.vmem [shape: bf16[25,32], index: 1, kind: input, shape index: {}]   ;;  %s2575_s2 = inlined_call_operand.vmem [shape: f32[1,32], index: 2, kind: input, shape index: {}]   ;;  %s2576_s3 = inlined_call_operand.vmem [shape: bf16[392,32], index: 3, kind: output, shape index: {}]  }
   0x1   :  { %s1737_s14 = smov 0  }
   0x2 LB: > { %s22_s15 = sadd.s32 1, %s1704_s13  ;;  %p1336_p0 = scmp.ge.s32.totalorder %s1708_s14, 1  ;;  %s1708_s14 = sphi %s1737_s14, %s13_s14   ;;  %s1704_s13 = sphi %s1735_s13, %s2677_s13   ;;  %s1700_s12 = sphi %s1733_s12, %s2676_s12  }
   0x3   : > { %p23_p1 = scmp.ge.s32.totalorder %s22_s15, 4  ;;  %p156_p2 = scmp.lt.s32.totalorder %s1708_s14, 5 }
   0x5   : > { %s2679_s15 = smov (%p23_p1, %s22_s15), 0  ;;  %p157_p3 = pnand %p1336_p0, %p156_p2 }
   0x7   : > { %160 = sbr.rel (%p157_p3) target bundleno = 413 (0x19d), region = 32 }
   0xe   : > { %v1659_v0 = vld [vmem:[%s2574_s1] sm:$0xff]   ;;  %v1710_v1 = vmov 0.0   ;;  %v1660_v2 = vld [vmem:[%s2574_s1 + $0x8] sm:$0x1f]   ;;  %vm471_vm0 = vcmask 1043456   ;;  %vm472_vm1 = vcmask 1044480  }
   0xf   : > { %1523 = vmatprep.subr.bf16.mxu0 %v1710_v1  ;;  %1627 = vmatprep.subr.bf16.mxu1 %v1710_v1  ;;  %p185_p4 = scmp.lt.s32.totalorder %s1700_s12, 3  ;;  %v1711_v3 = vmov 65535   ;;  %vm1712_vm2 = vmmov 0   ;;  %vm395_vm3 = vcmask 203776   ;;  %v1873_v32 = vld [vmem:[%s2575_s2] ss:$0 sm:$0xff] }
  0x10   : > { %1524 = vmatpush3.bf16.msra.mxu0 %v1659_v0  ;;  %1629 = vmatpush3.bf16.msra.mxu1 %v1659_v0  ;;  %v473_v4 = vsel %vm471_vm0, 4294967295, %v1711_v3  ;;  %p1391_p5 = scmp.ne.s32.totalorder %s1700_s12, 0 }
  0x11   : > { %1525 = vmatprep.subr.bf16.mxu0 %v1710_v1  ;;  %1527 = vmatprep.mubr.msk.bf16.mxu0 %vm1712_vm2, %v1710_v1  ;;  %v474_v5 = vsel %vm472_vm1, %v473_v4, 0  ;;  %s186_s20 = scalar_select %p185_p4, %s1700_s12, 3 }
  0x12   : > { %1628 = vmatprep.subr.bf16.mxu1 %v1710_v1  ;;  %1579 = vmatprep.mubr.msk.bf16.mxu1 %vm1712_vm2, %v1710_v1  ;;  %v476_v6 = vand.u32 %v1660_v2, %v474_v5  ;;  %vm763_vm4 = vcmask (!%p1391_p5), 261120  }
  0x13   : > { %s1631_s21 = smul.u32 196, %s186_s20 }
  0x14   : > { %1526 = vmatpush3.bf16.msra.mxu0 %v476_v6  ;;  %1630 = vmatpush3.bf16.msra.mxu1 %v476_v6 }
  0x15   : > { %s1772_s24 = scalar_lea.vmem %s2573_s0, %s1631_s21 }
  0x16   : > { %v1661_v7 = vld [vmem:[%s1772_s24] sm:$0xff]   ;;  %v1662_v8 = vld [vmem:[%s1772_s24 + $0x68] sm:$0xff]   ;;  %v1664_v10 = vld [vmem:[%s1772_s24 + $0x70] sm:$0xff]  }
  0x17   : > { %1528 = vmatmul.mubr.msk.bf16.vlgmr.msra.gmra.mrb[0].mxu0 %vm395_vm3, %v1661_v7  ;;  %1580 = vmatmul.mubr.msk.bf16.vlgmr.msra.gmra.mrb[0].mxu1 %vm395_vm3, %v1662_v8  ;;  %v1663_v9 = vld [vmem:[%s1772_s24 + $0x8] sm:$0xff]   ;;  %v1665_v11 = vld [vmem:[%s1772_s24 + $0x10] sm:$0xff]   ;;  %v1666_v12 = vld [vmem:[%s1772_s24 + $0x78] sm:$0xff]  }
  0x18   : > { %1531 = vmatprep.mubr.msk.bf16.mxu0 %vm1712_vm2, %v1710_v1  ;;  %1583 = vmatprep.mubr.msk.bf16.mxu1 %vm1712_vm2, %v1710_v1  ;;  %v1667_v13 = vld [vmem:[%s1772_s24 + $0x18] sm:$0xff]   ;;  %v1668_v14 = vld [vmem:[%s1772_s24 + $0x80] sm:$0xff]   ;;  %v1670_v16 = vld [vmem:[%s1772_s24 + $0x88] sm:$0xff]  }
  0x19   : > { %v1669_v15 = vld [vmem:[%s1772_s24 + $0x20] sm:$0xff]   ;;  %v1671_v17 = vld [vmem:[%s1772_s24 + $0x28] sm:$0xff]   ;;  %v1672_v18 = vld [vmem:[%s1772_s24 + $0x90] sm:$0xff]  }
  0x1a   : > { %v1673_v19 = vld [vmem:[%s1772_s24 + $0x30] sm:$0xff]   ;;  %v1674_v20 = vld [vmem:[%s1772_s24 + $0x98] sm:$0xff]   ;;  %v1676_v22 = vld [vmem:[%s1772_s24 + $0xa0] sm:$0xff]  }
  0x1b   : > { %v1675_v21 = vld [vmem:[%s1772_s24 + $0x38] sm:$0xff]   ;;  %v1677_v23 = vld [vmem:[%s1772_s24 + $0x40] sm:$0xff]   ;;  %v1678_v24 = vld [vmem:[%s1772_s24 + $0xa8] sm:$0xff]  }
  0x1c   : > { %v1679_v25 = vld [vmem:[%s1772_s24 + $0x48] sm:$0xff]   ;;  %v1680_v26 = vld [vmem:[%s1772_s24 + $0xb0] sm:$0xff]   ;;  %v1682_v28 = vld [vmem:[%s1772_s24 + $0xb8] sm:$0xff]  }
  0x1d   : > { %v1681_v27 = vld [vmem:[%s1772_s24 + $0x50] sm:$0xff]   ;;  %v1683_v29 = vld [vmem:[%s1772_s24 + $0x58] sm:$0xff]   ;;  %v1684_v30 = vld [vmem:[%s1772_s24 + $0xc0] ss:$0 sps:$4 sm:$0xff]  }
  0x1e   : > { %v1685_v31 = vld [vmem:[%s1772_s24 + $0x60] sm:$0xff]  }
  0x1f   : > { %1532 = vmatmul.mubr.msk.bf16.gmra.mrb[4].mxu0 %vm395_vm3, %v1663_v9  ;;  %1584 = vmatmul.mubr.msk.bf16.gmra.mrb[4].mxu1 %vm395_vm3, %v1664_v10 }
  0x20   : > { %1535 = vmatprep.mubr.msk.bf16.mxu0 %vm1712_vm2, %v1710_v1  ;;  %1587 = vmatprep.mubr.msk.bf16.mxu1 %vm1712_vm2, %v1710_v1 }
  0x27   : > { %1536 = vmatmul.mubr.msk.bf16.gmra.mrb[8].mxu0 %vm395_vm3, %v1665_v11  ;;  %1588 = vmatmul.mubr.msk.bf16.gmra.mrb[8].mxu1 %vm395_vm3, %v1666_v12 }
  0x28   : > { %1539 = vmatprep.mubr.msk.bf16.mxu0 %vm1712_vm2, %v1710_v1  ;;  %1591 = vmatprep.mubr.msk.bf16.mxu1 %vm1712_vm2, %v1710_v1 }
  0x2f   : > { %1540 = vmatmul.mubr.msk.bf16.gmra.mrb[12].mxu0 %vm395_vm3, %v1667_v13  ;;  %1592 = vmatmul.mubr.msk.bf16.gmra.mrb[12].mxu1 %vm395_vm3, %v1668_v14 }
  0x30   : > { %1543 = vmatprep.mubr.msk.bf16.mxu0 %vm1712_vm2, %v1710_v1  ;;  %1595 = vmatprep.mubr.msk.bf16.mxu1 %vm1712_vm2, %v1710_v1 }
  0x37   : > { %1544 = vmatmul.mubr.msk.bf16.gmra.mrb[16].mxu0 %vm395_vm3, %v1669_v15  ;;  %1596 = vmatmul.mubr.msk.bf16.gmra.mrb[16].mxu1 %vm395_vm3, %v1670_v16 }
  0x38   : > { %1547 = vmatprep.mubr.msk.bf16.mxu0 %vm1712_vm2, %v1710_v1  ;;  %1599 = vmatprep.mubr.msk.bf16.mxu1 %vm1712_vm2, %v1710_v1 }
  0x3f   : > { %1548 = vmatmul.mubr.msk.bf16.gmra.mrb[20].mxu0 %vm395_vm3, %v1671_v17  ;;  %1600 = vmatmul.mubr.msk.bf16.gmra.mrb[20].mxu1 %vm395_vm3, %v1672_v18 }
  0x40   : > { %1551 = vmatprep.mubr.msk.bf16.mxu0 %vm1712_vm2, %v1710_v1  ;;  %1603 = vmatprep.mubr.msk.bf16.mxu1 %vm1712_vm2, %v1710_v1 }
  0x47   : > { %1552 = vmatmul.mubr.msk.bf16.gmra.mrb[24].mxu0 %vm395_vm3, %v1673_v19  ;;  %1604 = vmatmul.mubr.msk.bf16.gmra.mrb[24].mxu1 %vm395_vm3, %v1674_v20 }
  0x48   : > { %1555 = vmatprep.mubr.msk.bf16.mxu0 %vm1712_vm2, %v1710_v1  ;;  %1607 = vmatprep.mubr.msk.bf16.mxu1 %vm1712_vm2, %v1710_v1 }
  0x4f   : > { %1556 = vmatmul.mubr.msk.bf16.gmra.mrb[28].mxu0 %vm395_vm3, %v1675_v21  ;;  %1608 = vmatmul.mubr.msk.bf16.gmra.mrb[28].mxu1 %vm395_vm3, %v1676_v22 }
  0x50   : > { %1559 = vmatprep.mubr.msk.bf16.mxu0 %vm1712_vm2, %v1710_v1  ;;  %1611 = vmatprep.mubr.msk.bf16.mxu1 %vm1712_vm2, %v1710_v1 }
  0x57   : > { %1560 = vmatmul.mubr.msk.bf16.gmra.mrb[32].mxu0 %vm395_vm3, %v1677_v23  ;;  %1612 = vmatmul.mubr.msk.bf16.gmra.mrb[32].mxu1 %vm395_vm3, %v1678_v24 }
  0x58   : > { %1563 = vmatprep.mubr.msk.bf16.mxu0 %vm1712_vm2, %v1710_v1  ;;  %1615 = vmatprep.mubr.msk.bf16.mxu1 %vm1712_vm2, %v1710_v1 }
  0x5f   : > { %1564 = vmatmul.mubr.msk.bf16.gmra.mrb[36].mxu0 %vm395_vm3, %v1679_v25  ;;  %1616 = vmatmul.mubr.msk.bf16.gmra.mrb[36].mxu1 %vm395_vm3, %v1680_v26 }
  0x60   : > { %1567 = vmatprep.mubr.msk.bf16.mxu0 %vm1712_vm2, %v1710_v1  ;;  %1619 = vmatprep.mubr.msk.bf16.mxu1 %vm1712_vm2, %v1710_v1 }
  0x67   : > { %1568 = vmatmul.mubr.msk.bf16.gmra.mrb[40].mxu0 %vm395_vm3, %v1681_v27  ;;  %1620 = vmatmul.mubr.msk.bf16.gmra.mrb[40].mxu1 %vm395_vm3, %v1682_v28 }
  0x68   : > { %1571 = vmatprep.mubr.msk.bf16.mxu0 %vm1712_vm2, %v1710_v1  ;;  %1623 = vmatprep.mubr.msk.bf16.mxu1 %vm1712_vm2, %v1710_v1 }
  0x6f   : > { %1572 = vmatmul.mubr.msk.bf16.gmra.mrb[44].mxu0 %vm395_vm3, %v1683_v29  ;;  %1624 = vmatmul.mubr.msk.bf16.gmra.mrb[44].mxu1 %vm395_vm3, %v1684_v30 }
  0x70   : > { %1575 = vmatprep.mubr.msk.bf16.mxu0 %vm1712_vm2, %v1710_v1 }
  0x77   : > { %1576 = vmatmul.mubr.msk.bf16.gmra.mrb[48].mxu0 %vm395_vm3, %v1685_v31 }
  0xea   : > { %v512_v33 = vpop.f32.mrb[0].mxu0  ;;  %v616_v36 = vpop.f32.mrb[0].mxu1 }
  0xeb   : > { %v1876_v34 = vadd.f32 %v1873_v32, %v512_v33  ;;  %v1529_v35 = vpop.f32.mrb[1].mxu0  ;;  %v1879_v38 = vadd.f32 %v1873_v32, %v616_v36  ;;  %v1581_v39 = vpop.f32.mrb[1].mxu1 }
  0xec   : > { %v515_v37 = vpop.f32.mrb[2].mxu0  ;;  %v619_v43 = vpop.f32.mrb[2].mxu1 }
  0xed   : > { %v710_v40 = vmax.f32 %v1876_v34, 0.0  ;;  %v1883_v41 = vadd.f32 %v1873_v32, %v515_v37  ;;  %v1530_v42 = vpop.f32.mrb[3].mxu0  ;;  %v1887_v45 = vadd.f32 %v1873_v32, %v619_v43  ;;  %v1582_v46 = vpop.f32.mrb[3].mxu1 }
  0xef   : > { %v711_v47 = vmax.f32 %v1883_v41, 0.0  ;;  %764 = vst.msk [vmem:[#allocation2] sm:$0xff] (!%p1391_p5), %vm763_vm4, %v710_v40 }
  0xf1   : > { %765 = vst.msk [vmem:[#allocation2 + $0x8] sm:$0xff] (!%p1391_p5), %vm763_vm4, %v711_v47 }
  0xf2   : > { %v520_v49 = vpop.f32.mrb[4].mxu0  ;;  %v624_v52 = vpop.f32.mrb[4].mxu1 }
  0xf3   : > { %v1892_v50 = vadd.f32 %v1873_v32, %v520_v49  ;;  %v1533_v51 = vpop.f32.mrb[5].mxu0  ;;  %v1895_v54 = vadd.f32 %v1873_v32, %v624_v52  ;;  %v1585_v55 = vpop.f32.mrb[5].mxu1 }
  0xf4   : > { %v523_v53 = vpop.f32.mrb[6].mxu0  ;;  %v627_v59 = vpop.f32.mrb[6].mxu1 }
  0xf5   : > { %v712_v56 = vmax.f32 %v1892_v50, 0.0  ;;  %v1899_v57 = vadd.f32 %v1873_v32, %v523_v53  ;;  %v1534_v58 = vpop.f32.mrb[7].mxu0  ;;  %v1903_v61 = vadd.f32 %v1873_v32, %v627_v59  ;;  %v1586_v62 = vpop.f32.mrb[7].mxu1 }
  0xf7   : > { %v713_v63 = vmax.f32 %v1899_v57, 0.0  ;;  %766 = vst.msk [vmem:[#allocation2 + $0x10] sm:$0xff] (!%p1391_p5), %vm763_vm4, %v712_v56 }
  0xf9   : > { %767 = vst.msk [vmem:[#allocation2 + $0x18] sm:$0xff] (!%p1391_p5), %vm763_vm4, %v713_v63 }
  0xfa   : > { %v528_v1 = vpop.f32.mrb[8].mxu0  ;;  %v632_v4 = vpop.f32.mrb[8].mxu1 }
  0xfb   : > { %v1908_v2 = vadd.f32 %v1873_v32, %v528_v1  ;;  %v1537_v3 = vpop.f32.mrb[9].mxu0  ;;  %v1911_v6 = vadd.f32 %v1873_v32, %v632_v4  ;;  %v1589_v7 = vpop.f32.mrb[9].mxu1 }
  0xfc   : > { %v531_v5 = vpop.f32.mrb[10].mxu0  ;;  %v635_v11 = vpop.f32.mrb[10].mxu1 }
  0xfd   : > { %v1915_v9 = vadd.f32 %v1873_v32, %v531_v5  ;;  %v1538_v10 = vpop.f32.mrb[11].mxu0  ;;  %v1919_v13 = vadd.f32 %v1873_v32, %v635_v11  ;;  %v1590_v14 = vpop.f32.mrb[11].mxu1 }
 0x102   : > { %v536_v17 = vpop.f32.mrb[12].mxu0  ;;  %v640_v20 = vpop.f32.mrb[12].mxu1 }
 0x103   : > { %v1924_v18 = vadd.f32 %v1873_v32, %v536_v17  ;;  %v1541_v19 = vpop.f32.mrb[13].mxu0  ;;  %v1927_v22 = vadd.f32 %v1873_v32, %v640_v20  ;;  %v1593_v23 = vpop.f32.mrb[13].mxu1 }
 0x104   : > { %v539_v21 = vpop.f32.mrb[14].mxu0  ;;  %v643_v27 = vpop.f32.mrb[14].mxu1 }
 0x105   : > { %v1931_v25 = vadd.f32 %v1873_v32, %v539_v21  ;;  %v1542_v26 = vpop.f32.mrb[15].mxu0  ;;  %v1935_v29 = vadd.f32 %v1873_v32, %v643_v27  ;;  %v1594_v30 = vpop.f32.mrb[15].mxu1 }
 0x10a   : > { %v544_v35 = vpop.f32.mrb[16].mxu0  ;;  %v648_v39 = vpop.f32.mrb[16].mxu1 }
 0x10b   : > { %v1940_v36 = vadd.f32 %v1873_v32, %v544_v35  ;;  %v1545_v37 = vpop.f32.mrb[17].mxu0  ;;  %v1943_v43 = vadd.f32 %v1873_v32, %v648_v39  ;;  %v1597_v46 = vpop.f32.mrb[17].mxu1 }
 0x10c   : > { %v547_v42 = vpop.f32.mrb[18].mxu0  ;;  %v651_v53 = vpop.f32.mrb[18].mxu1 }
 0x10d   : > { %v1947_v51 = vadd.f32 %v1873_v32, %v547_v42  ;;  %v1546_v52 = vpop.f32.mrb[19].mxu0  ;;  %v1951_v58 = vadd.f32 %v1873_v32, %v651_v53  ;;  %v1598_v59 = vpop.f32.mrb[19].mxu1 }
 0x112   : > { %v552_v3 = vpop.f32.mrb[20].mxu0  ;;  %v656_v7 = vpop.f32.mrb[20].mxu1 }
 0x113   : > { %v1956_v4 = vadd.f32 %v1873_v32, %v552_v3  ;;  %v1549_v5 = vpop.f32.mrb[21].mxu0  ;;  %v1959_v11 = vadd.f32 %v1873_v32, %v656_v7  ;;  %v1601_v14 = vpop.f32.mrb[21].mxu1 }
 0x114   : > { %v555_v10 = vpop.f32.mrb[22].mxu0  ;;  %v659_v21 = vpop.f32.mrb[22].mxu1 }
 0x115   : > { %v1963_v19 = vadd.f32 %v1873_v32, %v555_v10  ;;  %v1550_v20 = vpop.f32.mrb[23].mxu0  ;;  %v1967_v26 = vadd.f32 %v1873_v32, %v659_v21  ;;  %v1602_v27 = vpop.f32.mrb[23].mxu1 }
 0x11a   : > { %v560_v37 = vpop.f32.mrb[24].mxu0  ;;  %v664_v46 = vpop.f32.mrb[24].mxu1 }
 0x11b   : > { %v1972_v39 = vadd.f32 %v1873_v32, %v560_v37  ;;  %v1553_v42 = vpop.f32.mrb[25].mxu0  ;;  %v1975_v53 = vadd.f32 %v1873_v32, %v664_v46  ;;  %v1605_v59 = vpop.f32.mrb[25].mxu1 }
 0x11c   : > { %v563_v52 = vpop.f32.mrb[26].mxu0  ;;  %v667_v10 = vpop.f32.mrb[26].mxu1 }
 0x11d   : > { %v1979_v5 = vadd.f32 %v1873_v32, %v563_v52  ;;  %v1554_v7 = vpop.f32.mrb[27].mxu0  ;;  %v1983_v20 = vadd.f32 %v1873_v32, %v667_v10  ;;  %v1606_v21 = vpop.f32.mrb[27].mxu1 }
 0x122   : > { %v568_v42 = vpop.f32.mrb[28].mxu0  ;;  %v672_v35 = vpop.f32.mrb[28].mxu1 }
 0x123   : > { %v1988_v46 = vadd.f32 %v1873_v32, %v568_v42  ;;  %v1557_v59 = vpop.f32.mrb[29].mxu0  ;;  %v1991_v7 = vadd.f32 %v1873_v32, %v672_v35  ;;  %v1609_v23 = vpop.f32.mrb[29].mxu1 }
 0x124   : > { %v571_v52 = vpop.f32.mrb[30].mxu0  ;;  %v675_v1 = vpop.f32.mrb[30].mxu1 }
 0x125   : > { %v1995_v10 = vadd.f32 %v1873_v32, %v571_v52  ;;  %v1558_v21 = vpop.f32.mrb[31].mxu0  ;;  %v1999_v55 = vadd.f32 %v1873_v32, %v675_v1  ;;  %v1610_v42 = vpop.f32.mrb[31].mxu1 }
 0x12a   : > { %v576_v35 = vpop.f32.mrb[32].mxu0  ;;  %v680_v16 = vpop.f32.mrb[32].mxu1 }
 0x12b   : > { %v2004_v23 = vadd.f32 %v1873_v32, %v576_v35  ;;  %v1561_v28 = vpop.f32.mrb[33].mxu0  ;;  %v2007_v21 = vadd.f32 %v1873_v32, %v680_v16  ;;  %v1613_v12 = vpop.f32.mrb[33].mxu1 }
 0x12c   : > { %v579_v52 = vpop.f32.mrb[34].mxu0  ;;  %v683_v0 = vpop.f32.mrb[34].mxu1 }
 0x12d   : > { %v2011_v1 = vadd.f32 %v1873_v32, %v579_v52  ;;  %v1562_v42 = vpop.f32.mrb[35].mxu0  ;;  %v2015_v60 = vadd.f32 %v1873_v32, %v683_v0  ;;  %v1614_v35 = vpop.f32.mrb[35].mxu1 }
 0x132   : > { %v584_v16 = vpop.f32.mrb[36].mxu0  ;;  %v688_v37 = vpop.f32.mrb[36].mxu1 }
 0x133   : > { %v2020_v12 = vadd.f32 %v1873_v32, %v584_v16  ;;  %v1565_v44 = vpop.f32.mrb[37].mxu0  ;;  %v2023_v42 = vadd.f32 %v1873_v32, %v688_v37  ;;  %v1617_v59 = vpop.f32.mrb[37].mxu1 }
 0x134   : > { %v587_v52 = vpop.f32.mrb[38].mxu0  ;;  %v691_v28 = vpop.f32.mrb[38].mxu1 }
 0x135   : > { %v2027_v0 = vadd.f32 %v1873_v32, %v587_v52  ;;  %v1566_v35 = vpop.f32.mrb[39].mxu0  ;;  %v2031_v14 = vadd.f32 %v1873_v32, %v691_v28  ;;  %v1618_v16 = vpop.f32.mrb[39].mxu1 }
 0x13a   : > { %v592_v37 = vpop.f32.mrb[40].mxu0  ;;  %v696_v3 = vpop.f32.mrb[40].mxu1 }
 0x13b   : > { %v2036_v59 = vadd.f32 %v1873_v32, %v592_v37  ;;  %v1569_v33 = vpop.f32.mrb[41].mxu0  ;;  %v2039_v35 = vadd.f32 %v1873_v32, %v696_v3  ;;  %v1621_v30 = vpop.f32.mrb[41].mxu1 }
 0x13c   : > { %v595_v52 = vpop.f32.mrb[42].mxu0  ;;  %v699_v44 = vpop.f32.mrb[42].mxu1 }
 0x13d   : > { %2584 = vst [vmem:[#allocation3_spill] sm:$0xff] %v2039_v35  ;;  %v2043_v28 = vadd.f32 %v1873_v32, %v595_v52  ;;  %v1570_v16 = vpop.f32.mrb[43].mxu0  ;;  %v2047_v17 = vadd.f32 %v1873_v32, %v699_v44  ;;  %v1622_v37 = vpop.f32.mrb[43].mxu1 }
 0x13f   : > { %2585 = vst [vmem:[#allocation4_spill] sm:$0xff] %v2047_v17 }
 0x142   : > { %v600_v3 = vpop.f32.mrb[44].mxu0  ;;  %v704_v49 = vpop.f32.mrb[44].mxu1 }
 0x143   : > { %v2052_v30 = vadd.f32 %v1873_v32, %v600_v3  ;;  %v1573_v48 = vpop.f32.mrb[45].mxu0  ;;  %v2055_v16 = vadd.f32 %v1873_v32, %v704_v49  ;;  %v1625_v31 = vpop.f32.mrb[45].mxu1 }
 0x144   : > { %v603_v52 = vpop.f32.mrb[46].mxu0  ;;  %v707_v33 = vpop.f32.mrb[46].mxu1 }
 0x145   : > { %2586 = vst [vmem:[#allocation5_spill] sm:$0xff] %v2055_v16  ;;  %v2059_v44 = vadd.f32 %v1873_v32, %v603_v52  ;;  %v1574_v37 = vpop.f32.mrb[47].mxu0  ;;  %v2578_v62 = vmax.f32 %v2055_v16, 0.0  ;;  %v1626_v24 = vpop.f32.mrb[47].mxu1  ;;  %v2591_v33 = vmax.f32 (!%p1391_p5), %v1940_v36, 0.0 }
 0x146   : > { %v2590_v24 = vmax.f32 (!%p1391_p5), %v1931_v25, 0.0 }
 0x147   : > { %v2580_v3 = vmax.f32 %v2059_v44, 0.0  ;;  %772 = vst.msk [vmem:[#allocation2 + $0x40] sm:$0xff] (!%p1391_p5), %vm763_vm4, %v2591_v33  ;;  %v2598_v33 = vmax.f32 (!%p1391_p5), %v1995_v10, 0.0  ;;  %812 = vst.msk [vmem:[#allocation2 + $0x180] sm:$0xff] (!%p1391_p5), %vm763_vm4, %v2578_v62 }
 0x148   : > { %771 = vst.msk [vmem:[#allocation2 + $0x38] sm:$0xff] (!%p1391_p5), %vm763_vm4, %v2590_v24  ;;  %v2597_v24 = vmax.f32 (!%p1391_p5), %v1988_v46, 0.0 }
 0x149   : > { %762 = sbr.rel (%p1391_p5) target bundleno = 352 (0x160), region = 36  ;;  %779 = vst.msk [vmem:[#allocation2 + $0x78] sm:$0xff] (!%p1391_p5), %vm763_vm4, %v2598_v33  ;;  %v2605_v33 = vmax.f32 (!%p1391_p5), %v2052_v30, 0.0  ;;  %787 = vst.msk [vmem:[#allocation2 + $0xb8] sm:$0xff] (!%p1391_p5), %vm763_vm4, %v2580_v3 }
 0x14a   : > { %v608_v15 = vpop.f32.mrb[48].mxu0  ;;  %778 = vst.msk [vmem:[#allocation2 + $0x70] sm:$0xff] (!%p1391_p5), %vm763_vm4, %v2597_v24  ;;  %v2604_v24 = vmax.f32 (!%p1391_p5), %v2043_v28, 0.0 }
 0x14b   : > { %v2064_v48 = vadd.f32 %v1873_v32, %v608_v15  ;;  %v1577_v8 = vpop.f32.mrb[49].mxu0  ;;  %v2589_v15 = vmax.f32 (!%p1391_p5), %v1924_v18, 0.0  ;;  %786 = vst.msk [vmem:[#allocation2 + $0xb0] sm:$0xff] (!%p1391_p5), %vm763_vm4, %v2605_v33  ;;  %v2612_v33 = vmax.f32 (!%p1391_p5), %v1927_v22, 0.0 }
 0x14c   : > { %v611_v49 = vpop.f32.mrb[50].mxu0  ;;  %v2588_v8 = vmax.f32 (!%p1391_p5), %v1915_v9, 0.0  ;;  %785 = vst.msk [vmem:[#allocation2 + $0xa8] sm:$0xff] (!%p1391_p5), %vm763_vm4, %v2604_v24  ;;  %v2611_v24 = vmax.f32 (!%p1391_p5), %v1919_v13, 0.0 }
 0x14d   : > { %v2579_v31 = vmax.f32 %v2064_v48, 0.0  ;;  %v2068_v27 = vadd.f32 %v1873_v32, %v611_v49  ;;  %v1578_v52 = vpop.f32.mrb[51].mxu0  ;;  %v2587_v32 = vmax.f32 (!%p1391_p5), %v1908_v2, 0.0  ;;  %770 = vst.msk [vmem:[#allocation2 + $0x30] sm:$0xff] (!%p1391_p5), %vm763_vm4, %v2589_v15  ;;  %v2592_v49 = vmax.f32 (!%p1391_p5), %v1947_v51, 0.0  ;;  %796 = vst.msk [vmem:[#allocation2 + $0x100] sm:$0xff] (!%p1391_p5), %vm763_vm4, %v2612_v33 }
 0x14e   : > { %769 = vst.msk [vmem:[#allocation2 + $0x28] sm:$0xff] (!%p1391_p5), %vm763_vm4, %v2588_v8  ;;  %v2593_v52 = vmax.f32 (!%p1391_p5), %v1956_v4, 0.0  ;;  %v2595_v8 = vmax.f32 (!%p1391_p5), %v1972_v39, 0.0  ;;  %v2596_v15 = vmax.f32 (!%p1391_p5), %v1979_v5, 0.0  ;;  %795 = vst.msk [vmem:[#allocation2 + $0xf8] sm:$0xff] (!%p1391_p5), %vm763_vm4, %v2611_v24  ;;  %v2618_v24 = vmax.f32 (!%p1391_p5), %v1975_v53, 0.0 }
 0x14f   : > { %v2577_v37 = vmax.f32 %v2068_v27, 0.0  ;;  %768 = vst.msk [vmem:[#allocation2 + $0x20] sm:$0xff] (!%p1391_p5), %vm763_vm4, %v2587_v32  ;;  %773 = vst.msk [vmem:[#allocation2 + $0x48] sm:$0xff] (!%p1391_p5), %vm763_vm4, %v2592_v49  ;;  %v2594_v32 = vmax.f32 (!%p1391_p5), %v1963_v19, 0.0  ;;  %v2599_v49 = vmax.f32 (!%p1391_p5), %v2004_v23, 0.0  ;;  %v2619_v33 = vmax.f32 (!%p1391_p5), %v1983_v20, 0.0 }
 0x150   : > { %774 = vst.msk [vmem:[#allocation2 + $0x50] sm:$0xff] %vm763_vm4, %v2593_v52  ;;  %776 = vst.msk [vmem:[#allocation2 + $0x60] sm:$0xff] %vm763_vm4, %v2595_v8  ;;  %v2600_v52 = vmax.f32 %v2011_v1, 0.0  ;;  %v2602_v8 = vmax.f32 %v2027_v0, 0.0 }
 0x151   : > { %775 = vst.msk [vmem:[#allocation2 + $0x58] sm:$0xff] %vm763_vm4, %v2594_v32  ;;  %777 = vst.msk [vmem:[#allocation2 + $0x68] sm:$0xff] %vm763_vm4, %v2596_v15  ;;  %v2601_v32 = vmax.f32 %v2020_v12, 0.0  ;;  %v2603_v15 = vmax.f32 %v2036_v59, 0.0 }
 0x152   : > { %780 = vst.msk [vmem:[#allocation2 + $0x80] sm:$0xff] %vm763_vm4, %v2599_v49  ;;  %781 = vst.msk [vmem:[#allocation2 + $0x88] sm:$0xff] %vm763_vm4, %v2600_v52  ;;  %v2606_v49 = vmax.f32 %v1879_v38, 0.0  ;;  %v2607_v52 = vmax.f32 %v1887_v45, 0.0 }
 0x153   : > { %782 = vst.msk [vmem:[#allocation2 + $0x90] sm:$0xff] %vm763_vm4, %v2601_v32  ;;  %783 = vst.msk [vmem:[#allocation2 + $0x98] sm:$0xff] %vm763_vm4, %v2602_v8  ;;  %v2608_v32 = vmax.f32 %v1895_v54, 0.0  ;;  %v2609_v8 = vmax.f32 %v1903_v61, 0.0 }
 0x154   : > { %784 = vst.msk [vmem:[#allocation2 + $0xa0] sm:$0xff] %vm763_vm4, %v2603_v15  ;;  %788 = vst.msk [vmem:[#allocation2 + $0xc0] sm:$0xff] %vm763_vm4, %v2579_v31  ;;  %v2610_v15 = vmax.f32 %v1911_v6, 0.0 }
 0x155   : > { %789 = vst.msk [vmem:[#allocation2 + $0xc8] sm:$0xff] %vm763_vm4, %v2577_v37  ;;  %790 = vst.msk [vmem:[#allocation2 + $0xd0] sm:$0xff] %vm763_vm4, %v2606_v49  ;;  %v2613_v49 = vmax.f32 %v1935_v29, 0.0 }
 0x156   : > { %791 = vst.msk [vmem:[#allocation2 + $0xd8] sm:$0xff] %vm763_vm4, %v2607_v52  ;;  %792 = vst.msk [vmem:[#allocation2 + $0xe0] sm:$0xff] %vm763_vm4, %v2608_v32  ;;  %v2614_v52 = vmax.f32 %v1943_v43, 0.0  ;;  %v2615_v32 = vmax.f32 %v1951_v58, 0.0 }
 0x157   : > { %793 = vst.msk [vmem:[#allocation2 + $0xe8] sm:$0xff] %vm763_vm4, %v2609_v8  ;;  %794 = vst.msk [vmem:[#allocation2 + $0xf0] sm:$0xff] %vm763_vm4, %v2610_v15  ;;  %v2616_v8 = vmax.f32 %v1959_v11, 0.0  ;;  %v2617_v15 = vmax.f32 %v1967_v26, 0.0 }
 0x158   : > { %797 = vst.msk [vmem:[#allocation2 + $0x108] sm:$0xff] %vm763_vm4, %v2613_v49  ;;  %798 = vst.msk [vmem:[#allocation2 + $0x110] sm:$0xff] %vm763_vm4, %v2614_v52  ;;  %v2620_v49 = vmax.f32 %v1991_v7, 0.0  ;;  %v2621_v52 = vmax.f32 %v1999_v55, 0.0 }
 0x159   : > { %799 = vst.msk [vmem:[#allocation2 + $0x118] sm:$0xff] %vm763_vm4, %v2615_v32  ;;  %800 = vst.msk [vmem:[#allocation2 + $0x120] sm:$0xff] %vm763_vm4, %v2616_v8  ;;  %v2622_v32 = vmax.f32 %v2007_v21, 0.0  ;;  %v2623_v8 = vmax.f32 %v2015_v60, 0.0 }
 0x15a   : > { %801 = vst.msk [vmem:[#allocation2 + $0x128] sm:$0xff] %vm763_vm4, %v2617_v15  ;;  %802 = vst.msk [vmem:[#allocation2 + $0x130] sm:$0xff] %vm763_vm4, %v2618_v24  ;;  %v2624_v15 = vmax.f32 %v2023_v42, 0.0  ;;  %v2625_v24 = vmax.f32 %v2031_v14, 0.0 }
 0x15b   : > { %803 = vst.msk [vmem:[#allocation2 + $0x138] sm:$0xff] %vm763_vm4, %v2619_v33  ;;  %804 = vst.msk [vmem:[#allocation2 + $0x140] sm:$0xff] %vm763_vm4, %v2620_v49  ;;  %v2626_v33 = vmax.f32 %v2039_v35, 0.0  ;;  %v2627_v49 = vmax.f32 %v2047_v17, 0.0 }
 0x15c   : > { %805 = vst.msk [vmem:[#allocation2 + $0x148] sm:$0xff] %vm763_vm4, %v2621_v52  ;;  %806 = vst.msk [vmem:[#allocation2 + $0x150] sm:$0xff] %vm763_vm4, %v2622_v32 }
 0x15d   : > { %807 = vst.msk [vmem:[#allocation2 + $0x158] sm:$0xff] %vm763_vm4, %v2623_v8  ;;  %808 = vst.msk [vmem:[#allocation2 + $0x160] sm:$0xff] %vm763_vm4, %v2624_v15 }
 0x15e   : > { %809 = vst.msk [vmem:[#allocation2 + $0x168] sm:$0xff] %vm763_vm4, %v2625_v24  ;;  %810 = vst.msk [vmem:[#allocation2 + $0x170] sm:$0xff] %vm763_vm4, %v2626_v33 }
 0x15f   : > { %811 = vst.msk [vmem:[#allocation2 + $0x178] sm:$0xff] %vm763_vm4, %v2627_v49 }
 0x160 PF: > { %p1392_p6 = scmp.le.s32.totalorder %s1700_s12, 0 }
 0x161   : > { %v817_v52 = vld [vmem:[#allocation2] sm:$0xff] (!%p1392_p6)  ;;  %vm915_vm5 = vcmask (!%p1392_p6), 261120   ;;  %v818_v32 = vld [vmem:[#allocation2 + $0x8] sm:$0xff] (!%p1392_p6)  ;;  %v819_v8 = vld [vmem:[#allocation2 + $0x10] sm:$0xff] (!%p1392_p6)  ;;  %v2628_v3 = vmax.f32 (!%p1392_p6), %v1908_v2, 0.0  ;;  %v2629_v17 = vmax.f32 (!%p1392_p6), %v1915_v9, 0.0 }
 0x162   : > { %816 = sbr.rel (%p1392_p6) target bundleno = 383 (0x17f), region = 40  ;;  %v866_v15 = vmax.f32 (!%p1392_p6), %v817_v52, %v710_v40  ;;  %v867_v24 = vmax.f32 (!%p1392_p6), %v818_v32, %v711_v47  ;;  %v868_v33 = vmax.f32 (!%p1392_p6), %v819_v8, %v712_v56  ;;  %v820_v49 = vld [vmem:[#allocation2 + $0x18] sm:$0xff] (!%p1392_p6)  ;;  %v825_v52 = vld [vmem:[#allocation2 + $0x40] sm:$0xff] (!%p1392_p6)  ;;  %v2630_v41 = vmax.f32 (!%p1392_p6), %v1924_v18, 0.0  ;;  %v830_v8 = vld [vmem:[#allocation2 + $0x68] sm:$0xff] (!%p1392_p6) }
 0x163   : > { %v869_v31 = vmax.f32 (!%p1392_p6), %v820_v49, %v713_v63  ;;  %v824_v40 = vld [vmem:[#allocation2 + $0x38] sm:$0xff] (!%p1392_p6)  ;;  %v2631_v50 = vmax.f32 (!%p1392_p6), %v1931_v25, 0.0  ;;  %v2632_v57 = vmax.f32 (!%p1392_p6), %v1940_v36, 0.0  ;;  %v2634_v18 = vmax.f32 (!%p1392_p6), %v1956_v4, 0.0  ;;  %v834_v49 = vld [vmem:[#allocation2 + $0x88] sm:$0xff] (!%p1392_p6) }
 0x164   : > { %v823_v34 = vld [vmem:[#allocation2 + $0x30] sm:$0xff] (!%p1392_p6)  ;;  %916 = vst.msk [vmem:[#allocation2] sm:$0xff] (!%p1392_p6), %vm915_vm5, %v866_v15  ;;  %917 = vst.msk [vmem:[#allocation2 + $0x8] sm:$0xff] (!%p1392_p6), %vm915_vm5, %v867_v24  ;;  %v2635_v25 = vmax.f32 (!%p1392_p6), %v1963_v19, 0.0  ;;  %v2638_v4 = vmax.f32 (!%p1392_p6), %v1988_v46, 0.0  ;;  %v832_v19 = vld [vmem:[#allocation2 + $0x78] sm:$0xff] (!%p1392_p6) }
 0x165   : > { %v822_v62 = vld [vmem:[#allocation2 + $0x28] sm:$0xff] (!%p1392_p6)  ;;  %918 = vst.msk [vmem:[#allocation2 + $0x10] sm:$0xff] (!%p1392_p6), %vm915_vm5, %v868_v33  ;;  %v872_v47 = vmax.f32 (!%p1392_p6), %v823_v34, %v2630_v41  ;;  %v873_v56 = vmax.f32 (!%p1392_p6), %v824_v40, %v2631_v50  ;;  %v874_v63 = vmax.f32 (!%p1392_p6), %v825_v52, %v2632_v57  ;;  %919 = vst.msk [vmem:[#allocation2 + $0x18] sm:$0xff] (!%p1392_p6), %vm915_vm5, %v869_v31  ;;  %v831_v15 = vld [vmem:[#allocation2 + $0x70] sm:$0xff] (!%p1392_p6)  ;;  %v2639_v34 = vmax.f32 (!%p1392_p6), %v1995_v10, 0.0 }
 0x166   : > { %v821_v37 = vld [vmem:[#allocation2 + $0x20] sm:$0xff] (!%p1392_p6)  ;;  %v871_v35 = vmax.f32 (!%p1392_p6), %v822_v62, %v2629_v17  ;;  %v826_v2 = vld [vmem:[#allocation2 + $0x48] sm:$0xff] (!%p1392_p6)  ;;  %v828_v62 = vld [vmem:[#allocation2 + $0x58] sm:$0xff] (!%p1392_p6)  ;;  %v2633_v17 = vmax.f32 (!%p1392_p6), %v1947_v51, 0.0  ;;  %v2637_v51 = vmax.f32 (!%p1392_p6), %v1979_v5, 0.0  ;;  %v880_v24 = vmax.f32 (!%p1392_p6), %v831_v15, %v2638_v4 }
 0x167   : > { %v870_v16 = vmax.f32 (!%p1392_p6), %v821_v37, %v2628_v3  ;;  %v827_v9 = vld [vmem:[#allocation2 + $0x50] sm:$0xff] (!%p1392_p6)  ;;  %v877_v32 = vmax.f32 (!%p1392_p6), %v828_v62, %v2635_v25  ;;  %v829_v36 = vld [vmem:[#allocation2 + $0x60] sm:$0xff] (!%p1392_p6)  ;;  %922 = vst.msk [vmem:[#allocation2 + $0x30] sm:$0xff] (!%p1392_p6), %vm915_vm5, %v872_v47  ;;  %923 = vst.msk [vmem:[#allocation2 + $0x38] sm:$0xff] (!%p1392_p6), %vm915_vm5, %v873_v56  ;;  %v881_v40 = vmax.f32 (!%p1392_p6), %v832_v19, %v2639_v34  ;;  %v2641_v5 = vmax.f32 (!%p1392_p6), %v2011_v1, 0.0 }
 0x168   : > { %921 = vst.msk [vmem:[#allocation2 + $0x28] sm:$0xff] (!%p1392_p6), %vm915_vm5, %v871_v35  ;;  %v875_v3 = vmax.f32 (!%p1392_p6), %v826_v2, %v2633_v17  ;;  %v876_v37 = vmax.f32 (!%p1392_p6), %v827_v9, %v2634_v18  ;;  %924 = vst.msk [vmem:[#allocation2 + $0x40] sm:$0xff] (!%p1392_p6), %vm915_vm5, %v874_v63  ;;  %v2636_v35 = vmax.f32 (!%p1392_p6), %v1972_v39, 0.0  ;;  %v879_v31 = vmax.f32 (!%p1392_p6), %v830_v8, %v2637_v51  ;;  %v833_v33 = vld [vmem:[#allocation2 + $0x80] sm:$0xff] (!%p1392_p6)  ;;  %v835_v46 = vld [vmem:[#allocation2 + $0x90] sm:$0xff] (!%p1392_p6) }
 0x169   : > { %920 = vst.msk [vmem:[#allocation2 + $0x20] sm:$0xff] %vm915_vm5, %v870_v16  ;;  %927 = vst.msk [vmem:[#allocation2 + $0x58] sm:$0xff] %vm915_vm5, %v877_v32  ;;  %v2640_v39 = vmax.f32 %v2004_v23, 0.0  ;;  %v883_v41 = vmax.f32 %v834_v49, %v2641_v5  ;;  %v836_v47 = vld [vmem:[#allocation2 + $0x98] sm:$0xff]  ;;  %v837_v50 = vld [vmem:[#allocation2 + $0xa0] sm:$0xff]  ;;  %v2642_v56 = vmax.f32 %v2020_v12, 0.0 }
 0x16a   : > { %v878_v16 = vmax.f32 %v829_v36, %v2636_v35  ;;  %925 = vst.msk [vmem:[#allocation2 + $0x48] sm:$0xff] %vm915_vm5, %v875_v3  ;;  %926 = vst.msk [vmem:[#allocation2 + $0x50] sm:$0xff] %vm915_vm5, %v876_v37  ;;  %v2643_v10 = vmax.f32 %v2027_v0, 0.0  ;;  %v2644_v23 = vmax.f32 %v2036_v59, 0.0  ;;  %v838_v1 = vld [vmem:[#allocation2 + $0xa8] sm:$0xff]  ;;  %v839_v9 = vld [vmem:[#allocation2 + $0xb0] sm:$0xff] }
 0x16b   : > { %v882_v52 = vmax.f32 %v833_v33, %v2640_v39  ;;  %929 = vst.msk [vmem:[#allocation2 + $0x68] sm:$0xff] %vm915_vm5, %v879_v31  ;;  %930 = vst.msk [vmem:[#allocation2 + $0x70] sm:$0xff] %vm915_vm5, %v880_v24  ;;  %v884_v57 = vmax.f32 %v835_v46, %v2642_v56  ;;  %v840_v62 = vld [vmem:[#allocation2 + $0xb8] sm:$0xff]  ;;  %v2645_v17 = vmax.f32 %v2043_v28, 0.0  ;;  %v2646_v12 = vmax.f32 %v2052_v30, 0.0  ;;  %v841_v59 = vld [vmem:[#allocation2 + $0xc0] sm:$0xff] }
 0x16c   : > { %928 = vst.msk [vmem:[#allocation2 + $0x60] sm:$0xff] %vm915_vm5, %v878_v16  ;;  %v885_v63 = vmax.f32 %v836_v47, %v2643_v10  ;;  %v886_v2 = vmax.f32 %v837_v50, %v2644_v23  ;;  %931 = vst.msk [vmem:[#allocation2 + $0x78] sm:$0xff] %vm915_vm5, %v881_v40  ;;  %v2647_v0 = vmax.f32 %v2059_v44, 0.0  ;;  %v842_v25 = vld [vmem:[#allocation2 + $0xc8] sm:$0xff]  ;;  %v843_v32 = vld [vmem:[#allocation2 + $0xd0] sm:$0xff]  ;;  %v2648_v36 = vmax.f32 %v2064_v48, 0.0 }
 0x16d   : > { %932 = vst.msk [vmem:[#allocation2 + $0x80] sm:$0xff] %vm915_vm5, %v882_v52  ;;  %933 = vst.msk [vmem:[#allocation2 + $0x88] sm:$0xff] %vm915_vm5, %v883_v41  ;;  %v887_v3 = vmax.f32 %v838_v1, %v2645_v17  ;;  %v888_v18 = vmax.f32 %v839_v9, %v2646_v12  ;;  %v2649_v28 = vmax.f32 %v2068_v27, 0.0  ;;  %v2650_v30 = vmax.f32 %v1879_v38, 0.0  ;;  %v844_v44 = vld [vmem:[#allocation2 + $0xd8] sm:$0xff]  ;;  %v845_v16 = vld [vmem:[#allocation2 + $0xe0] sm:$0xff] }
 0x16e   : > { %v889_v37 = vmax.f32 %v840_v62, %v2647_v0  ;;  %934 = vst.msk [vmem:[#allocation2 + $0x90] sm:$0xff] %vm915_vm5, %v884_v57  ;;  %935 = vst.msk [vmem:[#allocation2 + $0x98] sm:$0xff] %vm915_vm5, %v885_v63  ;;  %v890_v8 = vmax.f32 %v841_v59, %v2648_v36  ;;  %v846_v51 = vld [vmem:[#allocation2 + $0xe8] sm:$0xff]  ;;  %v2651_v31 = vmax.f32 %v1887_v45, 0.0  ;;  %v2652_v48 = vmax.f32 %v1895_v54, 0.0  ;;  %v847_v38 = vld [vmem:[#allocation2 + $0xf0] sm:$0xff] }
 0x16f   : > { %936 = vst.msk [vmem:[#allocation2 + $0xa0] sm:$0xff] %vm915_vm5, %v886_v2  ;;  %v891_v15 = vmax.f32 %v842_v25, %v2649_v28  ;;  %v892_v35 = vmax.f32 %v843_v32, %v2650_v30  ;;  %937 = vst.msk [vmem:[#allocation2 + $0xa8] sm:$0xff] %vm915_vm5, %v887_v3  ;;  %v2653_v27 = vmax.f32 %v1903_v61, 0.0  ;;  %v848_v33 = vld [vmem:[#allocation2 + $0xf8] sm:$0xff]  ;;  %v849_v49 = vld [vmem:[#allocation2 + $0x100] sm:$0xff]  ;;  %v2654_v34 = vmax.f32 %v1911_v6, 0.0 }
 0x170   : > { %938 = vst.msk [vmem:[#allocation2 + $0xb0] sm:$0xff] %vm915_vm5, %v888_v18  ;;  %939 = vst.msk [vmem:[#allocation2 + $0xb8] sm:$0xff] %vm915_vm5, %v889_v37  ;;  %v893_v4 = vmax.f32 %v844_v44, %v2651_v31  ;;  %v894_v24 = vmax.f32 %v845_v16, %v2652_v48  ;;  %v2655_v45 = vmax.f32 %v1919_v13, 0.0  ;;  %v2656_v54 = vmax.f32 %v1927_v22, 0.0  ;;  %v850_v61 = vld [vmem:[#allocation2 + $0x108] sm:$0xff]  ;;  %v851_v5 = vld [vmem:[#allocation2 + $0x110] sm:$0xff] }
 0x171   : > { %v895_v19 = vmax.f32 %v846_v51, %v2653_v27  ;;  %940 = vst.msk [vmem:[#allocation2 + $0xc0] sm:$0xff] %vm915_vm5, %v890_v8  ;;  %941 = vst.msk [vmem:[#allocation2 + $0xc8] sm:$0xff] %vm915_vm5, %v891_v15  ;;  %v896_v40 = vmax.f32 %v847_v38, %v2654_v34  ;;  %v852_v41 = vld [vmem:[#allocation2 + $0x118] sm:$0xff]  ;;  %v2657_v46 = vmax.f32 %v1935_v29, 0.0  ;;  %v2658_v6 = vmax.f32 %v1943_v43, 0.0  ;;  %v853_v22 = vld [vmem:[#allocation2 + $0x120] sm:$0xff] }
 0x172   : > { %942 = vst.msk [vmem:[#allocation2 + $0xd0] sm:$0xff] %vm915_vm5, %v892_v35  ;;  %v897_v39 = vmax.f32 %v848_v33, %v2655_v45  ;;  %v898_v52 = vmax.f32 %v849_v49, %v2656_v54  ;;  %943 = vst.msk [vmem:[#allocation2 + $0xd8] sm:$0xff] %vm915_vm5, %v893_v4  ;;  %v2659_v13 = vmax.f32 %v1951_v58, 0.0  ;;  %v854_v57 = vld [vmem:[#allocation2 + $0x128] sm:$0xff]  ;;  %v855_v10 = vld [vmem:[#allocation2 + $0x130] sm:$0xff]  ;;  %v2660_v63 = vmax.f32 %v1959_v11, 0.0 }
 0x173   : > { %944 = vst.msk [vmem:[#allocation2 + $0xe0] sm:$0xff] %vm915_vm5, %v894_v24  ;;  %945 = vst.msk [vmem:[#allocation2 + $0xe8] sm:$0xff] %vm915_vm5, %v895_v19  ;;  %v899_v47 = vmax.f32 %v850_v61, %v2657_v46  ;;  %v900_v50 = vmax.f32 %v851_v5, %v2658_v6  ;;  %v2661_v29 = vmax.f32 %v1967_v26, 0.0  ;;  %v2662_v43 = vmax.f32 %v1975_v53, 0.0  ;;  %v856_v58 = vld [vmem:[#allocation2 + $0x138] sm:$0xff]  ;;  %v857_v9 = vld [vmem:[#allocation2 + $0x140] sm:$0xff] }
 0x174   : > { %v901_v56 = vmax.f32 %v852_v41, %v2659_v13  ;;  %946 = vst.msk [vmem:[#allocation2 + $0xf0] sm:$0xff] %vm915_vm5, %v896_v40  ;;  %947 = vst.msk [vmem:[#allocation2 + $0xf8] sm:$0xff] %vm915_vm5, %v897_v39  ;;  %v902_v23 = vmax.f32 %v853_v22, %v2660_v63  ;;  %v858_v62 = vld [vmem:[#allocation2 + $0x148] sm:$0xff]  ;;  %v2663_v17 = vmax.f32 %v1983_v20, 0.0  ;;  %v2664_v11 = vmax.f32 %v1991_v7, 0.0  ;;  %v859_v53 = vld [vmem:[#allocation2 + $0x150] sm:$0xff] }
 0x175   : > { %948 = vst.msk [vmem:[#allocation2 + $0x100] sm:$0xff] %vm915_vm5, %v898_v52  ;;  %v903_v2 = vmax.f32 %v854_v57, %v2661_v29  ;;  %v904_v1 = vmax.f32 %v855_v10, %v2662_v43  ;;  %949 = vst.msk [vmem:[#allocation2 + $0x108] sm:$0xff] %vm915_vm5, %v899_v47  ;;  %v2665_v26 = vmax.f32 %v1999_v55, 0.0  ;;  %v860_v0 = vld [vmem:[#allocation2 + $0x158] sm:$0xff]  ;;  %v861_v37 = vld [vmem:[#allocation2 + $0x160] sm:$0xff]  ;;  %v2666_v59 = vmax.f32 %v2007_v21, 0.0 }
 0x176   : > { %950 = vst.msk [vmem:[#allocation2 + $0x110] sm:$0xff] %vm915_vm5, %v900_v50  ;;  %951 = vst.msk [vmem:[#allocation2 + $0x118] sm:$0xff] %vm915_vm5, %v901_v56  ;;  %v905_v3 = vmax.f32 %v856_v58, %v2663_v17  ;;  %v906_v12 = vmax.f32 %v857_v9, %v2664_v11  ;;  %v2667_v20 = vmax.f32 %v2015_v60, 0.0  ;;  %v2668_v7 = vmax.f32 %v2023_v42, 0.0  ;;  %v862_v55 = vld [vmem:[#allocation2 + $0x168] sm:$0xff]  ;;  %v863_v8 = vld [vmem:[#allocation2 + $0x170] sm:$0xff] }
 0x177   : > { %v907_v18 = vmax.f32 %v858_v62, %v2665_v26  ;;  %952 = vst.msk [vmem:[#allocation2 + $0x120] sm:$0xff] %vm915_vm5, %v902_v23  ;;  %953 = vst.msk [vmem:[#allocation2 + $0x128] sm:$0xff] %vm915_vm5, %v903_v2  ;;  %v908_v25 = vmax.f32 %v859_v53, %v2666_v59  ;;  %v864_v28 = vld [vmem:[#allocation2 + $0x178] sm:$0xff]  ;;  %v2669_v15 = vmax.f32 %v2031_v14, 0.0  ;;  %v2670_v21 = vld [vmem:[#allocation3_spill] sm:$0xff] }
 0x178   : > { %954 = vst.msk [vmem:[#allocation2 + $0x130] sm:$0xff] %vm915_vm5, %v904_v1  ;;  %v909_v32 = vmax.f32 %v860_v0, %v2667_v20  ;;  %v910_v36 = vmax.f32 %v861_v37, %v2668_v7  ;;  %955 = vst.msk [vmem:[#allocation2 + $0x138] sm:$0xff] %vm915_vm5, %v905_v3  ;;  %v2671_v35 = vmax.f32 %v2670_v21, 0.0  ;;  %v2672_v60 = vld [vmem:[#allocation4_spill] sm:$0xff]  ;;  %v865_v42 = vld [vmem:[#allocation2 + $0x180] sm:$0xff] }
 0x179   : > { %956 = vst.msk [vmem:[#allocation2 + $0x140] sm:$0xff] %vm915_vm5, %v906_v12  ;;  %957 = vst.msk [vmem:[#allocation2 + $0x148] sm:$0xff] %vm915_vm5, %v907_v18  ;;  %v911_v30 = vmax.f32 %v862_v55, %v2669_v15  ;;  %v2673_v16 = vmax.f32 %v2672_v60, 0.0  ;;  %v2674_v31 = vld [vmem:[#allocation5_spill] sm:$0xff] }
 0x17a   : > { %v912_v44 = vmax.f32 %v863_v8, %v2671_v35  ;;  %958 = vst.msk [vmem:[#allocation2 + $0x150] sm:$0xff] %vm915_vm5, %v908_v25  ;;  %959 = vst.msk [vmem:[#allocation2 + $0x158] sm:$0xff] %vm915_vm5, %v909_v32  ;;  %v2675_v4 = vmax.f32 %v2674_v31, 0.0 }
 0x17b   : > { %v913_v51 = vmax.f32 %v864_v28, %v2673_v16  ;;  %960 = vst.msk [vmem:[#allocation2 + $0x160] sm:$0xff] %vm915_vm5, %v910_v36  ;;  %961 = vst.msk [vmem:[#allocation2 + $0x168] sm:$0xff] %vm915_vm5, %v911_v30 }
 0x17c   : > { %v914_v48 = vmax.f32 %v865_v42, %v2675_v4  ;;  %962 = vst.msk [vmem:[#allocation2 + $0x170] sm:$0xff] %vm915_vm5, %v912_v44 }
 0x17d   : > { %963 = vst.msk [vmem:[#allocation2 + $0x178] sm:$0xff] %vm915_vm5, %v913_v51 }
 0x17e   : > { %964 = vst.msk [vmem:[#allocation2 + $0x180] sm:$0xff] %vm915_vm5, %v914_v48 }
 0x17f PF: > { %p1393_p7 = scmp.ne.s32.totalorder %s1700_s12, 3 }
 0x180   : > { %vm1215_vm6 = vcmask (!%p1393_p7), 257024   ;;  %v978_v6 = vld [vmem:[#allocation2 + $0x48] sm:$0xff] (!%p1393_p7)  ;;  %v979_v50 = vld [vmem:[#allocation2 + $0x50] sm:$0xff] (!%p1393_p7)  ;;  %v981_v10 = vld [vmem:[#allocation2 + $0x60] sm:$0xff] (!%p1393_p7) }
 0x181   : > { %968 = sbr.rel (%p1393_p7) target bundleno = 413 (0x19d), region = 44  ;;  %v969_v14 = vld [vmem:[#allocation2] sm:$0xff] (!%p1393_p7)  ;;  %v970_v24 = vld [vmem:[#allocation2 + $0x8] sm:$0xff] (!%p1393_p7)  ;;  %v1456_v56 = vpack.c.bf16 (!%p1393_p7), %v978_v6, %v978_v6  ;;  %v1457_v22 = vpack.c.bf16 (!%p1393_p7), %v979_v50, %v979_v50  ;;  %v983_v23 = vld [vmem:[#allocation2 + $0x70] sm:$0xff] (!%p1393_p7)  ;;  %v1459_v29 = vpack.c.bf16 (!%p1393_p7), %v981_v10, %v981_v10 }
 0x182   : > { %v971_v27 = vld [vmem:[#allocation2 + $0x10] sm:$0xff] (!%p1393_p7)  ;;  %v1447_v19 = vpack.c.bf16 (!%p1393_p7), %v969_v14, %v969_v14  ;;  %v1448_v38 = vpack.c.bf16 (!%p1393_p7), %v970_v24, %v970_v24  ;;  %v972_v49 = vld [vmem:[#allocation2 + $0x18] sm:$0xff] (!%p1393_p7)  ;;  %v982_v63 = vld [vmem:[#allocation2 + $0x68] sm:$0xff] (!%p1393_p7)  ;;  %v1461_v43 = vpack.c.bf16 (!%p1393_p7), %v983_v23, %v983_v23 }
 0x183   : > { %v1449_v33 = vpack.c.bf16 (!%p1393_p7), %v971_v27, %v971_v27  ;;  %v1450_v45 = vpack.c.bf16 (!%p1393_p7), %v972_v49, %v972_v49  ;;  %v1460_v2 = vpack.c.bf16 (!%p1393_p7), %v982_v63, %v982_v63  ;;  %v984_v1 = vld [vmem:[#allocation2 + $0x78] sm:$0xff] (!%p1393_p7)  ;;  %v985_v58 = vld [vmem:[#allocation2 + $0x80] sm:$0xff] (!%p1393_p7)  ;;  %v986_v9 = vld [vmem:[#allocation2 + $0x88] sm:$0xff] (!%p1393_p7)  ;;  %1225 = vst.msk [vmem:[%s2576_s3 + $0x24] sm:$0xf] (!%p1393_p7), %vm1215_vm6, %v1456_v56 }
 0x184   : > { %v975_v52 = vld [vmem:[#allocation2 + $0x30] sm:$0xff] (!%p1393_p7)  ;;  %v976_v61 = vld [vmem:[#allocation2 + $0x38] sm:$0xff] (!%p1393_p7)  ;;  %1216 = vst.msk [vmem:[%s2576_s3] sm:$0xf] (!%p1393_p7), %vm1215_vm6, %v1447_v19  ;;  %1217 = vst.msk [vmem:[%s2576_s3 + $0x4] sm:$0xf] (!%p1393_p7), %vm1215_vm6, %v1448_v38  ;;  %v1462_v62 = vpack.c.bf16 (!%p1393_p7), %v984_v1, %v984_v1  ;;  %v1463_v17 = vpack.c.bf16 (!%p1393_p7), %v985_v58, %v985_v58  ;;  %v1464_v3 = vpack.c.bf16 (!%p1393_p7), %v986_v9, %v986_v9 }
 0x185   : > { %v974_v40 = vld [vmem:[#allocation2 + $0x28] sm:$0xff] (!%p1393_p7)  ;;  %v977_v5 = vld [vmem:[#allocation2 + $0x40] sm:$0xff] (!%p1393_p7)  ;;  %1218 = vst.msk [vmem:[%s2576_s3 + $0x8] sm:$0xf] (!%p1393_p7), %vm1215_vm6, %v1449_v33  ;;  %v1453_v41 = vpack.c.bf16 (!%p1393_p7), %v975_v52, %v975_v52  ;;  %v1454_v46 = vpack.c.bf16 (!%p1393_p7), %v976_v61, %v976_v61  ;;  %1219 = vst.msk [vmem:[%s2576_s3 + $0xc] sm:$0xf] (!%p1393_p7), %vm1215_vm6, %v1450_v45 }
 0x186   : > { %v973_v34 = vld [vmem:[#allocation2 + $0x20] sm:$0xff] (!%p1393_p7)  ;;  %v1452_v54 = vpack.c.bf16 (!%p1393_p7), %v974_v40, %v974_v40  ;;  %v1455_v47 = vpack.c.bf16 (!%p1393_p7), %v977_v5, %v977_v5  ;;  %v980_v13 = vld [vmem:[#allocation2 + $0x58] sm:$0xff] (!%p1393_p7)  ;;  %1226 = vst.msk [vmem:[%s2576_s3 + $0x28] sm:$0xf] (!%p1393_p7), %vm1215_vm6, %v1457_v22  ;;  %v987_v11 = vld [vmem:[#allocation2 + $0x90] sm:$0xff] (!%p1393_p7) }
 0x187   : > { %v1451_v39 = vpack.c.bf16 (!%p1393_p7), %v973_v34, %v973_v34  ;;  %v1458_v57 = vpack.c.bf16 (!%p1393_p7), %v980_v13, %v980_v13  ;;  %1222 = vst.msk [vmem:[%s2576_s3 + $0x18] sm:$0xf] (!%p1393_p7), %vm1215_vm6, %v1453_v41  ;;  %1223 = vst.msk [vmem:[%s2576_s3 + $0x1c] sm:$0xf] (!%p1393_p7), %vm1215_vm6, %v1454_v46  ;;  %v988_v12 = vld [vmem:[#allocation2 + $0x98] sm:$0xff] (!%p1393_p7)  ;;  %v989_v26 = vld [vmem:[#allocation2 + $0xa0] sm:$0xff] (!%p1393_p7)  ;;  %v1465_v18 = vpack.c.bf16 (!%p1393_p7), %v987_v11, %v987_v11 }
 0x188   : > { %1221 = vst.msk [vmem:[%s2576_s3 + $0x14] sm:$0xf] %vm1215_vm6, %v1452_v54  ;;  %1224 = vst.msk [vmem:[%s2576_s3 + $0x20] sm:$0xf] %vm1215_vm6, %v1455_v47  ;;  %v1466_v53 = vpack.c.bf16 %v988_v12, %v988_v12  ;;  %v1467_v0 = vpack.c.bf16 %v989_v26, %v989_v26  ;;  %v990_v37 = vld [vmem:[#allocation2 + $0xa8] sm:$0xff]  ;;  %v991_v59 = vld [vmem:[#allocation2 + $0xb0] sm:$0xff] }
 0x189   : > { %1220 = vst.msk [vmem:[%s2576_s3 + $0x10] sm:$0xf] %vm1215_vm6, %v1451_v39  ;;  %1227 = vst.msk [vmem:[%s2576_s3 + $0x2c] sm:$0xf] %vm1215_vm6, %v1458_v57  ;;  %v992_v25 = vld [vmem:[#allocation2 + $0xb8] sm:$0xff]  ;;  %v1468_v20 = vpack.c.bf16 %v990_v37, %v990_v37  ;;  %v1469_v32 = vpack.c.bf16 %v991_v59, %v991_v59  ;;  %v993_v36 = vld [vmem:[#allocation2 + $0xc0] sm:$0xff] }
 0x18a   : > { %1228 = vst.msk [vmem:[%s2576_s3 + $0x30] sm:$0xf] %vm1215_vm6, %v1459_v29  ;;  %1229 = vst.msk [vmem:[%s2576_s3 + $0x34] sm:$0xf] %vm1215_vm6, %v1460_v2  ;;  %v1470_v7 = vpack.c.bf16 %v992_v25, %v992_v25  ;;  %v994_v55 = vld [vmem:[#allocation2 + $0xc8] sm:$0xff]  ;;  %v995_v8 = vld [vmem:[#allocation2 + $0xd0] sm:$0xff]  ;;  %v1471_v28 = vpack.c.bf16 %v993_v36, %v993_v36 }
 0x18b   : > { %1230 = vst.msk [vmem:[%s2576_s3 + $0x38] sm:$0xf] %vm1215_vm6, %v1461_v43  ;;  %1231 = vst.msk [vmem:[%s2576_s3 + $0x3c] sm:$0xf] %vm1215_vm6, %v1462_v62  ;;  %v1472_v15 = vpack.c.bf16 %v994_v55, %v994_v55  ;;  %v1473_v30 = vpack.c.bf16 %v995_v8, %v995_v8  ;;  %v996_v21 = vld [vmem:[#allocation2 + $0xd8] sm:$0xff]  ;;  %v997_v35 = vld [vmem:[#allocation2 + $0xe0] sm:$0xff] }
 0x18c   : > { %1232 = vst.msk [vmem:[%s2576_s3 + $0x40] sm:$0xf] %vm1215_vm6, %v1463_v17  ;;  %1233 = vst.msk [vmem:[%s2576_s3 + $0x44] sm:$0xf] %vm1215_vm6, %v1464_v3  ;;  %v998_v44 = vld [vmem:[#allocation2 + $0xe8] sm:$0xff]  ;;  %v1474_v60 = vpack.c.bf16 %v996_v21, %v996_v21  ;;  %v1475_v16 = vpack.c.bf16 %v997_v35, %v997_v35  ;;  %v999_v42 = vld [vmem:[#allocation2 + $0xf0] sm:$0xff] }
 0x18d   : > { %1234 = vst.msk [vmem:[%s2576_s3 + $0x48] sm:$0xf] %vm1215_vm6, %v1465_v18  ;;  %1235 = vst.msk [vmem:[%s2576_s3 + $0x4c] sm:$0xf] %vm1215_vm6, %v1466_v53  ;;  %v1476_v51 = vpack.c.bf16 %v998_v44, %v998_v44  ;;  %v1000_v31 = vld [vmem:[#allocation2 + $0xf8] sm:$0xff]  ;;  %v1001_v4 = vld [vmem:[#allocation2 + $0x100] sm:$0xff]  ;;  %v1477_v48 = vpack.c.bf16 %v999_v42, %v999_v42 }
 0x18e   : > { %1236 = vst.msk [vmem:[%s2576_s3 + $0x50] sm:$0xf] %vm1215_vm6, %v1467_v0  ;;  %1237 = vst.msk [vmem:[%s2576_s3 + $0x54] sm:$0xf] %vm1215_vm6, %v1468_v20  ;;  %v1478_v14 = vpack.c.bf16 %v1000_v31, %v1000_v31  ;;  %v1479_v24 = vpack.c.bf16 %v1001_v4, %v1001_v4  ;;  %v1002_v27 = vld [vmem:[#allocation2 + $0x108] sm:$0xff]  ;;  %v1003_v19 = vld [vmem:[#allocation2 + $0x110] sm:$0xff] }
 0x18f   : > { %1238 = vst.msk [vmem:[%s2576_s3 + $0x58] sm:$0xf] %vm1215_vm6, %v1469_v32  ;;  %1239 = vst.msk [vmem:[%s2576_s3 + $0x5c] sm:$0xf] %vm1215_vm6, %v1470_v7  ;;  %v1004_v38 = vld [vmem:[#allocation2 + $0x118] sm:$0xff]  ;;  %v1480_v33 = vpack.c.bf16 %v1002_v27, %v1002_v27  ;;  %v1481_v49 = vpack.c.bf16 %v1003_v19, %v1003_v19  ;;  %v1005_v40 = vld [vmem:[#allocation2 + $0x120] sm:$0xff] }
 0x190   : > { %1240 = vst.msk [vmem:[%s2576_s3 + $0x60] sm:$0xf] %vm1215_vm6, %v1471_v28  ;;  %1241 = vst.msk [vmem:[%s2576_s3 + $0x64] sm:$0xf] %vm1215_vm6, %v1472_v15  ;;  %v1482_v34 = vpack.c.bf16 %v1004_v38, %v1004_v38  ;;  %v1006_v45 = vld [vmem:[#allocation2 + $0x128] sm:$0xff]  ;;  %v1007_v39 = vld [vmem:[#allocation2 + $0x130] sm:$0xff]  ;;  %v1483_v54 = vpack.c.bf16 %v1005_v40, %v1005_v40 }
 0x191   : > { %1242 = vst.msk [vmem:[%s2576_s3 + $0x68] sm:$0xf] %vm1215_vm6, %v1473_v30  ;;  %1243 = vst.msk [vmem:[%s2576_s3 + $0x6c] sm:$0xf] %vm1215_vm6, %v1474_v60  ;;  %v1484_v52 = vpack.c.bf16 %v1006_v45, %v1006_v45  ;;  %v1485_v61 = vpack.c.bf16 %v1007_v39, %v1007_v39  ;;  %v1008_v5 = vld [vmem:[#allocation2 + $0x138] sm:$0xff]  ;;  %v1009_v41 = vld [vmem:[#allocation2 + $0x140] sm:$0xff] }
 0x192   : > { %1244 = vst.msk [vmem:[%s2576_s3 + $0x70] sm:$0xf] %vm1215_vm6, %v1475_v16  ;;  %1245 = vst.msk [vmem:[%s2576_s3 + $0x74] sm:$0xf] %vm1215_vm6, %v1476_v51  ;;  %v1010_v46 = vld [vmem:[#allocation2 + $0x148] sm:$0xff]  ;;  %v1486_v47 = vpack.c.bf16 %v1008_v5, %v1008_v5  ;;  %v1487_v6 = vpack.c.bf16 %v1009_v41, %v1009_v41  ;;  %v1011_v13 = vld [vmem:[#allocation2 + $0x150] sm:$0xff] }
 0x193   : > { %1246 = vst.msk [vmem:[%s2576_s3 + $0x78] sm:$0xf] %vm1215_vm6, %v1477_v48  ;;  %1247 = vst.msk [vmem:[%s2576_s3 + $0x7c] sm:$0xf] %vm1215_vm6, %v1478_v14  ;;  %v1488_v50 = vpack.c.bf16 %v1010_v46, %v1010_v46  ;;  %v1012_v56 = vld [vmem:[#allocation2 + $0x158] sm:$0xff]  ;;  %v1013_v22 = vld [vmem:[#allocation2 + $0x160] sm:$0xff]  ;;  %v1489_v57 = vpack.c.bf16 %v1011_v13, %v1011_v13 }
 0x194   : > { %1248 = vst.msk [vmem:[%s2576_s3 + $0x80] sm:$0xf] %vm1215_vm6, %v1479_v24  ;;  %1249 = vst.msk [vmem:[%s2576_s3 + $0x84] sm:$0xf] %vm1215_vm6, %v1480_v33  ;;  %v1490_v10 = vpack.c.bf16 %v1012_v56, %v1012_v56  ;;  %v1491_v63 = vpack.c.bf16 %v1013_v22, %v1013_v22  ;;  %v1014_v23 = vld [vmem:[#allocation2 + $0x168] sm:$0xff]  ;;  %v1015_v29 = vld [vmem:[#allocation2 + $0x170] sm:$0xff] }
 0x195   : > { %1250 = vst.msk [vmem:[%s2576_s3 + $0x88] sm:$0xf] %vm1215_vm6, %v1481_v49  ;;  %1251 = vst.msk [vmem:[%s2576_s3 + $0x8c] sm:$0xf] %vm1215_vm6, %v1482_v34  ;;  %v1016_v2 = vld [vmem:[#allocation2 + $0x178] sm:$0xff]  ;;  %v1492_v43 = vpack.c.bf16 %v1014_v23, %v1014_v23  ;;  %v1493_v1 = vpack.c.bf16 %v1015_v29, %v1015_v29  ;;  %v1017_v9 = vld [vmem:[#allocation2 + $0x180] sm:$0xff] }
 0x196   : > { %1252 = vst.msk [vmem:[%s2576_s3 + $0x90] sm:$0xf] %vm1215_vm6, %v1483_v54  ;;  %1253 = vst.msk [vmem:[%s2576_s3 + $0x94] sm:$0xf] %vm1215_vm6, %v1484_v52  ;;  %v1494_v58 = vpack.c.bf16 %v1016_v2, %v1016_v2  ;;  %v1495_v62 = vpack.c.bf16 %v1017_v9, %v1017_v9 }
 0x197   : > { %1254 = vst.msk [vmem:[%s2576_s3 + $0x98] sm:$0xf] %vm1215_vm6, %v1485_v61  ;;  %1255 = vst.msk [vmem:[%s2576_s3 + $0x9c] sm:$0xf] %vm1215_vm6, %v1486_v47 }
 0x198   : > { %1256 = vst.msk [vmem:[%s2576_s3 + $0xa0] sm:$0xf] %vm1215_vm6, %v1487_v6  ;;  %1257 = vst.msk [vmem:[%s2576_s3 + $0xa4] sm:$0xf] %vm1215_vm6, %v1488_v50 }
 0x199   : > { %1258 = vst.msk [vmem:[%s2576_s3 + $0xa8] sm:$0xf] %vm1215_vm6, %v1489_v57  ;;  %1259 = vst.msk [vmem:[%s2576_s3 + $0xac] sm:$0xf] %vm1215_vm6, %v1490_v10 }
 0x19a   : > { %1260 = vst.msk [vmem:[%s2576_s3 + $0xb0] sm:$0xf] %vm1215_vm6, %v1491_v63  ;;  %1261 = vst.msk [vmem:[%s2576_s3 + $0xb4] sm:$0xf] %vm1215_vm6, %v1492_v43 }
 0x19b   : > { %1262 = vst.msk [vmem:[%s2576_s3 + $0xb8] sm:$0xf] %vm1215_vm6, %v1493_v1  ;;  %1263 = vst.msk [vmem:[%s2576_s3 + $0xbc] sm:$0xf] %vm1215_vm6, %v1494_v58 }
 0x19c   : > { %1264 = vst.msk [vmem:[%s2576_s3 + $0xc0] sm:$0xf] %vm1215_vm6, %v1495_v62 }
 0x19d PF: > { %s13_s14 = sadd.s32 1, %s1708_s14   ;;  %s2676_s12 = smov %s1704_s13 }
 0x19e   : > { %p10_p8 = scmp.ge.s32.totalorder %s13_s14, 6   ;;  %s2677_s13 = smov %s2679_s15 }
 0x1a0   :  { %12 = sbr.rel (!%p10_p8) target bundleno = 2 (0x2), region = 74 }

// kernel: cnn_forward.6
= control target key start
LH: loop header
LB: loop body
LE: loop exit
PB: predicated region body
PF: predicated region fallthrough
CT: control target
= control target key end

     0   :  { %s2054_s12 = smov 0   ;;  %s2056_s13 = smov 0   ;;  %s2512_s0 = inlined_call_operand.vmem [shape: bf16[4,98,800], index: 0, kind: input, shape index: {}]   ;;  %s2513_s1 = inlined_call_operand.vmem [shape: bf16[800,64], index: 1, kind: input, shape index: {}]   ;;  %s2514_s2 = inlined_call_operand.vmem [shape: f32[1,64], index: 2, kind: input, shape index: {}]   ;;  %s2515_s3 = inlined_call_operand.vmem [shape: bf16[98,64], index: 3, kind: output, shape index: {}]  }
   0x1   :  { %s2058_s14 = smov 0  }
   0x2 LB: > { %s22_s15 = sadd.s32 1, %s2026_s13  ;;  %p1507_p0 = scmp.ge.s32.totalorder %s2030_s14, 1  ;;  %s2030_s14 = sphi %s2058_s14, %s13_s14   ;;  %s2026_s13 = sphi %s2056_s13, %s2517_s13   ;;  %s2022_s12 = sphi %s2054_s12, %s2516_s12  }
   0x3   : > { %p23_p1 = scmp.ge.s32.totalorder %s22_s15, 4  ;;  %p157_p2 = scmp.lt.s32.totalorder %s2030_s14, 5 }
   0x5   : > { %s2519_s15 = smov (%p23_p1, %s22_s15), 0  ;;  %p158_p3 = pnand %p1507_p0, %p157_p2 }
   0x6   : > { %v1891_v0 = vld [vmem:[%s2513_s1 + $0x40] sm:$0xff] (!%p158_p3)   ;;  %v1895_v4 = vld [vmem:[%s2513_s1 + $0x48] sm:$0xff] (!%p158_p3)   ;;  %v1899_v8 = vld [vmem:[%s2513_s1 + $0x50] sm:$0xff] (!%p158_p3)   ;;  %p187_p4 = scmp.lt.s32.totalorder (!%p158_p3), %s2022_s12, 3  ;;  %v2032_v38 = vmov (!%p158_p3), 0.0   ;;  %vm2033_vm0 = vmmov (!%p158_p3), 0  }
   0x7   : > { %161 = sbr.rel (%p158_p3) target bundleno = 388 (0x184), region = 32  ;;  %v1892_v1 = vld [vmem:[%s2513_s1] sm:$0xff] (!%p158_p3)   ;;  %1649 = vmatprep.subr.bf16.mxu0 (!%p158_p3), %v1891_v0  ;;  %v1896_v5 = vld [vmem:[%s2513_s1 + $0x8] sm:$0xff] (!%p158_p3)   ;;  %v1900_v9 = vld [vmem:[%s2513_s1 + $0x10] sm:$0xff] (!%p158_p3)   ;;  %vm897_vm1 = vcmask (!%p158_p3), 261120   ;;  %p1616_p5 = scmp.ne.s32.totalorder (!%p158_p3), %s2022_s12, 0 }
   0x8   : > { %v1893_v2 = vld [vmem:[%s2513_s1 + $0xc0] sm:$0xff] (!%p158_p3)   ;;  %1650 = vmatpush3.bf16.msra.mxu0 (!%p158_p3), %v1892_v1  ;;  %v1897_v6 = vld [vmem:[%s2513_s1 + $0xc8] sm:$0xff] (!%p158_p3)   ;;  %v1901_v10 = vld [vmem:[%s2513_s1 + $0xd0] sm:$0xff] (!%p158_p3)  }
   0x9   : > { %v1894_v3 = vld [vmem:[%s2513_s1 + $0x80] sm:$0xff] (!%p158_p3)   ;;  %1707 = vmatprep.subr.bf16.mxu1 (!%p158_p3), %v1893_v2  ;;  %1651 = vmatprep.subr.bf16.mxu0 (!%p158_p3), %v1895_v4  ;;  %v1898_v7 = vld [vmem:[%s2513_s1 + $0x88] sm:$0xff] (!%p158_p3)   ;;  %v1902_v11 = vld [vmem:[%s2513_s1 + $0x90] sm:$0xff] (!%p158_p3)  }
   0xa   : > { %1708 = vmatpush3.bf16.msra.mxu1 (!%p158_p3), %v1894_v3  ;;  %v1903_v12 = vld [vmem:[%s2513_s1 + $0x58] sm:$0xff] (!%p158_p3)   ;;  %v1907_v16 = vld [vmem:[%s2513_s1 + $0x60] sm:$0xff] (!%p158_p3)   ;;  %v1911_v20 = vld [vmem:[%s2513_s1 + $0x68] sm:$0xff] (!%p158_p3)  }
   0xb   : > { %1709 = vmatprep.subr.bf16.mxu1 (!%p158_p3), %v1897_v6  ;;  %v1904_v13 = vld [vmem:[%s2513_s1 + $0x18] sm:$0xff] (!%p158_p3)   ;;  %v1908_v17 = vld [vmem:[%s2513_s1 + $0x20] sm:$0xff] (!%p158_p3)   ;;  %v1912_v21 = vld [vmem:[%s2513_s1 + $0x28] sm:$0xff] (!%p158_p3)  }
   0xc   : > { %1652 = vmatpush3.bf16.msra.mxu0 (!%p158_p3), %v1896_v5  ;;  %v1905_v14 = vld [vmem:[%s2513_s1 + $0xd8] sm:$0xff] (!%p158_p3)   ;;  %v1909_v18 = vld [vmem:[%s2513_s1 + $0xe0] sm:$0xff] (!%p158_p3)   ;;  %v1913_v22 = vld [vmem:[%s2513_s1 + $0xe8] sm:$0xff] (!%p158_p3)  }
   0xd   : > { %1653 = vmatprep.subr.bf16.mxu0 (!%p158_p3), %v1899_v8  ;;  %v1906_v15 = vld [vmem:[%s2513_s1 + $0x98] sm:$0xff] (!%p158_p3)   ;;  %v1910_v19 = vld [vmem:[%s2513_s1 + $0xa0] sm:$0xff] (!%p158_p3)   ;;  %v1914_v23 = vld [vmem:[%s2513_s1 + $0xa8] sm:$0xff] (!%p158_p3)  }
   0xe   : > { %1710 = vmatpush3.bf16.msra.mxu1 %v1898_v7  ;;  %s188_s8 = scalar_select %p187_p4, %s2022_s12, 3  ;;  %v1915_v24 = vld [vmem:[%s2513_s1 + $0x70] sm:$0xff]   ;;  %v1919_v28 = vld [vmem:[%s2513_s1 + $0x78] sm:$0xff]   ;;  %v1926_v34 = vld [vmem:[%s2513_s1 + $0x140] sm:$0xff]  }
   0xf   : > { %1711 = vmatprep.subr.bf16.mxu1 %v1901_v10  ;;  %v1916_v25 = vld [vmem:[%s2513_s1 + $0x30] sm:$0xff]   ;;  %v1920_v29 = vld [vmem:[%s2513_s1 + $0x38] sm:$0xff]   ;;  %v1930_v37 = vld [vmem:[%s2513_s1 + $0x100] sm:$0xff]   ;;  %vm1288_vm2 = vcmask (!%p1616_p5), 523264   ;;  %vm1301_vm3 = vcmask (!%p1616_p5), 517120  }
  0x10   : > { %1654 = vmatpush3.bf16.msra.mxu0 %v1900_v9  ;;  %s1864_s21 = smul.u32 364, %s188_s8  ;;  %v1917_v26 = vld [vmem:[%s2513_s1 + $0xf0] sm:$0xff]   ;;  %v1921_v30 = vld [vmem:[%s2513_s1 + $0xf8] sm:$0xff]   ;;  %v1931_v39 = vld [vmem:[%s2513_s1 + $0x180] sm:$0xff]  }
  0x11   : > { %1655 = vmatprep.subr.bf16.mxu0 %v1903_v12  ;;  %v1918_v27 = vld [vmem:[%s2513_s1 + $0xb0] sm:$0xff]   ;;  %v1925_v33 = vld [vmem:[%s2513_s1 + $0xb8] sm:$0xff]   ;;  %v1934_v41 = vld [vmem:[%s2513_s1 + $0x148] sm:$0xff]  }
  0x12   : > { %1712 = vmatpush3.bf16.msra.mxu1 %v1902_v11  ;;  %s2166_s5 = scalar_lea.vmem %s2512_s0, %s1864_s21  ;;  %v1936_v43 = vld [vmem:[%s2513_s1 + $0x108] sm:$0xff]   ;;  %v1940_v46 = vld [vmem:[%s2513_s1 + $0x150] sm:$0xff]   ;;  %v1948_v51 = vld [vmem:[%s2513_s1 + $0x158] sm:$0xff]  }
  0x13   : > { %1713 = vmatprep.subr.bf16.mxu1 %v1905_v14  ;;  %v1922_v31 = vld [vmem:[%s2166_s5] ss:$28 sps:$4 sm:$0xff]   ;;  %v1927_v35 = vld [vmem:[%s2166_s5 + $0x8] ss:$28 sps:$4 sm:$0xff]   ;;  %v1935_v42 = vld [vmem:[%s2166_s5 + $0x38] ss:$28 sps:$4 sm:$0xff]  }
  0x14   : > { %1656 = vmatpush3.bf16.msra.mxu0 %v1904_v13  ;;  %v1924_v32 = vld [vmem:[%s2166_s5 + $0x4] ss:$28 sps:$4 sm:$0xff]   ;;  %v1929_v36 = vld [vmem:[%s2166_s5 + $0xc] ss:$28 sps:$4 sm:$0xff]   ;;  %v1932_v40 = vld [vmem:[%s2166_s5 + $0x3c] ss:$28 sps:$4 sm:$0xff]  }
  0x15   : > { %1657 = vmatprep.subr.bf16.mxu0 %v1907_v16  ;;  %951 = vmatprep.mubr.bf16.mxu0 %v1924_v32  ;;  %v1937_v44 = vld [vmem:[%s2166_s5 + $0x44] ss:$28 sps:$4 sm:$0xff]   ;;  %v1941_v47 = vld [vmem:[%s2166_s5 + $0x74] ss:$28 sps:$4 sm:$0xff]   ;;  %v1945_v50 = vld [vmem:[%s2166_s5 + $0x7c] ss:$28 sps:$4 sm:$0xff]  }
  0x16   : > { %1714 = vmatpush3.bf16.msra.mxu1 %v1906_v15  ;;  %1039 = vmatprep.mubr.bf16.mxu1 %v1929_v36  ;;  %v1939_v45 = vld [vmem:[%s2166_s5 + $0x40] ss:$28 sps:$4 sm:$0xff]   ;;  %v1943_v48 = vld [vmem:[%s2513_s1 + $0x110] sm:$0xff]   ;;  %v1950_v53 = vld [vmem:[%s2166_s5 + $0xac] ss:$28 sps:$4 sm:$0xff]  }
  0x17   : > { %1715 = vmatprep.subr.bf16.mxu1 %v1909_v18  ;;  %v1944_v49 = vld [vmem:[%s2166_s5 + $0x70] ss:$28 sps:$4 sm:$0xff]   ;;  %v1949_v52 = vld [vmem:[%s2513_s1 + $0x118] sm:$0xff]   ;;  %v1956_v56 = vld [vmem:[%s2513_s1 + $0x160] sm:$0xff]  }
  0x18   : > { %1658 = vmatpush3.bf16.msra.mxu0 %v1908_v17  ;;  %v1947_v54 = vld [vmem:[%s2166_s5 + $0x78] ss:$28 sps:$4 sm:$0xff]   ;;  %v1957_v57 = vld [vmem:[%s2513_s1 + $0x120] sm:$0xff]   ;;  %v1955_v59 = vld [vmem:[%s2166_s5 + $0xb0] ss:$28 sps:$4 sm:$0xff]  }
  0x19   : > { %1659 = vmatprep.subr.bf16.mxu0 %v1911_v20  ;;  %v1953_v55 = vld [vmem:[%s2166_s5 + $0xb4] ss:$28 sps:$4 sm:$0xff]   ;;  %v1952_v58 = vld [vmem:[%s2166_s5 + $0xa8] ss:$28 sps:$4 sm:$0xff]   ;;  %v1960_v1 = vld [vmem:[%s2166_s5 + $0xe0] ss:$28 sps:$4 sm:$0xff]  }
  0x1a   : > { %1716 = vmatpush3.bf16.msra.mxu1 %v1910_v19  ;;  %v1958_v60 = vld [vmem:[%s2166_s5 + $0xe4] ss:$28 sps:$4 sm:$0xff]   ;;  %v1961_v61 = vld [vmem:[%s2166_s5 + $0xec] ss:$28 sps:$4 sm:$0xff]   ;;  %v1973_v2 = vld [vmem:[%s2513_s1 + $0x170] sm:$0xff]  }
  0x1b   : > { %1717 = vmatprep.subr.bf16.mxu1 %v1913_v22  ;;  %v1964_v62 = vld [vmem:[%s2513_s1 + $0x188] sm:$0xff]   ;;  %v1974_v3 = vld [vmem:[%s2513_s1 + $0x130] sm:$0xff]   ;;  %v1967_v5 = vld [vmem:[%s2166_s5 + $0x11c] ss:$28 sps:$4 sm:$0xff]  }
  0x1c   : > { %1660 = vmatpush3.bf16.msra.mxu0 %v1912_v21  ;;  %v1965_v63 = vld [vmem:[%s2513_s1 + $0x168] sm:$0xff]   ;;  %v1978_v6 = vld [vmem:[%s2513_s1 + $0x178] sm:$0xff]   ;;  %v1970_v8 = vld [vmem:[%s2166_s5 + $0x124] ss:$28 sps:$4 sm:$0xff]  }
  0x1d   : > { %1661 = vmatprep.subr.bf16.mxu0 %v1915_v24  ;;  %v1966_v0 = vld [vmem:[%s2513_s1 + $0x128] sm:$0xff]   ;;  %v1980_v7 = vld [vmem:[%s2513_s1 + $0x138] sm:$0xff]   ;;  %v252_v9 = vld [vmem:[%s2166_s5 + $0x150] sm:$0x11] }
  0x1e   : > { %1718 = vmatpush3.bf16.msra.mxu1 %v1914_v23  ;;  %v1963_v4 = vld [vmem:[%s2166_s5 + $0xe8] ss:$28 sps:$4 sm:$0xff]   ;;  %v1969_v10 = vld [vmem:[%s2166_s5 + $0x118] ss:$28 sps:$4 sm:$0xff]   ;;  %v1553_v11 = vcombine.high %v252_v9, %v252_v9  ;;  %v1972_v13 = vld [vmem:[%s2166_s5 + $0x120] ss:$28 sps:$4 sm:$0xff]   ;;  %v1552_v15 = vcombine.low %v252_v9, %v252_v9 }
  0x1f   : > { %1719 = vmatprep.subr.bf16.mxu1 %v1917_v26  ;;  %v253_v12 = vld [vmem:[%s2166_s5 + $0x158] sm:$0x11]  ;;  %v1983_v16 = vld [vmem:[%s2166_s5 + $0x14] ss:$28 sps:$4 sm:$0xff]   ;;  %v1985_v19 = vld [vmem:[%s2166_s5 + $0x4c] ss:$28 sps:$4 sm:$0xff]  }
  0x20   : > { %1662 = vmatpush3.bf16.msra.mxu0 %v1916_v25  ;;  %v1555_v14 = vcombine.high %v253_v12, %v253_v12  ;;  %v1554_v17 = vcombine.low %v253_v12, %v253_v12  ;;  %v1981_v18 = vld [vmem:[%s2166_s5 + $0x10] ss:$28 sps:$4 sm:$0xff]   ;;  %v1984_v20 = vld [vmem:[%s2166_s5 + $0x18] ss:$28 sps:$4 sm:$0xff]   ;;  %v1987_v21 = vld [vmem:[%s2166_s5 + $0x48] ss:$28 sps:$4 sm:$0xff]  }
  0x21   : > { %1663 = vmatprep.subr.bf16.mxu0 %v1919_v28  ;;  %v1989_v22 = vld [vmem:[%s2166_s5 + $0x84] ss:$28 sps:$4 sm:$0xff]   ;;  %v1988_v23 = vld [vmem:[%s2166_s5 + $0x50] ss:$28 sps:$4 sm:$0xff]   ;;  %v1993_v25 = vld [vmem:[%s2166_s5 + $0xbc] ss:$28 sps:$4 sm:$0xff]  }
  0x22   : > { %1720 = vmatpush3.bf16.msra.mxu1 %v1918_v27  ;;  %v1991_v24 = vld [vmem:[%s2166_s5 + $0x80] ss:$28 sps:$4 sm:$0xff]   ;;  %v1992_v26 = vld [vmem:[%s2166_s5 + $0x88] ss:$28 sps:$4 sm:$0xff]   ;;  %v1995_v27 = vld [vmem:[%s2166_s5 + $0xb8] ss:$28 sps:$4 sm:$0xff]  }
  0x23   : > { %1721 = vmatprep.subr.bf16.mxu1 %v1921_v30  ;;  %v1997_v28 = vld [vmem:[%s2166_s5 + $0xf4] ss:$28 sps:$4 sm:$0xff]  }
  0x24   : > { %1664 = vmatpush3.bf16.msra.mxu0 %v1920_v29  ;;  %v1996_v29 = vld [vmem:[%s2166_s5 + $0xc0] ss:$28 sps:$4 sm:$0xff]   ;;  %v1999_v30 = vld [vmem:[%s2166_s5 + $0xf0] ss:$28 sps:$4 sm:$0xff]   ;;  %v2000_v32 = vld [vmem:[%s2166_s5 + $0xf8] ss:$28 sps:$4 sm:$0xff]  }
  0x25   : > { %1765 = vmatprep.subr.bf16.mxu0 %v1926_v34  ;;  %v2003_v34 = vld [vmem:[%s2166_s5 + $0x128] ss:$28 sps:$4 sm:$0xff]   ;;  %v2004_v36 = vld [vmem:[%s2166_s5 + $0x130] ss:$28 sps:$4 sm:$0xff]  }
  0x26   : > { %1722 = vmatpush3.bf16.msra.mxu1 %v1925_v33  ;;  %v254_v33 = vld [vmem:[%s2166_s5 + $0x160] sm:$0x11] }
  0x27   : > { %952 = vmatmul.mubr.bf16.vlgmr.msra.gmra.mrb[0].mxu0 %v1922_v31  ;;  %1832 = vmatprep.subr.bf16.mxu1 %v2032_v38  ;;  %v2001_v31 = vld [vmem:[%s2166_s5 + $0x12c] ss:$28 sps:$4 sm:$0xff]  }
  0x28   : > { %1766 = vmatpush3.bf16.msra.mxu0 %v1930_v37  ;;  %959 = vmatprep.mubr.bf16.mxu0 %v1932_v40  ;;  %v1556_v37 = vcombine.low %v254_v33, %v254_v33 }
  0x29   : > { %1040 = vmatmul.mubr.bf16.vlgmr.msra.gmra.mrb[0].mxu1 %v1927_v35  ;;  %1767 = vmatprep.subr.bf16.mxu0 %v1934_v41  ;;  %v1557_v35 = vcombine.high %v254_v33, %v254_v33  ;;  %v2303_v41 = vld [vmem:[%s2514_s2] ss:$0 sm:$0xff] }
  0x2a   : > { %1833 = vmatpush3.bf16.msra.mxu1 %v1931_v39  ;;  %1047 = vmatprep.mubr.bf16.mxu1 %v1937_v44  ;;  %v2007_v39 = vld [vmem:[%s2166_s5 + $0x168] ss:$0 sps:$4 sm:$0x11]  }
  0x2b   : > { %1834 = vmatprep.subr.bf16.mxu1 %v2032_v38 }
  0x2c   : > { %1768 = vmatpush3.bf16.msra.mxu0 %v1936_v43 }
  0x2d   : > { %1769 = vmatprep.subr.bf16.mxu0 %v1940_v46 }
  0x2e   : > { %1835 = vmatpush3.bf16.msra.mxu1 %v1964_v62 }
  0x2f   : > { %960 = vmatmul.mubr.bf16.gmra.mrb[4].mxu0 %v1935_v42 }
  0x30   : > { %967 = vmatprep.mubr.bf16.mxu0 %v1941_v47  ;;  %1770 = vmatpush3.bf16.msra.mxu0 %v1943_v48 }
  0x31   : > { %1048 = vmatmul.mubr.bf16.gmra.mrb[4].mxu1 %v1939_v45  ;;  %1771 = vmatprep.subr.bf16.mxu0 %v1948_v51 }
  0x32   : > { %1055 = vmatprep.mubr.bf16.mxu1 %v1945_v50 }
  0x34   : > { %1772 = vmatpush3.bf16.msra.mxu0 %v1949_v52 }
  0x35   : > { %1773 = vmatprep.subr.bf16.mxu0 %v1956_v56 }
  0x37   : > { %968 = vmatmul.mubr.bf16.gmra.mrb[8].mxu0 %v1944_v49 }
  0x38   : > { %975 = vmatprep.mubr.bf16.mxu0 %v1950_v53  ;;  %1774 = vmatpush3.bf16.msra.mxu0 %v1957_v57 }
  0x39   : > { %1056 = vmatmul.mubr.bf16.gmra.mrb[8].mxu1 %v1947_v54  ;;  %1775 = vmatprep.subr.bf16.mxu0 %v1965_v63 }
  0x3a   : > { %1063 = vmatprep.mubr.bf16.mxu1 %v1953_v55 }
  0x3c   : > { %1776 = vmatpush3.bf16.msra.mxu0 %v1966_v0 }
  0x3d   : > { %1777 = vmatprep.subr.bf16.mxu0 %v1973_v2 }
  0x3f   : > { %976 = vmatmul.mubr.bf16.gmra.mrb[12].mxu0 %v1952_v58 }
  0x40   : > { %983 = vmatprep.mubr.bf16.mxu0 %v1958_v60  ;;  %1778 = vmatpush3.bf16.msra.mxu0 %v1974_v3 }
  0x41   : > { %1064 = vmatmul.mubr.bf16.gmra.mrb[12].mxu1 %v1955_v59  ;;  %1779 = vmatprep.subr.bf16.mxu0 %v1978_v6 }
  0x42   : > { %1071 = vmatprep.mubr.bf16.mxu1 %v1961_v61 }
  0x44   : > { %1780 = vmatpush3.bf16.msra.mxu0 %v1980_v7 }
  0x47   : > { %984 = vmatmul.mubr.bf16.gmra.mrb[16].mxu0 %v1960_v1 }
  0x48   : > { %991 = vmatprep.mubr.bf16.mxu0 %v1967_v5 }
  0x49   : > { %1072 = vmatmul.mubr.bf16.gmra.mrb[16].mxu1 %v1963_v4 }
  0x4a   : > { %1079 = vmatprep.mubr.bf16.mxu1 %v1970_v8 }
  0x4f   : > { %992 = vmatmul.mubr.bf16.gmra.mrb[20].mxu0 %v1969_v10 }
  0x50   : > { %999 = vmatprep.mubr.bf16.mxu0 %v1553_v11 }
  0x51   : > { %1080 = vmatmul.mubr.bf16.gmra.mrb[20].mxu1 %v1972_v13 }
  0x52   : > { %1087 = vmatprep.mubr.bf16.mxu1 %v1555_v14 }
  0x57   : > { %1000 = vmatmul.mubr.bf16.gmra.mrb[24].mxu0 %v1552_v15 }
  0x58   : > { %1127 = vmatprep.mubr.bf16.mxu0 %v1983_v16 }
  0x59   : > { %1088 = vmatmul.mubr.bf16.gmra.mrb[24].mxu1 %v1554_v17 }
  0x5a   : > { %1836 = vmatprep.mubr.msk.bf16.mxu1 %vm2033_vm0, %v2032_v38 }
  0x5f   : > { %1128 = vmatmul.mubr.bf16.vlgmr.msra.gmra.mrb[28].mxu0 %v1981_v18 }
  0x60   : > { %1135 = vmatprep.mubr.bf16.mxu0 %v1985_v19 }
  0x61   : > { %1837 = vmatmul.mubr.msk.bf16.vlgmr.msra.gmra.mrb[28].mxu1 %vm897_vm1, %v1984_v20 }
  0x62   : > { %1840 = vmatprep.mubr.msk.bf16.mxu1 %vm2033_vm0, %v2032_v38 }
  0x67   : > { %1136 = vmatmul.mubr.bf16.gmra.mrb[32].mxu0 %v1987_v21 }
  0x68   : > { %1143 = vmatprep.mubr.bf16.mxu0 %v1989_v22 }
  0x69   : > { %1841 = vmatmul.mubr.msk.bf16.gmra.mrb[32].mxu1 %vm897_vm1, %v1988_v23 }
  0x6a   : > { %1844 = vmatprep.mubr.msk.bf16.mxu1 %vm2033_vm0, %v2032_v38 }
  0x6f   : > { %1144 = vmatmul.mubr.bf16.gmra.mrb[36].mxu0 %v1991_v24 }
  0x70   : > { %1151 = vmatprep.mubr.bf16.mxu0 %v1993_v25 }
  0x71   : > { %1845 = vmatmul.mubr.msk.bf16.gmra.mrb[36].mxu1 %vm897_vm1, %v1992_v26 }
  0x72   : > { %1848 = vmatprep.mubr.msk.bf16.mxu1 %vm2033_vm0, %v2032_v38 }
  0x77   : > { %1152 = vmatmul.mubr.bf16.gmra.mrb[40].mxu0 %v1995_v27 }
  0x78   : > { %1159 = vmatprep.mubr.bf16.mxu0 %v1997_v28 }
  0x79   : > { %1849 = vmatmul.mubr.msk.bf16.gmra.mrb[40].mxu1 %vm897_vm1, %v1996_v29 }
  0x7a   : > { %1852 = vmatprep.mubr.msk.bf16.mxu1 %vm2033_vm0, %v2032_v38 }
  0x7f   : > { %1160 = vmatmul.mubr.bf16.gmra.mrb[44].mxu0 %v1999_v30 }
  0x80   : > { %1167 = vmatprep.mubr.bf16.mxu0 %v2001_v31 }
  0x81   : > { %1853 = vmatmul.mubr.msk.bf16.gmra.mrb[44].mxu1 %vm897_vm1, %v2000_v32 }
  0x82   : > { %1856 = vmatprep.mubr.msk.bf16.mxu1 %vm2033_vm0, %v2032_v38 }
  0x87   : > { %1168 = vmatmul.mubr.bf16.gmra.mrb[48].mxu0 %v2003_v34 }
  0x88   : > { %1175 = vmatprep.mubr.bf16.mxu0 %v1557_v35 }
  0x89   : > { %1857 = vmatmul.mubr.msk.bf16.gmra.mrb[48].mxu1 %vm897_vm1, %v2004_v36 }
  0x8a   : > { %1860 = vmatprep.mubr.msk.bf16.mxu1 %vm2033_vm0, %v2032_v38 }
  0x8f   : > { %1176 = vmatmul.mubr.bf16.gmra.mrb[52].mxu0 %v1556_v37 }
  0x91   : > { %1861 = vmatmul.mubr.msk.bf16.gmra.mrb[52].mxu1 %vm897_vm1, %v2007_v39 }
  0xfa   : > { %v1665_v40 = vpop.f32.mrb[0].mxu0 }
  0xfb   : > { %v1666_v42 = vpop.f32.mrb[1].mxu0 }
  0xfc   : > { %v1667_v43 = vadd.f32 %v1666_v42, %v1665_v40  ;;  %v1668_v44 = vpop.f32.mrb[2].mxu0  ;;  %v1723_v45 = vpop.f32.mrb[0].mxu1 }
  0xfd   : > { %v1669_v46 = vpop.f32.mrb[3].mxu0  ;;  %v1724_v49 = vpop.f32.mrb[1].mxu1 }
  0xfe   : > { %v954_v47 = vadd.f32 %v1667_v43, %v2303_v41  ;;  %v1670_v48 = vadd.f32 %v1669_v46, %v1668_v44  ;;  %v1725_v38 = vadd.f32 %v1724_v49, %v1723_v45  ;;  %v1726_v50 = vpop.f32.mrb[2].mxu1 }
  0xff   : > { %v1727_v52 = vpop.f32.mrb[3].mxu1 }
 0x100   : > { %v957_v51 = vadd.f32 %v1670_v48, %v2303_v41  ;;  %v2307_v53 = vadd.f32 %v1725_v38, %v954_v47  ;;  %v1728_v54 = vadd.f32 %v1727_v52, %v1726_v50 }
 0x102   : > { %v1671_v55 = vpop.f32.mrb[4].mxu0  ;;  %v2309_v56 = vadd.f32 %v1728_v54, %v957_v51 }
 0x103   : > { %v1672_v57 = vpop.f32.mrb[5].mxu0 }
 0x104   : > { %v1673_v58 = vadd.f32 %v1672_v57, %v1671_v55  ;;  %v1674_v59 = vpop.f32.mrb[6].mxu0  ;;  %v1729_v60 = vpop.f32.mrb[4].mxu1 }
 0x105   : > { %v1675_v61 = vpop.f32.mrb[7].mxu0  ;;  %v1730_v0 = vpop.f32.mrb[5].mxu1 }
 0x106   : > { %v962_v62 = vadd.f32 %v1673_v58, %v2303_v41  ;;  %v1676_v63 = vadd.f32 %v1675_v61, %v1674_v59  ;;  %v1731_v1 = vadd.f32 %v1730_v0, %v1729_v60  ;;  %v1732_v2 = vpop.f32.mrb[6].mxu1 }
 0x107   : > { %v1733_v4 = vpop.f32.mrb[7].mxu1 }
 0x108   : > { %v965_v3 = vadd.f32 %v1676_v63, %v2303_v41  ;;  %v2313_v5 = vadd.f32 %v1731_v1, %v962_v62  ;;  %v1734_v6 = vadd.f32 %v1733_v4, %v1732_v2 }
 0x10a   : > { %v1677_v7 = vpop.f32.mrb[8].mxu0  ;;  %v2315_v8 = vadd.f32 %v1734_v6, %v965_v3 }
 0x10b   : > { %v1678_v9 = vpop.f32.mrb[9].mxu0 }
 0x10c   : > { %v1679_v10 = vadd.f32 %v1678_v9, %v1677_v7  ;;  %v1680_v11 = vpop.f32.mrb[10].mxu0  ;;  %v1735_v12 = vpop.f32.mrb[8].mxu1 }
 0x10d   : > { %v1681_v13 = vpop.f32.mrb[11].mxu0  ;;  %v1736_v16 = vpop.f32.mrb[9].mxu1 }
 0x10e   : > { %v970_v14 = vadd.f32 %v1679_v10, %v2303_v41  ;;  %v1682_v15 = vadd.f32 %v1681_v13, %v1680_v11  ;;  %v1737_v17 = vadd.f32 %v1736_v16, %v1735_v12  ;;  %v1738_v18 = vpop.f32.mrb[10].mxu1 }
 0x10f   : > { %v1739_v20 = vpop.f32.mrb[11].mxu1 }
 0x110   : > { %v973_v19 = vadd.f32 %v1682_v15, %v2303_v41  ;;  %v2319_v21 = vadd.f32 %v1737_v17, %v970_v14  ;;  %v1740_v22 = vadd.f32 %v1739_v20, %v1738_v18 }
 0x112   : > { %v1683_v23 = vpop.f32.mrb[12].mxu0  ;;  %v2321_v24 = vadd.f32 %v1740_v22, %v973_v19 }
 0x113   : > { %v1684_v25 = vpop.f32.mrb[13].mxu0 }
 0x114   : > { %v1685_v26 = vadd.f32 %v1684_v25, %v1683_v23  ;;  %v1686_v27 = vpop.f32.mrb[14].mxu0  ;;  %v1741_v28 = vpop.f32.mrb[12].mxu1 }
 0x115   : > { %v1687_v29 = vpop.f32.mrb[15].mxu0  ;;  %v1742_v32 = vpop.f32.mrb[13].mxu1 }
 0x116   : > { %v978_v30 = vadd.f32 %v1685_v26, %v2303_v41  ;;  %v1688_v31 = vadd.f32 %v1687_v29, %v1686_v27  ;;  %v1743_v33 = vadd.f32 %v1742_v32, %v1741_v28  ;;  %v1744_v34 = vpop.f32.mrb[14].mxu1 }
 0x117   : > { %v1745_v36 = vpop.f32.mrb[15].mxu1 }
 0x118   : > { %v981_v35 = vadd.f32 %v1688_v31, %v2303_v41  ;;  %v2325_v37 = vadd.f32 %v1743_v33, %v978_v30  ;;  %v1746_v39 = vadd.f32 %v1745_v36, %v1744_v34 }
 0x11a   : > { %v1689_v40 = vpop.f32.mrb[16].mxu0  ;;  %v2327_v42 = vadd.f32 %v1746_v39, %v981_v35 }
 0x11b   : > { %v1690_v43 = vpop.f32.mrb[17].mxu0 }
 0x11c   : > { %v1691_v44 = vadd.f32 %v1690_v43, %v1689_v40  ;;  %v1692_v45 = vpop.f32.mrb[18].mxu0  ;;  %v1747_v46 = vpop.f32.mrb[16].mxu1 }
 0x11d   : > { %v1693_v47 = vpop.f32.mrb[19].mxu0  ;;  %v1748_v38 = vpop.f32.mrb[17].mxu1 }
 0x11e   : > { %v986_v48 = vadd.f32 %v1691_v44, %v2303_v41  ;;  %v1694_v49 = vadd.f32 %v1693_v47, %v1692_v45  ;;  %v1749_v50 = vadd.f32 %v1748_v38, %v1747_v46  ;;  %v1750_v51 = vpop.f32.mrb[18].mxu1 }
 0x11f   : > { %v1751_v54 = vpop.f32.mrb[19].mxu1 }
 0x120   : > { %v989_v52 = vadd.f32 %v1694_v49, %v2303_v41  ;;  %v2331_v55 = vadd.f32 %v1749_v50, %v986_v48  ;;  %v1752_v57 = vadd.f32 %v1751_v54, %v1750_v51 }
 0x122   : > { %v1695_v58 = vpop.f32.mrb[20].mxu0  ;;  %v2333_v59 = vadd.f32 %v1752_v57, %v989_v52 }
 0x123   : > { %v1696_v60 = vpop.f32.mrb[21].mxu0 }
 0x124   : > { %v1697_v61 = vadd.f32 %v1696_v60, %v1695_v58  ;;  %v1698_v62 = vpop.f32.mrb[22].mxu0  ;;  %v1753_v63 = vpop.f32.mrb[20].mxu1 }
 0x125   : > { %v1699_v0 = vpop.f32.mrb[23].mxu0  ;;  %v1754_v3 = vpop.f32.mrb[21].mxu1 }
 0x126   : > { %v994_v1 = vadd.f32 %v1697_v61, %v2303_v41  ;;  %v1700_v2 = vadd.f32 %v1699_v0, %v1698_v62  ;;  %v1755_v4 = vadd.f32 %v1754_v3, %v1753_v63  ;;  %v1756_v6 = vpop.f32.mrb[22].mxu1 }
 0x127   : > { %v1757_v9 = vpop.f32.mrb[23].mxu1 }
 0x128   : > { %v997_v7 = vadd.f32 %v1700_v2, %v2303_v41  ;;  %v2337_v10 = vadd.f32 %v1755_v4, %v994_v1  ;;  %v1758_v11 = vadd.f32 %v1757_v9, %v1756_v6 }
 0x12a   : > { %v1701_v12 = vpop.f32.mrb[24].mxu0  ;;  %v2339_v13 = vadd.f32 %v1758_v11, %v997_v7 }
 0x12b   : > { %v1702_v14 = vpop.f32.mrb[25].mxu0 }
 0x12c   : > { %v1703_v15 = vadd.f32 %v1702_v14, %v1701_v12  ;;  %v1704_v16 = vpop.f32.mrb[26].mxu0  ;;  %v1759_v17 = vpop.f32.mrb[24].mxu1 }
 0x12d   : > { %v1705_v18 = vpop.f32.mrb[27].mxu0  ;;  %v1760_v20 = vpop.f32.mrb[25].mxu1 }
 0x12e   : > { %v1002_v19 = vadd.f32 %v1703_v15, %v2303_v41  ;;  %v1761_v22 = vadd.f32 %v1760_v20, %v1759_v17  ;;  %v1762_v23 = vpop.f32.mrb[26].mxu1 }
 0x12f   : > { %v1763_v25 = vpop.f32.mrb[27].mxu1 }
 0x130   : > { %v2342_v26 = vadd.f32 %v1761_v22, %v1002_v19 }
 0x132   : > { %v1781_v27 = vpop.f32.mrb[28].mxu0 }
 0x133   : > { %v1782_v28 = vpop.f32.mrb[29].mxu0 }
 0x134   : > { %v1783_v29 = vadd.f32 %v1782_v28, %v1781_v27  ;;  %v1784_v30 = vpop.f32.mrb[30].mxu0  ;;  %v1217_v32 = vpop.f32.mrb[28].mxu1 }
 0x135   : > { %v1785_v31 = vpop.f32.mrb[31].mxu0  ;;  %v1838_v35 = vpop.f32.mrb[29].mxu1 }
 0x136   : > { %v1786_v33 = vadd.f32 %v1785_v31, %v1784_v30  ;;  %v1130_v34 = vadd.f32 %v1783_v29, %v2307_v53  ;;  %v1220_v36 = vpop.f32.mrb[30].mxu1 }
 0x137   : > { %v1839_v40 = vpop.f32.mrb[31].mxu1 }
 0x138   : > { %v2345_v39 = vadd.f32 %v1217_v32, %v1130_v34  ;;  %v1133_v41 = vadd.f32 %v1786_v33, %v2309_v56 }
 0x13a   : > { %v1271_v43 = vmax.f32 %v2345_v39, 0.0  ;;  %v2349_v44 = vadd.f32 %v1220_v36, %v1133_v41  ;;  %v1787_v45 = vpop.f32.mrb[32].mxu0 }
 0x13b   : > { %v1788_v46 = vpop.f32.mrb[33].mxu0 }
 0x13c   : > { %v1272_v47 = vmax.f32 %v2349_v44, 0.0  ;;  %v1789_v48 = vadd.f32 %v1788_v46, %v1787_v45  ;;  %v1790_v49 = vpop.f32.mrb[34].mxu0  ;;  %v1225_v50 = vpop.f32.mrb[32].mxu1  ;;  %1289 = vst.msk [vmem:[#allocation2] sm:$0xff] (!%p1616_p5), %vm1288_vm2, %v1271_v43 }
 0x13d   : > { %v1791_v38 = vpop.f32.mrb[35].mxu0  ;;  %v1842_v52 = vpop.f32.mrb[33].mxu1 }
 0x13e   : > { %v1792_v53 = vadd.f32 %v1791_v38, %v1790_v49  ;;  %v1138_v51 = vadd.f32 %v1789_v48, %v2313_v5  ;;  %v1228_v54 = vpop.f32.mrb[34].mxu1  ;;  %1290 = vst.msk [vmem:[#allocation2 + $0x8] sm:$0xff] (!%p1616_p5), %vm1288_vm2, %v1272_v47 }
 0x13f   : > { %v1843_v58 = vpop.f32.mrb[35].mxu1 }
 0x140   : > { %v2353_v57 = vadd.f32 %v1225_v50, %v1138_v51  ;;  %v1141_v56 = vadd.f32 %v1792_v53, %v2315_v8 }
 0x142   : > { %v1273_v60 = vmax.f32 %v2353_v57, 0.0  ;;  %v2357_v61 = vadd.f32 %v1228_v54, %v1141_v56  ;;  %v1793_v62 = vpop.f32.mrb[36].mxu0 }
 0x143   : > { %v1794_v63 = vpop.f32.mrb[37].mxu0 }
 0x144   : > { %v1274_v0 = vmax.f32 %v2357_v61, 0.0  ;;  %v1795_v1 = vadd.f32 %v1794_v63, %v1793_v62  ;;  %v1796_v2 = vpop.f32.mrb[38].mxu0  ;;  %v1233_v4 = vpop.f32.mrb[36].mxu1  ;;  %1291 = vst.msk [vmem:[#allocation2 + $0x10] sm:$0xff] (!%p1616_p5), %vm1288_vm2, %v1273_v60 }
 0x145   : > { %v1797_v3 = vpop.f32.mrb[39].mxu0  ;;  %v1846_v7 = vpop.f32.mrb[37].mxu1 }
 0x146   : > { %v1798_v5 = vadd.f32 %v1797_v3, %v1796_v2  ;;  %v1146_v6 = vadd.f32 %v1795_v1, %v2319_v21  ;;  %v1236_v9 = vpop.f32.mrb[38].mxu1  ;;  %1292 = vst.msk [vmem:[#allocation2 + $0x18] sm:$0xff] (!%p1616_p5), %vm1288_vm2, %v1274_v0 }
 0x147   : > { %v1847_v12 = vpop.f32.mrb[39].mxu1 }
 0x148   : > { %v2361_v11 = vadd.f32 %v1233_v4, %v1146_v6  ;;  %v1149_v8 = vadd.f32 %v1798_v5, %v2321_v24 }
 0x14a   : > { %v1275_v14 = vmax.f32 %v2361_v11, 0.0  ;;  %v2365_v15 = vadd.f32 %v1236_v9, %v1149_v8  ;;  %v1799_v16 = vpop.f32.mrb[40].mxu0 }
 0x14b   : > { %v1800_v17 = vpop.f32.mrb[41].mxu0 }
 0x14c   : > { %v1276_v18 = vmax.f32 %v2365_v15, 0.0  ;;  %v1801_v19 = vadd.f32 %v1800_v17, %v1799_v16  ;;  %v1802_v20 = vpop.f32.mrb[42].mxu0  ;;  %v1241_v23 = vpop.f32.mrb[40].mxu1  ;;  %1293 = vst.msk [vmem:[#allocation2 + $0x20] sm:$0xff] (!%p1616_p5), %vm1288_vm2, %v1275_v14 }
 0x14d   : > { %v1803_v22 = vpop.f32.mrb[43].mxu0  ;;  %v1850_v27 = vpop.f32.mrb[41].mxu1 }
 0x14e   : > { %v1804_v21 = vadd.f32 %v1803_v22, %v1802_v20  ;;  %v1154_v25 = vadd.f32 %v1801_v19, %v2325_v37  ;;  %v1244_v28 = vpop.f32.mrb[42].mxu1  ;;  %1294 = vst.msk [vmem:[#allocation2 + $0x28] sm:$0xff] (!%p1616_p5), %vm1288_vm2, %v1276_v18 }
 0x14f   : > { %v1851_v30 = vpop.f32.mrb[43].mxu1 }
 0x150   : > { %v2369_v29 = vadd.f32 %v1241_v23, %v1154_v25  ;;  %v1157_v24 = vadd.f32 %v1804_v21, %v2327_v42 }
 0x152   : > { %v1277_v31 = vmax.f32 %v2369_v29, 0.0  ;;  %v2373_v32 = vadd.f32 %v1244_v28, %v1157_v24  ;;  %v1805_v33 = vpop.f32.mrb[44].mxu0 }
 0x153   : > { %v1806_v34 = vpop.f32.mrb[45].mxu0 }
 0x154   : > { %v1278_v35 = vmax.f32 %v2373_v32, 0.0  ;;  %v1807_v36 = vadd.f32 %v1806_v34, %v1805_v33  ;;  %v1808_v41 = vpop.f32.mrb[46].mxu0  ;;  %v1249_v45 = vpop.f32.mrb[44].mxu1  ;;  %1295 = vst.msk [vmem:[#allocation2 + $0x30] sm:$0xff] (!%p1616_p5), %vm1288_vm2, %v1277_v31 }
 0x155   : > { %v1809_v40 = vpop.f32.mrb[47].mxu0  ;;  %v1854_v48 = vpop.f32.mrb[45].mxu1 }
 0x156   : > { %v1810_v37 = vadd.f32 %v1809_v40, %v1808_v41  ;;  %v1162_v46 = vadd.f32 %v1807_v36, %v2331_v55  ;;  %v1252_v49 = vpop.f32.mrb[46].mxu1  ;;  %1296 = vst.msk [vmem:[#allocation2 + $0x38] sm:$0xff] (!%p1616_p5), %vm1288_vm2, %v1278_v35 }
 0x157   : > { %v1855_v50 = vpop.f32.mrb[47].mxu1 }
 0x158   : > { %v2377_v38 = vadd.f32 %v1249_v45, %v1162_v46  ;;  %v1165_v42 = vadd.f32 %v1810_v37, %v2333_v59 }
 0x15a   : > { %v1279_v53 = vmax.f32 %v2377_v38, 0.0  ;;  %v2381_v51 = vadd.f32 %v1252_v49, %v1165_v42  ;;  %v1811_v52 = vpop.f32.mrb[48].mxu0 }
 0x15b   : > { %v1812_v54 = vpop.f32.mrb[49].mxu0 }
 0x15c   : > { %v1280_v56 = vmax.f32 %v2381_v51, 0.0  ;;  %v1813_v58 = vadd.f32 %v1812_v54, %v1811_v52  ;;  %v1814_v62 = vpop.f32.mrb[50].mxu0  ;;  %v1257_v1 = vpop.f32.mrb[48].mxu1  ;;  %1297 = vst.msk [vmem:[#allocation2 + $0x40] sm:$0xff] (!%p1616_p5), %vm1288_vm2, %v1279_v53 }
 0x15d   : > { %v1815_v63 = vpop.f32.mrb[51].mxu0  ;;  %v1858_v3 = vpop.f32.mrb[49].mxu1 }
 0x15e   : > { %v1816_v55 = vadd.f32 %v1815_v63, %v1814_v62  ;;  %v1170_v2 = vadd.f32 %v1813_v58, %v2337_v10  ;;  %v1260_v4 = vpop.f32.mrb[50].mxu1  ;;  %1298 = vst.msk [vmem:[#allocation2 + $0x48] sm:$0xff] (!%p1616_p5), %vm1288_vm2, %v1280_v56 }
 0x15f   : > { %v1859_v6 = vpop.f32.mrb[51].mxu1 }
 0x160   : > { %v2385_v5 = vadd.f32 %v1257_v1, %v1170_v2  ;;  %v1173_v59 = vadd.f32 %v1816_v55, %v2339_v13 }
 0x162   : > { %v1281_v7 = vmax.f32 %v2385_v5, 0.0  ;;  %v2389_v9 = vadd.f32 %v1260_v4, %v1173_v59  ;;  %v1817_v8 = vpop.f32.mrb[52].mxu0 }
 0x163   : > { %v1818_v12 = vpop.f32.mrb[53].mxu0 }
 0x164   : > { %v1282_v16 = vmax.f32 %v2389_v9, 0.0  ;;  %v1819_v17 = vadd.f32 %v1818_v12, %v1817_v8  ;;  %v1820_v19 = vpop.f32.mrb[54].mxu0  ;;  %v1265_v22 = vpop.f32.mrb[52].mxu1  ;;  %1287 = sbr.rel (%p1616_p5) target bundleno = 365 (0x16d), region = 36  ;;  %1299 = vst.msk [vmem:[#allocation2 + $0x50] sm:$0xff] (!%p1616_p5), %vm1288_vm2, %v1281_v7 }
 0x165   : > { %v1821_v20 = vpop.f32.mrb[55].mxu0  ;;  %v1862_v23 = vpop.f32.mrb[53].mxu1 }
 0x166   : > { %v1178_v10 = vadd.f32 %v1819_v17, %v2342_v26  ;;  %v1268_v21 = vpop.f32.mrb[54].mxu1  ;;  %1300 = vst.msk [vmem:[#allocation2 + $0x58] sm:$0xff] (!%p1616_p5), %vm1288_vm2, %v1282_v16 }
 0x167   : > { %v1863_v27 = vpop.f32.mrb[55].mxu1 }
 0x168   : > { %v1266_v25 = vadd.f32 %v1265_v22, %v1178_v10 }
 0x16a   : > { %v1283_v13 = vmax.f32 %v1266_v25, 0.0 }
 0x16c   : > { %1302 = vst.msk [vmem:[#allocation2 + $0x60] sm:$0x3] %vm1301_vm3, %v1283_v13 }
 0x16d PF: > { %p1617_p6 = scmp.le.s32.totalorder %s2022_s12, 0 }
 0x16e   : > { %v1307_v26 = vld [vmem:[#allocation2] sm:$0xff] (!%p1617_p6)  ;;  %vm1333_vm4 = vcmask (!%p1617_p6), 523264   ;;  %v1308_v28 = vld [vmem:[#allocation2 + $0x8] sm:$0xff] (!%p1617_p6)  ;;  %v1309_v24 = vld [vmem:[#allocation2 + $0x10] sm:$0xff] (!%p1617_p6)  ;;  %vm1346_vm5 = vcmask (!%p1617_p6), 517120  }
 0x16f   : > { %1306 = sbr.rel (%p1617_p6) target bundleno = 376 (0x178), region = 40  ;;  %v1320_v30 = vmax.f32 (!%p1617_p6), %v1307_v26, %v1271_v43  ;;  %v1321_v33 = vmax.f32 (!%p1617_p6), %v1308_v28, %v1272_v47  ;;  %v1322_v34 = vmax.f32 (!%p1617_p6), %v1309_v24, %v1273_v60  ;;  %v1310_v36 = vld [vmem:[#allocation2 + $0x18] sm:$0xff] (!%p1617_p6)  ;;  %v1311_v41 = vld [vmem:[#allocation2 + $0x20] sm:$0xff] (!%p1617_p6)  ;;  %v1312_v40 = vld [vmem:[#allocation2 + $0x28] sm:$0xff] (!%p1617_p6) }
 0x170   : > { %v1323_v45 = vmax.f32 (!%p1617_p6), %v1310_v36, %v1274_v0  ;;  %v1324_v37 = vmax.f32 (!%p1617_p6), %v1311_v41, %v1275_v14  ;;  %v1325_v46 = vmax.f32 (!%p1617_p6), %v1312_v40, %v1276_v18  ;;  %v1313_v39 = vld [vmem:[#allocation2 + $0x30] sm:$0xff] (!%p1617_p6)  ;;  %v1314_v43 = vld [vmem:[#allocation2 + $0x38] sm:$0xff] (!%p1617_p6)  ;;  %v1315_v48 = vld [vmem:[#allocation2 + $0x40] sm:$0xff] (!%p1617_p6) }
 0x171   : > { %1334 = vst.msk [vmem:[#allocation2] sm:$0xff] (!%p1617_p6), %vm1333_vm4, %v1320_v30  ;;  %1335 = vst.msk [vmem:[#allocation2 + $0x8] sm:$0xff] (!%p1617_p6), %vm1333_vm4, %v1321_v33  ;;  %v1326_v44 = vmax.f32 (!%p1617_p6), %v1313_v39, %v1277_v31  ;;  %v1327_v47 = vmax.f32 (!%p1617_p6), %v1314_v43, %v1278_v35  ;;  %v1328_v57 = vmax.f32 (!%p1617_p6), %v1315_v48, %v1279_v53  ;;  %v1316_v60 = vld [vmem:[#allocation2 + $0x48] sm:$0xff] (!%p1617_p6)  ;;  %v1317_v61 = vld [vmem:[#allocation2 + $0x50] sm:$0xff] (!%p1617_p6) }
 0x172   : > { %1336 = vst.msk [vmem:[#allocation2 + $0x10] sm:$0xff] (!%p1617_p6), %vm1333_vm4, %v1322_v34  ;;  %v1318_v0 = vld [vmem:[#allocation2 + $0x58] sm:$0xff] (!%p1617_p6)  ;;  %1337 = vst.msk [vmem:[#allocation2 + $0x18] sm:$0xff] (!%p1617_p6), %vm1333_vm4, %v1323_v45  ;;  %v1329_v11 = vmax.f32 (!%p1617_p6), %v1316_v60, %v1280_v56  ;;  %v1330_v14 = vmax.f32 (!%p1617_p6), %v1317_v61, %v1281_v7 }
 0x173   : > { %1338 = vst.msk [vmem:[#allocation2 + $0x20] sm:$0xff] (!%p1617_p6), %vm1333_vm4, %v1324_v37  ;;  %1339 = vst.msk [vmem:[#allocation2 + $0x28] sm:$0xff] (!%p1617_p6), %vm1333_vm4, %v1325_v46  ;;  %v1331_v15 = vmax.f32 (!%p1617_p6), %v1318_v0, %v1282_v16  ;;  %v1319_v18 = vld [vmem:[#allocation2 + $0x60] sm:$0x3] (!%p1617_p6) }
 0x174   : > { %1340 = vst.msk [vmem:[#allocation2 + $0x30] sm:$0xff] (!%p1617_p6), %vm1333_vm4, %v1326_v44  ;;  %1341 = vst.msk [vmem:[#allocation2 + $0x38] sm:$0xff] (!%p1617_p6), %vm1333_vm4, %v1327_v47  ;;  %v1332_v29 = vmax.f32 (!%p1617_p6), %v1319_v18, %v1283_v13 }
 0x175   : > { %1342 = vst.msk [vmem:[#allocation2 + $0x40] sm:$0xff] (!%p1617_p6), %vm1333_vm4, %v1328_v57  ;;  %1343 = vst.msk [vmem:[#allocation2 + $0x48] sm:$0xff] (!%p1617_p6), %vm1333_vm4, %v1329_v11 }
 0x176   : > { %1344 = vst.msk [vmem:[#allocation2 + $0x50] sm:$0xff] %vm1333_vm4, %v1330_v14  ;;  %1345 = vst.msk [vmem:[#allocation2 + $0x58] sm:$0xff] %vm1333_vm4, %v1331_v15 }
 0x177   : > { %1347 = vst.msk [vmem:[#allocation2 + $0x60] sm:$0x3] %vm1346_vm5, %v1332_v29 }
 0x178 PF: > { %p1618_p7 = scmp.ne.s32.totalorder %s2022_s12, 3 }
 0x179   : > { %vm1418_vm6 = vcmask (!%p1618_p7), 519168   ;;  %vm1431_vm7 = vcmask (!%p1618_p7), 516096  }
 0x17a   : > { %1351 = sbr.rel (%p1618_p7) target bundleno = 388 (0x184), region = 44  ;;  %v1352_v31 = vld [vmem:[#allocation2] sm:$0xff] (!%p1618_p7)  ;;  %v1353_v32 = vld [vmem:[#allocation2 + $0x8] sm:$0xff] (!%p1618_p7) }
 0x17b   : > { %v1354_v35 = vld [vmem:[#allocation2 + $0x10] sm:$0xff] (!%p1618_p7)  ;;  %v1636_v49 = vpack.c.bf16 (!%p1618_p7), %v1352_v31, %v1352_v31  ;;  %v1637_v38 = vpack.c.bf16 (!%p1618_p7), %v1353_v32, %v1353_v32  ;;  %v1355_v50 = vld [vmem:[#allocation2 + $0x18] sm:$0xff] (!%p1618_p7) }
 0x17c   : > { %v1638_v42 = vpack.c.bf16 (!%p1618_p7), %v1354_v35, %v1354_v35  ;;  %v1356_v53 = vld [vmem:[#allocation2 + $0x20] sm:$0xff] (!%p1618_p7)  ;;  %v1357_v51 = vld [vmem:[#allocation2 + $0x28] sm:$0xff] (!%p1618_p7)  ;;  %v1639_v52 = vpack.c.bf16 (!%p1618_p7), %v1355_v50, %v1355_v50 }
 0x17d   : > { %v1640_v54 = vpack.c.bf16 (!%p1618_p7), %v1356_v53, %v1356_v53  ;;  %v1641_v56 = vpack.c.bf16 (!%p1618_p7), %v1357_v51, %v1357_v51  ;;  %v1358_v58 = vld [vmem:[#allocation2 + $0x30] sm:$0xff] (!%p1618_p7)  ;;  %v1359_v62 = vld [vmem:[#allocation2 + $0x38] sm:$0xff] (!%p1618_p7)  ;;  %1419 = vst.msk [vmem:[%s2515_s3] sm:$0xf] (!%p1618_p7), %vm1418_vm6, %v1636_v49  ;;  %1420 = vst.msk [vmem:[%s2515_s3 + $0x4] sm:$0xf] (!%p1618_p7), %vm1418_vm6, %v1637_v38 }
 0x17e   : > { %v1360_v63 = vld [vmem:[#allocation2 + $0x40] sm:$0xff] (!%p1618_p7)  ;;  %1421 = vst.msk [vmem:[%s2515_s3 + $0x8] sm:$0xf] (!%p1618_p7), %vm1418_vm6, %v1638_v42  ;;  %v1642_v1 = vpack.c.bf16 (!%p1618_p7), %v1358_v58, %v1358_v58  ;;  %v1643_v55 = vpack.c.bf16 (!%p1618_p7), %v1359_v62, %v1359_v62  ;;  %v1361_v3 = vld [vmem:[#allocation2 + $0x48] sm:$0xff] (!%p1618_p7)  ;;  %1422 = vst.msk [vmem:[%s2515_s3 + $0xc] sm:$0xf] (!%p1618_p7), %vm1418_vm6, %v1639_v52 }
 0x17f   : > { %v1644_v2 = vpack.c.bf16 (!%p1618_p7), %v1360_v63, %v1360_v63  ;;  %v1362_v4 = vld [vmem:[#allocation2 + $0x50] sm:$0xff] (!%p1618_p7)  ;;  %v1363_v5 = vld [vmem:[#allocation2 + $0x58] sm:$0xff] (!%p1618_p7)  ;;  %1423 = vst.msk [vmem:[%s2515_s3 + $0x10] sm:$0xf] (!%p1618_p7), %vm1418_vm6, %v1640_v54  ;;  %1424 = vst.msk [vmem:[%s2515_s3 + $0x14] sm:$0xf] (!%p1618_p7), %vm1418_vm6, %v1641_v56  ;;  %v1645_v59 = vpack.c.bf16 (!%p1618_p7), %v1361_v3, %v1361_v3 }
 0x180   : > { %v1646_v6 = vpack.c.bf16 (!%p1618_p7), %v1362_v4, %v1362_v4  ;;  %v1647_v7 = vpack.c.bf16 (!%p1618_p7), %v1363_v5, %v1363_v5  ;;  %v1364_v9 = vld [vmem:[#allocation2 + $0x60] sm:$0x3] (!%p1618_p7)  ;;  %1425 = vst.msk [vmem:[%s2515_s3 + $0x18] sm:$0xf] (!%p1618_p7), %vm1418_vm6, %v1642_v1  ;;  %1426 = vst.msk [vmem:[%s2515_s3 + $0x1c] sm:$0xf] (!%p1618_p7), %vm1418_vm6, %v1643_v55 }
 0x181   : > { %1427 = vst.msk [vmem:[%s2515_s3 + $0x20] sm:$0xf] %vm1418_vm6, %v1644_v2  ;;  %v1648_v8 = vpack.c.bf16 %v1364_v9, %v1364_v9  ;;  %1428 = vst.msk [vmem:[%s2515_s3 + $0x24] sm:$0xf] %vm1418_vm6, %v1645_v59 }
 0x182   : > { %1429 = vst.msk [vmem:[%s2515_s3 + $0x28] sm:$0xf] %vm1418_vm6, %v1646_v6  ;;  %1430 = vst.msk [vmem:[%s2515_s3 + $0x2c] sm:$0xf] %vm1418_vm6, %v1647_v7 }
 0x183   : > { %1432 = vst.msk [vmem:[%s2515_s3 + $0x30] sm:$0x1] %vm1431_vm7, %v1648_v8 }
 0x184 PF: > { %s13_s14 = sadd.s32 1, %s2030_s14   ;;  %s2516_s12 = smov %s2026_s13 }
 0x185   : > { %p10_p8 = scmp.ge.s32.totalorder %s13_s14, 6   ;;  %s2517_s13 = smov %s2519_s15 }
 0x187   :  { %12 = sbr.rel (!%p10_p8) target bundleno = 2 (0x2), region = 74 }

// kernel: cnn_forward.8
= control target key start
LH: loop header
LB: loop body
LE: loop exit
PB: predicated region body
PF: predicated region fallthrough
CT: control target
= control target key end

     0   :  { %s2243_s12 = smov 0   ;;  %s2245_s13 = smov 0   ;;  %s2735_s0 = inlined_call_operand.vmem [shape: bf16[2,1024], index: 0, kind: input, shape index: {}]   ;;  %s2736_s1 = inlined_call_operand.vmem [shape: bf16[1024,512], index: 1, kind: input, shape index: {}]   ;;  %s2737_s2 = inlined_call_operand.vmem [shape: f32[1,512], index: 2, kind: input, shape index: {}]   ;;  %s2738_s3 = inlined_call_operand.vmem [shape: bf16[2,512], index: 3, kind: output, shape index: {}]  }
   0x1   :  { %s2247_s14 = smov 0  }
   0x2 LB: > { %s1824_s15 = sadd.s32 4294967295, %s2220_s14   ;;  %s2260_s16 = sadd.s32 1, %s2220_s14   ;;  %s2220_s14 = sphi %s2247_s14, %s2741_s14   ;;  %s2216_s13 = sphi %s2245_s13, %s2740_s13   ;;  %s2212_s12 = sphi %s2243_s12, %s2739_s12  }
   0x3   : > { %s38_s17 = ssub.s32 %s2220_s14, %s2260_s16  ;;  %s41_s18 = sadd.s32 1, %s2216_s13 }
   0x4   : > { %p39_p0 = scmp.eq.s32.totalorder %s38_s17, 0  ;;  %p48_p1 = scmp.ne.s32.totalorder %s2216_s13, %s2212_s12 }
   0x5   : > { %p49_p2 = scmp.eq.s32.totalorder %s2220_s14, 0  ;;  %p1827_p4 = scmp.ge.s32.totalorder %s2220_s14, 2 }
   0x6   : > { %s2269_s19 = scalar_select %p39_p0, %s2216_s13, %s41_s18  }
   0x7   : > { %p50_p3 = por %p49_p2, %p48_p1  ;;  %129 = sbr.rel (%p1827_p4) target bundleno = 82 (0x52), region = 20 }
   0xe   : > { %132 = sbr.rel (!%p50_p3) target bundleno = 82 (0x52), region = 24  ;;  %s134_s20 = sand.u32 (%p50_p3), 1, %s2216_s13  }
   0xf   : > { %s1967_s21 = sshll.u32 (%p50_p3), %s2220_s14, 3  ;;  %s1828_s22 = sshll.u32 (%p50_p3), %s134_s20, 10 }
  0x10   : > { %s2277_s25 = scalar_lea.vmem (%p50_p3), %s2736_s1, %s1967_s21  ;;  %s2282_s26 = scalar_lea.vmem (%p50_p3), [#allocation2], %s1828_s22 }
  0x11   : > { %v421_v0 = vld [vmem:[%s2277_s25] sm:$0xff] (%p50_p3)  ;;  %v423_v1 = vld [vmem:[%s2277_s25 + $0x10] sm:$0xff] (%p50_p3) }
  0x12   : > { %v425_v2 = vld [vmem:[%s2277_s25 + $0x20] sm:$0xff] (%p50_p3)  ;;  %422 = vst [vmem:[%s2282_s26] sm:$0xff] (%p50_p3), %v421_v0  ;;  %424 = vst [vmem:[%s2282_s26 + $0x8] sm:$0xff] (%p50_p3), %v423_v1  ;;  %v427_v3 = vld [vmem:[%s2277_s25 + $0x30] sm:$0xff] (%p50_p3) }
  0x13   : > { %426 = vst [vmem:[%s2282_s26 + $0x10] sm:$0xff] (%p50_p3), %v425_v2  ;;  %v429_v4 = vld [vmem:[%s2277_s25 + $0x40] sm:$0xff] (%p50_p3)  ;;  %v431_v5 = vld [vmem:[%s2277_s25 + $0x50] sm:$0xff] (%p50_p3)  ;;  %428 = vst [vmem:[%s2282_s26 + $0x18] sm:$0xff] (%p50_p3), %v427_v3 }
  0x14   : > { %430 = vst [vmem:[%s2282_s26 + $0x20] sm:$0xff] (%p50_p3), %v429_v4  ;;  %432 = vst [vmem:[%s2282_s26 + $0x28] sm:$0xff] (%p50_p3), %v431_v5  ;;  %v433_v6 = vld [vmem:[%s2277_s25 + $0x60] sm:$0xff] (%p50_p3)  ;;  %v435_v7 = vld [vmem:[%s2277_s25 + $0x70] sm:$0xff] (%p50_p3) }
  0x15   : > { %v437_v8 = vld [vmem:[%s2277_s25 + $0x80] sm:$0xff]  ;;  %434 = vst [vmem:[%s2282_s26 + $0x30] sm:$0xff] %v433_v6  ;;  %436 = vst [vmem:[%s2282_s26 + $0x38] sm:$0xff] %v435_v7  ;;  %v439_v9 = vld [vmem:[%s2277_s25 + $0x90] sm:$0xff] }
  0x16   : > { %438 = vst [vmem:[%s2282_s26 + $0x40] sm:$0xff] %v437_v8  ;;  %v441_v10 = vld [vmem:[%s2277_s25 + $0xa0] sm:$0xff]  ;;  %v443_v11 = vld [vmem:[%s2277_s25 + $0xb0] sm:$0xff]  ;;  %440 = vst [vmem:[%s2282_s26 + $0x48] sm:$0xff] %v439_v9 }
  0x17   : > { %442 = vst [vmem:[%s2282_s26 + $0x50] sm:$0xff] %v441_v10  ;;  %444 = vst [vmem:[%s2282_s26 + $0x58] sm:$0xff] %v443_v11  ;;  %v445_v12 = vld [vmem:[%s2277_s25 + $0xc0] sm:$0xff]  ;;  %v447_v13 = vld [vmem:[%s2277_s25 + $0xd0] sm:$0xff] }
  0x18   : > { %v449_v14 = vld [vmem:[%s2277_s25 + $0xe0] sm:$0xff]  ;;  %446 = vst [vmem:[%s2282_s26 + $0x60] sm:$0xff] %v445_v12  ;;  %448 = vst [vmem:[%s2282_s26 + $0x68] sm:$0xff] %v447_v13  ;;  %v451_v15 = vld [vmem:[%s2277_s25 + $0xf0] sm:$0xff] }
  0x19   : > { %450 = vst [vmem:[%s2282_s26 + $0x70] sm:$0xff] %v449_v14  ;;  %v453_v16 = vld [vmem:[%s2277_s25 + $0x100] sm:$0xff]  ;;  %v455_v17 = vld [vmem:[%s2277_s25 + $0x110] sm:$0xff]  ;;  %452 = vst [vmem:[%s2282_s26 + $0x78] sm:$0xff] %v451_v15 }
  0x1a   : > { %454 = vst [vmem:[%s2282_s26 + $0x80] sm:$0xff] %v453_v16  ;;  %456 = vst [vmem:[%s2282_s26 + $0x88] sm:$0xff] %v455_v17  ;;  %v457_v18 = vld [vmem:[%s2277_s25 + $0x120] sm:$0xff]  ;;  %v459_v19 = vld [vmem:[%s2277_s25 + $0x130] sm:$0xff] }
  0x1b   : > { %v461_v20 = vld [vmem:[%s2277_s25 + $0x140] sm:$0xff]  ;;  %458 = vst [vmem:[%s2282_s26 + $0x90] sm:$0xff] %v457_v18  ;;  %460 = vst [vmem:[%s2282_s26 + $0x98] sm:$0xff] %v459_v19  ;;  %v463_v21 = vld [vmem:[%s2277_s25 + $0x150] sm:$0xff] }
  0x1c   : > { %462 = vst [vmem:[%s2282_s26 + $0xa0] sm:$0xff] %v461_v20  ;;  %v465_v22 = vld [vmem:[%s2277_s25 + $0x160] sm:$0xff]  ;;  %v467_v23 = vld [vmem:[%s2277_s25 + $0x170] sm:$0xff]  ;;  %464 = vst [vmem:[%s2282_s26 + $0xa8] sm:$0xff] %v463_v21 }
  0x1d   : > { %466 = vst [vmem:[%s2282_s26 + $0xb0] sm:$0xff] %v465_v22  ;;  %468 = vst [vmem:[%s2282_s26 + $0xb8] sm:$0xff] %v467_v23  ;;  %v469_v24 = vld [vmem:[%s2277_s25 + $0x180] sm:$0xff]  ;;  %v471_v25 = vld [vmem:[%s2277_s25 + $0x190] sm:$0xff] }
  0x1e   : > { %v473_v26 = vld [vmem:[%s2277_s25 + $0x1a0] sm:$0xff]  ;;  %470 = vst [vmem:[%s2282_s26 + $0xc0] sm:$0xff] %v469_v24  ;;  %472 = vst [vmem:[%s2282_s26 + $0xc8] sm:$0xff] %v471_v25  ;;  %v475_v27 = vld [vmem:[%s2277_s25 + $0x1b0] sm:$0xff] }
  0x1f   : > { %474 = vst [vmem:[%s2282_s26 + $0xd0] sm:$0xff] %v473_v26  ;;  %v477_v28 = vld [vmem:[%s2277_s25 + $0x1c0] sm:$0xff]  ;;  %v479_v29 = vld [vmem:[%s2277_s25 + $0x1d0] sm:$0xff]  ;;  %476 = vst [vmem:[%s2282_s26 + $0xd8] sm:$0xff] %v475_v27 }
  0x20   : > { %478 = vst [vmem:[%s2282_s26 + $0xe0] sm:$0xff] %v477_v28  ;;  %480 = vst [vmem:[%s2282_s26 + $0xe8] sm:$0xff] %v479_v29  ;;  %v481_v30 = vld [vmem:[%s2277_s25 + $0x1e0] sm:$0xff]  ;;  %v483_v31 = vld [vmem:[%s2277_s25 + $0x1f0] sm:$0xff] }
  0x21   : > { %v485_v32 = vld [vmem:[%s2277_s25 + $0x200] sm:$0xff]  ;;  %482 = vst [vmem:[%s2282_s26 + $0xf0] sm:$0xff] %v481_v30  ;;  %484 = vst [vmem:[%s2282_s26 + $0xf8] sm:$0xff] %v483_v31  ;;  %v487_v33 = vld [vmem:[%s2277_s25 + $0x210] sm:$0xff] }
  0x22   : > { %486 = vst [vmem:[%s2282_s26 + $0x100] sm:$0xff] %v485_v32  ;;  %v489_v34 = vld [vmem:[%s2277_s25 + $0x220] sm:$0xff]  ;;  %v491_v35 = vld [vmem:[%s2277_s25 + $0x230] sm:$0xff]  ;;  %488 = vst [vmem:[%s2282_s26 + $0x108] sm:$0xff] %v487_v33 }
  0x23   : > { %490 = vst [vmem:[%s2282_s26 + $0x110] sm:$0xff] %v489_v34  ;;  %492 = vst [vmem:[%s2282_s26 + $0x118] sm:$0xff] %v491_v35  ;;  %v493_v36 = vld [vmem:[%s2277_s25 + $0x240] sm:$0xff]  ;;  %v495_v37 = vld [vmem:[%s2277_s25 + $0x250] sm:$0xff] }
  0x24   : > { %v497_v38 = vld [vmem:[%s2277_s25 + $0x260] sm:$0xff]  ;;  %494 = vst [vmem:[%s2282_s26 + $0x120] sm:$0xff] %v493_v36  ;;  %496 = vst [vmem:[%s2282_s26 + $0x128] sm:$0xff] %v495_v37  ;;  %v499_v39 = vld [vmem:[%s2277_s25 + $0x270] sm:$0xff] }
  0x25   : > { %498 = vst [vmem:[%s2282_s26 + $0x130] sm:$0xff] %v497_v38  ;;  %v501_v40 = vld [vmem:[%s2277_s25 + $0x280] sm:$0xff]  ;;  %v503_v41 = vld [vmem:[%s2277_s25 + $0x290] sm:$0xff]  ;;  %500 = vst [vmem:[%s2282_s26 + $0x138] sm:$0xff] %v499_v39 }
  0x26   : > { %502 = vst [vmem:[%s2282_s26 + $0x140] sm:$0xff] %v501_v40  ;;  %504 = vst [vmem:[%s2282_s26 + $0x148] sm:$0xff] %v503_v41  ;;  %v505_v42 = vld [vmem:[%s2277_s25 + $0x2a0] sm:$0xff]  ;;  %v507_v43 = vld [vmem:[%s2277_s25 + $0x2b0] sm:$0xff] }
  0x27   : > { %v509_v44 = vld [vmem:[%s2277_s25 + $0x2c0] sm:$0xff]  ;;  %506 = vst [vmem:[%s2282_s26 + $0x150] sm:$0xff] %v505_v42  ;;  %508 = vst [vmem:[%s2282_s26 + $0x158] sm:$0xff] %v507_v43  ;;  %v511_v45 = vld [vmem:[%s2277_s25 + $0x2d0] sm:$0xff] }
  0x28   : > { %510 = vst [vmem:[%s2282_s26 + $0x160] sm:$0xff] %v509_v44  ;;  %v513_v46 = vld [vmem:[%s2277_s25 + $0x2e0] sm:$0xff]  ;;  %v515_v47 = vld [vmem:[%s2277_s25 + $0x2f0] sm:$0xff]  ;;  %512 = vst [vmem:[%s2282_s26 + $0x168] sm:$0xff] %v511_v45 }
  0x29   : > { %514 = vst [vmem:[%s2282_s26 + $0x170] sm:$0xff] %v513_v46  ;;  %516 = vst [vmem:[%s2282_s26 + $0x178] sm:$0xff] %v515_v47  ;;  %v517_v48 = vld [vmem:[%s2277_s25 + $0x300] sm:$0xff]  ;;  %v519_v49 = vld [vmem:[%s2277_s25 + $0x310] sm:$0xff] }
  0x2a   : > { %v521_v50 = vld [vmem:[%s2277_s25 + $0x320] sm:$0xff]  ;;  %518 = vst [vmem:[%s2282_s26 + $0x180] sm:$0xff] %v517_v48  ;;  %520 = vst [vmem:[%s2282_s26 + $0x188] sm:$0xff] %v519_v49  ;;  %v523_v51 = vld [vmem:[%s2277_s25 + $0x330] sm:$0xff] }
  0x2b   : > { %522 = vst [vmem:[%s2282_s26 + $0x190] sm:$0xff] %v521_v50  ;;  %v525_v52 = vld [vmem:[%s2277_s25 + $0x340] sm:$0xff]  ;;  %v527_v53 = vld [vmem:[%s2277_s25 + $0x350] sm:$0xff]  ;;  %524 = vst [vmem:[%s2282_s26 + $0x198] sm:$0xff] %v523_v51 }
  0x2c   : > { %526 = vst [vmem:[%s2282_s26 + $0x1a0] sm:$0xff] %v525_v52  ;;  %528 = vst [vmem:[%s2282_s26 + $0x1a8] sm:$0xff] %v527_v53  ;;  %v529_v54 = vld [vmem:[%s2277_s25 + $0x360] sm:$0xff]  ;;  %v531_v55 = vld [vmem:[%s2277_s25 + $0x370] sm:$0xff] }
  0x2d   : > { %v533_v56 = vld [vmem:[%s2277_s25 + $0x380] sm:$0xff]  ;;  %530 = vst [vmem:[%s2282_s26 + $0x1b0] sm:$0xff] %v529_v54  ;;  %532 = vst [vmem:[%s2282_s26 + $0x1b8] sm:$0xff] %v531_v55  ;;  %v535_v57 = vld [vmem:[%s2277_s25 + $0x390] sm:$0xff] }
  0x2e   : > { %534 = vst [vmem:[%s2282_s26 + $0x1c0] sm:$0xff] %v533_v56  ;;  %v537_v58 = vld [vmem:[%s2277_s25 + $0x3a0] sm:$0xff]  ;;  %v539_v59 = vld [vmem:[%s2277_s25 + $0x3b0] sm:$0xff]  ;;  %536 = vst [vmem:[%s2282_s26 + $0x1c8] sm:$0xff] %v535_v57 }
  0x2f   : > { %538 = vst [vmem:[%s2282_s26 + $0x1d0] sm:$0xff] %v537_v58  ;;  %540 = vst [vmem:[%s2282_s26 + $0x1d8] sm:$0xff] %v539_v59  ;;  %v541_v60 = vld [vmem:[%s2277_s25 + $0x3c0] sm:$0xff]  ;;  %v543_v61 = vld [vmem:[%s2277_s25 + $0x3d0] sm:$0xff] }
  0x30   : > { %v545_v62 = vld [vmem:[%s2277_s25 + $0x3e0] sm:$0xff]  ;;  %542 = vst [vmem:[%s2282_s26 + $0x1e0] sm:$0xff] %v541_v60  ;;  %544 = vst [vmem:[%s2282_s26 + $0x1e8] sm:$0xff] %v543_v61  ;;  %v547_v63 = vld [vmem:[%s2277_s25 + $0x3f0] sm:$0xff] }
  0x31   : > { %546 = vst [vmem:[%s2282_s26 + $0x1f0] sm:$0xff] %v545_v62  ;;  %v549_v0 = vld [vmem:[%s2277_s25 + $0x400] sm:$0xff]  ;;  %v551_v1 = vld [vmem:[%s2277_s25 + $0x410] sm:$0xff]  ;;  %548 = vst [vmem:[%s2282_s26 + $0x1f8] sm:$0xff] %v547_v63 }
  0x32   : > { %550 = vst [vmem:[%s2282_s26 + $0x200] sm:$0xff] %v549_v0  ;;  %552 = vst [vmem:[%s2282_s26 + $0x208] sm:$0xff] %v551_v1  ;;  %v553_v2 = vld [vmem:[%s2277_s25 + $0x420] sm:$0xff]  ;;  %v555_v3 = vld [vmem:[%s2277_s25 + $0x430] sm:$0xff] }
  0x33   : > { %v557_v4 = vld [vmem:[%s2277_s25 + $0x440] sm:$0xff]  ;;  %554 = vst [vmem:[%s2282_s26 + $0x210] sm:$0xff] %v553_v2  ;;  %556 = vst [vmem:[%s2282_s26 + $0x218] sm:$0xff] %v555_v3  ;;  %v559_v5 = vld [vmem:[%s2277_s25 + $0x450] sm:$0xff] }
  0x34   : > { %558 = vst [vmem:[%s2282_s26 + $0x220] sm:$0xff] %v557_v4  ;;  %v561_v6 = vld [vmem:[%s2277_s25 + $0x460] sm:$0xff]  ;;  %v563_v7 = vld [vmem:[%s2277_s25 + $0x470] sm:$0xff]  ;;  %560 = vst [vmem:[%s2282_s26 + $0x228] sm:$0xff] %v559_v5 }
  0x35   : > { %562 = vst [vmem:[%s2282_s26 + $0x230] sm:$0xff] %v561_v6  ;;  %564 = vst [vmem:[%s2282_s26 + $0x238] sm:$0xff] %v563_v7  ;;  %v565_v8 = vld [vmem:[%s2277_s25 + $0x480] sm:$0xff]  ;;  %v567_v9 = vld [vmem:[%s2277_s25 + $0x490] sm:$0xff] }
  0x36   : > { %v569_v10 = vld [vmem:[%s2277_s25 + $0x4a0] sm:$0xff]  ;;  %566 = vst [vmem:[%s2282_s26 + $0x240] sm:$0xff] %v565_v8  ;;  %568 = vst [vmem:[%s2282_s26 + $0x248] sm:$0xff] %v567_v9  ;;  %v571_v11 = vld [vmem:[%s2277_s25 + $0x4b0] sm:$0xff] }
  0x37   : > { %570 = vst [vmem:[%s2282_s26 + $0x250] sm:$0xff] %v569_v10  ;;  %v573_v12 = vld [vmem:[%s2277_s25 + $0x4c0] sm:$0xff]  ;;  %v575_v13 = vld [vmem:[%s2277_s25 + $0x4d0] sm:$0xff]  ;;  %572 = vst [vmem:[%s2282_s26 + $0x258] sm:$0xff] %v571_v11 }
  0x38   : > { %574 = vst [vmem:[%s2282_s26 + $0x260] sm:$0xff] %v573_v12  ;;  %576 = vst [vmem:[%s2282_s26 + $0x268] sm:$0xff] %v575_v13  ;;  %v577_v14 = vld [vmem:[%s2277_s25 + $0x4e0] sm:$0xff]  ;;  %v579_v15 = vld [vmem:[%s2277_s25 + $0x4f0] sm:$0xff] }
  0x39   : > { %v581_v16 = vld [vmem:[%s2277_s25 + $0x500] sm:$0xff]  ;;  %578 = vst [vmem:[%s2282_s26 + $0x270] sm:$0xff] %v577_v14  ;;  %580 = vst [vmem:[%s2282_s26 + $0x278] sm:$0xff] %v579_v15  ;;  %v583_v17 = vld [vmem:[%s2277_s25 + $0x510] sm:$0xff] }
  0x3a   : > { %582 = vst [vmem:[%s2282_s26 + $0x280] sm:$0xff] %v581_v16  ;;  %v585_v18 = vld [vmem:[%s2277_s25 + $0x520] sm:$0xff]  ;;  %v587_v19 = vld [vmem:[%s2277_s25 + $0x530] sm:$0xff]  ;;  %584 = vst [vmem:[%s2282_s26 + $0x288] sm:$0xff] %v583_v17 }
  0x3b   : > { %586 = vst [vmem:[%s2282_s26 + $0x290] sm:$0xff] %v585_v18  ;;  %588 = vst [vmem:[%s2282_s26 + $0x298] sm:$0xff] %v587_v19  ;;  %v589_v20 = vld [vmem:[%s2277_s25 + $0x540] sm:$0xff]  ;;  %v591_v21 = vld [vmem:[%s2277_s25 + $0x550] sm:$0xff] }
  0x3c   : > { %v593_v22 = vld [vmem:[%s2277_s25 + $0x560] sm:$0xff]  ;;  %590 = vst [vmem:[%s2282_s26 + $0x2a0] sm:$0xff] %v589_v20  ;;  %592 = vst [vmem:[%s2282_s26 + $0x2a8] sm:$0xff] %v591_v21  ;;  %v595_v23 = vld [vmem:[%s2277_s25 + $0x570] sm:$0xff] }
  0x3d   : > { %594 = vst [vmem:[%s2282_s26 + $0x2b0] sm:$0xff] %v593_v22  ;;  %v597_v24 = vld [vmem:[%s2277_s25 + $0x580] sm:$0xff]  ;;  %v599_v25 = vld [vmem:[%s2277_s25 + $0x590] sm:$0xff]  ;;  %596 = vst [vmem:[%s2282_s26 + $0x2b8] sm:$0xff] %v595_v23 }
  0x3e   : > { %598 = vst [vmem:[%s2282_s26 + $0x2c0] sm:$0xff] %v597_v24  ;;  %600 = vst [vmem:[%s2282_s26 + $0x2c8] sm:$0xff] %v599_v25  ;;  %v601_v26 = vld [vmem:[%s2277_s25 + $0x5a0] sm:$0xff]  ;;  %v603_v27 = vld [vmem:[%s2277_s25 + $0x5b0] sm:$0xff] }
  0x3f   : > { %v605_v28 = vld [vmem:[%s2277_s25 + $0x5c0] sm:$0xff]  ;;  %602 = vst [vmem:[%s2282_s26 + $0x2d0] sm:$0xff] %v601_v26  ;;  %604 = vst [vmem:[%s2282_s26 + $0x2d8] sm:$0xff] %v603_v27  ;;  %v607_v29 = vld [vmem:[%s2277_s25 + $0x5d0] sm:$0xff] }
  0x40   : > { %606 = vst [vmem:[%s2282_s26 + $0x2e0] sm:$0xff] %v605_v28  ;;  %v609_v30 = vld [vmem:[%s2277_s25 + $0x5e0] sm:$0xff]  ;;  %v611_v31 = vld [vmem:[%s2277_s25 + $0x5f0] sm:$0xff]  ;;  %608 = vst [vmem:[%s2282_s26 + $0x2e8] sm:$0xff] %v607_v29 }
  0x41   : > { %610 = vst [vmem:[%s2282_s26 + $0x2f0] sm:$0xff] %v609_v30  ;;  %612 = vst [vmem:[%s2282_s26 + $0x2f8] sm:$0xff] %v611_v31  ;;  %v613_v32 = vld [vmem:[%s2277_s25 + $0x600] sm:$0xff]  ;;  %v615_v33 = vld [vmem:[%s2277_s25 + $0x610] sm:$0xff] }
  0x42   : > { %v617_v34 = vld [vmem:[%s2277_s25 + $0x620] sm:$0xff]  ;;  %614 = vst [vmem:[%s2282_s26 + $0x300] sm:$0xff] %v613_v32  ;;  %616 = vst [vmem:[%s2282_s26 + $0x308] sm:$0xff] %v615_v33  ;;  %v619_v35 = vld [vmem:[%s2277_s25 + $0x630] sm:$0xff] }
  0x43   : > { %618 = vst [vmem:[%s2282_s26 + $0x310] sm:$0xff] %v617_v34  ;;  %v621_v36 = vld [vmem:[%s2277_s25 + $0x640] sm:$0xff]  ;;  %v623_v37 = vld [vmem:[%s2277_s25 + $0x650] sm:$0xff]  ;;  %620 = vst [vmem:[%s2282_s26 + $0x318] sm:$0xff] %v619_v35 }
  0x44   : > { %622 = vst [vmem:[%s2282_s26 + $0x320] sm:$0xff] %v621_v36  ;;  %624 = vst [vmem:[%s2282_s26 + $0x328] sm:$0xff] %v623_v37  ;;  %v625_v38 = vld [vmem:[%s2277_s25 + $0x660] sm:$0xff]  ;;  %v627_v39 = vld [vmem:[%s2277_s25 + $0x670] sm:$0xff] }
  0x45   : > { %v629_v40 = vld [vmem:[%s2277_s25 + $0x680] sm:$0xff]  ;;  %626 = vst [vmem:[%s2282_s26 + $0x330] sm:$0xff] %v625_v38  ;;  %628 = vst [vmem:[%s2282_s26 + $0x338] sm:$0xff] %v627_v39  ;;  %v631_v41 = vld [vmem:[%s2277_s25 + $0x690] sm:$0xff] }
  0x46   : > { %630 = vst [vmem:[%s2282_s26 + $0x340] sm:$0xff] %v629_v40  ;;  %v633_v42 = vld [vmem:[%s2277_s25 + $0x6a0] sm:$0xff]  ;;  %v635_v43 = vld [vmem:[%s2277_s25 + $0x6b0] sm:$0xff]  ;;  %632 = vst [vmem:[%s2282_s26 + $0x348] sm:$0xff] %v631_v41 }
  0x47   : > { %634 = vst [vmem:[%s2282_s26 + $0x350] sm:$0xff] %v633_v42  ;;  %636 = vst [vmem:[%s2282_s26 + $0x358] sm:$0xff] %v635_v43  ;;  %v637_v44 = vld [vmem:[%s2277_s25 + $0x6c0] sm:$0xff]  ;;  %v639_v45 = vld [vmem:[%s2277_s25 + $0x6d0] sm:$0xff] }
  0x48   : > { %v641_v46 = vld [vmem:[%s2277_s25 + $0x6e0] sm:$0xff]  ;;  %638 = vst [vmem:[%s2282_s26 + $0x360] sm:$0xff] %v637_v44  ;;  %640 = vst [vmem:[%s2282_s26 + $0x368] sm:$0xff] %v639_v45  ;;  %v643_v47 = vld [vmem:[%s2277_s25 + $0x6f0] sm:$0xff] }
  0x49   : > { %642 = vst [vmem:[%s2282_s26 + $0x370] sm:$0xff] %v641_v46  ;;  %v645_v48 = vld [vmem:[%s2277_s25 + $0x700] sm:$0xff]  ;;  %v647_v49 = vld [vmem:[%s2277_s25 + $0x710] sm:$0xff]  ;;  %644 = vst [vmem:[%s2282_s26 + $0x378] sm:$0xff] %v643_v47 }
  0x4a   : > { %646 = vst [vmem:[%s2282_s26 + $0x380] sm:$0xff] %v645_v48  ;;  %648 = vst [vmem:[%s2282_s26 + $0x388] sm:$0xff] %v647_v49  ;;  %v649_v50 = vld [vmem:[%s2277_s25 + $0x720] sm:$0xff]  ;;  %v651_v51 = vld [vmem:[%s2277_s25 + $0x730] sm:$0xff] }
  0x4b   : > { %v653_v52 = vld [vmem:[%s2277_s25 + $0x740] sm:$0xff]  ;;  %650 = vst [vmem:[%s2282_s26 + $0x390] sm:$0xff] %v649_v50  ;;  %652 = vst [vmem:[%s2282_s26 + $0x398] sm:$0xff] %v651_v51  ;;  %v655_v53 = vld [vmem:[%s2277_s25 + $0x750] sm:$0xff] }
  0x4c   : > { %654 = vst [vmem:[%s2282_s26 + $0x3a0] sm:$0xff] %v653_v52  ;;  %v657_v54 = vld [vmem:[%s2277_s25 + $0x760] sm:$0xff]  ;;  %v659_v55 = vld [vmem:[%s2277_s25 + $0x770] sm:$0xff]  ;;  %656 = vst [vmem:[%s2282_s26 + $0x3a8] sm:$0xff] %v655_v53 }
  0x4d   : > { %658 = vst [vmem:[%s2282_s26 + $0x3b0] sm:$0xff] %v657_v54  ;;  %660 = vst [vmem:[%s2282_s26 + $0x3b8] sm:$0xff] %v659_v55  ;;  %v661_v56 = vld [vmem:[%s2277_s25 + $0x780] sm:$0xff]  ;;  %v663_v57 = vld [vmem:[%s2277_s25 + $0x790] sm:$0xff] }
  0x4e   : > { %v665_v58 = vld [vmem:[%s2277_s25 + $0x7a0] sm:$0xff]  ;;  %662 = vst [vmem:[%s2282_s26 + $0x3c0] sm:$0xff] %v661_v56  ;;  %664 = vst [vmem:[%s2282_s26 + $0x3c8] sm:$0xff] %v663_v57  ;;  %v667_v59 = vld [vmem:[%s2277_s25 + $0x7b0] sm:$0xff] }
  0x4f   : > { %666 = vst [vmem:[%s2282_s26 + $0x3d0] sm:$0xff] %v665_v58  ;;  %v669_v60 = vld [vmem:[%s2277_s25 + $0x7c0] sm:$0xff]  ;;  %v671_v61 = vld [vmem:[%s2277_s25 + $0x7d0] sm:$0xff]  ;;  %668 = vst [vmem:[%s2282_s26 + $0x3d8] sm:$0xff] %v667_v59 }
  0x50   : > { %670 = vst [vmem:[%s2282_s26 + $0x3e0] sm:$0xff] %v669_v60  ;;  %672 = vst [vmem:[%s2282_s26 + $0x3e8] sm:$0xff] %v671_v61  ;;  %v673_v62 = vld [vmem:[%s2277_s25 + $0x7e0] sm:$0xff]  ;;  %v675_v63 = vld [vmem:[%s2277_s25 + $0x7f0] sm:$0xff] }
  0x51   : > { %674 = vst [vmem:[%s2282_s26 + $0x3f0] sm:$0xff] %v673_v62  ;;  %676 = vst [vmem:[%s2282_s26 + $0x3f8] sm:$0xff] %v675_v63 }
  0x52 PF: > { %p1831_p5 = scmp.ge.s32.totalorder %s2220_s14, 1  ;;  %p689_p6 = scmp.lt.s32.totalorder %s2220_s14, 3 }
  0x54   : > { %p690_p7 = pnand %p1831_p5, %p689_p6 }
  0x55   : > { %s696_s27 = sand.u32 (!%p690_p7), 1, %s2212_s12   ;;  %v733_v0 = vld [vmem:[%s2735_s0] sm:$0xff] (!%p690_p7)  ;;  %v864_v1 = vlaneseq (!%p690_p7)  ;;  %v2222_v2 = vmov (!%p690_p7), 1966171168   ;;  %s1833_s5 = sshll.u32 (!%p690_p7), %s1824_s15, 1 }
  0x56   : > { %693 = sbr.rel (%p690_p7) target bundleno = 442 (0x1ba), region = 66  ;;  %s1832_s30 = sshll.u32 (!%p690_p7), %s696_s27, 10  ;;  %v877_v3 = vunpack.c.l.s4 (!%p690_p7), %v2222_v2  ;;  %v875_v7 = vcombine.high (!%p690_p7), %v733_v0, %v733_v0 }
  0x57   : > { %v2543_v4 = vshrl.u32 (!%p690_p7), %v864_v1, 7  ;;  %s2545_s4 = scalar_lea.vmem (!%p690_p7), [#allocation2], %s1832_s30  ;;  %p724_p8 = scmp.lt.s32.totalorder (!%p690_p7), %s1833_s5, 3 }
  0x58   : > { %v2005_v5 = vld [vmem:[%s2545_s4 + $0x4] ss:$8 sps:$4 sm:$0xff] (!%p690_p7)   ;;  %v878_v6 = vunpack.c.0.s8 (!%p690_p7), %v877_v3  ;;  %v2009_v9 = vld [vmem:[%s2545_s4] ss:$8 sps:$4 sm:$0xff] (!%p690_p7)   ;;  %v2011_v12 = vld [vmem:[%s2545_s4 + $0x14] ss:$8 sps:$4 sm:$0xff] (!%p690_p7)  }
  0x59   : > { %v2007_v8 = vld [vmem:[%s2545_s4 + $0x204] ss:$8 sps:$4 sm:$0xff] (!%p690_p7)   ;;  %1572 = vmatprep.subr.bf16.mxu1 (!%p690_p7), %v2005_v5  ;;  %v2010_v10 = vld [vmem:[%s2545_s4 + $0x200] ss:$8 sps:$4 sm:$0xff] (!%p690_p7)   ;;  %v2013_v13 = vld [vmem:[%s2545_s4 + $0x214] ss:$8 sps:$4 sm:$0xff] (!%p690_p7)  }
  0x5a   : > { %v2552_v11 = vsub.s32 (!%p690_p7), %v878_v6, %v2543_v4  ;;  %1654 = vmatprep.subr.bf16.mxu0 (!%p690_p7), %v2007_v8  ;;  %1573 = vmatpush1.bf16.msra.mxu1 (!%p690_p7), %v2009_v9  ;;  %v2015_v14 = vld [vmem:[%s2545_s4 + $0x10] ss:$8 sps:$4 sm:$0xff] (!%p690_p7)   ;;  %v2017_v18 = vld [vmem:[%s2545_s4 + $0x24] ss:$8 sps:$4 sm:$0xff] (!%p690_p7)   ;;  %v2021_v22 = vld [vmem:[%s2545_s4 + $0x20] ss:$8 sps:$4 sm:$0xff] (!%p690_p7)  }
  0x5b   : > { %1655 = vmatpush1.bf16.msra.mxu0 (!%p690_p7), %v2010_v10  ;;  %1574 = vmatprep.subr.bf16.mxu1 (!%p690_p7), %v2011_v12  ;;  %v2016_v17 = vld [vmem:[%s2545_s4 + $0x210] ss:$8 sps:$4 sm:$0xff] (!%p690_p7)   ;;  %v2019_v21 = vld [vmem:[%s2545_s4 + $0x224] ss:$8 sps:$4 sm:$0xff] (!%p690_p7)   ;;  %v2022_v23 = vld [vmem:[%s2545_s4 + $0x220] ss:$8 sps:$4 sm:$0xff] (!%p690_p7)  }
  0x5c   : > { %v2558_v15 = vrot.slane (!%p690_p7), %v733_v0, %v2552_v11  ;;  %v2561_v16 = vrot.slane (!%p690_p7), %v875_v7, %v2552_v11  ;;  %1656 = vmatprep.subr.bf16.mxu0 (!%p690_p7), %v2013_v13  ;;  %v2023_v24 = vld [vmem:[%s2545_s4 + $0x34] ss:$8 sps:$4 sm:$0xff] (!%p690_p7)   ;;  %v2027_v28 = vld [vmem:[%s2545_s4 + $0x30] ss:$8 sps:$4 sm:$0xff] (!%p690_p7)   ;;  %v2029_v30 = vld [vmem:[%s2545_s4 + $0x44] ss:$8 sps:$4 sm:$0xff] (!%p690_p7)  }
  0x5d   : > { %v2025_v27 = vld [vmem:[%s2545_s4 + $0x234] ss:$8 sps:$4 sm:$0xff]   ;;  %v2028_v29 = vld [vmem:[%s2545_s4 + $0x230] ss:$8 sps:$4 sm:$0xff]   ;;  %v2031_v31 = vld [vmem:[%s2545_s4 + $0x244] ss:$8 sps:$4 sm:$0xff]  }
  0x5e   : > { %v890_v19 = vcombine.high %v2558_v15, %v2558_v15  ;;  %v891_v20 = vcombine.high %v2561_v16, %v2561_v16  ;;  %1575 = vmatpush1.bf16.msra.mxu1 %v2015_v14  ;;  %v2033_v32 = vld [vmem:[%s2545_s4 + $0x40] ss:$8 sps:$4 sm:$0xff]   ;;  %v2035_v34 = vld [vmem:[%s2545_s4 + $0x54] ss:$8 sps:$4 sm:$0xff]   ;;  %v2039_v36 = vld [vmem:[%s2545_s4 + $0x50] ss:$8 sps:$4 sm:$0xff]  }
  0x5f   : > { %1657 = vmatpush1.bf16.msra.mxu0 %v2016_v17  ;;  %1576 = vmatprep.subr.bf16.mxu1 %v2017_v18  ;;  %v2034_v33 = vld [vmem:[%s2545_s4 + $0x240] ss:$8 sps:$4 sm:$0xff]   ;;  %v2037_v35 = vld [vmem:[%s2545_s4 + $0x254] ss:$8 sps:$4 sm:$0xff]   ;;  %v2040_v37 = vld [vmem:[%s2545_s4 + $0x250] ss:$8 sps:$4 sm:$0xff]  }
  0x60   : > { %v2574_v25 = vrot.slane %v890_v19, %v2552_v11  ;;  %v2577_v26 = vrot.slane %v891_v20, %v2552_v11  ;;  %1658 = vmatprep.subr.bf16.mxu0 %v2019_v21  ;;  %v2041_v38 = vld [vmem:[%s2545_s4 + $0x64] ss:$8 sps:$4 sm:$0xff]   ;;  %v2045_v40 = vld [vmem:[%s2545_s4 + $0x60] ss:$8 sps:$4 sm:$0xff]   ;;  %v2047_v42 = vld [vmem:[%s2545_s4 + $0x74] ss:$8 sps:$4 sm:$0xff]  }
  0x61   : > { %v2043_v39 = vld [vmem:[%s2545_s4 + $0x264] ss:$8 sps:$4 sm:$0xff]   ;;  %v2046_v41 = vld [vmem:[%s2545_s4 + $0x260] ss:$8 sps:$4 sm:$0xff]   ;;  %v2049_v43 = vld [vmem:[%s2545_s4 + $0x274] ss:$8 sps:$4 sm:$0xff]  }
  0x62   : > { %1604 = vmatprep.mubr.bf16.mxu1 %v2574_v25  ;;  %1686 = vmatprep.mubr.bf16.mxu0 %v2577_v26  ;;  %v2051_v44 = vld [vmem:[%s2545_s4 + $0x70] ss:$8 sps:$4 sm:$0xff]   ;;  %v2053_v46 = vld [vmem:[%s2545_s4 + $0x84] ss:$8 sps:$4 sm:$0xff]   ;;  %v2057_v48 = vld [vmem:[%s2545_s4 + $0x80] ss:$8 sps:$4 sm:$0xff]  }
  0x63   : > { %1577 = vmatpush1.bf16.msra.mxu1 %v2021_v22  ;;  %1659 = vmatpush1.bf16.msra.mxu0 %v2022_v23  ;;  %v2052_v45 = vld [vmem:[%s2545_s4 + $0x270] ss:$8 sps:$4 sm:$0xff]   ;;  %v2055_v47 = vld [vmem:[%s2545_s4 + $0x284] ss:$8 sps:$4 sm:$0xff]   ;;  %v2058_v49 = vld [vmem:[%s2545_s4 + $0x280] ss:$8 sps:$4 sm:$0xff]   ;;  %v2638_v22 = vrot.slane %v2558_v15, %v2552_v11  ;;  %v2642_v23 = vrot.slane %v2561_v16, %v2552_v11  ;;  %v923_v15 = vcombine.high %v2577_v26, %v2577_v26 }
  0x64   : > { %1578 = vmatprep.subr.bf16.mxu1 %v2023_v24  ;;  %1660 = vmatprep.subr.bf16.mxu0 %v2025_v27  ;;  %v2059_v50 = vld [vmem:[%s2545_s4 + $0x94] ss:$8 sps:$4 sm:$0xff]   ;;  %v2063_v52 = vld [vmem:[%s2545_s4 + $0x90] ss:$8 sps:$4 sm:$0xff]   ;;  %v2065_v54 = vld [vmem:[%s2545_s4 + $0xa4] ss:$8 sps:$4 sm:$0xff]  }
  0x65   : > { %v2061_v51 = vld [vmem:[%s2545_s4 + $0x294] ss:$8 sps:$4 sm:$0xff]   ;;  %v2064_v53 = vld [vmem:[%s2545_s4 + $0x290] ss:$8 sps:$4 sm:$0xff]   ;;  %v2067_v55 = vld [vmem:[%s2545_s4 + $0x2a4] ss:$8 sps:$4 sm:$0xff]  }
  0x66   : > { %v2069_v56 = vld [vmem:[%s2545_s4 + $0xa0] ss:$8 sps:$4 sm:$0xff]   ;;  %v2071_v58 = vld [vmem:[%s2545_s4 + $0xb4] ss:$8 sps:$4 sm:$0xff]   ;;  %v2075_v60 = vld [vmem:[%s2545_s4 + $0xb0] ss:$8 sps:$4 sm:$0xff]  }
  0x67   : > { %1579 = vmatpush1.bf16.msra.mxu1 %v2027_v28  ;;  %1661 = vmatpush1.bf16.msra.mxu0 %v2028_v29  ;;  %v2070_v57 = vld [vmem:[%s2545_s4 + $0x2a0] ss:$8 sps:$4 sm:$0xff]   ;;  %v2073_v59 = vld [vmem:[%s2545_s4 + $0x2b4] ss:$8 sps:$4 sm:$0xff]   ;;  %v2076_v61 = vld [vmem:[%s2545_s4 + $0x2b0] ss:$8 sps:$4 sm:$0xff]   ;;  %v922_v28 = vcombine.high %v2574_v25, %v2574_v25 }
  0x68   : > { %1580 = vmatprep.subr.bf16.mxu1 %v2029_v30  ;;  %1662 = vmatprep.subr.bf16.mxu0 %v2031_v31  ;;  %v2077_v62 = vld [vmem:[%s2545_s4 + $0xc4] ss:$8 sps:$4 sm:$0xff]   ;;  %v2081_v0 = vld [vmem:[%s2545_s4 + $0xc0] ss:$8 sps:$4 sm:$0xff]   ;;  %v2083_v2 = vld [vmem:[%s2545_s4 + $0xd4] ss:$8 sps:$4 sm:$0xff]  }
  0x69   : > { %v2079_v63 = vld [vmem:[%s2545_s4 + $0x2c4] ss:$8 sps:$4 sm:$0xff]   ;;  %v2082_v1 = vld [vmem:[%s2545_s4 + $0x2c0] ss:$8 sps:$4 sm:$0xff]   ;;  %v2085_v3 = vld [vmem:[%s2545_s4 + $0x2d4] ss:$8 sps:$4 sm:$0xff]  }
  0x6a   : > { %v2087_v5 = vld [vmem:[%s2545_s4 + $0xd0] ss:$8 sps:$4 sm:$0xff]   ;;  %v2089_v7 = vld [vmem:[%s2545_s4 + $0xe4] ss:$8 sps:$4 sm:$0xff]   ;;  %v2093_v9 = vld [vmem:[%s2545_s4 + $0xe0] ss:$8 sps:$4 sm:$0xff]  }
  0x6b   : > { %1581 = vmatpush1.bf16.msra.mxu1 %v2033_v32  ;;  %1663 = vmatpush1.bf16.msra.mxu0 %v2034_v33  ;;  %v2088_v6 = vld [vmem:[%s2545_s4 + $0x2d0] ss:$8 sps:$4 sm:$0xff]   ;;  %v2091_v8 = vld [vmem:[%s2545_s4 + $0x2e4] ss:$8 sps:$4 sm:$0xff]   ;;  %v2094_v10 = vld [vmem:[%s2545_s4 + $0x2e0] ss:$8 sps:$4 sm:$0xff]  }
  0x6c   : > { %1582 = vmatprep.subr.bf16.mxu1 %v2035_v34  ;;  %1664 = vmatprep.subr.bf16.mxu0 %v2037_v35  ;;  %v2095_v12 = vld [vmem:[%s2545_s4 + $0xf4] ss:$8 sps:$4 sm:$0xff]   ;;  %v2099_v14 = vld [vmem:[%s2545_s4 + $0xf0] ss:$8 sps:$4 sm:$0xff]   ;;  %v2103_v18 = vld [vmem:[%s2545_s4 + $0x104] ss:$8 sps:$4 sm:$0xff]  }
  0x6d   : > { %v2097_v13 = vld [vmem:[%s2545_s4 + $0x2f4] ss:$8 sps:$4 sm:$0xff]   ;;  %v2100_v17 = vld [vmem:[%s2545_s4 + $0x2f0] ss:$8 sps:$4 sm:$0xff]   ;;  %v2107_v19 = vld [vmem:[%s2545_s4 + $0x304] ss:$8 sps:$4 sm:$0xff]  }
  0x6e   : > { %v2101_v20 = vld [vmem:[%s2545_s4 + $0x100] ss:$8 sps:$4 sm:$0xff]   ;;  %v2110_v24 = vld [vmem:[%s2545_s4 + $0x114] ss:$8 sps:$4 sm:$0xff]   ;;  %v2108_v16 = vld [vmem:[%s2545_s4 + $0x110] ss:$8 sps:$4 sm:$0xff]  }
  0x6f   : > { %1583 = vmatpush1.bf16.msra.mxu1 %v2039_v36  ;;  %1665 = vmatpush1.bf16.msra.mxu0 %v2040_v37  ;;  %v2105_v21 = vld [vmem:[%s2545_s4 + $0x300] ss:$8 sps:$4 sm:$0xff]   ;;  %v2113_v27 = vld [vmem:[%s2545_s4 + $0x314] ss:$8 sps:$4 sm:$0xff]   ;;  %v2111_v29 = vld [vmem:[%s2545_s4 + $0x310] ss:$8 sps:$4 sm:$0xff]  }
  0x70   : > { %1584 = vmatprep.subr.bf16.mxu1 %v2041_v38  ;;  %1666 = vmatprep.subr.bf16.mxu0 %v2043_v39  ;;  %v2116_v30 = vld [vmem:[%s2545_s4 + $0x124] ss:$8 sps:$4 sm:$0xff]   ;;  %v2114_v26 = vld [vmem:[%s2545_s4 + $0x120] ss:$8 sps:$4 sm:$0xff]   ;;  %v2122_v32 = vld [vmem:[%s2545_s4 + $0x134] ss:$8 sps:$4 sm:$0xff]  }
  0x71   : > { %v2119_v25 = vld [vmem:[%s2545_s4 + $0x324] ss:$8 sps:$4 sm:$0xff]   ;;  %v2117_v31 = vld [vmem:[%s2545_s4 + $0x320] ss:$8 sps:$4 sm:$0xff]   ;;  %v2125_v33 = vld [vmem:[%s2545_s4 + $0x334] ss:$8 sps:$4 sm:$0xff]  }
  0x72   : > { %v2120_v34 = vld [vmem:[%s2545_s4 + $0x130] ss:$8 sps:$4 sm:$0xff]   ;;  %v2128_v36 = vld [vmem:[%s2545_s4 + $0x144] ss:$8 sps:$4 sm:$0xff]   ;;  %v2126_v38 = vld [vmem:[%s2545_s4 + $0x140] ss:$8 sps:$4 sm:$0xff]  }
  0x73   : > { %1585 = vmatpush1.bf16.msra.mxu1 %v2045_v40  ;;  %1667 = vmatpush1.bf16.msra.mxu0 %v2046_v41  ;;  %v2123_v35 = vld [vmem:[%s2545_s4 + $0x330] ss:$8 sps:$4 sm:$0xff]   ;;  %v2131_v37 = vld [vmem:[%s2545_s4 + $0x344] ss:$8 sps:$4 sm:$0xff]   ;;  %v2129_v39 = vld [vmem:[%s2545_s4 + $0x340] ss:$8 sps:$4 sm:$0xff]  }
  0x74   : > { %1586 = vmatprep.subr.bf16.mxu1 %v2047_v42  ;;  %1668 = vmatprep.subr.bf16.mxu0 %v2049_v43  ;;  %v2134_v40 = vld [vmem:[%s2545_s4 + $0x154] ss:$8 sps:$4 sm:$0xff]   ;;  %v2132_v42 = vld [vmem:[%s2545_s4 + $0x150] ss:$8 sps:$4 sm:$0xff]   ;;  %s2743_s5 = smov (!%p724_p8, %s1833_s5), 3 }
  0x75   : > { %v2137_v41 = vld [vmem:[%s2545_s4 + $0x354] ss:$8 sps:$4 sm:$0xff]   ;;  %v2135_v43 = vld [vmem:[%s2545_s4 + $0x350] ss:$8 sps:$4 sm:$0xff]   ;;  %s726_s8 = scalar_lea.vmem %s2737_s2, %s2743_s5  ;;  %s731_s11 = scalar_lea.vmem %s2738_s3, %s2743_s5 }
  0x77   : > { %1587 = vmatpush1.bf16.msra.mxu1 %v2051_v44  ;;  %1669 = vmatpush1.bf16.msra.mxu0 %v2052_v45  ;;  %v2140_v44 = vld [vmem:[%s2545_s4 + $0x164] ss:$8 sps:$4 sm:$0xff]  }
  0x78   : > { %1588 = vmatprep.subr.bf16.mxu1 %v2053_v46  ;;  %1670 = vmatprep.subr.bf16.mxu0 %v2055_v47  ;;  %v2143_v45 = vld [vmem:[%s2545_s4 + $0x364] ss:$8 sps:$4 sm:$0xff]   ;;  %v2138_v46 = vld [vmem:[%s2545_s4 + $0x160] ss:$8 sps:$4 sm:$0xff]  }
  0x79   : > { %v2141_v47 = vld [vmem:[%s2545_s4 + $0x360] ss:$8 sps:$4 sm:$0xff]  }
  0x7b   : > { %1589 = vmatpush1.bf16.msra.mxu1 %v2057_v48  ;;  %1671 = vmatpush1.bf16.msra.mxu0 %v2058_v49  ;;  %v2146_v48 = vld [vmem:[%s2545_s4 + $0x174] ss:$8 sps:$4 sm:$0xff]  }
  0x7c   : > { %1590 = vmatprep.subr.bf16.mxu1 %v2059_v50  ;;  %1672 = vmatprep.subr.bf16.mxu0 %v2061_v51  ;;  %v2149_v49 = vld [vmem:[%s2545_s4 + $0x374] ss:$8 sps:$4 sm:$0xff]   ;;  %v2144_v50 = vld [vmem:[%s2545_s4 + $0x170] ss:$8 sps:$4 sm:$0xff]  }
  0x7d   : > { %v2147_v51 = vld [vmem:[%s2545_s4 + $0x370] ss:$8 sps:$4 sm:$0xff]  }
  0x7f   : > { %1591 = vmatpush1.bf16.msra.mxu1 %v2063_v52  ;;  %1673 = vmatpush1.bf16.msra.mxu0 %v2064_v53  ;;  %v2152_v52 = vld [vmem:[%s2545_s4 + $0x184] ss:$8 sps:$4 sm:$0xff]  }
  0x80   : > { %1592 = vmatprep.subr.bf16.mxu1 %v2065_v54  ;;  %1674 = vmatprep.subr.bf16.mxu0 %v2067_v55  ;;  %v2155_v53 = vld [vmem:[%s2545_s4 + $0x384] ss:$8 sps:$4 sm:$0xff]   ;;  %v2150_v54 = vld [vmem:[%s2545_s4 + $0x180] ss:$8 sps:$4 sm:$0xff]  }
  0x81   : > { %v2153_v55 = vld [vmem:[%s2545_s4 + $0x380] ss:$8 sps:$4 sm:$0xff]  }
  0x83   : > { %1593 = vmatpush1.bf16.msra.mxu1 %v2069_v56  ;;  %1675 = vmatpush1.bf16.msra.mxu0 %v2070_v57  ;;  %v2158_v56 = vld [vmem:[%s2545_s4 + $0x194] ss:$8 sps:$4 sm:$0xff]  }
  0x84   : > { %1594 = vmatprep.subr.bf16.mxu1 %v2071_v58  ;;  %1676 = vmatprep.subr.bf16.mxu0 %v2073_v59  ;;  %v2161_v57 = vld [vmem:[%s2545_s4 + $0x394] ss:$8 sps:$4 sm:$0xff]   ;;  %v2156_v58 = vld [vmem:[%s2545_s4 + $0x190] ss:$8 sps:$4 sm:$0xff]  }
  0x85   : > { %v2159_v59 = vld [vmem:[%s2545_s4 + $0x390] ss:$8 sps:$4 sm:$0xff]  }
  0x87   : > { %1595 = vmatpush1.bf16.msra.mxu1 %v2075_v60  ;;  %1677 = vmatpush1.bf16.msra.mxu0 %v2076_v61  ;;  %v2164_v60 = vld [vmem:[%s2545_s4 + $0x1a4] ss:$8 sps:$4 sm:$0xff]  }
  0x88   : > { %1596 = vmatprep.subr.bf16.mxu1 %v2077_v62  ;;  %1678 = vmatprep.subr.bf16.mxu0 %v2079_v63  ;;  %v2167_v61 = vld [vmem:[%s2545_s4 + $0x3a4] ss:$8 sps:$4 sm:$0xff]   ;;  %v2162_v62 = vld [vmem:[%s2545_s4 + $0x1a0] ss:$8 sps:$4 sm:$0xff]  }
  0x89   : > { %v2165_v63 = vld [vmem:[%s2545_s4 + $0x3a0] ss:$8 sps:$4 sm:$0xff]  }
  0x8b   : > { %1597 = vmatpush1.bf16.msra.mxu1 %v2081_v0  ;;  %1679 = vmatpush1.bf16.msra.mxu0 %v2082_v1  ;;  %v2170_v0 = vld [vmem:[%s2545_s4 + $0x1b4] ss:$8 sps:$4 sm:$0xff]  }
  0x8c   : > { %1598 = vmatprep.subr.bf16.mxu1 %v2083_v2  ;;  %1680 = vmatprep.subr.bf16.mxu0 %v2085_v3  ;;  %v2173_v1 = vld [vmem:[%s2545_s4 + $0x3b4] ss:$8 sps:$4 sm:$0xff]   ;;  %v2168_v2 = vld [vmem:[%s2545_s4 + $0x1b0] ss:$8 sps:$4 sm:$0xff]  }
  0x8d   : > { %v2171_v3 = vld [vmem:[%s2545_s4 + $0x3b0] ss:$8 sps:$4 sm:$0xff]  }
  0x8f   : > { %1599 = vmatpush1.bf16.msra.mxu1 %v2087_v5  ;;  %1681 = vmatpush1.bf16.msra.mxu0 %v2088_v6  ;;  %v2176_v5 = vld [vmem:[%s2545_s4 + $0x1c4] ss:$8 sps:$4 sm:$0xff]  }
  0x90   : > { %1600 = vmatprep.subr.bf16.mxu1 %v2089_v7  ;;  %1682 = vmatprep.subr.bf16.mxu0 %v2091_v8  ;;  %v2179_v6 = vld [vmem:[%s2545_s4 + $0x3c4] ss:$8 sps:$4 sm:$0xff]   ;;  %v2174_v7 = vld [vmem:[%s2545_s4 + $0x1c0] ss:$8 sps:$4 sm:$0xff]  }
  0x91   : > { %v2177_v8 = vld [vmem:[%s2545_s4 + $0x3c0] ss:$8 sps:$4 sm:$0xff]  }
  0x93   : > { %1601 = vmatpush1.bf16.msra.mxu1 %v2093_v9  ;;  %1683 = vmatpush1.bf16.msra.mxu0 %v2094_v10  ;;  %v2182_v9 = vld [vmem:[%s2545_s4 + $0x1d4] ss:$8 sps:$4 sm:$0xff]  }
  0x94   : > { %1602 = vmatprep.subr.bf16.mxu1 %v2095_v12  ;;  %1684 = vmatprep.subr.bf16.mxu0 %v2097_v13  ;;  %v2185_v10 = vld [vmem:[%s2545_s4 + $0x3d4] ss:$8 sps:$4 sm:$0xff]   ;;  %v2180_v12 = vld [vmem:[%s2545_s4 + $0x1d0] ss:$8 sps:$4 sm:$0xff]  }
  0x95   : > { %v2183_v13 = vld [vmem:[%s2545_s4 + $0x3d0] ss:$8 sps:$4 sm:$0xff]  }
  0x97   : > { %1603 = vmatpush1.bf16.msra.mxu1 %v2099_v14  ;;  %1685 = vmatpush1.bf16.msra.mxu0 %v2100_v17  ;;  %v2188_v14 = vld [vmem:[%s2545_s4 + $0x1e4] ss:$8 sps:$4 sm:$0xff]  }
  0x98   : > { %1613 = vmatprep.subr.bf16.mxu1 %v2103_v18  ;;  %1695 = vmatprep.subr.bf16.mxu0 %v2107_v19  ;;  %v2191_v17 = vld [vmem:[%s2545_s4 + $0x3e4] ss:$8 sps:$4 sm:$0xff]   ;;  %v2186_v18 = vld [vmem:[%s2545_s4 + $0x1e0] ss:$8 sps:$4 sm:$0xff]  }
  0x99   : > { %v2189_v19 = vld [vmem:[%s2545_s4 + $0x3e0] ss:$8 sps:$4 sm:$0xff]  }
  0x9a   : > { %1605 = vmatmul.mubr.bf16.vlgmr.msra.gmra.mrb[0].mxu1 %v2638_v22  ;;  %1687 = vmatmul.mubr.bf16.vlgmr.msra.gmra.mrb[0].mxu0 %v2642_v23 }
  0x9b   : > { %1614 = vmatpush1.bf16.msra.mxu1 %v2101_v20  ;;  %1696 = vmatpush1.bf16.msra.mxu0 %v2105_v21  ;;  %v2194_v20 = vld [vmem:[%s2545_s4 + $0x1f4] ss:$8 sps:$4 sm:$0xff]  }
  0x9c   : > { %1615 = vmatprep.subr.bf16.mxu1 %v2110_v24  ;;  %1697 = vmatprep.subr.bf16.mxu0 %v2113_v27  ;;  %v2197_v21 = vld [vmem:[%s2545_s4 + $0x3f4] ss:$8 sps:$4 sm:$0xff]   ;;  %v2192_v24 = vld [vmem:[%s2545_s4 + $0x1f0] ss:$8 sps:$4 sm:$0xff]  }
  0x9d   : > { %1645 = vmatprep.mubr.bf16.mxu1 %v922_v28  ;;  %1727 = vmatprep.mubr.bf16.mxu0 %v923_v15  ;;  %v2195_v27 = vld [vmem:[%s2545_s4 + $0x3f0] ss:$8 sps:$4 sm:$0xff]   ;;  %v920_v28 = vcombine.high %v2638_v22, %v2638_v22  ;;  %v921_v15 = vcombine.high %v2642_v23, %v2642_v23  ;;  %v870_v22 = vsub.s32 1, %v2543_v4 }
  0x9f   : > { %1616 = vmatpush1.bf16.msra.mxu1 %v2108_v16  ;;  %1698 = vmatpush1.bf16.msra.mxu0 %v2111_v29  ;;  %v866_v16 = vsub.s32 0, %v2543_v4  ;;  %v862_v29 = vld [vmem:[%s726_s8] sm:$0x3] }
  0xa0   : > { %1617 = vmatprep.subr.bf16.mxu1 %v2116_v30  ;;  %1699 = vmatprep.subr.bf16.mxu0 %v2119_v25  ;;  %v871_v25 = vrot.slane %v862_v29, %v870_v22 }
  0xa1   : > { %v867_v30 = vrot.slane %v862_v29, %v866_v16 }
  0xa3   : > { %1618 = vmatpush1.bf16.msra.mxu1 %v2114_v26  ;;  %1700 = vmatpush1.bf16.msra.mxu0 %v2117_v31 }
  0xa4   : > { %1619 = vmatprep.subr.bf16.mxu1 %v2122_v32  ;;  %1701 = vmatprep.subr.bf16.mxu0 %v2125_v33 }
  0xa7   : > { %1620 = vmatpush1.bf16.msra.mxu1 %v2120_v34  ;;  %1702 = vmatpush1.bf16.msra.mxu0 %v2123_v35 }
  0xa8   : > { %1621 = vmatprep.subr.bf16.mxu1 %v2128_v36  ;;  %1703 = vmatprep.subr.bf16.mxu0 %v2131_v37 }
  0xab   : > { %1622 = vmatpush1.bf16.msra.mxu1 %v2126_v38  ;;  %1704 = vmatpush1.bf16.msra.mxu0 %v2129_v39 }
  0xac   : > { %1623 = vmatprep.subr.bf16.mxu1 %v2134_v40  ;;  %1705 = vmatprep.subr.bf16.mxu0 %v2137_v41 }
  0xaf   : > { %1624 = vmatpush1.bf16.msra.mxu1 %v2132_v42  ;;  %1706 = vmatpush1.bf16.msra.mxu0 %v2135_v43 }
  0xb0   : > { %1625 = vmatprep.subr.bf16.mxu1 %v2140_v44  ;;  %1707 = vmatprep.subr.bf16.mxu0 %v2143_v45 }
  0xb3   : > { %1626 = vmatpush1.bf16.msra.mxu1 %v2138_v46  ;;  %1708 = vmatpush1.bf16.msra.mxu0 %v2141_v47 }
  0xb4   : > { %1627 = vmatprep.subr.bf16.mxu1 %v2146_v48  ;;  %1709 = vmatprep.subr.bf16.mxu0 %v2149_v49 }
  0xb7   : > { %1628 = vmatpush1.bf16.msra.mxu1 %v2144_v50  ;;  %1710 = vmatpush1.bf16.msra.mxu0 %v2147_v51 }
  0xb8   : > { %1629 = vmatprep.subr.bf16.mxu1 %v2152_v52  ;;  %1711 = vmatprep.subr.bf16.mxu0 %v2155_v53 }
  0xbb   : > { %1630 = vmatpush1.bf16.msra.mxu1 %v2150_v54  ;;  %1712 = vmatpush1.bf16.msra.mxu0 %v2153_v55 }
  0xbc   : > { %1631 = vmatprep.subr.bf16.mxu1 %v2158_v56  ;;  %1713 = vmatprep.subr.bf16.mxu0 %v2161_v57 }
  0xbf   : > { %1632 = vmatpush1.bf16.msra.mxu1 %v2156_v58  ;;  %1714 = vmatpush1.bf16.msra.mxu0 %v2159_v59 }
  0xc0   : > { %1633 = vmatprep.subr.bf16.mxu1 %v2164_v60  ;;  %1715 = vmatprep.subr.bf16.mxu0 %v2167_v61 }
  0xc3   : > { %1634 = vmatpush1.bf16.msra.mxu1 %v2162_v62  ;;  %1716 = vmatpush1.bf16.msra.mxu0 %v2165_v63 }
  0xc4   : > { %1635 = vmatprep.subr.bf16.mxu1 %v2170_v0  ;;  %1717 = vmatprep.subr.bf16.mxu0 %v2173_v1 }
  0xc7   : > { %1636 = vmatpush1.bf16.msra.mxu1 %v2168_v2  ;;  %1718 = vmatpush1.bf16.msra.mxu0 %v2171_v3 }
  0xc8   : > { %1637 = vmatprep.subr.bf16.mxu1 %v2176_v5  ;;  %1719 = vmatprep.subr.bf16.mxu0 %v2179_v6 }
  0xcb   : > { %1638 = vmatpush1.bf16.msra.mxu1 %v2174_v7  ;;  %1720 = vmatpush1.bf16.msra.mxu0 %v2177_v8 }
  0xcc   : > { %1639 = vmatprep.subr.bf16.mxu1 %v2182_v9  ;;  %1721 = vmatprep.subr.bf16.mxu0 %v2185_v10 }
  0xcf   : > { %1640 = vmatpush1.bf16.msra.mxu1 %v2180_v12  ;;  %1722 = vmatpush1.bf16.msra.mxu0 %v2183_v13 }
  0xd0   : > { %1641 = vmatprep.subr.bf16.mxu1 %v2188_v14  ;;  %1723 = vmatprep.subr.bf16.mxu0 %v2191_v17 }
  0xd3   : > { %1642 = vmatpush1.bf16.msra.mxu1 %v2186_v18  ;;  %1724 = vmatpush1.bf16.msra.mxu0 %v2189_v19 }
  0xd4   : > { %1643 = vmatprep.subr.bf16.mxu1 %v2194_v20  ;;  %1725 = vmatprep.subr.bf16.mxu0 %v2197_v21 }
  0xd7   : > { %1644 = vmatpush1.bf16.msra.mxu1 %v2192_v24  ;;  %1726 = vmatpush1.bf16.msra.mxu0 %v2195_v27 }
  0xda   : > { %1646 = vmatmul.mubr.bf16.vlgmr.msra.gmra.mrb[0].mxu1 %v920_v28  ;;  %1728 = vmatmul.mubr.bf16.vlgmr.msra.gmra.mrb[0].mxu0 %v921_v15 }
 0x1ad   : > { %v1647_v23 = vpop.f32.mrb[0].mxu1  ;;  %v1729_v26 = vpop.f32.mrb[0].mxu0 }
 0x1ae   : > { %v1968_v31 = vadd.f32 %v1647_v23, %v867_v30  ;;  %v1649_v32 = vpop.f32.mrb[1].mxu1  ;;  %v1731_v33 = vpop.f32.mrb[1].mxu0 }
 0x1af   : > { %v1970_v34 = vadd.f32 %v1649_v32, %v871_v25  ;;  %v1651_v35 = vpop.f32.mrb[2].mxu1  ;;  %v1733_v36 = vpop.f32.mrb[2].mxu0 }
 0x1b0   : > { %v1969_v37 = vadd.f32 %v1968_v31, %v1729_v26  ;;  %v1652_v38 = vpop.f32.mrb[3].mxu1  ;;  %v1734_v39 = vpop.f32.mrb[3].mxu0 }
 0x1b1   : > { %v1971_v40 = vadd.f32 %v1970_v34, %v1731_v33 }
 0x1b2   : > { %v1736_v41 = vmax.f32 %v1969_v37, 0.0 }
 0x1b3   : > { %v1737_v42 = vmax.f32 %v1971_v40, 0.0 }
 0x1b5   : > { %v1963_v43 = vpack.c.bf16 %v1737_v42, %v1736_v41 }
 0x1b7   : > { %v1749_v4 = vrot.slane %v1963_v43, %v2552_v11 }
 0x1b9   : > { %1964 = vst.sshfl [vmem:[%s731_s11] sm:$0x5 pattern:$0x73625140] %v1749_v4 }
 0x1ba PF: > { %p10_p9 = scmp.ge.s32.totalorder %s2260_s16, 4   ;;  %s2739_s12 = smov %s2216_s13 }
 0x1bb   : > { %s2740_s13 = smov %s2269_s19  ;;  %s2741_s14 = smov %s2260_s16 }
 0x1bc   :  { %12 = sbr.rel (!%p10_p9) target bundleno = 2 (0x2), region = 108 }

// kernel: cnn_forward.9
= control target key start
LH: loop header
LB: loop body
LE: loop exit
PB: predicated region body
PF: predicated region fallthrough
CT: control target
= control target key end

     0   :  { %v100_v30 = vlaneseq  ;;  %v541_v34 = vmov 1966171168   ;;  %s677_s0 = inlined_call_operand.vmem [shape: bf16[2,512], index: 0, kind: input, shape index: {}]   ;;  %s678_s1 = inlined_call_operand.vmem [shape: bf16[512,10], index: 1, kind: input, shape index: {}]   ;;  %s679_s2 = inlined_call_operand.vmem [shape: f32[1,10], index: 2, kind: input, shape index: {}]   ;;  %s680_s3 = inlined_call_operand.hbm [shape: f32[2,10], index: 3, kind: output, shape index: {}]  }
   0x1   :  { %v485_v0 = vld [vmem:[%s678_s1 + $0x40] sm:$0xff]   ;;  %v489_v4 = vld [vmem:[%s678_s1 + $0x48] sm:$0xff]   ;;  %v493_v8 = vld [vmem:[%s678_s1 + $0x50] sm:$0xff]   ;;  %v98_v35 = vunpack.c.l.s4 %v541_v34 }
   0x2   :  { %v486_v1 = vld [vmem:[%s678_s1 + $0xc0] sm:$0xff]   ;;  %439 = vmatprep.subr.bf16.mxu0 %v485_v0  ;;  %v490_v5 = vld [vmem:[%s678_s1 + $0xc8] sm:$0xff]   ;;  %v494_v9 = vld [vmem:[%s678_s1 + $0xd0] sm:$0xff]   ;;  %v101_v36 = vshrl.u32 %v100_v30, 7 }
   0x3   :  { %v487_v2 = vld [vmem:[%s678_s1] sm:$0xff]   ;;  %461 = vmatprep.subr.bf16.mxu1 %v486_v1  ;;  %v491_v6 = vld [vmem:[%s678_s1 + $0x8] sm:$0xff]   ;;  %v495_v10 = vld [vmem:[%s678_s1 + $0x10] sm:$0xff]  }
   0x4   :  { %v488_v3 = vld [vmem:[%s678_s1 + $0x80] sm:$0xff]   ;;  %440 = vmatpush3.bf16.msra.mxu0 %v487_v2  ;;  %v492_v7 = vld [vmem:[%s678_s1 + $0x88] sm:$0xff]   ;;  %v496_v11 = vld [vmem:[%s678_s1 + $0x90] sm:$0xff]  }
   0x5   :  { %462 = vmatpush3.bf16.msra.mxu1 %v488_v3  ;;  %441 = vmatprep.subr.bf16.mxu0 %v489_v4  ;;  %v497_v12 = vld [vmem:[%s678_s1 + $0x58] sm:$0xff]   ;;  %v501_v16 = vld [vmem:[%s678_s1 + $0x60] sm:$0xff]   ;;  %v505_v20 = vld [vmem:[%s678_s1 + $0x68] sm:$0xff]  }
   0x6   :  { %463 = vmatprep.subr.bf16.mxu1 %v490_v5  ;;  %v498_v13 = vld [vmem:[%s678_s1 + $0xd8] sm:$0xff]   ;;  %v502_v17 = vld [vmem:[%s678_s1 + $0xe0] sm:$0xff]   ;;  %v506_v21 = vld [vmem:[%s678_s1 + $0xe8] sm:$0xff]  }
   0x7   :  { %v499_v14 = vld [vmem:[%s678_s1 + $0x18] sm:$0xff]   ;;  %v503_v18 = vld [vmem:[%s678_s1 + $0x20] sm:$0xff]   ;;  %v507_v22 = vld [vmem:[%s678_s1 + $0x28] sm:$0xff]  }
   0x8   :  { %442 = vmatpush3.bf16.msra.mxu0 %v491_v6  ;;  %v500_v15 = vld [vmem:[%s678_s1 + $0x98] sm:$0xff]   ;;  %v504_v19 = vld [vmem:[%s678_s1 + $0xa0] sm:$0xff]   ;;  %v508_v23 = vld [vmem:[%s678_s1 + $0xa8] sm:$0xff]  }
   0x9   :  { %464 = vmatpush3.bf16.msra.mxu1 %v492_v7  ;;  %443 = vmatprep.subr.bf16.mxu0 %v493_v8  ;;  %v509_v24 = vld [vmem:[%s678_s1 + $0x70] sm:$0xff]   ;;  %v513_v28 = vld [vmem:[%s678_s1 + $0x78] sm:$0xff]   ;;  %v406_v33 = vld.sshfl [vmem:[%s677_s0] sm:$0x33 pattern:$0x75316420] }
   0xa   :  { %465 = vmatprep.subr.bf16.mxu1 %v494_v9  ;;  %v510_v25 = vld [vmem:[%s678_s1 + $0xf0] sm:$0xff]   ;;  %v514_v29 = vld [vmem:[%s678_s1 + $0xf8] sm:$0xff]  }
   0xb   :  { %v511_v26 = vld [vmem:[%s678_s1 + $0x30] sm:$0xff]   ;;  %v515_v31 = vld [vmem:[%s678_s1 + $0x38] sm:$0xff]  }
   0xc   :  { %444 = vmatpush3.bf16.msra.mxu0 %v495_v10  ;;  %v512_v27 = vld [vmem:[%s678_s1 + $0xb0] sm:$0xff]   ;;  %v516_v32 = vld [vmem:[%s678_s1 + $0xb8] sm:$0xff]  }
   0xd   :  { %466 = vmatpush3.bf16.msra.mxu1 %v496_v11  ;;  %445 = vmatprep.subr.bf16.mxu0 %v497_v12 }
   0xe   :  { %467 = vmatprep.subr.bf16.mxu1 %v498_v13 }
  0x10   :  { %446 = vmatpush3.bf16.msra.mxu0 %v499_v14 }
  0x11   :  { %468 = vmatpush3.bf16.msra.mxu1 %v500_v15  ;;  %447 = vmatprep.subr.bf16.mxu0 %v501_v16 }
  0x12   :  { %469 = vmatprep.subr.bf16.mxu1 %v502_v17 }
  0x14   :  { %448 = vmatpush3.bf16.msra.mxu0 %v503_v18 }
  0x15   :  { %470 = vmatpush3.bf16.msra.mxu1 %v504_v19  ;;  %449 = vmatprep.subr.bf16.mxu0 %v505_v20 }
  0x16   :  { %471 = vmatprep.subr.bf16.mxu1 %v506_v21 }
  0x18   :  { %450 = vmatpush3.bf16.msra.mxu0 %v507_v22 }
  0x19   :  { %472 = vmatpush3.bf16.msra.mxu1 %v508_v23  ;;  %451 = vmatprep.subr.bf16.mxu0 %v509_v24 }
  0x1a   :  { %473 = vmatprep.subr.bf16.mxu1 %v510_v25 }
  0x1c   :  { %452 = vmatpush3.bf16.msra.mxu0 %v511_v26 }
  0x1d   :  { %474 = vmatpush3.bf16.msra.mxu1 %v512_v27  ;;  %453 = vmatprep.subr.bf16.mxu0 %v513_v28 }
  0x1e   :  { %475 = vmatprep.subr.bf16.mxu1 %v514_v29 }
  0x20   :  { %454 = vmatpush3.bf16.msra.mxu0 %v515_v31 }
  0x21   :  { %476 = vmatpush3.bf16.msra.mxu1 %v516_v32 }
  0x22   :  { %8 = vsyncpa [#allocation3], 0  ;;  %v96_v37 = vcombine.high %v406_v33, %v406_v33  ;;  %v99_v38 = vunpack.c.0.s8 %v98_v35  ;;  %v405_v45 = vld [vmem:[%s679_s2] ss:$0 sm:$0xff]  ;;  %s542_s0 = smov [#allocation2]   ;;  %vm389_vm0 = vcmask 74752  }
  0x23   :  { %s397_s25 = sshll.u32 %s542_s0, 4  ;;  %s398_s25 = int_to_ptr.vmem [resolvable:$true] %s397_s25 }
  0x24   :  { %v102_v39 = vsub.s32 %v99_v38, %v101_v36  ;;  %s517_s26 = scalar_lea.vmem %s398_s25, 32  ;;  %p522_p1 = scmp.lt.s32.totalorder %s398_s25, %s398_s25 }
  0x25   :  { %p518_p0 = scmp.ne.s32.totalorder %s398_s25, %s517_s26  ;;  %p523_p2 = scmp.lt.s32.totalorder %s517_s26, %s517_s26 }
  0x26   :  { %v110_v40 = vrot.slane %v96_v37, %v102_v39  ;;  %v103_v41 = vrot.slane %v406_v33, %v102_v39 }
  0x27   :  { %p524_p3 = por %p523_p2, %p522_p1 }
  0x28   :  { %341 = vmatprep.mubr.bf16.mxu0 %v110_v40  ;;  %v112_v42 = vcombine.high %v110_v40, %v110_v40  ;;  %v111_v43 = vcombine.high %v103_v41, %v103_v41 }
  0x29   :  { %342 = vmatmul.mubr.bf16.vlgmr.msra.gmra.mrb[0].mxu0 %v103_v41  ;;  %p525_p4 = pnand %p524_p3, %p518_p0 }
  0x2a   :  { %381 = vmatprep.mubr.bf16.mxu1 %v112_v42 }
  0x2b   :  { %382 = vmatmul.mubr.bf16.vlgmr.msra.gmra.mrb[0].mxu1 %v111_v43 }
  0xfc   :  { %v455_v44 = vpop.f32.mrb[0].mxu0 }
  0xfd   :  { %v456_v46 = vpop.f32.mrb[1].mxu0 }
  0xfe   :  { %v477_v47 = vpop.f32.mrb[0].mxu1  ;;  %v457_v48 = vadd.f32 %v456_v46, %v455_v44  ;;  %v458_v49 = vpop.f32.mrb[2].mxu0 }
  0xff   :  { %v478_v50 = vpop.f32.mrb[1].mxu1  ;;  %v459_v51 = vpop.f32.mrb[3].mxu0 }
 0x100   :  { %v344_v52 = vadd.f32 %v457_v48, %v405_v45  ;;  %v479_v53 = vadd.f32 %v478_v50, %v477_v47  ;;  %v480_v54 = vpop.f32.mrb[2].mxu1 }
 0x101   :  { %v481_v55 = vpop.f32.mrb[3].mxu1 }
 0x102   :  { %v384_v56 = vadd.f32 %v479_v53, %v344_v52 }
 0x104   :  { %390 = vst.msk [vmem:[#allocation2] sm:$0x3] %vm389_vm0, %v384_v56 }
 0x105   :  { %528 = shalt.err (!%p525_p4)
}
 0x106   :  { %s529_s28 = scalar_lea.hbm %s680_s3, 32 }
 0x107   :  { %p530_p5 = scmp.ne.s32.totalorder %s680_s3, %s529_s28  ;;  %p533_p6 = scmp.lt.u32.totalorder %s529_s28, %s680_s3 }
 0x109   :  { %p535_p7 = pnand %p533_p6, %p530_p5 }
 0x10b   :  { %538 = shalt.err (!%p535_p7)
}
 0x10c   :  { %400 = dma.vmem_to_hbm [thread:$0]  %s398_s25, 32, %s680_s3, [#allocation3]  }
 0x10d   :  { %539 = dma.done.wait [#allocation3], 32  }
 0x10e   :  { %540 = vsyncadd [#allocation3], 4294967264 }
 0x10f   :  { %404 = vsyncpa [#allocation3], 1 }

// kernel: cnn_forward.7
= control target key start
LH: loop header
LB: loop body
LE: loop exit
PB: predicated region body
PF: predicated region fallthrough
CT: control target
= control target key end

     0   :  { %s6095_s12 = smov 0   ;;  %s6097_s13 = smov 0   ;;  %s7473_s0 = inlined_call_operand.vmem [shape: bf16[2,3136], index: 0, kind: input, shape index: {}]   ;;  %s7474_s1 = inlined_call_operand.vmem [shape: bf16[3136,1024], index: 1, kind: input, shape index: {}]   ;;  %s7475_s2 = inlined_call_operand.vmem [shape: f32[1,1024], index: 2, kind: input, shape index: {}]   ;;  %s7476_s3 = inlined_call_operand.vmem [shape: bf16[2,1024], index: 3, kind: output, shape index: {}]  }
   0x1   :  { %s6099_s14 = smov 0  }
   0x2 LB: > { %s4972_s15 = sadd.s32 4294967295, %s6071_s14   ;;  %s6112_s16 = sadd.s32 1, %s6071_s14   ;;  %s6071_s14 = sphi %s6099_s14, %s7479_s14   ;;  %s6067_s13 = sphi %s6097_s13, %s7478_s13   ;;  %s6063_s12 = sphi %s6095_s12, %s7477_s12  }
   0x3   : > { %s38_s17 = ssub.s32 %s6071_s14, %s6112_s16  ;;  %s41_s18 = sadd.s32 1, %s6067_s13 }
   0x4   : > { %p39_p0 = scmp.eq.s32.totalorder %s38_s17, 0  ;;  %p48_p1 = scmp.ne.s32.totalorder %s6067_s13, %s6063_s12 }
   0x5   : > { %p49_p2 = scmp.eq.s32.totalorder %s6071_s14, 0  ;;  %p4975_p4 = scmp.ge.s32.totalorder %s6071_s14, 4 }
   0x6   : > { %s6121_s19 = scalar_select %p39_p0, %s6067_s13, %s41_s18  }
   0x7   : > { %p50_p3 = por %p49_p2, %p48_p1  ;;  %129 = sbr.rel (%p4975_p4) target bundleno = 410 (0x19a), region = 20 }
   0xe   : > { %132 = sbr.rel (!%p50_p3) target bundleno = 410 (0x19a), region = 24  ;;  %s134_s20 = sand.u32 (%p50_p3), 1, %s6067_s13  }
   0xf   : > { %s5379_s21 = sshll.u32 (%p50_p3), %s6071_s14, 3  ;;  %s5428_s22 = smul.u32 (%p50_p3), 3136, %s134_s20 }
  0x10   : > { %s6129_s25 = scalar_lea.vmem (%p50_p3), %s7474_s1, %s5379_s21 }
  0x11   : > { %v949_v0 = vld [vmem:[%s6129_s25] sm:$0xff] (%p50_p3)  ;;  %s6137_s26 = scalar_lea.vmem (%p50_p3), [#allocation2], %s5428_s22 }
  0x12   : > { %v951_v1 = vld [vmem:[%s6129_s25 + $0x20] sm:$0xff] (%p50_p3)  ;;  %950 = vst [vmem:[%s6137_s26] sm:$0xff] (%p50_p3), %v949_v0 }
  0x13   : > { %v953_v2 = vld [vmem:[%s6129_s25 + $0x40] sm:$0xff] (%p50_p3)  ;;  %952 = vst [vmem:[%s6137_s26 + $0x8] sm:$0xff] (%p50_p3), %v951_v1 }
  0x14   : > { %v955_v3 = vld [vmem:[%s6129_s25 + $0x60] sm:$0xff] (%p50_p3)  ;;  %954 = vst [vmem:[%s6137_s26 + $0x10] sm:$0xff] (%p50_p3), %v953_v2 }
  0x15   : > { %v957_v4 = vld [vmem:[%s6129_s25 + $0x80] sm:$0xff]  ;;  %956 = vst [vmem:[%s6137_s26 + $0x18] sm:$0xff] %v955_v3 }
  0x16   : > { %v959_v5 = vld [vmem:[%s6129_s25 + $0xa0] sm:$0xff]  ;;  %958 = vst [vmem:[%s6137_s26 + $0x20] sm:$0xff] %v957_v4 }
  0x17   : > { %960 = vst [vmem:[%s6137_s26 + $0x28] sm:$0xff] %v959_v5  ;;  %v961_v6 = vld [vmem:[%s6129_s25 + $0xc0] sm:$0xff] }
  0x18   : > { %v963_v7 = vld [vmem:[%s6129_s25 + $0xe0] sm:$0xff]  ;;  %962 = vst [vmem:[%s6137_s26 + $0x30] sm:$0xff] %v961_v6 }
  0x19   : > { %v965_v8 = vld [vmem:[%s6129_s25 + $0x100] sm:$0xff]  ;;  %964 = vst [vmem:[%s6137_s26 + $0x38] sm:$0xff] %v963_v7 }
  0x1a   : > { %966 = vst [vmem:[%s6137_s26 + $0x40] sm:$0xff] %v965_v8  ;;  %v967_v9 = vld [vmem:[%s6129_s25 + $0x120] sm:$0xff] }
  0x1b   : > { %v969_v10 = vld [vmem:[%s6129_s25 + $0x140] sm:$0xff]  ;;  %968 = vst [vmem:[%s6137_s26 + $0x48] sm:$0xff] %v967_v9 }
  0x1c   : > { %v971_v11 = vld [vmem:[%s6129_s25 + $0x160] sm:$0xff]  ;;  %970 = vst [vmem:[%s6137_s26 + $0x50] sm:$0xff] %v969_v10 }
  0x1d   : > { %972 = vst [vmem:[%s6137_s26 + $0x58] sm:$0xff] %v971_v11  ;;  %v973_v12 = vld [vmem:[%s6129_s25 + $0x180] sm:$0xff] }
  0x1e   : > { %v975_v13 = vld [vmem:[%s6129_s25 + $0x1a0] sm:$0xff]  ;;  %974 = vst [vmem:[%s6137_s26 + $0x60] sm:$0xff] %v973_v12 }
  0x1f   : > { %v977_v14 = vld [vmem:[%s6129_s25 + $0x1c0] sm:$0xff]  ;;  %976 = vst [vmem:[%s6137_s26 + $0x68] sm:$0xff] %v975_v13 }
  0x20   : > { %978 = vst [vmem:[%s6137_s26 + $0x70] sm:$0xff] %v977_v14  ;;  %v979_v15 = vld [vmem:[%s6129_s25 + $0x1e0] sm:$0xff] }
  0x21   : > { %v981_v16 = vld [vmem:[%s6129_s25 + $0x200] sm:$0xff]  ;;  %980 = vst [vmem:[%s6137_s26 + $0x78] sm:$0xff] %v979_v15 }
  0x22   : > { %v983_v17 = vld [vmem:[%s6129_s25 + $0x220] sm:$0xff]  ;;  %982 = vst [vmem:[%s6137_s26 + $0x80] sm:$0xff] %v981_v16 }
  0x23   : > { %984 = vst [vmem:[%s6137_s26 + $0x88] sm:$0xff] %v983_v17  ;;  %v985_v18 = vld [vmem:[%s6129_s25 + $0x240] sm:$0xff] }
  0x24   : > { %v987_v19 = vld [vmem:[%s6129_s25 + $0x260] sm:$0xff]  ;;  %986 = vst [vmem:[%s6137_s26 + $0x90] sm:$0xff] %v985_v18 }
  0x25   : > { %v989_v20 = vld [vmem:[%s6129_s25 + $0x280] sm:$0xff]  ;;  %988 = vst [vmem:[%s6137_s26 + $0x98] sm:$0xff] %v987_v19 }
  0x26   : > { %990 = vst [vmem:[%s6137_s26 + $0xa0] sm:$0xff] %v989_v20  ;;  %v991_v21 = vld [vmem:[%s6129_s25 + $0x2a0] sm:$0xff] }
  0x27   : > { %v993_v22 = vld [vmem:[%s6129_s25 + $0x2c0] sm:$0xff]  ;;  %992 = vst [vmem:[%s6137_s26 + $0xa8] sm:$0xff] %v991_v21 }
  0x28   : > { %v995_v23 = vld [vmem:[%s6129_s25 + $0x2e0] sm:$0xff]  ;;  %994 = vst [vmem:[%s6137_s26 + $0xb0] sm:$0xff] %v993_v22 }
  0x29   : > { %996 = vst [vmem:[%s6137_s26 + $0xb8] sm:$0xff] %v995_v23  ;;  %v997_v24 = vld [vmem:[%s6129_s25 + $0x300] sm:$0xff] }
  0x2a   : > { %v999_v25 = vld [vmem:[%s6129_s25 + $0x320] sm:$0xff]  ;;  %998 = vst [vmem:[%s6137_s26 + $0xc0] sm:$0xff] %v997_v24 }
  0x2b   : > { %v1001_v26 = vld [vmem:[%s6129_s25 + $0x340] sm:$0xff]  ;;  %1000 = vst [vmem:[%s6137_s26 + $0xc8] sm:$0xff] %v999_v25 }
  0x2c   : > { %1002 = vst [vmem:[%s6137_s26 + $0xd0] sm:$0xff] %v1001_v26  ;;  %v1003_v27 = vld [vmem:[%s6129_s25 + $0x360] sm:$0xff] }
  0x2d   : > { %v1005_v28 = vld [vmem:[%s6129_s25 + $0x380] sm:$0xff]  ;;  %1004 = vst [vmem:[%s6137_s26 + $0xd8] sm:$0xff] %v1003_v27 }
  0x2e   : > { %v1007_v29 = vld [vmem:[%s6129_s25 + $0x3a0] sm:$0xff]  ;;  %1006 = vst [vmem:[%s6137_s26 + $0xe0] sm:$0xff] %v1005_v28 }
  0x2f   : > { %1008 = vst [vmem:[%s6137_s26 + $0xe8] sm:$0xff] %v1007_v29  ;;  %v1009_v30 = vld [vmem:[%s6129_s25 + $0x3c0] sm:$0xff] }
  0x30   : > { %v1011_v31 = vld [vmem:[%s6129_s25 + $0x3e0] sm:$0xff]  ;;  %1010 = vst [vmem:[%s6137_s26 + $0xf0] sm:$0xff] %v1009_v30 }
  0x31   : > { %v1013_v32 = vld [vmem:[%s6129_s25 + $0x400] sm:$0xff]  ;;  %1012 = vst [vmem:[%s6137_s26 + $0xf8] sm:$0xff] %v1011_v31 }
  0x32   : > { %1014 = vst [vmem:[%s6137_s26 + $0x100] sm:$0xff] %v1013_v32  ;;  %v1015_v33 = vld [vmem:[%s6129_s25 + $0x420] sm:$0xff] }
  0x33   : > { %v1017_v34 = vld [vmem:[%s6129_s25 + $0x440] sm:$0xff]  ;;  %1016 = vst [vmem:[%s6137_s26 + $0x108] sm:$0xff] %v1015_v33 }
  0x34   : > { %v1019_v35 = vld [vmem:[%s6129_s25 + $0x460] sm:$0xff]  ;;  %1018 = vst [vmem:[%s6137_s26 + $0x110] sm:$0xff] %v1017_v34 }
  0x35   : > { %1020 = vst [vmem:[%s6137_s26 + $0x118] sm:$0xff] %v1019_v35  ;;  %v1021_v36 = vld [vmem:[%s6129_s25 + $0x480] sm:$0xff] }
  0x36   : > { %v1023_v37 = vld [vmem:[%s6129_s25 + $0x4a0] sm:$0xff]  ;;  %1022 = vst [vmem:[%s6137_s26 + $0x120] sm:$0xff] %v1021_v36 }
  0x37   : > { %v1025_v38 = vld [vmem:[%s6129_s25 + $0x4c0] sm:$0xff]  ;;  %1024 = vst [vmem:[%s6137_s26 + $0x128] sm:$0xff] %v1023_v37 }
  0x38   : > { %1026 = vst [vmem:[%s6137_s26 + $0x130] sm:$0xff] %v1025_v38  ;;  %v1027_v39 = vld [vmem:[%s6129_s25 + $0x4e0] sm:$0xff] }
  0x39   : > { %v1029_v40 = vld [vmem:[%s6129_s25 + $0x500] sm:$0xff]  ;;  %1028 = vst [vmem:[%s6137_s26 + $0x138] sm:$0xff] %v1027_v39 }
  0x3a   : > { %v1031_v41 = vld [vmem:[%s6129_s25 + $0x520] sm:$0xff]  ;;  %1030 = vst [vmem:[%s6137_s26 + $0x140] sm:$0xff] %v1029_v40 }
  0x3b   : > { %1032 = vst [vmem:[%s6137_s26 + $0x148] sm:$0xff] %v1031_v41  ;;  %v1033_v42 = vld [vmem:[%s6129_s25 + $0x540] sm:$0xff] }
  0x3c   : > { %v1035_v43 = vld [vmem:[%s6129_s25 + $0x560] sm:$0xff]  ;;  %1034 = vst [vmem:[%s6137_s26 + $0x150] sm:$0xff] %v1033_v42 }
  0x3d   : > { %v1037_v44 = vld [vmem:[%s6129_s25 + $0x580] sm:$0xff]  ;;  %1036 = vst [vmem:[%s6137_s26 + $0x158] sm:$0xff] %v1035_v43 }
  0x3e   : > { %1038 = vst [vmem:[%s6137_s26 + $0x160] sm:$0xff] %v1037_v44  ;;  %v1039_v45 = vld [vmem:[%s6129_s25 + $0x5a0] sm:$0xff] }
  0x3f   : > { %v1041_v46 = vld [vmem:[%s6129_s25 + $0x5c0] sm:$0xff]  ;;  %1040 = vst [vmem:[%s6137_s26 + $0x168] sm:$0xff] %v1039_v45 }
  0x40   : > { %v1043_v47 = vld [vmem:[%s6129_s25 + $0x5e0] sm:$0xff]  ;;  %1042 = vst [vmem:[%s6137_s26 + $0x170] sm:$0xff] %v1041_v46 }
  0x41   : > { %1044 = vst [vmem:[%s6137_s26 + $0x178] sm:$0xff] %v1043_v47  ;;  %v1045_v48 = vld [vmem:[%s6129_s25 + $0x600] sm:$0xff] }
  0x42   : > { %v1047_v49 = vld [vmem:[%s6129_s25 + $0x620] sm:$0xff]  ;;  %1046 = vst [vmem:[%s6137_s26 + $0x180] sm:$0xff] %v1045_v48 }
  0x43   : > { %v1049_v50 = vld [vmem:[%s6129_s25 + $0x640] sm:$0xff]  ;;  %1048 = vst [vmem:[%s6137_s26 + $0x188] sm:$0xff] %v1047_v49 }
  0x44   : > { %1050 = vst [vmem:[%s6137_s26 + $0x190] sm:$0xff] %v1049_v50  ;;  %v1051_v51 = vld [vmem:[%s6129_s25 + $0x660] sm:$0xff] }
  0x45   : > { %v1053_v52 = vld [vmem:[%s6129_s25 + $0x680] sm:$0xff]  ;;  %1052 = vst [vmem:[%s6137_s26 + $0x198] sm:$0xff] %v1051_v51 }
  0x46   : > { %v1055_v53 = vld [vmem:[%s6129_s25 + $0x6a0] sm:$0xff]  ;;  %1054 = vst [vmem:[%s6137_s26 + $0x1a0] sm:$0xff] %v1053_v52 }
  0x47   : > { %1056 = vst [vmem:[%s6137_s26 + $0x1a8] sm:$0xff] %v1055_v53  ;;  %v1057_v54 = vld [vmem:[%s6129_s25 + $0x6c0] sm:$0xff] }
  0x48   : > { %v1059_v55 = vld [vmem:[%s6129_s25 + $0x6e0] sm:$0xff]  ;;  %1058 = vst [vmem:[%s6137_s26 + $0x1b0] sm:$0xff] %v1057_v54 }
  0x49   : > { %v1061_v56 = vld [vmem:[%s6129_s25 + $0x700] sm:$0xff]  ;;  %1060 = vst [vmem:[%s6137_s26 + $0x1b8] sm:$0xff] %v1059_v55 }
  0x4a   : > { %1062 = vst [vmem:[%s6137_s26 + $0x1c0] sm:$0xff] %v1061_v56  ;;  %v1063_v57 = vld [vmem:[%s6129_s25 + $0x720] sm:$0xff] }
  0x4b   : > { %v1065_v58 = vld [vmem:[%s6129_s25 + $0x740] sm:$0xff]  ;;  %1064 = vst [vmem:[%s6137_s26 + $0x1c8] sm:$0xff] %v1063_v57 }
  0x4c   : > { %v1067_v59 = vld [vmem:[%s6129_s25 + $0x760] sm:$0xff]  ;;  %1066 = vst [vmem:[%s6137_s26 + $0x1d0] sm:$0xff] %v1065_v58 }
  0x4d   : > { %1068 = vst [vmem:[%s6137_s26 + $0x1d8] sm:$0xff] %v1067_v59  ;;  %v1069_v60 = vld [vmem:[%s6129_s25 + $0x780] sm:$0xff] }
  0x4e   : > { %v1071_v61 = vld [vmem:[%s6129_s25 + $0x7a0] sm:$0xff]  ;;  %1070 = vst [vmem:[%s6137_s26 + $0x1e0] sm:$0xff] %v1069_v60 }
  0x4f   : > { %v1073_v62 = vld [vmem:[%s6129_s25 + $0x7c0] sm:$0xff]  ;;  %1072 = vst [vmem:[%s6137_s26 + $0x1e8] sm:$0xff] %v1071_v61 }
  0x50   : > { %1074 = vst [vmem:[%s6137_s26 + $0x1f0] sm:$0xff] %v1073_v62  ;;  %v1075_v63 = vld [vmem:[%s6129_s25 + $0x7e0] sm:$0xff] }
  0x51   : > { %v1077_v0 = vld [vmem:[%s6129_s25 + $0x800] sm:$0xff]  ;;  %1076 = vst [vmem:[%s6137_s26 + $0x1f8] sm:$0xff] %v1075_v63 }
  0x52   : > { %v1079_v1 = vld [vmem:[%s6129_s25 + $0x820] sm:$0xff]  ;;  %1078 = vst [vmem:[%s6137_s26 + $0x200] sm:$0xff] %v1077_v0 }
  0x53   : > { %1080 = vst [vmem:[%s6137_s26 + $0x208] sm:$0xff] %v1079_v1  ;;  %v1081_v2 = vld [vmem:[%s6129_s25 + $0x840] sm:$0xff] }
  0x54   : > { %v1083_v3 = vld [vmem:[%s6129_s25 + $0x860] sm:$0xff]  ;;  %1082 = vst [vmem:[%s6137_s26 + $0x210] sm:$0xff] %v1081_v2 }
  0x55   : > { %v1085_v4 = vld [vmem:[%s6129_s25 + $0x880] sm:$0xff]  ;;  %1084 = vst [vmem:[%s6137_s26 + $0x218] sm:$0xff] %v1083_v3 }
  0x56   : > { %1086 = vst [vmem:[%s6137_s26 + $0x220] sm:$0xff] %v1085_v4  ;;  %v1087_v5 = vld [vmem:[%s6129_s25 + $0x8a0] sm:$0xff] }
  0x57   : > { %v1089_v6 = vld [vmem:[%s6129_s25 + $0x8c0] sm:$0xff]  ;;  %1088 = vst [vmem:[%s6137_s26 + $0x228] sm:$0xff] %v1087_v5 }
  0x58   : > { %v1091_v7 = vld [vmem:[%s6129_s25 + $0x8e0] sm:$0xff]  ;;  %1090 = vst [vmem:[%s6137_s26 + $0x230] sm:$0xff] %v1089_v6 }
  0x59   : > { %1092 = vst [vmem:[%s6137_s26 + $0x238] sm:$0xff] %v1091_v7  ;;  %v1093_v8 = vld [vmem:[%s6129_s25 + $0x900] sm:$0xff] }
  0x5a   : > { %v1095_v9 = vld [vmem:[%s6129_s25 + $0x920] sm:$0xff]  ;;  %1094 = vst [vmem:[%s6137_s26 + $0x240] sm:$0xff] %v1093_v8 }
  0x5b   : > { %v1097_v10 = vld [vmem:[%s6129_s25 + $0x940] sm:$0xff]  ;;  %1096 = vst [vmem:[%s6137_s26 + $0x248] sm:$0xff] %v1095_v9 }
  0x5c   : > { %1098 = vst [vmem:[%s6137_s26 + $0x250] sm:$0xff] %v1097_v10  ;;  %v1099_v11 = vld [vmem:[%s6129_s25 + $0x960] sm:$0xff] }
  0x5d   : > { %v1101_v12 = vld [vmem:[%s6129_s25 + $0x980] sm:$0xff]  ;;  %1100 = vst [vmem:[%s6137_s26 + $0x258] sm:$0xff] %v1099_v11 }
  0x5e   : > { %v1103_v13 = vld [vmem:[%s6129_s25 + $0x9a0] sm:$0xff]  ;;  %1102 = vst [vmem:[%s6137_s26 + $0x260] sm:$0xff] %v1101_v12 }
  0x5f   : > { %1104 = vst [vmem:[%s6137_s26 + $0x268] sm:$0xff] %v1103_v13  ;;  %v1105_v14 = vld [vmem:[%s6129_s25 + $0x9c0] sm:$0xff] }
  0x60   : > { %v1107_v15 = vld [vmem:[%s6129_s25 + $0x9e0] sm:$0xff]  ;;  %1106 = vst [vmem:[%s6137_s26 + $0x270] sm:$0xff] %v1105_v14 }
  0x61   : > { %v1109_v16 = vld [vmem:[%s6129_s25 + $0xa00] sm:$0xff]  ;;  %1108 = vst [vmem:[%s6137_s26 + $0x278] sm:$0xff] %v1107_v15 }
  0x62   : > { %1110 = vst [vmem:[%s6137_s26 + $0x280] sm:$0xff] %v1109_v16  ;;  %v1111_v17 = vld [vmem:[%s6129_s25 + $0xa20] sm:$0xff] }
  0x63   : > { %v1113_v18 = vld [vmem:[%s6129_s25 + $0xa40] sm:$0xff]  ;;  %1112 = vst [vmem:[%s6137_s26 + $0x288] sm:$0xff] %v1111_v17 }
  0x64   : > { %v1115_v19 = vld [vmem:[%s6129_s25 + $0xa60] sm:$0xff]  ;;  %1114 = vst [vmem:[%s6137_s26 + $0x290] sm:$0xff] %v1113_v18 }
  0x65   : > { %1116 = vst [vmem:[%s6137_s26 + $0x298] sm:$0xff] %v1115_v19  ;;  %v1117_v20 = vld [vmem:[%s6129_s25 + $0xa80] sm:$0xff] }
  0x66   : > { %v1119_v21 = vld [vmem:[%s6129_s25 + $0xaa0] sm:$0xff]  ;;  %1118 = vst [vmem:[%s6137_s26 + $0x2a0] sm:$0xff] %v1117_v20 }
  0x67   : > { %v1121_v22 = vld [vmem:[%s6129_s25 + $0xac0] sm:$0xff]  ;;  %1120 = vst [vmem:[%s6137_s26 + $0x2a8] sm:$0xff] %v1119_v21 }
  0x68   : > { %1122 = vst [vmem:[%s6137_s26 + $0x2b0] sm:$0xff] %v1121_v22  ;;  %v1123_v23 = vld [vmem:[%s6129_s25 + $0xae0] sm:$0xff] }
  0x69   : > { %v1125_v24 = vld [vmem:[%s6129_s25 + $0xb00] sm:$0xff]  ;;  %1124 = vst [vmem:[%s6137_s26 + $0x2b8] sm:$0xff] %v1123_v23 }
  0x6a   : > { %v1127_v25 = vld [vmem:[%s6129_s25 + $0xb20] sm:$0xff]  ;;  %1126 = vst [vmem:[%s6137_s26 + $0x2c0] sm:$0xff] %v1125_v24 }
  0x6b   : > { %1128 = vst [vmem:[%s6137_s26 + $0x2c8] sm:$0xff] %v1127_v25  ;;  %v1129_v26 = vld [vmem:[%s6129_s25 + $0xb40] sm:$0xff] }
  0x6c   : > { %v1131_v27 = vld [vmem:[%s6129_s25 + $0xb60] sm:$0xff]  ;;  %1130 = vst [vmem:[%s6137_s26 + $0x2d0] sm:$0xff] %v1129_v26 }
  0x6d   : > { %v1133_v28 = vld [vmem:[%s6129_s25 + $0xb80] sm:$0xff]  ;;  %1132 = vst [vmem:[%s6137_s26 + $0x2d8] sm:$0xff] %v1131_v27 }
  0x6e   : > { %1134 = vst [vmem:[%s6137_s26 + $0x2e0] sm:$0xff] %v1133_v28  ;;  %v1135_v29 = vld [vmem:[%s6129_s25 + $0xba0] sm:$0xff] }
  0x6f   : > { %v1137_v30 = vld [vmem:[%s6129_s25 + $0xbc0] sm:$0xff]  ;;  %1136 = vst [vmem:[%s6137_s26 + $0x2e8] sm:$0xff] %v1135_v29 }
  0x70   : > { %v1139_v31 = vld [vmem:[%s6129_s25 + $0xbe0] sm:$0xff]  ;;  %1138 = vst [vmem:[%s6137_s26 + $0x2f0] sm:$0xff] %v1137_v30 }
  0x71   : > { %1140 = vst [vmem:[%s6137_s26 + $0x2f8] sm:$0xff] %v1139_v31  ;;  %v1141_v32 = vld [vmem:[%s6129_s25 + $0xc00] sm:$0xff] }
  0x72   : > { %v1143_v33 = vld [vmem:[%s6129_s25 + $0xc20] sm:$0xff]  ;;  %1142 = vst [vmem:[%s6137_s26 + $0x300] sm:$0xff] %v1141_v32 }
  0x73   : > { %v1145_v34 = vld [vmem:[%s6129_s25 + $0xc40] sm:$0xff]  ;;  %1144 = vst [vmem:[%s6137_s26 + $0x308] sm:$0xff] %v1143_v33 }
  0x74   : > { %1146 = vst [vmem:[%s6137_s26 + $0x310] sm:$0xff] %v1145_v34  ;;  %v1147_v35 = vld [vmem:[%s6129_s25 + $0xc60] sm:$0xff] }
  0x75   : > { %v1149_v36 = vld [vmem:[%s6129_s25 + $0xc80] sm:$0xff]  ;;  %1148 = vst [vmem:[%s6137_s26 + $0x318] sm:$0xff] %v1147_v35 }
  0x76   : > { %v1151_v37 = vld [vmem:[%s6129_s25 + $0xca0] sm:$0xff]  ;;  %1150 = vst [vmem:[%s6137_s26 + $0x320] sm:$0xff] %v1149_v36 }
  0x77   : > { %1152 = vst [vmem:[%s6137_s26 + $0x328] sm:$0xff] %v1151_v37  ;;  %v1153_v38 = vld [vmem:[%s6129_s25 + $0xcc0] sm:$0xff] }
  0x78   : > { %v1155_v39 = vld [vmem:[%s6129_s25 + $0xce0] sm:$0xff]  ;;  %1154 = vst [vmem:[%s6137_s26 + $0x330] sm:$0xff] %v1153_v38 }
  0x79   : > { %v1157_v40 = vld [vmem:[%s6129_s25 + $0xd00] sm:$0xff]  ;;  %1156 = vst [vmem:[%s6137_s26 + $0x338] sm:$0xff] %v1155_v39 }
  0x7a   : > { %1158 = vst [vmem:[%s6137_s26 + $0x340] sm:$0xff] %v1157_v40  ;;  %v1159_v41 = vld [vmem:[%s6129_s25 + $0xd20] sm:$0xff] }
  0x7b   : > { %v1161_v42 = vld [vmem:[%s6129_s25 + $0xd40] sm:$0xff]  ;;  %1160 = vst [vmem:[%s6137_s26 + $0x348] sm:$0xff] %v1159_v41 }
  0x7c   : > { %v1163_v43 = vld [vmem:[%s6129_s25 + $0xd60] sm:$0xff]  ;;  %1162 = vst [vmem:[%s6137_s26 + $0x350] sm:$0xff] %v1161_v42 }
  0x7d   : > { %1164 = vst [vmem:[%s6137_s26 + $0x358] sm:$0xff] %v1163_v43  ;;  %v1165_v44 = vld [vmem:[%s6129_s25 + $0xd80] sm:$0xff] }
  0x7e   : > { %v1167_v45 = vld [vmem:[%s6129_s25 + $0xda0] sm:$0xff]  ;;  %1166 = vst [vmem:[%s6137_s26 + $0x360] sm:$0xff] %v1165_v44 }
  0x7f   : > { %v1169_v46 = vld [vmem:[%s6129_s25 + $0xdc0] sm:$0xff]  ;;  %1168 = vst [vmem:[%s6137_s26 + $0x368] sm:$0xff] %v1167_v45 }
  0x80   : > { %1170 = vst [vmem:[%s6137_s26 + $0x370] sm:$0xff] %v1169_v46  ;;  %v1171_v47 = vld [vmem:[%s6129_s25 + $0xde0] sm:$0xff] }
  0x81   : > { %v1173_v48 = vld [vmem:[%s6129_s25 + $0xe00] sm:$0xff]  ;;  %1172 = vst [vmem:[%s6137_s26 + $0x378] sm:$0xff] %v1171_v47 }
  0x82   : > { %v1175_v49 = vld [vmem:[%s6129_s25 + $0xe20] sm:$0xff]  ;;  %1174 = vst [vmem:[%s6137_s26 + $0x380] sm:$0xff] %v1173_v48 }
  0x83   : > { %1176 = vst [vmem:[%s6137_s26 + $0x388] sm:$0xff] %v1175_v49  ;;  %v1177_v50 = vld [vmem:[%s6129_s25 + $0xe40] sm:$0xff] }
  0x84   : > { %v1179_v51 = vld [vmem:[%s6129_s25 + $0xe60] sm:$0xff]  ;;  %1178 = vst [vmem:[%s6137_s26 + $0x390] sm:$0xff] %v1177_v50 }
  0x85   : > { %v1181_v52 = vld [vmem:[%s6129_s25 + $0xe80] sm:$0xff]  ;;  %1180 = vst [vmem:[%s6137_s26 + $0x398] sm:$0xff] %v1179_v51 }
  0x86   : > { %1182 = vst [vmem:[%s6137_s26 + $0x3a0] sm:$0xff] %v1181_v52  ;;  %v1183_v53 = vld [vmem:[%s6129_s25 + $0xea0] sm:$0xff] }
  0x87   : > { %v1185_v54 = vld [vmem:[%s6129_s25 + $0xec0] sm:$0xff]  ;;  %1184 = vst [vmem:[%s6137_s26 + $0x3a8] sm:$0xff] %v1183_v53 }
  0x88   : > { %v1187_v55 = vld [vmem:[%s6129_s25 + $0xee0] sm:$0xff]  ;;  %1186 = vst [vmem:[%s6137_s26 + $0x3b0] sm:$0xff] %v1185_v54 }
  0x89   : > { %1188 = vst [vmem:[%s6137_s26 + $0x3b8] sm:$0xff] %v1187_v55  ;;  %v1189_v56 = vld [vmem:[%s6129_s25 + $0xf00] sm:$0xff] }
  0x8a   : > { %v1191_v57 = vld [vmem:[%s6129_s25 + $0xf20] sm:$0xff]  ;;  %1190 = vst [vmem:[%s6137_s26 + $0x3c0] sm:$0xff] %v1189_v56 }
  0x8b   : > { %v1193_v58 = vld [vmem:[%s6129_s25 + $0xf40] sm:$0xff]  ;;  %1192 = vst [vmem:[%s6137_s26 + $0x3c8] sm:$0xff] %v1191_v57 }
  0x8c   : > { %1194 = vst [vmem:[%s6137_s26 + $0x3d0] sm:$0xff] %v1193_v58  ;;  %v1195_v59 = vld [vmem:[%s6129_s25 + $0xf60] sm:$0xff] }
  0x8d   : > { %v1197_v60 = vld [vmem:[%s6129_s25 + $0xf80] sm:$0xff]  ;;  %1196 = vst [vmem:[%s6137_s26 + $0x3d8] sm:$0xff] %v1195_v59 }
  0x8e   : > { %v1199_v61 = vld [vmem:[%s6129_s25 + $0xfa0] sm:$0xff]  ;;  %1198 = vst [vmem:[%s6137_s26 + $0x3e0] sm:$0xff] %v1197_v60 }
  0x8f   : > { %1200 = vst [vmem:[%s6137_s26 + $0x3e8] sm:$0xff] %v1199_v61  ;;  %v1201_v62 = vld [vmem:[%s6129_s25 + $0xfc0] sm:$0xff] }
  0x90   : > { %v1203_v63 = vld [vmem:[%s6129_s25 + $0xfe0] sm:$0xff]  ;;  %1202 = vst [vmem:[%s6137_s26 + $0x3f0] sm:$0xff] %v1201_v62 }
  0x91   : > { %v1205_v0 = vld [vmem:[%s6129_s25 + $0x1000] sm:$0xff]  ;;  %1204 = vst [vmem:[%s6137_s26 + $0x3f8] sm:$0xff] %v1203_v63 }
  0x92   : > { %1206 = vst [vmem:[%s6137_s26 + $0x400] sm:$0xff] %v1205_v0  ;;  %v1207_v1 = vld [vmem:[%s6129_s25 + $0x1020] sm:$0xff] }
  0x93   : > { %v1209_v2 = vld [vmem:[%s6129_s25 + $0x1040] sm:$0xff]  ;;  %1208 = vst [vmem:[%s6137_s26 + $0x408] sm:$0xff] %v1207_v1 }
  0x94   : > { %v1211_v3 = vld [vmem:[%s6129_s25 + $0x1060] sm:$0xff]  ;;  %1210 = vst [vmem:[%s6137_s26 + $0x410] sm:$0xff] %v1209_v2 }
  0x95   : > { %1212 = vst [vmem:[%s6137_s26 + $0x418] sm:$0xff] %v1211_v3  ;;  %v1213_v4 = vld [vmem:[%s6129_s25 + $0x1080] sm:$0xff] }
  0x96   : > { %v1215_v5 = vld [vmem:[%s6129_s25 + $0x10a0] sm:$0xff]  ;;  %1214 = vst [vmem:[%s6137_s26 + $0x420] sm:$0xff] %v1213_v4 }
  0x97   : > { %v1217_v6 = vld [vmem:[%s6129_s25 + $0x10c0] sm:$0xff]  ;;  %1216 = vst [vmem:[%s6137_s26 + $0x428] sm:$0xff] %v1215_v5 }
  0x98   : > { %1218 = vst [vmem:[%s6137_s26 + $0x430] sm:$0xff] %v1217_v6  ;;  %v1219_v7 = vld [vmem:[%s6129_s25 + $0x10e0] sm:$0xff] }
  0x99   : > { %v1221_v8 = vld [vmem:[%s6129_s25 + $0x1100] sm:$0xff]  ;;  %1220 = vst [vmem:[%s6137_s26 + $0x438] sm:$0xff] %v1219_v7 }
  0x9a   : > { %v1223_v9 = vld [vmem:[%s6129_s25 + $0x1120] sm:$0xff]  ;;  %1222 = vst [vmem:[%s6137_s26 + $0x440] sm:$0xff] %v1221_v8 }
  0x9b   : > { %1224 = vst [vmem:[%s6137_s26 + $0x448] sm:$0xff] %v1223_v9  ;;  %v1225_v10 = vld [vmem:[%s6129_s25 + $0x1140] sm:$0xff] }
  0x9c   : > { %v1227_v11 = vld [vmem:[%s6129_s25 + $0x1160] sm:$0xff]  ;;  %1226 = vst [vmem:[%s6137_s26 + $0x450] sm:$0xff] %v1225_v10 }
  0x9d   : > { %v1229_v12 = vld [vmem:[%s6129_s25 + $0x1180] sm:$0xff]  ;;  %1228 = vst [vmem:[%s6137_s26 + $0x458] sm:$0xff] %v1227_v11 }
  0x9e   : > { %1230 = vst [vmem:[%s6137_s26 + $0x460] sm:$0xff] %v1229_v12  ;;  %v1231_v13 = vld [vmem:[%s6129_s25 + $0x11a0] sm:$0xff] }
  0x9f   : > { %v1233_v14 = vld [vmem:[%s6129_s25 + $0x11c0] sm:$0xff]  ;;  %1232 = vst [vmem:[%s6137_s26 + $0x468] sm:$0xff] %v1231_v13 }
  0xa0   : > { %v1235_v15 = vld [vmem:[%s6129_s25 + $0x11e0] sm:$0xff]  ;;  %1234 = vst [vmem:[%s6137_s26 + $0x470] sm:$0xff] %v1233_v14 }
  0xa1   : > { %1236 = vst [vmem:[%s6137_s26 + $0x478] sm:$0xff] %v1235_v15  ;;  %v1237_v16 = vld [vmem:[%s6129_s25 + $0x1200] sm:$0xff] }
  0xa2   : > { %v1239_v17 = vld [vmem:[%s6129_s25 + $0x1220] sm:$0xff]  ;;  %1238 = vst [vmem:[%s6137_s26 + $0x480] sm:$0xff] %v1237_v16 }
  0xa3   : > { %v1241_v18 = vld [vmem:[%s6129_s25 + $0x1240] sm:$0xff]  ;;  %1240 = vst [vmem:[%s6137_s26 + $0x488] sm:$0xff] %v1239_v17 }
  0xa4   : > { %1242 = vst [vmem:[%s6137_s26 + $0x490] sm:$0xff] %v1241_v18  ;;  %v1243_v19 = vld [vmem:[%s6129_s25 + $0x1260] sm:$0xff] }
  0xa5   : > { %v1245_v20 = vld [vmem:[%s6129_s25 + $0x1280] sm:$0xff]  ;;  %1244 = vst [vmem:[%s6137_s26 + $0x498] sm:$0xff] %v1243_v19 }
  0xa6   : > { %v1247_v21 = vld [vmem:[%s6129_s25 + $0x12a0] sm:$0xff]  ;;  %1246 = vst [vmem:[%s6137_s26 + $0x4a0] sm:$0xff] %v1245_v20 }
  0xa7   : > { %1248 = vst [vmem:[%s6137_s26 + $0x4a8] sm:$0xff] %v1247_v21  ;;  %v1249_v22 = vld [vmem:[%s6129_s25 + $0x12c0] sm:$0xff] }
  0xa8   : > { %v1251_v23 = vld [vmem:[%s6129_s25 + $0x12e0] sm:$0xff]  ;;  %1250 = vst [vmem:[%s6137_s26 + $0x4b0] sm:$0xff] %v1249_v22 }
  0xa9   : > { %v1253_v24 = vld [vmem:[%s6129_s25 + $0x1300] sm:$0xff]  ;;  %1252 = vst [vmem:[%s6137_s26 + $0x4b8] sm:$0xff] %v1251_v23 }
  0xaa   : > { %1254 = vst [vmem:[%s6137_s26 + $0x4c0] sm:$0xff] %v1253_v24  ;;  %v1255_v25 = vld [vmem:[%s6129_s25 + $0x1320] sm:$0xff] }
  0xab   : > { %v1257_v26 = vld [vmem:[%s6129_s25 + $0x1340] sm:$0xff]  ;;  %1256 = vst [vmem:[%s6137_s26 + $0x4c8] sm:$0xff] %v1255_v25 }
  0xac   : > { %v1259_v27 = vld [vmem:[%s6129_s25 + $0x1360] sm:$0xff]  ;;  %1258 = vst [vmem:[%s6137_s26 + $0x4d0] sm:$0xff] %v1257_v26 }
  0xad   : > { %1260 = vst [vmem:[%s6137_s26 + $0x4d8] sm:$0xff] %v1259_v27  ;;  %v1261_v28 = vld [vmem:[%s6129_s25 + $0x1380] sm:$0xff] }
  0xae   : > { %v1263_v29 = vld [vmem:[%s6129_s25 + $0x13a0] sm:$0xff]  ;;  %1262 = vst [vmem:[%s6137_s26 + $0x4e0] sm:$0xff] %v1261_v28 }
  0xaf   : > { %v1265_v30 = vld [vmem:[%s6129_s25 + $0x13c0] sm:$0xff]  ;;  %1264 = vst [vmem:[%s6137_s26 + $0x4e8] sm:$0xff] %v1263_v29 }
  0xb0   : > { %1266 = vst [vmem:[%s6137_s26 + $0x4f0] sm:$0xff] %v1265_v30  ;;  %v1267_v31 = vld [vmem:[%s6129_s25 + $0x13e0] sm:$0xff] }
  0xb1   : > { %v1269_v32 = vld [vmem:[%s6129_s25 + $0x1400] sm:$0xff]  ;;  %1268 = vst [vmem:[%s6137_s26 + $0x4f8] sm:$0xff] %v1267_v31 }
  0xb2   : > { %v1271_v33 = vld [vmem:[%s6129_s25 + $0x1420] sm:$0xff]  ;;  %1270 = vst [vmem:[%s6137_s26 + $0x500] sm:$0xff] %v1269_v32 }
  0xb3   : > { %1272 = vst [vmem:[%s6137_s26 + $0x508] sm:$0xff] %v1271_v33  ;;  %v1273_v34 = vld [vmem:[%s6129_s25 + $0x1440] sm:$0xff] }
  0xb4   : > { %v1275_v35 = vld [vmem:[%s6129_s25 + $0x1460] sm:$0xff]  ;;  %1274 = vst [vmem:[%s6137_s26 + $0x510] sm:$0xff] %v1273_v34 }
  0xb5   : > { %v1277_v36 = vld [vmem:[%s6129_s25 + $0x1480] sm:$0xff]  ;;  %1276 = vst [vmem:[%s6137_s26 + $0x518] sm:$0xff] %v1275_v35 }
  0xb6   : > { %1278 = vst [vmem:[%s6137_s26 + $0x520] sm:$0xff] %v1277_v36  ;;  %v1279_v37 = vld [vmem:[%s6129_s25 + $0x14a0] sm:$0xff] }
  0xb7   : > { %v1281_v38 = vld [vmem:[%s6129_s25 + $0x14c0] sm:$0xff]  ;;  %1280 = vst [vmem:[%s6137_s26 + $0x528] sm:$0xff] %v1279_v37 }
  0xb8   : > { %v1283_v39 = vld [vmem:[%s6129_s25 + $0x14e0] sm:$0xff]  ;;  %1282 = vst [vmem:[%s6137_s26 + $0x530] sm:$0xff] %v1281_v38 }
  0xb9   : > { %1284 = vst [vmem:[%s6137_s26 + $0x538] sm:$0xff] %v1283_v39  ;;  %v1285_v40 = vld [vmem:[%s6129_s25 + $0x1500] sm:$0xff] }
  0xba   : > { %v1287_v41 = vld [vmem:[%s6129_s25 + $0x1520] sm:$0xff]  ;;  %1286 = vst [vmem:[%s6137_s26 + $0x540] sm:$0xff] %v1285_v40 }
  0xbb   : > { %v1289_v42 = vld [vmem:[%s6129_s25 + $0x1540] sm:$0xff]  ;;  %1288 = vst [vmem:[%s6137_s26 + $0x548] sm:$0xff] %v1287_v41 }
  0xbc   : > { %1290 = vst [vmem:[%s6137_s26 + $0x550] sm:$0xff] %v1289_v42  ;;  %v1291_v43 = vld [vmem:[%s6129_s25 + $0x1560] sm:$0xff] }
  0xbd   : > { %v1293_v44 = vld [vmem:[%s6129_s25 + $0x1580] sm:$0xff]  ;;  %1292 = vst [vmem:[%s6137_s26 + $0x558] sm:$0xff] %v1291_v43 }
  0xbe   : > { %v1295_v45 = vld [vmem:[%s6129_s25 + $0x15a0] sm:$0xff]  ;;  %1294 = vst [vmem:[%s6137_s26 + $0x560] sm:$0xff] %v1293_v44 }
  0xbf   : > { %1296 = vst [vmem:[%s6137_s26 + $0x568] sm:$0xff] %v1295_v45  ;;  %v1297_v46 = vld [vmem:[%s6129_s25 + $0x15c0] sm:$0xff] }
  0xc0   : > { %v1299_v47 = vld [vmem:[%s6129_s25 + $0x15e0] sm:$0xff]  ;;  %1298 = vst [vmem:[%s6137_s26 + $0x570] sm:$0xff] %v1297_v46 }
  0xc1   : > { %v1301_v48 = vld [vmem:[%s6129_s25 + $0x1600] sm:$0xff]  ;;  %1300 = vst [vmem:[%s6137_s26 + $0x578] sm:$0xff] %v1299_v47 }
  0xc2   : > { %1302 = vst [vmem:[%s6137_s26 + $0x580] sm:$0xff] %v1301_v48  ;;  %v1303_v49 = vld [vmem:[%s6129_s25 + $0x1620] sm:$0xff] }
  0xc3   : > { %v1305_v50 = vld [vmem:[%s6129_s25 + $0x1640] sm:$0xff]  ;;  %1304 = vst [vmem:[%s6137_s26 + $0x588] sm:$0xff] %v1303_v49 }
  0xc4   : > { %v1307_v51 = vld [vmem:[%s6129_s25 + $0x1660] sm:$0xff]  ;;  %1306 = vst [vmem:[%s6137_s26 + $0x590] sm:$0xff] %v1305_v50 }
  0xc5   : > { %1308 = vst [vmem:[%s6137_s26 + $0x598] sm:$0xff] %v1307_v51  ;;  %v1309_v52 = vld [vmem:[%s6129_s25 + $0x1680] sm:$0xff] }
  0xc6   : > { %v1311_v53 = vld [vmem:[%s6129_s25 + $0x16a0] sm:$0xff]  ;;  %1310 = vst [vmem:[%s6137_s26 + $0x5a0] sm:$0xff] %v1309_v52 }
  0xc7   : > { %v1313_v54 = vld [vmem:[%s6129_s25 + $0x16c0] sm:$0xff]  ;;  %1312 = vst [vmem:[%s6137_s26 + $0x5a8] sm:$0xff] %v1311_v53 }
  0xc8   : > { %1314 = vst [vmem:[%s6137_s26 + $0x5b0] sm:$0xff] %v1313_v54  ;;  %v1315_v55 = vld [vmem:[%s6129_s25 + $0x16e0] sm:$0xff] }
  0xc9   : > { %v1317_v56 = vld [vmem:[%s6129_s25 + $0x1700] sm:$0xff]  ;;  %1316 = vst [vmem:[%s6137_s26 + $0x5b8] sm:$0xff] %v1315_v55 }
  0xca   : > { %v1319_v57 = vld [vmem:[%s6129_s25 + $0x1720] sm:$0xff]  ;;  %1318 = vst [vmem:[%s6137_s26 + $0x5c0] sm:$0xff] %v1317_v56 }
  0xcb   : > { %1320 = vst [vmem:[%s6137_s26 + $0x5c8] sm:$0xff] %v1319_v57  ;;  %v1321_v58 = vld [vmem:[%s6129_s25 + $0x1740] sm:$0xff] }
  0xcc   : > { %v1323_v59 = vld [vmem:[%s6129_s25 + $0x1760] sm:$0xff]  ;;  %1322 = vst [vmem:[%s6137_s26 + $0x5d0] sm:$0xff] %v1321_v58 }
  0xcd   : > { %v1325_v60 = vld [vmem:[%s6129_s25 + $0x1780] sm:$0xff]  ;;  %1324 = vst [vmem:[%s6137_s26 + $0x5d8] sm:$0xff] %v1323_v59 }
  0xce   : > { %1326 = vst [vmem:[%s6137_s26 + $0x5e0] sm:$0xff] %v1325_v60  ;;  %v1327_v61 = vld [vmem:[%s6129_s25 + $0x17a0] sm:$0xff] }
  0xcf   : > { %v1329_v62 = vld [vmem:[%s6129_s25 + $0x17c0] sm:$0xff]  ;;  %1328 = vst [vmem:[%s6137_s26 + $0x5e8] sm:$0xff] %v1327_v61 }
  0xd0   : > { %v1331_v63 = vld [vmem:[%s6129_s25 + $0x17e0] sm:$0xff]  ;;  %1330 = vst [vmem:[%s6137_s26 + $0x5f0] sm:$0xff] %v1329_v62 }
  0xd1   : > { %1332 = vst [vmem:[%s6137_s26 + $0x5f8] sm:$0xff] %v1331_v63  ;;  %v1333_v0 = vld [vmem:[%s6129_s25 + $0x1800] sm:$0xff] }
  0xd2   : > { %v1335_v1 = vld [vmem:[%s6129_s25 + $0x1820] sm:$0xff]  ;;  %1334 = vst [vmem:[%s6137_s26 + $0x600] sm:$0xff] %v1333_v0 }
  0xd3   : > { %v1337_v2 = vld [vmem:[%s6129_s25 + $0x1840] sm:$0xff]  ;;  %1336 = vst [vmem:[%s6137_s26 + $0x608] sm:$0xff] %v1335_v1 }
  0xd4   : > { %1338 = vst [vmem:[%s6137_s26 + $0x610] sm:$0xff] %v1337_v2  ;;  %v1339_v3 = vld [vmem:[%s6129_s25 + $0x1860] sm:$0xff] }
  0xd5   : > { %v1341_v4 = vld [vmem:[%s6129_s25 + $0x1880] sm:$0xff]  ;;  %1340 = vst [vmem:[%s6137_s26 + $0x618] sm:$0xff] %v1339_v3 }
  0xd6   : > { %v1343_v5 = vld [vmem:[%s6129_s25 + $0x18a0] sm:$0xff]  ;;  %1342 = vst [vmem:[%s6137_s26 + $0x620] sm:$0xff] %v1341_v4 }
  0xd7   : > { %1344 = vst [vmem:[%s6137_s26 + $0x628] sm:$0xff] %v1343_v5  ;;  %v1345_v6 = vld [vmem:[%s6129_s25 + $0x18c0] sm:$0xff] }
  0xd8   : > { %v1347_v7 = vld [vmem:[%s6129_s25 + $0x18e0] sm:$0xff]  ;;  %1346 = vst [vmem:[%s6137_s26 + $0x630] sm:$0xff] %v1345_v6 }
  0xd9   : > { %v1349_v8 = vld [vmem:[%s6129_s25 + $0x1900] sm:$0xff]  ;;  %1348 = vst [vmem:[%s6137_s26 + $0x638] sm:$0xff] %v1347_v7 }
  0xda   : > { %1350 = vst [vmem:[%s6137_s26 + $0x640] sm:$0xff] %v1349_v8  ;;  %v1351_v9 = vld [vmem:[%s6129_s25 + $0x1920] sm:$0xff] }
  0xdb   : > { %v1353_v10 = vld [vmem:[%s6129_s25 + $0x1940] sm:$0xff]  ;;  %1352 = vst [vmem:[%s6137_s26 + $0x648] sm:$0xff] %v1351_v9 }
  0xdc   : > { %v1355_v11 = vld [vmem:[%s6129_s25 + $0x1960] sm:$0xff]  ;;  %1354 = vst [vmem:[%s6137_s26 + $0x650] sm:$0xff] %v1353_v10 }
  0xdd   : > { %1356 = vst [vmem:[%s6137_s26 + $0x658] sm:$0xff] %v1355_v11  ;;  %v1357_v12 = vld [vmem:[%s6129_s25 + $0x1980] sm:$0xff] }
  0xde   : > { %v1359_v13 = vld [vmem:[%s6129_s25 + $0x19a0] sm:$0xff]  ;;  %1358 = vst [vmem:[%s6137_s26 + $0x660] sm:$0xff] %v1357_v12 }
  0xdf   : > { %v1361_v14 = vld [vmem:[%s6129_s25 + $0x19c0] sm:$0xff]  ;;  %1360 = vst [vmem:[%s6137_s26 + $0x668] sm:$0xff] %v1359_v13 }
  0xe0   : > { %1362 = vst [vmem:[%s6137_s26 + $0x670] sm:$0xff] %v1361_v14  ;;  %v1363_v15 = vld [vmem:[%s6129_s25 + $0x19e0] sm:$0xff] }
  0xe1   : > { %v1365_v16 = vld [vmem:[%s6129_s25 + $0x1a00] sm:$0xff]  ;;  %1364 = vst [vmem:[%s6137_s26 + $0x678] sm:$0xff] %v1363_v15 }
  0xe2   : > { %v1367_v17 = vld [vmem:[%s6129_s25 + $0x1a20] sm:$0xff]  ;;  %1366 = vst [vmem:[%s6137_s26 + $0x680] sm:$0xff] %v1365_v16 }
  0xe3   : > { %1368 = vst [vmem:[%s6137_s26 + $0x688] sm:$0xff] %v1367_v17  ;;  %v1369_v18 = vld [vmem:[%s6129_s25 + $0x1a40] sm:$0xff] }
  0xe4   : > { %v1371_v19 = vld [vmem:[%s6129_s25 + $0x1a60] sm:$0xff]  ;;  %1370 = vst [vmem:[%s6137_s26 + $0x690] sm:$0xff] %v1369_v18 }
  0xe5   : > { %v1373_v20 = vld [vmem:[%s6129_s25 + $0x1a80] sm:$0xff]  ;;  %1372 = vst [vmem:[%s6137_s26 + $0x698] sm:$0xff] %v1371_v19 }
  0xe6   : > { %1374 = vst [vmem:[%s6137_s26 + $0x6a0] sm:$0xff] %v1373_v20  ;;  %v1375_v21 = vld [vmem:[%s6129_s25 + $0x1aa0] sm:$0xff] }
  0xe7   : > { %v1377_v22 = vld [vmem:[%s6129_s25 + $0x1ac0] sm:$0xff]  ;;  %1376 = vst [vmem:[%s6137_s26 + $0x6a8] sm:$0xff] %v1375_v21 }
  0xe8   : > { %v1379_v23 = vld [vmem:[%s6129_s25 + $0x1ae0] sm:$0xff]  ;;  %1378 = vst [vmem:[%s6137_s26 + $0x6b0] sm:$0xff] %v1377_v22 }
  0xe9   : > { %1380 = vst [vmem:[%s6137_s26 + $0x6b8] sm:$0xff] %v1379_v23  ;;  %v1381_v24 = vld [vmem:[%s6129_s25 + $0x1b00] sm:$0xff] }
  0xea   : > { %v1383_v25 = vld [vmem:[%s6129_s25 + $0x1b20] sm:$0xff]  ;;  %1382 = vst [vmem:[%s6137_s26 + $0x6c0] sm:$0xff] %v1381_v24 }
  0xeb   : > { %v1385_v26 = vld [vmem:[%s6129_s25 + $0x1b40] sm:$0xff]  ;;  %1384 = vst [vmem:[%s6137_s26 + $0x6c8] sm:$0xff] %v1383_v25 }
  0xec   : > { %1386 = vst [vmem:[%s6137_s26 + $0x6d0] sm:$0xff] %v1385_v26  ;;  %v1387_v27 = vld [vmem:[%s6129_s25 + $0x1b60] sm:$0xff] }
  0xed   : > { %v1389_v28 = vld [vmem:[%s6129_s25 + $0x1b80] sm:$0xff]  ;;  %1388 = vst [vmem:[%s6137_s26 + $0x6d8] sm:$0xff] %v1387_v27 }
  0xee   : > { %v1391_v29 = vld [vmem:[%s6129_s25 + $0x1ba0] sm:$0xff]  ;;  %1390 = vst [vmem:[%s6137_s26 + $0x6e0] sm:$0xff] %v1389_v28 }
  0xef   : > { %1392 = vst [vmem:[%s6137_s26 + $0x6e8] sm:$0xff] %v1391_v29  ;;  %v1393_v30 = vld [vmem:[%s6129_s25 + $0x1bc0] sm:$0xff] }
  0xf0   : > { %v1395_v31 = vld [vmem:[%s6129_s25 + $0x1be0] sm:$0xff]  ;;  %1394 = vst [vmem:[%s6137_s26 + $0x6f0] sm:$0xff] %v1393_v30 }
  0xf1   : > { %v1397_v32 = vld [vmem:[%s6129_s25 + $0x1c00] sm:$0xff]  ;;  %1396 = vst [vmem:[%s6137_s26 + $0x6f8] sm:$0xff] %v1395_v31 }
  0xf2   : > { %1398 = vst [vmem:[%s6137_s26 + $0x700] sm:$0xff] %v1397_v32  ;;  %v1399_v33 = vld [vmem:[%s6129_s25 + $0x1c20] sm:$0xff] }
  0xf3   : > { %v1401_v34 = vld [vmem:[%s6129_s25 + $0x1c40] sm:$0xff]  ;;  %1400 = vst [vmem:[%s6137_s26 + $0x708] sm:$0xff] %v1399_v33 }
  0xf4   : > { %v1403_v35 = vld [vmem:[%s6129_s25 + $0x1c60] sm:$0xff]  ;;  %1402 = vst [vmem:[%s6137_s26 + $0x710] sm:$0xff] %v1401_v34 }
  0xf5   : > { %1404 = vst [vmem:[%s6137_s26 + $0x718] sm:$0xff] %v1403_v35  ;;  %v1405_v36 = vld [vmem:[%s6129_s25 + $0x1c80] sm:$0xff] }
  0xf6   : > { %v1407_v37 = vld [vmem:[%s6129_s25 + $0x1ca0] sm:$0xff]  ;;  %1406 = vst [vmem:[%s6137_s26 + $0x720] sm:$0xff] %v1405_v36 }
  0xf7   : > { %v1409_v38 = vld [vmem:[%s6129_s25 + $0x1cc0] sm:$0xff]  ;;  %1408 = vst [vmem:[%s6137_s26 + $0x728] sm:$0xff] %v1407_v37 }
  0xf8   : > { %1410 = vst [vmem:[%s6137_s26 + $0x730] sm:$0xff] %v1409_v38  ;;  %v1411_v39 = vld [vmem:[%s6129_s25 + $0x1ce0] sm:$0xff] }
  0xf9   : > { %v1413_v40 = vld [vmem:[%s6129_s25 + $0x1d00] sm:$0xff]  ;;  %1412 = vst [vmem:[%s6137_s26 + $0x738] sm:$0xff] %v1411_v39 }
  0xfa   : > { %v1415_v41 = vld [vmem:[%s6129_s25 + $0x1d20] sm:$0xff]  ;;  %1414 = vst [vmem:[%s6137_s26 + $0x740] sm:$0xff] %v1413_v40 }
  0xfb   : > { %1416 = vst [vmem:[%s6137_s26 + $0x748] sm:$0xff] %v1415_v41  ;;  %v1417_v42 = vld [vmem:[%s6129_s25 + $0x1d40] sm:$0xff] }
  0xfc   : > { %v1419_v43 = vld [vmem:[%s6129_s25 + $0x1d60] sm:$0xff]  ;;  %1418 = vst [vmem:[%s6137_s26 + $0x750] sm:$0xff] %v1417_v42 }
  0xfd   : > { %v1421_v44 = vld [vmem:[%s6129_s25 + $0x1d80] sm:$0xff]  ;;  %1420 = vst [vmem:[%s6137_s26 + $0x758] sm:$0xff] %v1419_v43 }
  0xfe   : > { %1422 = vst [vmem:[%s6137_s26 + $0x760] sm:$0xff] %v1421_v44  ;;  %v1423_v45 = vld [vmem:[%s6129_s25 + $0x1da0] sm:$0xff] }
  0xff   : > { %v1425_v46 = vld [vmem:[%s6129_s25 + $0x1dc0] sm:$0xff]  ;;  %1424 = vst [vmem:[%s6137_s26 + $0x768] sm:$0xff] %v1423_v45 }
 0x100   : > { %v1427_v47 = vld [vmem:[%s6129_s25 + $0x1de0] sm:$0xff]  ;;  %1426 = vst [vmem:[%s6137_s26 + $0x770] sm:$0xff] %v1425_v46 }
 0x101   : > { %1428 = vst [vmem:[%s6137_s26 + $0x778] sm:$0xff] %v1427_v47  ;;  %v1429_v48 = vld [vmem:[%s6129_s25 + $0x1e00] sm:$0xff] }
 0x102   : > { %v1431_v49 = vld [vmem:[%s6129_s25 + $0x1e20] sm:$0xff]  ;;  %1430 = vst [vmem:[%s6137_s26 + $0x780] sm:$0xff] %v1429_v48 }
 0x103   : > { %v1433_v50 = vld [vmem:[%s6129_s25 + $0x1e40] sm:$0xff]  ;;  %1432 = vst [vmem:[%s6137_s26 + $0x788] sm:$0xff] %v1431_v49 }
 0x104   : > { %1434 = vst [vmem:[%s6137_s26 + $0x790] sm:$0xff] %v1433_v50  ;;  %v1435_v51 = vld [vmem:[%s6129_s25 + $0x1e60] sm:$0xff] }
 0x105   : > { %v1437_v52 = vld [vmem:[%s6129_s25 + $0x1e80] sm:$0xff]  ;;  %1436 = vst [vmem:[%s6137_s26 + $0x798] sm:$0xff] %v1435_v51 }
 0x106   : > { %v1439_v53 = vld [vmem:[%s6129_s25 + $0x1ea0] sm:$0xff]  ;;  %1438 = vst [vmem:[%s6137_s26 + $0x7a0] sm:$0xff] %v1437_v52 }
 0x107   : > { %1440 = vst [vmem:[%s6137_s26 + $0x7a8] sm:$0xff] %v1439_v53  ;;  %v1441_v54 = vld [vmem:[%s6129_s25 + $0x1ec0] sm:$0xff] }
 0x108   : > { %v1443_v55 = vld [vmem:[%s6129_s25 + $0x1ee0] sm:$0xff]  ;;  %1442 = vst [vmem:[%s6137_s26 + $0x7b0] sm:$0xff] %v1441_v54 }
 0x109   : > { %v1445_v56 = vld [vmem:[%s6129_s25 + $0x1f00] sm:$0xff]  ;;  %1444 = vst [vmem:[%s6137_s26 + $0x7b8] sm:$0xff] %v1443_v55 }
 0x10a   : > { %1446 = vst [vmem:[%s6137_s26 + $0x7c0] sm:$0xff] %v1445_v56  ;;  %v1447_v57 = vld [vmem:[%s6129_s25 + $0x1f20] sm:$0xff] }
 0x10b   : > { %v1449_v58 = vld [vmem:[%s6129_s25 + $0x1f40] sm:$0xff]  ;;  %1448 = vst [vmem:[%s6137_s26 + $0x7c8] sm:$0xff] %v1447_v57 }
 0x10c   : > { %v1451_v59 = vld [vmem:[%s6129_s25 + $0x1f60] sm:$0xff]  ;;  %1450 = vst [vmem:[%s6137_s26 + $0x7d0] sm:$0xff] %v1449_v58 }
 0x10d   : > { %1452 = vst [vmem:[%s6137_s26 + $0x7d8] sm:$0xff] %v1451_v59  ;;  %v1453_v60 = vld [vmem:[%s6129_s25 + $0x1f80] sm:$0xff] }
 0x10e   : > { %v1455_v61 = vld [vmem:[%s6129_s25 + $0x1fa0] sm:$0xff]  ;;  %1454 = vst [vmem:[%s6137_s26 + $0x7e0] sm:$0xff] %v1453_v60 }
 0x10f   : > { %v1457_v62 = vld [vmem:[%s6129_s25 + $0x1fc0] sm:$0xff]  ;;  %1456 = vst [vmem:[%s6137_s26 + $0x7e8] sm:$0xff] %v1455_v61 }
 0x110   : > { %1458 = vst [vmem:[%s6137_s26 + $0x7f0] sm:$0xff] %v1457_v62  ;;  %v1459_v63 = vld [vmem:[%s6129_s25 + $0x1fe0] sm:$0xff] }
 0x111   : > { %v1461_v0 = vld [vmem:[%s6129_s25 + $0x2000] sm:$0xff]  ;;  %1460 = vst [vmem:[%s6137_s26 + $0x7f8] sm:$0xff] %v1459_v63 }
 0x112   : > { %v1463_v1 = vld [vmem:[%s6129_s25 + $0x2020] sm:$0xff]  ;;  %1462 = vst [vmem:[%s6137_s26 + $0x800] sm:$0xff] %v1461_v0 }
 0x113   : > { %1464 = vst [vmem:[%s6137_s26 + $0x808] sm:$0xff] %v1463_v1  ;;  %v1465_v2 = vld [vmem:[%s6129_s25 + $0x2040] sm:$0xff] }
 0x114   : > { %v1467_v3 = vld [vmem:[%s6129_s25 + $0x2060] sm:$0xff]  ;;  %1466 = vst [vmem:[%s6137_s26 + $0x810] sm:$0xff] %v1465_v2 }
 0x115   : > { %v1469_v4 = vld [vmem:[%s6129_s25 + $0x2080] sm:$0xff]  ;;  %1468 = vst [vmem:[%s6137_s26 + $0x818] sm:$0xff] %v1467_v3 }
 0x116   : > { %1470 = vst [vmem:[%s6137_s26 + $0x820] sm:$0xff] %v1469_v4  ;;  %v1471_v5 = vld [vmem:[%s6129_s25 + $0x20a0] sm:$0xff] }
 0x117   : > { %v1473_v6 = vld [vmem:[%s6129_s25 + $0x20c0] sm:$0xff]  ;;  %1472 = vst [vmem:[%s6137_s26 + $0x828] sm:$0xff] %v1471_v5 }
 0x118   : > { %v1475_v7 = vld [vmem:[%s6129_s25 + $0x20e0] sm:$0xff]  ;;  %1474 = vst [vmem:[%s6137_s26 + $0x830] sm:$0xff] %v1473_v6 }
 0x119   : > { %1476 = vst [vmem:[%s6137_s26 + $0x838] sm:$0xff] %v1475_v7  ;;  %v1477_v8 = vld [vmem:[%s6129_s25 + $0x2100] sm:$0xff] }
 0x11a   : > { %v1479_v9 = vld [vmem:[%s6129_s25 + $0x2120] sm:$0xff]  ;;  %1478 = vst [vmem:[%s6137_s26 + $0x840] sm:$0xff] %v1477_v8 }
 0x11b   : > { %v1481_v10 = vld [vmem:[%s6129_s25 + $0x2140] sm:$0xff]  ;;  %1480 = vst [vmem:[%s6137_s26 + $0x848] sm:$0xff] %v1479_v9 }
 0x11c   : > { %1482 = vst [vmem:[%s6137_s26 + $0x850] sm:$0xff] %v1481_v10  ;;  %v1483_v11 = vld [vmem:[%s6129_s25 + $0x2160] sm:$0xff] }
 0x11d   : > { %v1485_v12 = vld [vmem:[%s6129_s25 + $0x2180] sm:$0xff]  ;;  %1484 = vst [vmem:[%s6137_s26 + $0x858] sm:$0xff] %v1483_v11 }
 0x11e   : > { %v1487_v13 = vld [vmem:[%s6129_s25 + $0x21a0] sm:$0xff]  ;;  %1486 = vst [vmem:[%s6137_s26 + $0x860] sm:$0xff] %v1485_v12 }
 0x11f   : > { %1488 = vst [vmem:[%s6137_s26 + $0x868] sm:$0xff] %v1487_v13  ;;  %v1489_v14 = vld [vmem:[%s6129_s25 + $0x21c0] sm:$0xff] }
 0x120   : > { %v1491_v15 = vld [vmem:[%s6129_s25 + $0x21e0] sm:$0xff]  ;;  %1490 = vst [vmem:[%s6137_s26 + $0x870] sm:$0xff] %v1489_v14 }
 0x121   : > { %v1493_v16 = vld [vmem:[%s6129_s25 + $0x2200] sm:$0xff]  ;;  %1492 = vst [vmem:[%s6137_s26 + $0x878] sm:$0xff] %v1491_v15 }
 0x122   : > { %1494 = vst [vmem:[%s6137_s26 + $0x880] sm:$0xff] %v1493_v16  ;;  %v1495_v17 = vld [vmem:[%s6129_s25 + $0x2220] sm:$0xff] }
 0x123   : > { %v1497_v18 = vld [vmem:[%s6129_s25 + $0x2240] sm:$0xff]  ;;  %1496 = vst [vmem:[%s6137_s26 + $0x888] sm:$0xff] %v1495_v17 }
 0x124   : > { %v1499_v19 = vld [vmem:[%s6129_s25 + $0x2260] sm:$0xff]  ;;  %1498 = vst [vmem:[%s6137_s26 + $0x890] sm:$0xff] %v1497_v18 }
 0x125   : > { %1500 = vst [vmem:[%s6137_s26 + $0x898] sm:$0xff] %v1499_v19  ;;  %v1501_v20 = vld [vmem:[%s6129_s25 + $0x2280] sm:$0xff] }
 0x126   : > { %v1503_v21 = vld [vmem:[%s6129_s25 + $0x22a0] sm:$0xff]  ;;  %1502 = vst [vmem:[%s6137_s26 + $0x8a0] sm:$0xff] %v1501_v20 }
 0x127   : > { %v1505_v22 = vld [vmem:[%s6129_s25 + $0x22c0] sm:$0xff]  ;;  %1504 = vst [vmem:[%s6137_s26 + $0x8a8] sm:$0xff] %v1503_v21 }
 0x128   : > { %1506 = vst [vmem:[%s6137_s26 + $0x8b0] sm:$0xff] %v1505_v22  ;;  %v1507_v23 = vld [vmem:[%s6129_s25 + $0x22e0] sm:$0xff] }
 0x129   : > { %v1509_v24 = vld [vmem:[%s6129_s25 + $0x2300] sm:$0xff]  ;;  %1508 = vst [vmem:[%s6137_s26 + $0x8b8] sm:$0xff] %v1507_v23 }
 0x12a   : > { %v1511_v25 = vld [vmem:[%s6129_s25 + $0x2320] sm:$0xff]  ;;  %1510 = vst [vmem:[%s6137_s26 + $0x8c0] sm:$0xff] %v1509_v24 }
 0x12b   : > { %1512 = vst [vmem:[%s6137_s26 + $0x8c8] sm:$0xff] %v1511_v25  ;;  %v1513_v26 = vld [vmem:[%s6129_s25 + $0x2340] sm:$0xff] }
 0x12c   : > { %v1515_v27 = vld [vmem:[%s6129_s25 + $0x2360] sm:$0xff]  ;;  %1514 = vst [vmem:[%s6137_s26 + $0x8d0] sm:$0xff] %v1513_v26 }
 0x12d   : > { %v1517_v28 = vld [vmem:[%s6129_s25 + $0x2380] sm:$0xff]  ;;  %1516 = vst [vmem:[%s6137_s26 + $0x8d8] sm:$0xff] %v1515_v27 }
 0x12e   : > { %1518 = vst [vmem:[%s6137_s26 + $0x8e0] sm:$0xff] %v1517_v28  ;;  %v1519_v29 = vld [vmem:[%s6129_s25 + $0x23a0] sm:$0xff] }
 0x12f   : > { %v1521_v30 = vld [vmem:[%s6129_s25 + $0x23c0] sm:$0xff]  ;;  %1520 = vst [vmem:[%s6137_s26 + $0x8e8] sm:$0xff] %v1519_v29 }
 0x130   : > { %v1523_v31 = vld [vmem:[%s6129_s25 + $0x23e0] sm:$0xff]  ;;  %1522 = vst [vmem:[%s6137_s26 + $0x8f0] sm:$0xff] %v1521_v30 }
 0x131   : > { %1524 = vst [vmem:[%s6137_s26 + $0x8f8] sm:$0xff] %v1523_v31  ;;  %v1525_v32 = vld [vmem:[%s6129_s25 + $0x2400] sm:$0xff] }
 0x132   : > { %v1527_v33 = vld [vmem:[%s6129_s25 + $0x2420] sm:$0xff]  ;;  %1526 = vst [vmem:[%s6137_s26 + $0x900] sm:$0xff] %v1525_v32 }
 0x133   : > { %v1529_v34 = vld [vmem:[%s6129_s25 + $0x2440] sm:$0xff]  ;;  %1528 = vst [vmem:[%s6137_s26 + $0x908] sm:$0xff] %v1527_v33 }
 0x134   : > { %1530 = vst [vmem:[%s6137_s26 + $0x910] sm:$0xff] %v1529_v34  ;;  %v1531_v35 = vld [vmem:[%s6129_s25 + $0x2460] sm:$0xff] }
 0x135   : > { %v1533_v36 = vld [vmem:[%s6129_s25 + $0x2480] sm:$0xff]  ;;  %1532 = vst [vmem:[%s6137_s26 + $0x918] sm:$0xff] %v1531_v35 }
 0x136   : > { %v1535_v37 = vld [vmem:[%s6129_s25 + $0x24a0] sm:$0xff]  ;;  %1534 = vst [vmem:[%s6137_s26 + $0x920] sm:$0xff] %v1533_v36 }
 0x137   : > { %1536 = vst [vmem:[%s6137_s26 + $0x928] sm:$0xff] %v1535_v37  ;;  %v1537_v38 = vld [vmem:[%s6129_s25 + $0x24c0] sm:$0xff] }
 0x138   : > { %v1539_v39 = vld [vmem:[%s6129_s25 + $0x24e0] sm:$0xff]  ;;  %1538 = vst [vmem:[%s6137_s26 + $0x930] sm:$0xff] %v1537_v38 }
 0x139   : > { %v1541_v40 = vld [vmem:[%s6129_s25 + $0x2500] sm:$0xff]  ;;  %1540 = vst [vmem:[%s6137_s26 + $0x938] sm:$0xff] %v1539_v39 }
 0x13a   : > { %1542 = vst [vmem:[%s6137_s26 + $0x940] sm:$0xff] %v1541_v40  ;;  %v1543_v41 = vld [vmem:[%s6129_s25 + $0x2520] sm:$0xff] }
 0x13b   : > { %v1545_v42 = vld [vmem:[%s6129_s25 + $0x2540] sm:$0xff]  ;;  %1544 = vst [vmem:[%s6137_s26 + $0x948] sm:$0xff] %v1543_v41 }
 0x13c   : > { %v1547_v43 = vld [vmem:[%s6129_s25 + $0x2560] sm:$0xff]  ;;  %1546 = vst [vmem:[%s6137_s26 + $0x950] sm:$0xff] %v1545_v42 }
 0x13d   : > { %1548 = vst [vmem:[%s6137_s26 + $0x958] sm:$0xff] %v1547_v43  ;;  %v1549_v44 = vld [vmem:[%s6129_s25 + $0x2580] sm:$0xff] }
 0x13e   : > { %v1551_v45 = vld [vmem:[%s6129_s25 + $0x25a0] sm:$0xff]  ;;  %1550 = vst [vmem:[%s6137_s26 + $0x960] sm:$0xff] %v1549_v44 }
 0x13f   : > { %v1553_v46 = vld [vmem:[%s6129_s25 + $0x25c0] sm:$0xff]  ;;  %1552 = vst [vmem:[%s6137_s26 + $0x968] sm:$0xff] %v1551_v45 }
 0x140   : > { %1554 = vst [vmem:[%s6137_s26 + $0x970] sm:$0xff] %v1553_v46  ;;  %v1555_v47 = vld [vmem:[%s6129_s25 + $0x25e0] sm:$0xff] }
 0x141   : > { %v1557_v48 = vld [vmem:[%s6129_s25 + $0x2600] sm:$0xff]  ;;  %1556 = vst [vmem:[%s6137_s26 + $0x978] sm:$0xff] %v1555_v47 }
 0x142   : > { %v1559_v49 = vld [vmem:[%s6129_s25 + $0x2620] sm:$0xff]  ;;  %1558 = vst [vmem:[%s6137_s26 + $0x980] sm:$0xff] %v1557_v48 }
 0x143   : > { %1560 = vst [vmem:[%s6137_s26 + $0x988] sm:$0xff] %v1559_v49  ;;  %v1561_v50 = vld [vmem:[%s6129_s25 + $0x2640] sm:$0xff] }
 0x144   : > { %v1563_v51 = vld [vmem:[%s6129_s25 + $0x2660] sm:$0xff]  ;;  %1562 = vst [vmem:[%s6137_s26 + $0x990] sm:$0xff] %v1561_v50 }
 0x145   : > { %v1565_v52 = vld [vmem:[%s6129_s25 + $0x2680] sm:$0xff]  ;;  %1564 = vst [vmem:[%s6137_s26 + $0x998] sm:$0xff] %v1563_v51 }
 0x146   : > { %1566 = vst [vmem:[%s6137_s26 + $0x9a0] sm:$0xff] %v1565_v52  ;;  %v1567_v53 = vld [vmem:[%s6129_s25 + $0x26a0] sm:$0xff] }
 0x147   : > { %v1569_v54 = vld [vmem:[%s6129_s25 + $0x26c0] sm:$0xff]  ;;  %1568 = vst [vmem:[%s6137_s26 + $0x9a8] sm:$0xff] %v1567_v53 }
 0x148   : > { %v1571_v55 = vld [vmem:[%s6129_s25 + $0x26e0] sm:$0xff]  ;;  %1570 = vst [vmem:[%s6137_s26 + $0x9b0] sm:$0xff] %v1569_v54 }
 0x149   : > { %1572 = vst [vmem:[%s6137_s26 + $0x9b8] sm:$0xff] %v1571_v55  ;;  %v1573_v56 = vld [vmem:[%s6129_s25 + $0x2700] sm:$0xff] }
 0x14a   : > { %v1575_v57 = vld [vmem:[%s6129_s25 + $0x2720] sm:$0xff]  ;;  %1574 = vst [vmem:[%s6137_s26 + $0x9c0] sm:$0xff] %v1573_v56 }
 0x14b   : > { %v1577_v58 = vld [vmem:[%s6129_s25 + $0x2740] sm:$0xff]  ;;  %1576 = vst [vmem:[%s6137_s26 + $0x9c8] sm:$0xff] %v1575_v57 }
 0x14c   : > { %1578 = vst [vmem:[%s6137_s26 + $0x9d0] sm:$0xff] %v1577_v58  ;;  %v1579_v59 = vld [vmem:[%s6129_s25 + $0x2760] sm:$0xff] }
 0x14d   : > { %v1581_v60 = vld [vmem:[%s6129_s25 + $0x2780] sm:$0xff]  ;;  %1580 = vst [vmem:[%s6137_s26 + $0x9d8] sm:$0xff] %v1579_v59 }
 0x14e   : > { %v1583_v61 = vld [vmem:[%s6129_s25 + $0x27a0] sm:$0xff]  ;;  %1582 = vst [vmem:[%s6137_s26 + $0x9e0] sm:$0xff] %v1581_v60 }
 0x14f   : > { %1584 = vst [vmem:[%s6137_s26 + $0x9e8] sm:$0xff] %v1583_v61  ;;  %v1585_v62 = vld [vmem:[%s6129_s25 + $0x27c0] sm:$0xff] }
 0x150   : > { %v1587_v63 = vld [vmem:[%s6129_s25 + $0x27e0] sm:$0xff]  ;;  %1586 = vst [vmem:[%s6137_s26 + $0x9f0] sm:$0xff] %v1585_v62 }
 0x151   : > { %v1589_v0 = vld [vmem:[%s6129_s25 + $0x2800] sm:$0xff]  ;;  %1588 = vst [vmem:[%s6137_s26 + $0x9f8] sm:$0xff] %v1587_v63 }
 0x152   : > { %1590 = vst [vmem:[%s6137_s26 + $0xa00] sm:$0xff] %v1589_v0  ;;  %v1591_v1 = vld [vmem:[%s6129_s25 + $0x2820] sm:$0xff] }
 0x153   : > { %v1593_v2 = vld [vmem:[%s6129_s25 + $0x2840] sm:$0xff]  ;;  %1592 = vst [vmem:[%s6137_s26 + $0xa08] sm:$0xff] %v1591_v1 }
 0x154   : > { %v1595_v3 = vld [vmem:[%s6129_s25 + $0x2860] sm:$0xff]  ;;  %1594 = vst [vmem:[%s6137_s26 + $0xa10] sm:$0xff] %v1593_v2 }
 0x155   : > { %1596 = vst [vmem:[%s6137_s26 + $0xa18] sm:$0xff] %v1595_v3  ;;  %v1597_v4 = vld [vmem:[%s6129_s25 + $0x2880] sm:$0xff] }
 0x156   : > { %v1599_v5 = vld [vmem:[%s6129_s25 + $0x28a0] sm:$0xff]  ;;  %1598 = vst [vmem:[%s6137_s26 + $0xa20] sm:$0xff] %v1597_v4 }
 0x157   : > { %v1601_v6 = vld [vmem:[%s6129_s25 + $0x28c0] sm:$0xff]  ;;  %1600 = vst [vmem:[%s6137_s26 + $0xa28] sm:$0xff] %v1599_v5 }
 0x158   : > { %1602 = vst [vmem:[%s6137_s26 + $0xa30] sm:$0xff] %v1601_v6  ;;  %v1603_v7 = vld [vmem:[%s6129_s25 + $0x28e0] sm:$0xff] }
 0x159   : > { %v1605_v8 = vld [vmem:[%s6129_s25 + $0x2900] sm:$0xff]  ;;  %1604 = vst [vmem:[%s6137_s26 + $0xa38] sm:$0xff] %v1603_v7 }
 0x15a   : > { %v1607_v9 = vld [vmem:[%s6129_s25 + $0x2920] sm:$0xff]  ;;  %1606 = vst [vmem:[%s6137_s26 + $0xa40] sm:$0xff] %v1605_v8 }
 0x15b   : > { %1608 = vst [vmem:[%s6137_s26 + $0xa48] sm:$0xff] %v1607_v9  ;;  %v1609_v10 = vld [vmem:[%s6129_s25 + $0x2940] sm:$0xff] }
 0x15c   : > { %v1611_v11 = vld [vmem:[%s6129_s25 + $0x2960] sm:$0xff]  ;;  %1610 = vst [vmem:[%s6137_s26 + $0xa50] sm:$0xff] %v1609_v10 }
 0x15d   : > { %v1613_v12 = vld [vmem:[%s6129_s25 + $0x2980] sm:$0xff]  ;;  %1612 = vst [vmem:[%s6137_s26 + $0xa58] sm:$0xff] %v1611_v11 }
 0x15e   : > { %1614 = vst [vmem:[%s6137_s26 + $0xa60] sm:$0xff] %v1613_v12  ;;  %v1615_v13 = vld [vmem:[%s6129_s25 + $0x29a0] sm:$0xff] }
 0x15f   : > { %v1617_v14 = vld [vmem:[%s6129_s25 + $0x29c0] sm:$0xff]  ;;  %1616 = vst [vmem:[%s6137_s26 + $0xa68] sm:$0xff] %v1615_v13 }
 0x160   : > { %v1619_v15 = vld [vmem:[%s6129_s25 + $0x29e0] sm:$0xff]  ;;  %1618 = vst [vmem:[%s6137_s26 + $0xa70] sm:$0xff] %v1617_v14 }
 0x161   : > { %1620 = vst [vmem:[%s6137_s26 + $0xa78] sm:$0xff] %v1619_v15  ;;  %v1621_v16 = vld [vmem:[%s6129_s25 + $0x2a00] sm:$0xff] }
 0x162   : > { %v1623_v17 = vld [vmem:[%s6129_s25 + $0x2a20] sm:$0xff]  ;;  %1622 = vst [vmem:[%s6137_s26 + $0xa80] sm:$0xff] %v1621_v16 }
 0x163   : > { %v1625_v18 = vld [vmem:[%s6129_s25 + $0x2a40] sm:$0xff]  ;;  %1624 = vst [vmem:[%s6137_s26 + $0xa88] sm:$0xff] %v1623_v17 }
 0x164   : > { %1626 = vst [vmem:[%s6137_s26 + $0xa90] sm:$0xff] %v1625_v18  ;;  %v1627_v19 = vld [vmem:[%s6129_s25 + $0x2a60] sm:$0xff] }
 0x165   : > { %v1629_v20 = vld [vmem:[%s6129_s25 + $0x2a80] sm:$0xff]  ;;  %1628 = vst [vmem:[%s6137_s26 + $0xa98] sm:$0xff] %v1627_v19 }
 0x166   : > { %v1631_v21 = vld [vmem:[%s6129_s25 + $0x2aa0] sm:$0xff]  ;;  %1630 = vst [vmem:[%s6137_s26 + $0xaa0] sm:$0xff] %v1629_v20 }
 0x167   : > { %1632 = vst [vmem:[%s6137_s26 + $0xaa8] sm:$0xff] %v1631_v21  ;;  %v1633_v22 = vld [vmem:[%s6129_s25 + $0x2ac0] sm:$0xff] }
 0x168   : > { %v1635_v23 = vld [vmem:[%s6129_s25 + $0x2ae0] sm:$0xff]  ;;  %1634 = vst [vmem:[%s6137_s26 + $0xab0] sm:$0xff] %v1633_v22 }
 0x169   : > { %v1637_v24 = vld [vmem:[%s6129_s25 + $0x2b00] sm:$0xff]  ;;  %1636 = vst [vmem:[%s6137_s26 + $0xab8] sm:$0xff] %v1635_v23 }
 0x16a   : > { %1638 = vst [vmem:[%s6137_s26 + $0xac0] sm:$0xff] %v1637_v24  ;;  %v1639_v25 = vld [vmem:[%s6129_s25 + $0x2b20] sm:$0xff] }
 0x16b   : > { %v1641_v26 = vld [vmem:[%s6129_s25 + $0x2b40] sm:$0xff]  ;;  %1640 = vst [vmem:[%s6137_s26 + $0xac8] sm:$0xff] %v1639_v25 }
 0x16c   : > { %v1643_v27 = vld [vmem:[%s6129_s25 + $0x2b60] sm:$0xff]  ;;  %1642 = vst [vmem:[%s6137_s26 + $0xad0] sm:$0xff] %v1641_v26 }
 0x16d   : > { %1644 = vst [vmem:[%s6137_s26 + $0xad8] sm:$0xff] %v1643_v27  ;;  %v1645_v28 = vld [vmem:[%s6129_s25 + $0x2b80] sm:$0xff] }
 0x16e   : > { %v1647_v29 = vld [vmem:[%s6129_s25 + $0x2ba0] sm:$0xff]  ;;  %1646 = vst [vmem:[%s6137_s26 + $0xae0] sm:$0xff] %v1645_v28 }
 0x16f   : > { %v1649_v30 = vld [vmem:[%s6129_s25 + $0x2bc0] sm:$0xff]  ;;  %1648 = vst [vmem:[%s6137_s26 + $0xae8] sm:$0xff] %v1647_v29 }
 0x170   : > { %1650 = vst [vmem:[%s6137_s26 + $0xaf0] sm:$0xff] %v1649_v30  ;;  %v1651_v31 = vld [vmem:[%s6129_s25 + $0x2be0] sm:$0xff] }
 0x171   : > { %v1653_v32 = vld [vmem:[%s6129_s25 + $0x2c00] sm:$0xff]  ;;  %1652 = vst [vmem:[%s6137_s26 + $0xaf8] sm:$0xff] %v1651_v31 }
 0x172   : > { %v1655_v33 = vld [vmem:[%s6129_s25 + $0x2c20] sm:$0xff]  ;;  %1654 = vst [vmem:[%s6137_s26 + $0xb00] sm:$0xff] %v1653_v32 }
 0x173   : > { %1656 = vst [vmem:[%s6137_s26 + $0xb08] sm:$0xff] %v1655_v33  ;;  %v1657_v34 = vld [vmem:[%s6129_s25 + $0x2c40] sm:$0xff] }
 0x174   : > { %v1659_v35 = vld [vmem:[%s6129_s25 + $0x2c60] sm:$0xff]  ;;  %1658 = vst [vmem:[%s6137_s26 + $0xb10] sm:$0xff] %v1657_v34 }
 0x175   : > { %v1661_v36 = vld [vmem:[%s6129_s25 + $0x2c80] sm:$0xff]  ;;  %1660 = vst [vmem:[%s6137_s26 + $0xb18] sm:$0xff] %v1659_v35 }
 0x176   : > { %1662 = vst [vmem:[%s6137_s26 + $0xb20] sm:$0xff] %v1661_v36  ;;  %v1663_v37 = vld [vmem:[%s6129_s25 + $0x2ca0] sm:$0xff] }
 0x177   : > { %v1665_v38 = vld [vmem:[%s6129_s25 + $0x2cc0] sm:$0xff]  ;;  %1664 = vst [vmem:[%s6137_s26 + $0xb28] sm:$0xff] %v1663_v37 }
 0x178   : > { %v1667_v39 = vld [vmem:[%s6129_s25 + $0x2ce0] sm:$0xff]  ;;  %1666 = vst [vmem:[%s6137_s26 + $0xb30] sm:$0xff] %v1665_v38 }
 0x179   : > { %1668 = vst [vmem:[%s6137_s26 + $0xb38] sm:$0xff] %v1667_v39  ;;  %v1669_v40 = vld [vmem:[%s6129_s25 + $0x2d00] sm:$0xff] }
 0x17a   : > { %v1671_v41 = vld [vmem:[%s6129_s25 + $0x2d20] sm:$0xff]  ;;  %1670 = vst [vmem:[%s6137_s26 + $0xb40] sm:$0xff] %v1669_v40 }
 0x17b   : > { %v1673_v42 = vld [vmem:[%s6129_s25 + $0x2d40] sm:$0xff]  ;;  %1672 = vst [vmem:[%s6137_s26 + $0xb48] sm:$0xff] %v1671_v41 }
 0x17c   : > { %1674 = vst [vmem:[%s6137_s26 + $0xb50] sm:$0xff] %v1673_v42  ;;  %v1675_v43 = vld [vmem:[%s6129_s25 + $0x2d60] sm:$0xff] }
 0x17d   : > { %v1677_v44 = vld [vmem:[%s6129_s25 + $0x2d80] sm:$0xff]  ;;  %1676 = vst [vmem:[%s6137_s26 + $0xb58] sm:$0xff] %v1675_v43 }
 0x17e   : > { %v1679_v45 = vld [vmem:[%s6129_s25 + $0x2da0] sm:$0xff]  ;;  %1678 = vst [vmem:[%s6137_s26 + $0xb60] sm:$0xff] %v1677_v44 }
 0x17f   : > { %1680 = vst [vmem:[%s6137_s26 + $0xb68] sm:$0xff] %v1679_v45  ;;  %v1681_v46 = vld [vmem:[%s6129_s25 + $0x2dc0] sm:$0xff] }
 0x180   : > { %v1683_v47 = vld [vmem:[%s6129_s25 + $0x2de0] sm:$0xff]  ;;  %1682 = vst [vmem:[%s6137_s26 + $0xb70] sm:$0xff] %v1681_v46 }
 0x181   : > { %v1685_v48 = vld [vmem:[%s6129_s25 + $0x2e00] sm:$0xff]  ;;  %1684 = vst [vmem:[%s6137_s26 + $0xb78] sm:$0xff] %v1683_v47 }
 0x182   : > { %1686 = vst [vmem:[%s6137_s26 + $0xb80] sm:$0xff] %v1685_v48  ;;  %v1687_v49 = vld [vmem:[%s6129_s25 + $0x2e20] sm:$0xff] }
 0x183   : > { %v1689_v50 = vld [vmem:[%s6129_s25 + $0x2e40] sm:$0xff]  ;;  %1688 = vst [vmem:[%s6137_s26 + $0xb88] sm:$0xff] %v1687_v49 }
 0x184   : > { %v1691_v51 = vld [vmem:[%s6129_s25 + $0x2e60] sm:$0xff]  ;;  %1690 = vst [vmem:[%s6137_s26 + $0xb90] sm:$0xff] %v1689_v50 }
 0x185   : > { %1692 = vst [vmem:[%s6137_s26 + $0xb98] sm:$0xff] %v1691_v51  ;;  %v1693_v52 = vld [vmem:[%s6129_s25 + $0x2e80] sm:$0xff] }
 0x186   : > { %v1695_v53 = vld [vmem:[%s6129_s25 + $0x2ea0] sm:$0xff]  ;;  %1694 = vst [vmem:[%s6137_s26 + $0xba0] sm:$0xff] %v1693_v52 }
 0x187   : > { %v1697_v54 = vld [vmem:[%s6129_s25 + $0x2ec0] sm:$0xff]  ;;  %1696 = vst [vmem:[%s6137_s26 + $0xba8] sm:$0xff] %v1695_v53 }
 0x188   : > { %1698 = vst [vmem:[%s6137_s26 + $0xbb0] sm:$0xff] %v1697_v54  ;;  %v1699_v55 = vld [vmem:[%s6129_s25 + $0x2ee0] sm:$0xff] }
 0x189   : > { %v1701_v56 = vld [vmem:[%s6129_s25 + $0x2f00] sm:$0xff]  ;;  %1700 = vst [vmem:[%s6137_s26 + $0xbb8] sm:$0xff] %v1699_v55 }
 0x18a   : > { %v1703_v57 = vld [vmem:[%s6129_s25 + $0x2f20] sm:$0xff]  ;;  %1702 = vst [vmem:[%s6137_s26 + $0xbc0] sm:$0xff] %v1701_v56 }
 0x18b   : > { %1704 = vst [vmem:[%s6137_s26 + $0xbc8] sm:$0xff] %v1703_v57  ;;  %v1705_v58 = vld [vmem:[%s6129_s25 + $0x2f40] sm:$0xff] }
 0x18c   : > { %v1707_v59 = vld [vmem:[%s6129_s25 + $0x2f60] sm:$0xff]  ;;  %1706 = vst [vmem:[%s6137_s26 + $0xbd0] sm:$0xff] %v1705_v58 }
 0x18d   : > { %v1709_v60 = vld [vmem:[%s6129_s25 + $0x2f80] sm:$0xff]  ;;  %1708 = vst [vmem:[%s6137_s26 + $0xbd8] sm:$0xff] %v1707_v59 }
 0x18e   : > { %1710 = vst [vmem:[%s6137_s26 + $0xbe0] sm:$0xff] %v1709_v60  ;;  %v1711_v61 = vld [vmem:[%s6129_s25 + $0x2fa0] sm:$0xff] }
 0x18f   : > { %v1713_v62 = vld [vmem:[%s6129_s25 + $0x2fc0] sm:$0xff]  ;;  %1712 = vst [vmem:[%s6137_s26 + $0xbe8] sm:$0xff] %v1711_v61 }
 0x190   : > { %v1715_v63 = vld [vmem:[%s6129_s25 + $0x2fe0] sm:$0xff]  ;;  %1714 = vst [vmem:[%s6137_s26 + $0xbf0] sm:$0xff] %v1713_v62 }
 0x191   : > { %1716 = vst [vmem:[%s6137_s26 + $0xbf8] sm:$0xff] %v1715_v63  ;;  %v1717_v0 = vld [vmem:[%s6129_s25 + $0x3000] sm:$0xff] }
 0x192   : > { %v1719_v1 = vld [vmem:[%s6129_s25 + $0x3020] sm:$0xff]  ;;  %1718 = vst [vmem:[%s6137_s26 + $0xc00] sm:$0xff] %v1717_v0 }
 0x193   : > { %v1721_v2 = vld [vmem:[%s6129_s25 + $0x3040] sm:$0xff]  ;;  %1720 = vst [vmem:[%s6137_s26 + $0xc08] sm:$0xff] %v1719_v1 }
 0x194   : > { %1722 = vst [vmem:[%s6137_s26 + $0xc10] sm:$0xff] %v1721_v2  ;;  %v1723_v3 = vld [vmem:[%s6129_s25 + $0x3060] sm:$0xff] }
 0x195   : > { %v1725_v4 = vld [vmem:[%s6129_s25 + $0x3080] sm:$0xff]  ;;  %1724 = vst [vmem:[%s6137_s26 + $0xc18] sm:$0xff] %v1723_v3 }
 0x196   : > { %v1727_v5 = vld [vmem:[%s6129_s25 + $0x30a0] sm:$0xff]  ;;  %1726 = vst [vmem:[%s6137_s26 + $0xc20] sm:$0xff] %v1725_v4 }
 0x197   : > { %1728 = vst [vmem:[%s6137_s26 + $0xc28] sm:$0xff] %v1727_v5  ;;  %v1729_v6 = vld [vmem:[%s6129_s25 + $0x30c0] sm:$0xff] }
 0x198   : > { %v1731_v7 = vld [vmem:[%s6129_s25 + $0x30e0] sm:$0xff]  ;;  %1730 = vst [vmem:[%s6137_s26 + $0xc30] sm:$0xff] %v1729_v6 }
 0x199   : > { %1732 = vst [vmem:[%s6137_s26 + $0xc38] sm:$0xff] %v1731_v7 }
 0x19a PF: > { %p4978_p5 = scmp.ge.s32.totalorder %s6071_s14, 1  ;;  %p1745_p6 = scmp.lt.s32.totalorder %s6071_s14, 5 }
 0x19c   : > { %p1746_p7 = pnand %p4978_p5, %p1745_p6 }
 0x19d   : > { %s1752_s27 = sand.u32 (!%p1746_p7), 1, %s6063_s12   ;;  %v2188_v8 = vlaneseq (!%p1746_p7)  ;;  %v1791_v9 = vld [vmem:[%s7473_s0 + $0x8] sm:$0xff] (!%p1746_p7)  ;;  %v6073_v10 = vmov (!%p1746_p7), 1966171168   ;;  %v6928_v13 = vld [vmem:[%s7473_s0] sm:$0xff] (!%p1746_p7)  ;;  %vm4347_vm0 = vcmask (!%p1746_p7), 523264  }
 0x19e   : > { %1749 = sbr.rel (%p1746_p7) target bundleno = 1042 (0x412), region = 66  ;;  %v2204_v11 = vunpack.c.l.s4 (!%p1746_p7), %v6073_v10  ;;  %v2251_v15 = vcombine.high (!%p1746_p7), %v1791_v9, %v1791_v9  ;;  %s4979_s17 = sshll.u32 (!%p1746_p7), %s4972_s15, 1 }
 0x19f   : > { %s5429_s30 = smul.u32 (!%p1746_p7), 3136, %s1752_s27  ;;  %v6923_v12 = vshrl.u32 (!%p1746_p7), %v2188_v8, 7  ;;  %p1780_p8 = scmp.lt.s32.totalorder (!%p1746_p7), %s4979_s17, 7 }
 0x1a0   : > { %v2205_v14 = vunpack.c.0.s8 (!%p1746_p7), %v2204_v11 }
 0x1a1   : > { %s6930_s6 = scalar_lea.vmem (!%p1746_p7), [#allocation2], %s5429_s30 }
 0x1a2   : > { %v5456_v16 = vld [vmem:[%s6930_s6 + $0x4] ss:$8 sps:$4 sm:$0xff] (!%p1746_p7)   ;;  %v6935_v18 = vsub.s32 (!%p1746_p7), %v2205_v14, %v6923_v12  ;;  %v5460_v19 = vld [vmem:[%s6930_s6] ss:$8 sps:$4 sm:$0xff] (!%p1746_p7)   ;;  %v5462_v21 = vld [vmem:[%s6930_s6 + $0x14] ss:$8 sps:$4 sm:$0xff] (!%p1746_p7)  }
 0x1a3   : > { %v5458_v17 = vld [vmem:[%s6930_s6 + $0x604] ss:$8 sps:$4 sm:$0xff] (!%p1746_p7)   ;;  %4351 = vmatprep.subr.bf16.mxu1 (!%p1746_p7), %v5456_v16  ;;  %v5461_v20 = vld [vmem:[%s6930_s6 + $0x600] ss:$8 sps:$4 sm:$0xff] (!%p1746_p7)   ;;  %v5464_v24 = vld [vmem:[%s6930_s6 + $0x614] ss:$8 sps:$4 sm:$0xff] (!%p1746_p7)  }
 0x1a4   : > { %4597 = vmatprep.subr.bf16.mxu0 (!%p1746_p7), %v5458_v17  ;;  %v6942_v22 = vrot.slane (!%p1746_p7), %v6928_v13, %v6935_v18  ;;  %v6945_v23 = vrot.slane (!%p1746_p7), %v2251_v15, %v6935_v18  ;;  %4352 = vmatpush1.bf16.msra.mxu1 (!%p1746_p7), %v5460_v19  ;;  %v5466_v25 = vld [vmem:[%s6930_s6 + $0x10] ss:$8 sps:$4 sm:$0xff] (!%p1746_p7)   ;;  %v5468_v29 = vld [vmem:[%s6930_s6 + $0x24] ss:$8 sps:$4 sm:$0xff] (!%p1746_p7)   ;;  %v5472_v31 = vld [vmem:[%s6930_s6 + $0x20] ss:$8 sps:$4 sm:$0xff] (!%p1746_p7)  }
 0x1a5   : > { %4598 = vmatpush1.bf16.msra.mxu0 %v5461_v20  ;;  %4353 = vmatprep.subr.bf16.mxu1 %v5462_v21  ;;  %v5467_v26 = vld [vmem:[%s6930_s6 + $0x610] ss:$8 sps:$4 sm:$0xff]   ;;  %v5470_v30 = vld [vmem:[%s6930_s6 + $0x624] ss:$8 sps:$4 sm:$0xff]   ;;  %v5473_v32 = vld [vmem:[%s6930_s6 + $0x620] ss:$8 sps:$4 sm:$0xff]  }
 0x1a6   : > { %v2217_v27 = vcombine.high %v6942_v22, %v6942_v22  ;;  %v2267_v28 = vcombine.high %v6945_v23, %v6945_v23  ;;  %4599 = vmatprep.subr.bf16.mxu0 %v5464_v24  ;;  %v5474_v35 = vld [vmem:[%s6930_s6 + $0x34] ss:$8 sps:$4 sm:$0xff]   ;;  %v5478_v37 = vld [vmem:[%s6930_s6 + $0x30] ss:$8 sps:$4 sm:$0xff]   ;;  %v5480_v39 = vld [vmem:[%s6930_s6 + $0x44] ss:$8 sps:$4 sm:$0xff]  }
 0x1a7   : > { %v5476_v36 = vld [vmem:[%s6930_s6 + $0x634] ss:$8 sps:$4 sm:$0xff]   ;;  %v5479_v38 = vld [vmem:[%s6930_s6 + $0x630] ss:$8 sps:$4 sm:$0xff]   ;;  %v5482_v40 = vld [vmem:[%s6930_s6 + $0x644] ss:$8 sps:$4 sm:$0xff]  }
 0x1a8   : > { %v6959_v33 = vrot.slane %v2217_v27, %v6935_v18  ;;  %v6962_v34 = vrot.slane %v2267_v28, %v6935_v18  ;;  %4354 = vmatpush1.bf16.msra.mxu1 %v5466_v25  ;;  %v5484_v41 = vld [vmem:[%s6930_s6 + $0x40] ss:$8 sps:$4 sm:$0xff]   ;;  %v5486_v43 = vld [vmem:[%s6930_s6 + $0x54] ss:$8 sps:$4 sm:$0xff]   ;;  %v5490_v45 = vld [vmem:[%s6930_s6 + $0x50] ss:$8 sps:$4 sm:$0xff]  }
 0x1a9   : > { %4600 = vmatpush1.bf16.msra.mxu0 %v5467_v26  ;;  %4355 = vmatprep.subr.bf16.mxu1 %v5468_v29  ;;  %v5485_v42 = vld [vmem:[%s6930_s6 + $0x640] ss:$8 sps:$4 sm:$0xff]   ;;  %v5488_v44 = vld [vmem:[%s6930_s6 + $0x654] ss:$8 sps:$4 sm:$0xff]   ;;  %v5491_v46 = vld [vmem:[%s6930_s6 + $0x650] ss:$8 sps:$4 sm:$0xff]  }
 0x1aa   : > { %4601 = vmatprep.subr.bf16.mxu0 %v5470_v30  ;;  %4383 = vmatprep.mubr.bf16.mxu1 %v6959_v33  ;;  %v5492_v47 = vld [vmem:[%s6930_s6 + $0x64] ss:$8 sps:$4 sm:$0xff]   ;;  %v5496_v49 = vld [vmem:[%s6930_s6 + $0x60] ss:$8 sps:$4 sm:$0xff]   ;;  %v5498_v51 = vld [vmem:[%s6930_s6 + $0x74] ss:$8 sps:$4 sm:$0xff]  }
 0x1ab   : > { %4629 = vmatprep.mubr.bf16.mxu0 %v6962_v34  ;;  %v5494_v48 = vld [vmem:[%s6930_s6 + $0x664] ss:$8 sps:$4 sm:$0xff]   ;;  %v5497_v50 = vld [vmem:[%s6930_s6 + $0x660] ss:$8 sps:$4 sm:$0xff]   ;;  %v5500_v52 = vld [vmem:[%s6930_s6 + $0x674] ss:$8 sps:$4 sm:$0xff]  }
 0x1ac   : > { %4356 = vmatpush1.bf16.msra.mxu1 %v5472_v31  ;;  %v5502_v53 = vld [vmem:[%s6930_s6 + $0x70] ss:$8 sps:$4 sm:$0xff]   ;;  %v5504_v55 = vld [vmem:[%s6930_s6 + $0x84] ss:$8 sps:$4 sm:$0xff]   ;;  %v5508_v57 = vld [vmem:[%s6930_s6 + $0x80] ss:$8 sps:$4 sm:$0xff]  }
 0x1ad   : > { %4602 = vmatpush1.bf16.msra.mxu0 %v5473_v32  ;;  %4357 = vmatprep.subr.bf16.mxu1 %v5474_v35  ;;  %v5503_v54 = vld [vmem:[%s6930_s6 + $0x670] ss:$8 sps:$4 sm:$0xff]   ;;  %v5506_v56 = vld [vmem:[%s6930_s6 + $0x684] ss:$8 sps:$4 sm:$0xff]   ;;  %v5509_v58 = vld [vmem:[%s6930_s6 + $0x680] ss:$8 sps:$4 sm:$0xff]   ;;  %v7024_v32 = vrot.slane %v6942_v22, %v6935_v18  ;;  %v7028_v35 = vrot.slane %v6945_v23, %v6935_v18  ;;  %v2299_v22 = vcombine.high %v6962_v34, %v6962_v34 }
 0x1ae   : > { %4603 = vmatprep.subr.bf16.mxu0 %v5476_v36  ;;  %v5510_v59 = vld [vmem:[%s6930_s6 + $0x94] ss:$8 sps:$4 sm:$0xff]   ;;  %v5514_v61 = vld [vmem:[%s6930_s6 + $0x90] ss:$8 sps:$4 sm:$0xff]   ;;  %v5516_v63 = vld [vmem:[%s6930_s6 + $0xa4] ss:$8 sps:$4 sm:$0xff]  }
 0x1af   : > { %v5512_v60 = vld [vmem:[%s6930_s6 + $0x694] ss:$8 sps:$4 sm:$0xff]   ;;  %v5515_v62 = vld [vmem:[%s6930_s6 + $0x690] ss:$8 sps:$4 sm:$0xff]   ;;  %v5518_v0 = vld [vmem:[%s6930_s6 + $0x6a4] ss:$8 sps:$4 sm:$0xff]  }
 0x1b0   : > { %4358 = vmatpush1.bf16.msra.mxu1 %v5478_v37  ;;  %v5520_v1 = vld [vmem:[%s6930_s6 + $0xa0] ss:$8 sps:$4 sm:$0xff]   ;;  %v5522_v3 = vld [vmem:[%s6930_s6 + $0xb4] ss:$8 sps:$4 sm:$0xff]   ;;  %v5526_v5 = vld [vmem:[%s6930_s6 + $0xb0] ss:$8 sps:$4 sm:$0xff]  }
 0x1b1   : > { %4604 = vmatpush1.bf16.msra.mxu0 %v5479_v38  ;;  %4359 = vmatprep.subr.bf16.mxu1 %v5480_v39  ;;  %v5521_v2 = vld [vmem:[%s6930_s6 + $0x6a0] ss:$8 sps:$4 sm:$0xff]   ;;  %v5524_v4 = vld [vmem:[%s6930_s6 + $0x6b4] ss:$8 sps:$4 sm:$0xff]   ;;  %v5527_v6 = vld [vmem:[%s6930_s6 + $0x6b0] ss:$8 sps:$4 sm:$0xff]   ;;  %v2249_v38 = vcombine.high %v6959_v33, %v6959_v33 }
 0x1b2   : > { %4605 = vmatprep.subr.bf16.mxu0 %v5482_v40  ;;  %v5528_v7 = vld [vmem:[%s6930_s6 + $0xc4] ss:$8 sps:$4 sm:$0xff]   ;;  %v5532_v9 = vld [vmem:[%s6930_s6 + $0xc0] ss:$8 sps:$4 sm:$0xff]   ;;  %v5534_v11 = vld [vmem:[%s6930_s6 + $0xd4] ss:$8 sps:$4 sm:$0xff]  }
 0x1b3   : > { %v5530_v8 = vld [vmem:[%s6930_s6 + $0x6c4] ss:$8 sps:$4 sm:$0xff]   ;;  %v5533_v10 = vld [vmem:[%s6930_s6 + $0x6c0] ss:$8 sps:$4 sm:$0xff]   ;;  %v5536_v14 = vld [vmem:[%s6930_s6 + $0x6d4] ss:$8 sps:$4 sm:$0xff]  }
 0x1b4   : > { %4360 = vmatpush1.bf16.msra.mxu1 %v5484_v41  ;;  %v5538_v15 = vld [vmem:[%s6930_s6 + $0xd0] ss:$8 sps:$4 sm:$0xff]   ;;  %v5540_v17 = vld [vmem:[%s6930_s6 + $0xe4] ss:$8 sps:$4 sm:$0xff]   ;;  %v5544_v20 = vld [vmem:[%s6930_s6 + $0xe0] ss:$8 sps:$4 sm:$0xff]  }
 0x1b5   : > { %4606 = vmatpush1.bf16.msra.mxu0 %v5485_v42  ;;  %4361 = vmatprep.subr.bf16.mxu1 %v5486_v43  ;;  %v5539_v16 = vld [vmem:[%s6930_s6 + $0x6d0] ss:$8 sps:$4 sm:$0xff]   ;;  %v5542_v19 = vld [vmem:[%s6930_s6 + $0x6e4] ss:$8 sps:$4 sm:$0xff]   ;;  %v5545_v21 = vld [vmem:[%s6930_s6 + $0x6e0] ss:$8 sps:$4 sm:$0xff]  }
 0x1b6   : > { %4607 = vmatprep.subr.bf16.mxu0 %v5488_v44  ;;  %v5546_v24 = vld [vmem:[%s6930_s6 + $0xf4] ss:$8 sps:$4 sm:$0xff]   ;;  %v5550_v26 = vld [vmem:[%s6930_s6 + $0xf0] ss:$8 sps:$4 sm:$0xff]   ;;  %v5555_v28 = vld [vmem:[%s6930_s6 + $0x104] ss:$8 sps:$4 sm:$0xff]  }
 0x1b7   : > { %v5548_v25 = vld [vmem:[%s6930_s6 + $0x6f4] ss:$8 sps:$4 sm:$0xff]   ;;  %v5551_v27 = vld [vmem:[%s6930_s6 + $0x6f0] ss:$8 sps:$4 sm:$0xff]   ;;  %v5559_v29 = vld [vmem:[%s6930_s6 + $0x704] ss:$8 sps:$4 sm:$0xff]  }
 0x1b8   : > { %4362 = vmatpush1.bf16.msra.mxu1 %v5490_v45  ;;  %v5553_v30 = vld [vmem:[%s6930_s6 + $0x100] ss:$8 sps:$4 sm:$0xff]   ;;  %v5562_v36 = vld [vmem:[%s6930_s6 + $0x114] ss:$8 sps:$4 sm:$0xff]   ;;  %v5560_v23 = vld [vmem:[%s6930_s6 + $0x110] ss:$8 sps:$4 sm:$0xff]  }
 0x1b9   : > { %4608 = vmatpush1.bf16.msra.mxu0 %v5491_v46  ;;  %4363 = vmatprep.subr.bf16.mxu1 %v5492_v47  ;;  %v5557_v31 = vld [vmem:[%s6930_s6 + $0x700] ss:$8 sps:$4 sm:$0xff]   ;;  %v5565_v37 = vld [vmem:[%s6930_s6 + $0x714] ss:$8 sps:$4 sm:$0xff]   ;;  %v5563_v39 = vld [vmem:[%s6930_s6 + $0x710] ss:$8 sps:$4 sm:$0xff]  }
 0x1ba   : > { %4609 = vmatprep.subr.bf16.mxu0 %v5494_v48  ;;  %v5568_v40 = vld [vmem:[%s6930_s6 + $0x124] ss:$8 sps:$4 sm:$0xff]   ;;  %v5566_v34 = vld [vmem:[%s6930_s6 + $0x120] ss:$8 sps:$4 sm:$0xff]   ;;  %v5574_v42 = vld [vmem:[%s6930_s6 + $0x134] ss:$8 sps:$4 sm:$0xff]  }
 0x1bb   : > { %v5571_v33 = vld [vmem:[%s6930_s6 + $0x724] ss:$8 sps:$4 sm:$0xff]   ;;  %v5569_v41 = vld [vmem:[%s6930_s6 + $0x720] ss:$8 sps:$4 sm:$0xff]   ;;  %v5577_v43 = vld [vmem:[%s6930_s6 + $0x734] ss:$8 sps:$4 sm:$0xff]  }
 0x1bc   : > { %4364 = vmatpush1.bf16.msra.mxu1 %v5496_v49  ;;  %v5572_v44 = vld [vmem:[%s6930_s6 + $0x130] ss:$8 sps:$4 sm:$0xff]   ;;  %v5580_v46 = vld [vmem:[%s6930_s6 + $0x144] ss:$8 sps:$4 sm:$0xff]   ;;  %v5578_v48 = vld [vmem:[%s6930_s6 + $0x140] ss:$8 sps:$4 sm:$0xff]  }
 0x1bd   : > { %4610 = vmatpush1.bf16.msra.mxu0 %v5497_v50  ;;  %4365 = vmatprep.subr.bf16.mxu1 %v5498_v51  ;;  %v5575_v45 = vld [vmem:[%s6930_s6 + $0x730] ss:$8 sps:$4 sm:$0xff]   ;;  %v5583_v47 = vld [vmem:[%s6930_s6 + $0x744] ss:$8 sps:$4 sm:$0xff]   ;;  %v5581_v49 = vld [vmem:[%s6930_s6 + $0x740] ss:$8 sps:$4 sm:$0xff]  }
 0x1be   : > { %4611 = vmatprep.subr.bf16.mxu0 %v5500_v52  ;;  %v5586_v50 = vld [vmem:[%s6930_s6 + $0x154] ss:$8 sps:$4 sm:$0xff]   ;;  %v5584_v52 = vld [vmem:[%s6930_s6 + $0x150] ss:$8 sps:$4 sm:$0xff]   ;;  %s7481_s17 = smov (!%p1780_p8, %s4979_s17), 7 }
 0x1bf   : > { %v5589_v51 = vld [vmem:[%s6930_s6 + $0x754] ss:$8 sps:$4 sm:$0xff]   ;;  %s1782_s21 = scalar_lea.vmem %s7475_s2, %s7481_s17  ;;  %s1787_s22 = scalar_lea.vmem %s7476_s3, %s7481_s17 }
 0x1c0   : > { %4366 = vmatpush1.bf16.msra.mxu1 %v5502_v53  ;;  %v5587_v53 = vld [vmem:[%s6930_s6 + $0x750] ss:$8 sps:$4 sm:$0xff]  }
 0x1c1   : > { %4612 = vmatpush1.bf16.msra.mxu0 %v5503_v54  ;;  %4367 = vmatprep.subr.bf16.mxu1 %v5504_v55  ;;  %v5592_v54 = vld [vmem:[%s6930_s6 + $0x164] ss:$8 sps:$4 sm:$0xff]  }
 0x1c2   : > { %4613 = vmatprep.subr.bf16.mxu0 %v5506_v56  ;;  %v5595_v55 = vld [vmem:[%s6930_s6 + $0x764] ss:$8 sps:$4 sm:$0xff]   ;;  %v5590_v56 = vld [vmem:[%s6930_s6 + $0x160] ss:$8 sps:$4 sm:$0xff]  }
 0x1c4   : > { %4368 = vmatpush1.bf16.msra.mxu1 %v5508_v57  ;;  %v5593_v57 = vld [vmem:[%s6930_s6 + $0x760] ss:$8 sps:$4 sm:$0xff]  }
 0x1c5   : > { %4614 = vmatpush1.bf16.msra.mxu0 %v5509_v58  ;;  %4369 = vmatprep.subr.bf16.mxu1 %v5510_v59  ;;  %v5598_v58 = vld [vmem:[%s6930_s6 + $0x174] ss:$8 sps:$4 sm:$0xff]  }
 0x1c6   : > { %4615 = vmatprep.subr.bf16.mxu0 %v5512_v60  ;;  %v5601_v59 = vld [vmem:[%s6930_s6 + $0x774] ss:$8 sps:$4 sm:$0xff]   ;;  %v5596_v60 = vld [vmem:[%s6930_s6 + $0x170] ss:$8 sps:$4 sm:$0xff]  }
 0x1c8   : > { %4370 = vmatpush1.bf16.msra.mxu1 %v5514_v61  ;;  %v5599_v61 = vld [vmem:[%s6930_s6 + $0x770] ss:$8 sps:$4 sm:$0xff]  }
 0x1c9   : > { %4616 = vmatpush1.bf16.msra.mxu0 %v5515_v62  ;;  %4371 = vmatprep.subr.bf16.mxu1 %v5516_v63  ;;  %v5604_v62 = vld [vmem:[%s6930_s6 + $0x184] ss:$8 sps:$4 sm:$0xff]  }
 0x1ca   : > { %4617 = vmatprep.subr.bf16.mxu0 %v5518_v0  ;;  %v5607_v63 = vld [vmem:[%s6930_s6 + $0x784] ss:$8 sps:$4 sm:$0xff]   ;;  %v5602_v0 = vld [vmem:[%s6930_s6 + $0x180] ss:$8 sps:$4 sm:$0xff]  }
 0x1cc   : > { %4372 = vmatpush1.bf16.msra.mxu1 %v5520_v1  ;;  %v5605_v1 = vld [vmem:[%s6930_s6 + $0x780] ss:$8 sps:$4 sm:$0xff]  }
 0x1cd   : > { %4618 = vmatpush1.bf16.msra.mxu0 %v5521_v2  ;;  %4373 = vmatprep.subr.bf16.mxu1 %v5522_v3  ;;  %v5610_v2 = vld [vmem:[%s6930_s6 + $0x194] ss:$8 sps:$4 sm:$0xff]  }
 0x1ce   : > { %4619 = vmatprep.subr.bf16.mxu0 %v5524_v4  ;;  %v5613_v3 = vld [vmem:[%s6930_s6 + $0x794] ss:$8 sps:$4 sm:$0xff]   ;;  %v5608_v4 = vld [vmem:[%s6930_s6 + $0x190] ss:$8 sps:$4 sm:$0xff]  }
 0x1d0   : > { %4374 = vmatpush1.bf16.msra.mxu1 %v5526_v5  ;;  %v5611_v5 = vld [vmem:[%s6930_s6 + $0x790] ss:$8 sps:$4 sm:$0xff]  }
 0x1d1   : > { %4620 = vmatpush1.bf16.msra.mxu0 %v5527_v6  ;;  %4375 = vmatprep.subr.bf16.mxu1 %v5528_v7  ;;  %v5616_v6 = vld [vmem:[%s6930_s6 + $0x1a4] ss:$8 sps:$4 sm:$0xff]  }
 0x1d2   : > { %4621 = vmatprep.subr.bf16.mxu0 %v5530_v8  ;;  %v5619_v7 = vld [vmem:[%s6930_s6 + $0x7a4] ss:$8 sps:$4 sm:$0xff]   ;;  %v5614_v8 = vld [vmem:[%s6930_s6 + $0x1a0] ss:$8 sps:$4 sm:$0xff]  }
 0x1d4   : > { %4376 = vmatpush1.bf16.msra.mxu1 %v5532_v9  ;;  %v5617_v9 = vld [vmem:[%s6930_s6 + $0x7a0] ss:$8 sps:$4 sm:$0xff]  }
 0x1d5   : > { %4622 = vmatpush1.bf16.msra.mxu0 %v5533_v10  ;;  %4377 = vmatprep.subr.bf16.mxu1 %v5534_v11  ;;  %v5622_v10 = vld [vmem:[%s6930_s6 + $0x1b4] ss:$8 sps:$4 sm:$0xff]  }
 0x1d6   : > { %4623 = vmatprep.subr.bf16.mxu0 %v5536_v14  ;;  %v5625_v11 = vld [vmem:[%s6930_s6 + $0x7b4] ss:$8 sps:$4 sm:$0xff]   ;;  %v5620_v14 = vld [vmem:[%s6930_s6 + $0x1b0] ss:$8 sps:$4 sm:$0xff]  }
 0x1d8   : > { %4378 = vmatpush1.bf16.msra.mxu1 %v5538_v15  ;;  %v5623_v15 = vld [vmem:[%s6930_s6 + $0x7b0] ss:$8 sps:$4 sm:$0xff]  }
 0x1d9   : > { %4624 = vmatpush1.bf16.msra.mxu0 %v5539_v16  ;;  %4379 = vmatprep.subr.bf16.mxu1 %v5540_v17  ;;  %v5628_v16 = vld [vmem:[%s6930_s6 + $0x1c4] ss:$8 sps:$4 sm:$0xff]  }
 0x1da   : > { %4625 = vmatprep.subr.bf16.mxu0 %v5542_v19  ;;  %v5631_v17 = vld [vmem:[%s6930_s6 + $0x7c4] ss:$8 sps:$4 sm:$0xff]   ;;  %v5626_v19 = vld [vmem:[%s6930_s6 + $0x1c0] ss:$8 sps:$4 sm:$0xff]  }
 0x1dc   : > { %4380 = vmatpush1.bf16.msra.mxu1 %v5544_v20  ;;  %v5629_v20 = vld [vmem:[%s6930_s6 + $0x7c0] ss:$8 sps:$4 sm:$0xff]  }
 0x1dd   : > { %4626 = vmatpush1.bf16.msra.mxu0 %v5545_v21  ;;  %4381 = vmatprep.subr.bf16.mxu1 %v5546_v24  ;;  %v5634_v21 = vld [vmem:[%s6930_s6 + $0x1d4] ss:$8 sps:$4 sm:$0xff]  }
 0x1de   : > { %4627 = vmatprep.subr.bf16.mxu0 %v5548_v25  ;;  %v5637_v24 = vld [vmem:[%s6930_s6 + $0x7d4] ss:$8 sps:$4 sm:$0xff]   ;;  %v5632_v25 = vld [vmem:[%s6930_s6 + $0x1d0] ss:$8 sps:$4 sm:$0xff]  }
 0x1e0   : > { %4382 = vmatpush1.bf16.msra.mxu1 %v5550_v26  ;;  %v5635_v26 = vld [vmem:[%s6930_s6 + $0x7d0] ss:$8 sps:$4 sm:$0xff]  }
 0x1e1   : > { %4628 = vmatpush1.bf16.msra.mxu0 %v5551_v27  ;;  %4392 = vmatprep.subr.bf16.mxu1 %v5555_v28  ;;  %v5640_v27 = vld [vmem:[%s6930_s6 + $0x1e4] ss:$8 sps:$4 sm:$0xff]  }
 0x1e2   : > { %4638 = vmatprep.subr.bf16.mxu0 %v5559_v29  ;;  %v5643_v28 = vld [vmem:[%s6930_s6 + $0x7e4] ss:$8 sps:$4 sm:$0xff]   ;;  %v2202_v29 = vcombine.high %v6928_v13, %v6928_v13 }
 0x1e3   : > { %4384 = vmatmul.mubr.bf16.vlgmr.msra.gmra.mrb[0].mxu1 %v7024_v32  ;;  %v5652_v13 = vld [vmem:[%s6930_s6 + $0x204] ss:$8 sps:$4 sm:$0xff]  }
 0x1e4   : > { %4630 = vmatmul.mubr.bf16.vlgmr.msra.gmra.mrb[0].mxu0 %v7028_v35  ;;  %4393 = vmatpush1.bf16.msra.mxu1 %v5553_v30  ;;  %v5638_v30 = vld [vmem:[%s6930_s6 + $0x1e0] ss:$8 sps:$4 sm:$0xff]  }
 0x1e5   : > { %4639 = vmatpush1.bf16.msra.mxu0 %v5557_v31  ;;  %4394 = vmatprep.subr.bf16.mxu1 %v5562_v36  ;;  %v5641_v31 = vld [vmem:[%s6930_s6 + $0x7e0] ss:$8 sps:$4 sm:$0xff]   ;;  %v5646_v36 = vld [vmem:[%s6930_s6 + $0x1f4] ss:$8 sps:$4 sm:$0xff]  }
 0x1e6   : > { %4640 = vmatprep.subr.bf16.mxu0 %v5565_v37  ;;  %4424 = vmatprep.mubr.bf16.mxu1 %v2249_v38  ;;  %v5649_v37 = vld [vmem:[%s6930_s6 + $0x7f4] ss:$8 sps:$4 sm:$0xff]   ;;  %v7097_v38 = vrot.slane %v2202_v29, %v6935_v18  ;;  %v5716_v29 = vld [vmem:[%s6930_s6 + $0x2b0] ss:$8 sps:$4 sm:$0xff]  }
 0x1e7   : > { %4670 = vmatprep.mubr.bf16.mxu0 %v2299_v22  ;;  %v5644_v22 = vld [vmem:[%s6930_s6 + $0x1f0] ss:$8 sps:$4 sm:$0xff]  }
 0x1e8   : > { %4395 = vmatpush1.bf16.msra.mxu1 %v5560_v23  ;;  %v5647_v23 = vld [vmem:[%s6930_s6 + $0x7f0] ss:$8 sps:$4 sm:$0xff]  }
 0x1e9   : > { %4641 = vmatpush1.bf16.msra.mxu0 %v5563_v39  ;;  %4396 = vmatprep.subr.bf16.mxu1 %v5568_v40  ;;  %v5655_v39 = vld [vmem:[%s6930_s6 + $0x804] ss:$8 sps:$4 sm:$0xff]   ;;  %v2218_v40 = vcombine.high %v7097_v38, %v7097_v38 }
 0x1ea   : > { %4642 = vmatprep.subr.bf16.mxu0 %v5571_v33  ;;  %v2247_v33 = vcombine.high %v7024_v32, %v7024_v32 }
 0x1eb   : > { %v7119_v32 = vrot.slane %v2218_v40, %v6935_v18  ;;  %v5731_v40 = vld [vmem:[%s6930_s6 + $0x8d0] ss:$8 sps:$4 sm:$0xff]  }
 0x1ec   : > { %4397 = vmatpush1.bf16.msra.mxu1 %v5566_v34  ;;  %v2297_v34 = vcombine.high %v7028_v35, %v7028_v35 }
 0x1ed   : > { %4643 = vmatpush1.bf16.msra.mxu0 %v5569_v41  ;;  %4398 = vmatprep.subr.bf16.mxu1 %v5574_v42  ;;  %v5650_v41 = vld [vmem:[%s6930_s6 + $0x200] ss:$8 sps:$4 sm:$0xff]  }
 0x1ee   : > { %4644 = vmatprep.subr.bf16.mxu0 %v5577_v43  ;;  %v5653_v42 = vld [vmem:[%s6930_s6 + $0x800] ss:$8 sps:$4 sm:$0xff]   ;;  %v5658_v43 = vld [vmem:[%s6930_s6 + $0x214] ss:$8 sps:$4 sm:$0xff]  }
 0x1f0   : > { %4399 = vmatpush1.bf16.msra.mxu1 %v5572_v44  ;;  %v5661_v44 = vld [vmem:[%s6930_s6 + $0x814] ss:$8 sps:$4 sm:$0xff]  }
 0x1f1   : > { %4645 = vmatpush1.bf16.msra.mxu0 %v5575_v45  ;;  %4400 = vmatprep.subr.bf16.mxu1 %v5580_v46  ;;  %v7116_v45 = vld [vmem:[%s7473_s0 + $0x10] sm:$0xff] }
 0x1f2   : > { %4646 = vmatprep.subr.bf16.mxu0 %v5583_v47  ;;  %v7123_v35 = vrot.slane %v7116_v45, %v6935_v18  ;;  %v5656_v46 = vld [vmem:[%s6930_s6 + $0x210] ss:$8 sps:$4 sm:$0xff]  }
 0x1f3   : > { %v5659_v47 = vld [vmem:[%s6930_s6 + $0x810] ss:$8 sps:$4 sm:$0xff]  }
 0x1f4   : > { %4401 = vmatpush1.bf16.msra.mxu1 %v5578_v48  ;;  %v2315_v48 = vcombine.high %v7123_v35, %v7123_v35 }
 0x1f5   : > { %4647 = vmatpush1.bf16.msra.mxu0 %v5581_v49  ;;  %4402 = vmatprep.subr.bf16.mxu1 %v5586_v50  ;;  %v5664_v49 = vld [vmem:[%s6930_s6 + $0x224] ss:$8 sps:$4 sm:$0xff]  }
 0x1f6   : > { %4648 = vmatprep.subr.bf16.mxu0 %v5589_v51  ;;  %v5667_v50 = vld [vmem:[%s6930_s6 + $0x824] ss:$8 sps:$4 sm:$0xff]   ;;  %v7133_v51 = vrot.slane %v2315_v48, %v6935_v18 }
 0x1f7   : > { %v5748_v48 = vld [vmem:[%s6930_s6 + $0x304] ss:$8 sps:$4 sm:$0xff]  }
 0x1f8   : > { %4403 = vmatpush1.bf16.msra.mxu1 %v5584_v52  ;;  %v5662_v52 = vld [vmem:[%s6930_s6 + $0x220] ss:$8 sps:$4 sm:$0xff]  }
 0x1f9   : > { %4649 = vmatpush1.bf16.msra.mxu0 %v5587_v53  ;;  %4404 = vmatprep.subr.bf16.mxu1 %v5592_v54  ;;  %v5665_v53 = vld [vmem:[%s6930_s6 + $0x820] ss:$8 sps:$4 sm:$0xff]   ;;  %v5670_v54 = vld [vmem:[%s6930_s6 + $0x234] ss:$8 sps:$4 sm:$0xff]  }
 0x1fa   : > { %4650 = vmatprep.subr.bf16.mxu0 %v5595_v55  ;;  %v5673_v55 = vld [vmem:[%s6930_s6 + $0x834] ss:$8 sps:$4 sm:$0xff]  }
 0x1fc   : > { %4405 = vmatpush1.bf16.msra.mxu1 %v5590_v56  ;;  %v5668_v56 = vld [vmem:[%s6930_s6 + $0x230] ss:$8 sps:$4 sm:$0xff]  }
 0x1fd   : > { %4651 = vmatpush1.bf16.msra.mxu0 %v5593_v57  ;;  %4406 = vmatprep.subr.bf16.mxu1 %v5598_v58  ;;  %v5671_v57 = vld [vmem:[%s6930_s6 + $0x830] ss:$8 sps:$4 sm:$0xff]   ;;  %v5676_v58 = vld [vmem:[%s6930_s6 + $0x244] ss:$8 sps:$4 sm:$0xff]  }
 0x1fe   : > { %4652 = vmatprep.subr.bf16.mxu0 %v5601_v59  ;;  %v5679_v59 = vld [vmem:[%s6930_s6 + $0x844] ss:$8 sps:$4 sm:$0xff]  }
 0x200   : > { %4407 = vmatpush1.bf16.msra.mxu1 %v5596_v60  ;;  %v5674_v60 = vld [vmem:[%s6930_s6 + $0x240] ss:$8 sps:$4 sm:$0xff]  }
 0x201   : > { %4653 = vmatpush1.bf16.msra.mxu0 %v5599_v61  ;;  %4408 = vmatprep.subr.bf16.mxu1 %v5604_v62  ;;  %v5677_v61 = vld [vmem:[%s6930_s6 + $0x840] ss:$8 sps:$4 sm:$0xff]   ;;  %v5682_v62 = vld [vmem:[%s6930_s6 + $0x254] ss:$8 sps:$4 sm:$0xff]  }
 0x202   : > { %4654 = vmatprep.subr.bf16.mxu0 %v5607_v63  ;;  %v5685_v63 = vld [vmem:[%s6930_s6 + $0x854] ss:$8 sps:$4 sm:$0xff]  }
 0x204   : > { %4409 = vmatpush1.bf16.msra.mxu1 %v5602_v0  ;;  %v5680_v0 = vld [vmem:[%s6930_s6 + $0x250] ss:$8 sps:$4 sm:$0xff]  }
 0x205   : > { %4655 = vmatpush1.bf16.msra.mxu0 %v5605_v1  ;;  %4410 = vmatprep.subr.bf16.mxu1 %v5610_v2  ;;  %v5683_v1 = vld [vmem:[%s6930_s6 + $0x850] ss:$8 sps:$4 sm:$0xff]   ;;  %v5688_v2 = vld [vmem:[%s6930_s6 + $0x264] ss:$8 sps:$4 sm:$0xff]  }
 0x206   : > { %4656 = vmatprep.subr.bf16.mxu0 %v5613_v3  ;;  %v5691_v3 = vld [vmem:[%s6930_s6 + $0x864] ss:$8 sps:$4 sm:$0xff]  }
 0x208   : > { %4411 = vmatpush1.bf16.msra.mxu1 %v5608_v4  ;;  %v5686_v4 = vld [vmem:[%s6930_s6 + $0x260] ss:$8 sps:$4 sm:$0xff]  }
 0x209   : > { %4657 = vmatpush1.bf16.msra.mxu0 %v5611_v5  ;;  %4412 = vmatprep.subr.bf16.mxu1 %v5616_v6  ;;  %v5689_v5 = vld [vmem:[%s6930_s6 + $0x860] ss:$8 sps:$4 sm:$0xff]   ;;  %v5694_v6 = vld [vmem:[%s6930_s6 + $0x274] ss:$8 sps:$4 sm:$0xff]  }
 0x20a   : > { %4658 = vmatprep.subr.bf16.mxu0 %v5619_v7  ;;  %v5697_v7 = vld [vmem:[%s6930_s6 + $0x874] ss:$8 sps:$4 sm:$0xff]  }
 0x20c   : > { %4413 = vmatpush1.bf16.msra.mxu1 %v5614_v8  ;;  %v5692_v8 = vld [vmem:[%s6930_s6 + $0x270] ss:$8 sps:$4 sm:$0xff]  }
 0x20d   : > { %4659 = vmatpush1.bf16.msra.mxu0 %v5617_v9  ;;  %4414 = vmatprep.subr.bf16.mxu1 %v5622_v10  ;;  %v5695_v9 = vld [vmem:[%s6930_s6 + $0x870] ss:$8 sps:$4 sm:$0xff]   ;;  %v5700_v10 = vld [vmem:[%s6930_s6 + $0x284] ss:$8 sps:$4 sm:$0xff]  }
 0x20e   : > { %4660 = vmatprep.subr.bf16.mxu0 %v5625_v11  ;;  %v5703_v11 = vld [vmem:[%s6930_s6 + $0x884] ss:$8 sps:$4 sm:$0xff]  }
 0x210   : > { %4415 = vmatpush1.bf16.msra.mxu1 %v5620_v14  ;;  %v5698_v14 = vld [vmem:[%s6930_s6 + $0x280] ss:$8 sps:$4 sm:$0xff]  }
 0x211   : > { %4661 = vmatpush1.bf16.msra.mxu0 %v5623_v15  ;;  %4416 = vmatprep.subr.bf16.mxu1 %v5628_v16  ;;  %v5701_v15 = vld [vmem:[%s6930_s6 + $0x880] ss:$8 sps:$4 sm:$0xff]   ;;  %v5706_v16 = vld [vmem:[%s6930_s6 + $0x294] ss:$8 sps:$4 sm:$0xff]  }
 0x212   : > { %4662 = vmatprep.subr.bf16.mxu0 %v5631_v17  ;;  %v5709_v17 = vld [vmem:[%s6930_s6 + $0x894] ss:$8 sps:$4 sm:$0xff]  }
 0x214   : > { %4417 = vmatpush1.bf16.msra.mxu1 %v5626_v19  ;;  %v5704_v19 = vld [vmem:[%s6930_s6 + $0x290] ss:$8 sps:$4 sm:$0xff]  }
 0x215   : > { %4663 = vmatpush1.bf16.msra.mxu0 %v5629_v20  ;;  %4418 = vmatprep.subr.bf16.mxu1 %v5634_v21  ;;  %v5707_v20 = vld [vmem:[%s6930_s6 + $0x890] ss:$8 sps:$4 sm:$0xff]   ;;  %v5712_v21 = vld [vmem:[%s6930_s6 + $0x2a4] ss:$8 sps:$4 sm:$0xff]  }
 0x216   : > { %4664 = vmatprep.subr.bf16.mxu0 %v5637_v24  ;;  %v5715_v24 = vld [vmem:[%s6930_s6 + $0x8a4] ss:$8 sps:$4 sm:$0xff]  }
 0x218   : > { %4419 = vmatpush1.bf16.msra.mxu1 %v5632_v25  ;;  %v5710_v25 = vld [vmem:[%s6930_s6 + $0x2a0] ss:$8 sps:$4 sm:$0xff]  }
 0x219   : > { %4665 = vmatpush1.bf16.msra.mxu0 %v5635_v26  ;;  %4420 = vmatprep.subr.bf16.mxu1 %v5640_v27  ;;  %v5713_v26 = vld [vmem:[%s6930_s6 + $0x8a0] ss:$8 sps:$4 sm:$0xff]   ;;  %v5718_v27 = vld [vmem:[%s6930_s6 + $0x2b4] ss:$8 sps:$4 sm:$0xff]  }
 0x21a   : > { %4666 = vmatprep.subr.bf16.mxu0 %v5643_v28  ;;  %v5721_v28 = vld [vmem:[%s6930_s6 + $0x8b4] ss:$8 sps:$4 sm:$0xff]  }
 0x21c   : > { %4421 = vmatpush1.bf16.msra.mxu1 %v5638_v30  ;;  %v5719_v30 = vld [vmem:[%s6930_s6 + $0x8b0] ss:$8 sps:$4 sm:$0xff]  }
 0x21d   : > { %4667 = vmatpush1.bf16.msra.mxu0 %v5641_v31  ;;  %4422 = vmatprep.subr.bf16.mxu1 %v5646_v36  ;;  %v5724_v31 = vld [vmem:[%s6930_s6 + $0x2c4] ss:$8 sps:$4 sm:$0xff]  }
 0x21e   : > { %4668 = vmatprep.subr.bf16.mxu0 %v5649_v37  ;;  %v5727_v36 = vld [vmem:[%s6930_s6 + $0x8c4] ss:$8 sps:$4 sm:$0xff]   ;;  %v5722_v37 = vld [vmem:[%s6930_s6 + $0x2c0] ss:$8 sps:$4 sm:$0xff]  }
 0x220   : > { %4423 = vmatpush1.bf16.msra.mxu1 %v5644_v22  ;;  %v5725_v22 = vld [vmem:[%s6930_s6 + $0x8c0] ss:$8 sps:$4 sm:$0xff]  }
 0x221   : > { %4669 = vmatpush1.bf16.msra.mxu0 %v5647_v23  ;;  %4433 = vmatprep.subr.bf16.mxu1 %v5652_v13  ;;  %v5730_v23 = vld [vmem:[%s6930_s6 + $0x2d4] ss:$8 sps:$4 sm:$0xff]  }
 0x222   : > { %4679 = vmatprep.subr.bf16.mxu0 %v5655_v39  ;;  %v5733_v13 = vld [vmem:[%s6930_s6 + $0x8d4] ss:$8 sps:$4 sm:$0xff]   ;;  %v5728_v39 = vld [vmem:[%s6930_s6 + $0x2d0] ss:$8 sps:$4 sm:$0xff]  }
 0x223   : > { %4425 = vmatmul.mubr.bf16.vlgmr.msra.gmra.mrb[0].mxu1 %v2247_v33  ;;  %v5736_v33 = vld [vmem:[%s6930_s6 + $0x2e4] ss:$8 sps:$4 sm:$0xff]  }
 0x224   : > { %4671 = vmatmul.mubr.bf16.vlgmr.msra.gmra.mrb[0].mxu0 %v2297_v34  ;;  %4434 = vmatpush1.bf16.msra.mxu1 %v5650_v41  ;;  %v5739_v34 = vld [vmem:[%s6930_s6 + $0x8e4] ss:$8 sps:$4 sm:$0xff]   ;;  %v5734_v41 = vld [vmem:[%s6930_s6 + $0x2e0] ss:$8 sps:$4 sm:$0xff]  }
 0x225   : > { %4680 = vmatpush1.bf16.msra.mxu0 %v5653_v42  ;;  %4435 = vmatprep.subr.bf16.mxu1 %v5658_v43  ;;  %v5737_v42 = vld [vmem:[%s6930_s6 + $0x8e0] ss:$8 sps:$4 sm:$0xff]   ;;  %v5742_v43 = vld [vmem:[%s6930_s6 + $0x2f4] ss:$8 sps:$4 sm:$0xff]  }
 0x226   : > { %4681 = vmatprep.subr.bf16.mxu0 %v5661_v44  ;;  %4465 = vmatprep.mubr.bf16.mxu1 %v7119_v32  ;;  %v5745_v44 = vld [vmem:[%s6930_s6 + $0x8f4] ss:$8 sps:$4 sm:$0xff]  }
 0x227   : > { %4711 = vmatprep.mubr.bf16.mxu0 %v7133_v51 }
 0x228   : > { %4436 = vmatpush1.bf16.msra.mxu1 %v5656_v46  ;;  %v5740_v46 = vld [vmem:[%s6930_s6 + $0x2f0] ss:$8 sps:$4 sm:$0xff]  }
 0x229   : > { %4682 = vmatpush1.bf16.msra.mxu0 %v5659_v47  ;;  %4437 = vmatprep.subr.bf16.mxu1 %v5664_v49  ;;  %v5743_v47 = vld [vmem:[%s6930_s6 + $0x8f0] ss:$8 sps:$4 sm:$0xff]   ;;  %v5751_v49 = vld [vmem:[%s6930_s6 + $0x904] ss:$8 sps:$4 sm:$0xff]  }
 0x22a   : > { %4683 = vmatprep.subr.bf16.mxu0 %v5667_v50  ;;  %v5746_v50 = vld [vmem:[%s6930_s6 + $0x300] ss:$8 sps:$4 sm:$0xff]  }
 0x22c   : > { %4438 = vmatpush1.bf16.msra.mxu1 %v5662_v52  ;;  %v7195_v52 = vrot.slane %v7097_v38, %v6935_v18  ;;  %v2347_v38 = vcombine.high %v7133_v51, %v7133_v51  ;;  %v5758_v51 = vld [vmem:[%s6930_s6 + $0x320] ss:$8 sps:$4 sm:$0xff]  }
 0x22d   : > { %4684 = vmatpush1.bf16.msra.mxu0 %v5665_v53  ;;  %4439 = vmatprep.subr.bf16.mxu1 %v5670_v54  ;;  %v7199_v53 = vrot.slane %v7123_v35, %v6935_v18  ;;  %v5749_v54 = vld [vmem:[%s6930_s6 + $0x900] ss:$8 sps:$4 sm:$0xff]   ;;  %v5752_v35 = vld [vmem:[%s6930_s6 + $0x310] ss:$8 sps:$4 sm:$0xff]  }
 0x22e   : > { %4685 = vmatprep.subr.bf16.mxu0 %v5673_v55  ;;  %v5754_v55 = vld [vmem:[%s6930_s6 + $0x314] ss:$8 sps:$4 sm:$0xff]  }
 0x230   : > { %4440 = vmatpush1.bf16.msra.mxu1 %v5668_v56  ;;  %v5757_v56 = vld [vmem:[%s6930_s6 + $0x914] ss:$8 sps:$4 sm:$0xff]  }
 0x231   : > { %4686 = vmatpush1.bf16.msra.mxu0 %v5671_v57  ;;  %4441 = vmatprep.subr.bf16.mxu1 %v5676_v58  ;;  %v2250_v57 = vcombine.high %v7119_v32, %v7119_v32  ;;  %v5755_v58 = vld [vmem:[%s6930_s6 + $0x910] ss:$8 sps:$4 sm:$0xff]   ;;  %v5763_v32 = vld [vmem:[%s6930_s6 + $0x924] ss:$8 sps:$4 sm:$0xff]  }
 0x232   : > { %4687 = vmatprep.subr.bf16.mxu0 %v5679_v59  ;;  %v5760_v59 = vld [vmem:[%s6930_s6 + $0x324] ss:$8 sps:$4 sm:$0xff]  }
 0x234   : > { %4442 = vmatpush1.bf16.msra.mxu1 %v5674_v60  ;;  %v5761_v60 = vld [vmem:[%s6930_s6 + $0x920] ss:$8 sps:$4 sm:$0xff]  }
 0x235   : > { %4688 = vmatpush1.bf16.msra.mxu0 %v5677_v61  ;;  %4443 = vmatprep.subr.bf16.mxu1 %v5682_v62  ;;  %v5766_v61 = vld [vmem:[%s6930_s6 + $0x334] ss:$8 sps:$4 sm:$0xff]  }
 0x236   : > { %4689 = vmatprep.subr.bf16.mxu0 %v5685_v63  ;;  %v5769_v62 = vld [vmem:[%s6930_s6 + $0x934] ss:$8 sps:$4 sm:$0xff]   ;;  %v5764_v63 = vld [vmem:[%s6930_s6 + $0x330] ss:$8 sps:$4 sm:$0xff]  }
 0x238   : > { %4444 = vmatpush1.bf16.msra.mxu1 %v5680_v0  ;;  %v5767_v0 = vld [vmem:[%s6930_s6 + $0x930] ss:$8 sps:$4 sm:$0xff]  }
 0x239   : > { %4690 = vmatpush1.bf16.msra.mxu0 %v5683_v1  ;;  %4445 = vmatprep.subr.bf16.mxu1 %v5688_v2  ;;  %v5772_v1 = vld [vmem:[%s6930_s6 + $0x344] ss:$8 sps:$4 sm:$0xff]  }
 0x23a   : > { %4691 = vmatprep.subr.bf16.mxu0 %v5691_v3  ;;  %v5775_v2 = vld [vmem:[%s6930_s6 + $0x944] ss:$8 sps:$4 sm:$0xff]   ;;  %v5770_v3 = vld [vmem:[%s6930_s6 + $0x340] ss:$8 sps:$4 sm:$0xff]  }
 0x23c   : > { %4446 = vmatpush1.bf16.msra.mxu1 %v5686_v4  ;;  %v5773_v4 = vld [vmem:[%s6930_s6 + $0x940] ss:$8 sps:$4 sm:$0xff]  }
 0x23d   : > { %4692 = vmatpush1.bf16.msra.mxu0 %v5689_v5  ;;  %4447 = vmatprep.subr.bf16.mxu1 %v5694_v6  ;;  %v5778_v5 = vld [vmem:[%s6930_s6 + $0x354] ss:$8 sps:$4 sm:$0xff]  }
 0x23e   : > { %4693 = vmatprep.subr.bf16.mxu0 %v5697_v7  ;;  %v5781_v6 = vld [vmem:[%s6930_s6 + $0x954] ss:$8 sps:$4 sm:$0xff]   ;;  %v5776_v7 = vld [vmem:[%s6930_s6 + $0x350] ss:$8 sps:$4 sm:$0xff]  }
 0x240   : > { %4448 = vmatpush1.bf16.msra.mxu1 %v5692_v8  ;;  %v5779_v8 = vld [vmem:[%s6930_s6 + $0x950] ss:$8 sps:$4 sm:$0xff]  }
 0x241   : > { %4694 = vmatpush1.bf16.msra.mxu0 %v5695_v9  ;;  %4449 = vmatprep.subr.bf16.mxu1 %v5700_v10  ;;  %v5784_v9 = vld [vmem:[%s6930_s6 + $0x364] ss:$8 sps:$4 sm:$0xff]  }
 0x242   : > { %4695 = vmatprep.subr.bf16.mxu0 %v5703_v11  ;;  %v5787_v10 = vld [vmem:[%s6930_s6 + $0x964] ss:$8 sps:$4 sm:$0xff]   ;;  %v5782_v11 = vld [vmem:[%s6930_s6 + $0x360] ss:$8 sps:$4 sm:$0xff]  }
 0x244   : > { %4450 = vmatpush1.bf16.msra.mxu1 %v5698_v14  ;;  %v5785_v14 = vld [vmem:[%s6930_s6 + $0x960] ss:$8 sps:$4 sm:$0xff]  }
 0x245   : > { %4696 = vmatpush1.bf16.msra.mxu0 %v5701_v15  ;;  %4451 = vmatprep.subr.bf16.mxu1 %v5706_v16  ;;  %v5790_v15 = vld [vmem:[%s6930_s6 + $0x374] ss:$8 sps:$4 sm:$0xff]  }
 0x246   : > { %4697 = vmatprep.subr.bf16.mxu0 %v5709_v17  ;;  %v5793_v16 = vld [vmem:[%s6930_s6 + $0x974] ss:$8 sps:$4 sm:$0xff]   ;;  %v5788_v17 = vld [vmem:[%s6930_s6 + $0x370] ss:$8 sps:$4 sm:$0xff]  }
 0x248   : > { %4452 = vmatpush1.bf16.msra.mxu1 %v5704_v19  ;;  %v5791_v19 = vld [vmem:[%s6930_s6 + $0x970] ss:$8 sps:$4 sm:$0xff]  }
 0x249   : > { %4698 = vmatpush1.bf16.msra.mxu0 %v5707_v20  ;;  %4453 = vmatprep.subr.bf16.mxu1 %v5712_v21  ;;  %v5796_v20 = vld [vmem:[%s6930_s6 + $0x384] ss:$8 sps:$4 sm:$0xff]  }
 0x24a   : > { %4699 = vmatprep.subr.bf16.mxu0 %v5715_v24  ;;  %v5799_v21 = vld [vmem:[%s6930_s6 + $0x984] ss:$8 sps:$4 sm:$0xff]   ;;  %v5794_v24 = vld [vmem:[%s6930_s6 + $0x380] ss:$8 sps:$4 sm:$0xff]  }
 0x24c   : > { %4454 = vmatpush1.bf16.msra.mxu1 %v5710_v25  ;;  %v5797_v25 = vld [vmem:[%s6930_s6 + $0x980] ss:$8 sps:$4 sm:$0xff]  }
 0x24d   : > { %4700 = vmatpush1.bf16.msra.mxu0 %v5713_v26  ;;  %4455 = vmatprep.subr.bf16.mxu1 %v5718_v27  ;;  %v5802_v26 = vld [vmem:[%s6930_s6 + $0x394] ss:$8 sps:$4 sm:$0xff]  }
 0x24e   : > { %4701 = vmatprep.subr.bf16.mxu0 %v5721_v28  ;;  %v5805_v27 = vld [vmem:[%s6930_s6 + $0x994] ss:$8 sps:$4 sm:$0xff]   ;;  %v5800_v28 = vld [vmem:[%s6930_s6 + $0x390] ss:$8 sps:$4 sm:$0xff]  }
 0x250   : > { %4456 = vmatpush1.bf16.msra.mxu1 %v5716_v29  ;;  %v5803_v29 = vld [vmem:[%s6930_s6 + $0x990] ss:$8 sps:$4 sm:$0xff]  }
 0x251   : > { %4702 = vmatpush1.bf16.msra.mxu0 %v5719_v30  ;;  %4457 = vmatprep.subr.bf16.mxu1 %v5724_v31  ;;  %v5808_v30 = vld [vmem:[%s6930_s6 + $0x3a4] ss:$8 sps:$4 sm:$0xff]  }
 0x252   : > { %4703 = vmatprep.subr.bf16.mxu0 %v5727_v36  ;;  %v5811_v31 = vld [vmem:[%s6930_s6 + $0x9a4] ss:$8 sps:$4 sm:$0xff]   ;;  %v5806_v36 = vld [vmem:[%s6930_s6 + $0x3a0] ss:$8 sps:$4 sm:$0xff]  }
 0x254   : > { %4458 = vmatpush1.bf16.msra.mxu1 %v5722_v37  ;;  %v5809_v37 = vld [vmem:[%s6930_s6 + $0x9a0] ss:$8 sps:$4 sm:$0xff]  }
 0x255   : > { %4704 = vmatpush1.bf16.msra.mxu0 %v5725_v22  ;;  %4459 = vmatprep.subr.bf16.mxu1 %v5730_v23  ;;  %v5814_v22 = vld [vmem:[%s6930_s6 + $0x3b4] ss:$8 sps:$4 sm:$0xff]  }
 0x256   : > { %4705 = vmatprep.subr.bf16.mxu0 %v5733_v13  ;;  %v5817_v23 = vld [vmem:[%s6930_s6 + $0x9b4] ss:$8 sps:$4 sm:$0xff]   ;;  %v5812_v13 = vld [vmem:[%s6930_s6 + $0x3b0] ss:$8 sps:$4 sm:$0xff]  }
 0x258   : > { %4460 = vmatpush1.bf16.msra.mxu1 %v5728_v39  ;;  %v5815_v39 = vld [vmem:[%s6930_s6 + $0x9b0] ss:$8 sps:$4 sm:$0xff]  }
 0x259   : > { %4706 = vmatpush1.bf16.msra.mxu0 %v5731_v40  ;;  %4461 = vmatprep.subr.bf16.mxu1 %v5736_v33  ;;  %v5820_v40 = vld [vmem:[%s6930_s6 + $0x3c4] ss:$8 sps:$4 sm:$0xff]  }
 0x25a   : > { %4707 = vmatprep.subr.bf16.mxu0 %v5739_v34  ;;  %v5823_v33 = vld [vmem:[%s6930_s6 + $0x9c4] ss:$8 sps:$4 sm:$0xff]   ;;  %v5818_v34 = vld [vmem:[%s6930_s6 + $0x3c0] ss:$8 sps:$4 sm:$0xff]  }
 0x25c   : > { %4462 = vmatpush1.bf16.msra.mxu1 %v5734_v41  ;;  %v5821_v41 = vld [vmem:[%s6930_s6 + $0x9c0] ss:$8 sps:$4 sm:$0xff]  }
 0x25d   : > { %4708 = vmatpush1.bf16.msra.mxu0 %v5737_v42  ;;  %4463 = vmatprep.subr.bf16.mxu1 %v5742_v43  ;;  %v5826_v42 = vld [vmem:[%s6930_s6 + $0x3d4] ss:$8 sps:$4 sm:$0xff]  }
 0x25e   : > { %4709 = vmatprep.subr.bf16.mxu0 %v5745_v44  ;;  %v5829_v43 = vld [vmem:[%s6930_s6 + $0x9d4] ss:$8 sps:$4 sm:$0xff]   ;;  %v5824_v44 = vld [vmem:[%s6930_s6 + $0x3d0] ss:$8 sps:$4 sm:$0xff]  }
 0x260   : > { %4464 = vmatpush1.bf16.msra.mxu1 %v5740_v46  ;;  %v5827_v46 = vld [vmem:[%s6930_s6 + $0x9d0] ss:$8 sps:$4 sm:$0xff]  }
 0x261   : > { %4710 = vmatpush1.bf16.msra.mxu0 %v5743_v47  ;;  %4474 = vmatprep.subr.bf16.mxu1 %v5748_v48  ;;  %v5832_v47 = vld [vmem:[%s6930_s6 + $0x3e4] ss:$8 sps:$4 sm:$0xff]  }
 0x262   : > { %4720 = vmatprep.subr.bf16.mxu0 %v5751_v49  ;;  %v5835_v48 = vld [vmem:[%s6930_s6 + $0x9e4] ss:$8 sps:$4 sm:$0xff]   ;;  %v2300_v49 = vcombine.high %v7116_v45, %v7116_v45  ;;  %v5836_v45 = vld [vmem:[%s6930_s6 + $0x3f0] ss:$8 sps:$4 sm:$0xff]  }
 0x263   : > { %4466 = vmatmul.mubr.bf16.vlgmr.msra.gmra.mrb[0].mxu1 %v7195_v52 }
 0x264   : > { %4712 = vmatmul.mubr.bf16.vlgmr.msra.gmra.mrb[0].mxu0 %v7199_v53  ;;  %4475 = vmatpush1.bf16.msra.mxu1 %v5746_v50  ;;  %v5830_v50 = vld [vmem:[%s6930_s6 + $0x3e0] ss:$8 sps:$4 sm:$0xff]  }
 0x265   : > { %4721 = vmatpush1.bf16.msra.mxu0 %v5749_v54  ;;  %4476 = vmatprep.subr.bf16.mxu1 %v5754_v55  ;;  %v5833_v54 = vld [vmem:[%s6930_s6 + $0x9e0] ss:$8 sps:$4 sm:$0xff]   ;;  %v5838_v55 = vld [vmem:[%s6930_s6 + $0x3f4] ss:$8 sps:$4 sm:$0xff]  }
 0x266   : > { %4722 = vmatprep.subr.bf16.mxu0 %v5757_v56  ;;  %4506 = vmatprep.mubr.bf16.mxu1 %v2250_v57  ;;  %v5841_v56 = vld [vmem:[%s6930_s6 + $0x9f4] ss:$8 sps:$4 sm:$0xff]   ;;  %v7271_v57 = vld.sshfl [vmem:[%s7473_s0 + $0x8] sm:$0xff pattern:$0x75316420] }
 0x267   : > { %4752 = vmatprep.mubr.bf16.mxu0 %v2347_v38  ;;  %v7274_v38 = vrot.slane %v2300_v49, %v6935_v18  ;;  %v5911_v49 = vld [vmem:[%s6930_s6 + $0xab0] ss:$8 sps:$4 sm:$0xff]  }
 0x268   : > { %4477 = vmatpush1.bf16.msra.mxu1 %v5752_v35  ;;  %v5839_v35 = vld [vmem:[%s6930_s6 + $0x9f0] ss:$8 sps:$4 sm:$0xff]  }
 0x269   : > { %4723 = vmatpush1.bf16.msra.mxu0 %v5755_v58  ;;  %4478 = vmatprep.subr.bf16.mxu1 %v5760_v59  ;;  %v5844_v58 = vld [vmem:[%s6930_s6 + $0x404] ss:$8 sps:$4 sm:$0xff]  }
 0x26a   : > { %4724 = vmatprep.subr.bf16.mxu0 %v5763_v32  ;;  %v5847_v59 = vld [vmem:[%s6930_s6 + $0xa04] ss:$8 sps:$4 sm:$0xff]   ;;  %v5842_v32 = vld [vmem:[%s6930_s6 + $0x400] ss:$8 sps:$4 sm:$0xff]  }
 0x26c   : > { %4479 = vmatpush1.bf16.msra.mxu1 %v5758_v51  ;;  %v2266_v51 = vcombine.high %v7271_v57, %v7271_v57 }
 0x26d   : > { %4725 = vmatpush1.bf16.msra.mxu0 %v5761_v60  ;;  %4480 = vmatprep.subr.bf16.mxu1 %v5766_v61  ;;  %v2316_v60 = vcombine.high %v7274_v38, %v7274_v38  ;;  %v5845_v61 = vld [vmem:[%s6930_s6 + $0xa00] ss:$8 sps:$4 sm:$0xff]  }
 0x26e   : > { %4726 = vmatprep.subr.bf16.mxu0 %v5769_v62  ;;  %v2248_v62 = vcombine.high %v7195_v52, %v7195_v52  ;;  %v5848_v52 = vld [vmem:[%s6930_s6 + $0x410] ss:$8 sps:$4 sm:$0xff]  }
 0x270   : > { %4481 = vmatpush1.bf16.msra.mxu1 %v5764_v63  ;;  %v2345_v63 = vcombine.high %v7199_v53, %v7199_v53  ;;  %v5851_v53 = vld [vmem:[%s6930_s6 + $0xa10] ss:$8 sps:$4 sm:$0xff]  }
 0x271   : > { %4727 = vmatpush1.bf16.msra.mxu0 %v5767_v0  ;;  %4482 = vmatprep.subr.bf16.mxu1 %v5772_v1  ;;  %v5850_v0 = vld [vmem:[%s6930_s6 + $0x414] ss:$8 sps:$4 sm:$0xff]  }
 0x272   : > { %4728 = vmatprep.subr.bf16.mxu0 %v5775_v2  ;;  %v5853_v1 = vld [vmem:[%s6930_s6 + $0xa14] ss:$8 sps:$4 sm:$0xff]   ;;  %v7293_v2 = vrot.slane %v2266_v51, %v6935_v18  ;;  %v5931_v51 = vld [vmem:[%s6930_s6 + $0xae4] ss:$8 sps:$4 sm:$0xff]  }
 0x274   : > { %4483 = vmatpush1.bf16.msra.mxu1 %v5770_v3  ;;  %v7296_v3 = vrot.slane %v2316_v60, %v6935_v18  ;;  %v5926_v60 = vld [vmem:[%s6930_s6 + $0x4e0] ss:$8 sps:$4 sm:$0xff]  }
 0x275   : > { %4729 = vmatpush1.bf16.msra.mxu0 %v5773_v4  ;;  %4484 = vmatprep.subr.bf16.mxu1 %v5778_v5  ;;  %v5856_v4 = vld [vmem:[%s6930_s6 + $0x424] ss:$8 sps:$4 sm:$0xff]  }
 0x276   : > { %4730 = vmatprep.subr.bf16.mxu0 %v5781_v6  ;;  %v5859_v5 = vld [vmem:[%s6930_s6 + $0xa24] ss:$8 sps:$4 sm:$0xff]   ;;  %v5854_v6 = vld [vmem:[%s6930_s6 + $0x420] ss:$8 sps:$4 sm:$0xff]  }
 0x278   : > { %4485 = vmatpush1.bf16.msra.mxu1 %v5776_v7  ;;  %v5857_v7 = vld [vmem:[%s6930_s6 + $0xa20] ss:$8 sps:$4 sm:$0xff]  }
 0x279   : > { %4731 = vmatpush1.bf16.msra.mxu0 %v5779_v8  ;;  %4486 = vmatprep.subr.bf16.mxu1 %v5784_v9  ;;  %v5862_v8 = vld [vmem:[%s6930_s6 + $0x434] ss:$8 sps:$4 sm:$0xff]  }
 0x27a   : > { %4732 = vmatprep.subr.bf16.mxu0 %v5787_v10  ;;  %v5865_v9 = vld [vmem:[%s6930_s6 + $0xa34] ss:$8 sps:$4 sm:$0xff]   ;;  %v5860_v10 = vld [vmem:[%s6930_s6 + $0x430] ss:$8 sps:$4 sm:$0xff]  }
 0x27c   : > { %4487 = vmatpush1.bf16.msra.mxu1 %v5782_v11  ;;  %v5863_v11 = vld [vmem:[%s6930_s6 + $0xa30] ss:$8 sps:$4 sm:$0xff]  }
 0x27d   : > { %4733 = vmatpush1.bf16.msra.mxu0 %v5785_v14  ;;  %4488 = vmatprep.subr.bf16.mxu1 %v5790_v15  ;;  %v5868_v14 = vld [vmem:[%s6930_s6 + $0x444] ss:$8 sps:$4 sm:$0xff]  }
 0x27e   : > { %4734 = vmatprep.subr.bf16.mxu0 %v5793_v16  ;;  %v5871_v15 = vld [vmem:[%s6930_s6 + $0xa44] ss:$8 sps:$4 sm:$0xff]   ;;  %v5866_v16 = vld [vmem:[%s6930_s6 + $0x440] ss:$8 sps:$4 sm:$0xff]  }
 0x280   : > { %4489 = vmatpush1.bf16.msra.mxu1 %v5788_v17  ;;  %v5869_v17 = vld [vmem:[%s6930_s6 + $0xa40] ss:$8 sps:$4 sm:$0xff]  }
 0x281   : > { %4735 = vmatpush1.bf16.msra.mxu0 %v5791_v19  ;;  %4490 = vmatprep.subr.bf16.mxu1 %v5796_v20  ;;  %v5874_v19 = vld [vmem:[%s6930_s6 + $0x454] ss:$8 sps:$4 sm:$0xff]  }
 0x282   : > { %4736 = vmatprep.subr.bf16.mxu0 %v5799_v21  ;;  %v5877_v20 = vld [vmem:[%s6930_s6 + $0xa54] ss:$8 sps:$4 sm:$0xff]   ;;  %v5872_v21 = vld [vmem:[%s6930_s6 + $0x450] ss:$8 sps:$4 sm:$0xff]  }
 0x284   : > { %4491 = vmatpush1.bf16.msra.mxu1 %v5794_v24  ;;  %v5875_v24 = vld [vmem:[%s6930_s6 + $0xa50] ss:$8 sps:$4 sm:$0xff]  }
 0x285   : > { %4737 = vmatpush1.bf16.msra.mxu0 %v5797_v25  ;;  %4492 = vmatprep.subr.bf16.mxu1 %v5802_v26  ;;  %v5880_v25 = vld [vmem:[%s6930_s6 + $0x464] ss:$8 sps:$4 sm:$0xff]  }
 0x286   : > { %4738 = vmatprep.subr.bf16.mxu0 %v5805_v27  ;;  %v5883_v26 = vld [vmem:[%s6930_s6 + $0xa64] ss:$8 sps:$4 sm:$0xff]   ;;  %v5878_v27 = vld [vmem:[%s6930_s6 + $0x460] ss:$8 sps:$4 sm:$0xff]  }
 0x288   : > { %4493 = vmatpush1.bf16.msra.mxu1 %v5800_v28  ;;  %v5881_v28 = vld [vmem:[%s6930_s6 + $0xa60] ss:$8 sps:$4 sm:$0xff]  }
 0x289   : > { %4739 = vmatpush1.bf16.msra.mxu0 %v5803_v29  ;;  %4494 = vmatprep.subr.bf16.mxu1 %v5808_v30  ;;  %v5886_v29 = vld [vmem:[%s6930_s6 + $0x474] ss:$8 sps:$4 sm:$0xff]  }
 0x28a   : > { %4740 = vmatprep.subr.bf16.mxu0 %v5811_v31  ;;  %v5889_v30 = vld [vmem:[%s6930_s6 + $0xa74] ss:$8 sps:$4 sm:$0xff]   ;;  %v5884_v31 = vld [vmem:[%s6930_s6 + $0x470] ss:$8 sps:$4 sm:$0xff]  }
 0x28c   : > { %4495 = vmatpush1.bf16.msra.mxu1 %v5806_v36  ;;  %v5887_v36 = vld [vmem:[%s6930_s6 + $0xa70] ss:$8 sps:$4 sm:$0xff]  }
 0x28d   : > { %4741 = vmatpush1.bf16.msra.mxu0 %v5809_v37  ;;  %4496 = vmatprep.subr.bf16.mxu1 %v5814_v22  ;;  %v5892_v37 = vld [vmem:[%s6930_s6 + $0x484] ss:$8 sps:$4 sm:$0xff]  }
 0x28e   : > { %4742 = vmatprep.subr.bf16.mxu0 %v5817_v23  ;;  %v5895_v22 = vld [vmem:[%s6930_s6 + $0xa84] ss:$8 sps:$4 sm:$0xff]   ;;  %v5890_v23 = vld [vmem:[%s6930_s6 + $0x480] ss:$8 sps:$4 sm:$0xff]  }
 0x290   : > { %4497 = vmatpush1.bf16.msra.mxu1 %v5812_v13  ;;  %v5893_v13 = vld [vmem:[%s6930_s6 + $0xa80] ss:$8 sps:$4 sm:$0xff]  }
 0x291   : > { %4743 = vmatpush1.bf16.msra.mxu0 %v5815_v39  ;;  %4498 = vmatprep.subr.bf16.mxu1 %v5820_v40  ;;  %v5898_v39 = vld [vmem:[%s6930_s6 + $0x494] ss:$8 sps:$4 sm:$0xff]  }
 0x292   : > { %4744 = vmatprep.subr.bf16.mxu0 %v5823_v33  ;;  %v5901_v40 = vld [vmem:[%s6930_s6 + $0xa94] ss:$8 sps:$4 sm:$0xff]   ;;  %v5896_v33 = vld [vmem:[%s6930_s6 + $0x490] ss:$8 sps:$4 sm:$0xff]  }
 0x294   : > { %4499 = vmatpush1.bf16.msra.mxu1 %v5818_v34  ;;  %v5899_v34 = vld [vmem:[%s6930_s6 + $0xa90] ss:$8 sps:$4 sm:$0xff]  }
 0x295   : > { %4745 = vmatpush1.bf16.msra.mxu0 %v5821_v41  ;;  %4500 = vmatprep.subr.bf16.mxu1 %v5826_v42  ;;  %v5904_v41 = vld [vmem:[%s6930_s6 + $0x4a4] ss:$8 sps:$4 sm:$0xff]  }
 0x296   : > { %4746 = vmatprep.subr.bf16.mxu0 %v5829_v43  ;;  %v5907_v42 = vld [vmem:[%s6930_s6 + $0xaa4] ss:$8 sps:$4 sm:$0xff]   ;;  %v5902_v43 = vld [vmem:[%s6930_s6 + $0x4a0] ss:$8 sps:$4 sm:$0xff]  }
 0x298   : > { %4501 = vmatpush1.bf16.msra.mxu1 %v5824_v44  ;;  %v5905_v44 = vld [vmem:[%s6930_s6 + $0xaa0] ss:$8 sps:$4 sm:$0xff]  }
 0x299   : > { %4747 = vmatpush1.bf16.msra.mxu0 %v5827_v46  ;;  %4502 = vmatprep.subr.bf16.mxu1 %v5832_v47  ;;  %v5910_v46 = vld [vmem:[%s6930_s6 + $0x4b4] ss:$8 sps:$4 sm:$0xff]  }
 0x29a   : > { %4748 = vmatprep.subr.bf16.mxu0 %v5835_v48  ;;  %v5913_v47 = vld [vmem:[%s6930_s6 + $0xab4] ss:$8 sps:$4 sm:$0xff]   ;;  %v5908_v48 = vld [vmem:[%s6930_s6 + $0x4b0] ss:$8 sps:$4 sm:$0xff]  }
 0x29c   : > { %4503 = vmatpush1.bf16.msra.mxu1 %v5830_v50  ;;  %v5916_v50 = vld [vmem:[%s6930_s6 + $0x4c4] ss:$8 sps:$4 sm:$0xff]  }
 0x29d   : > { %4749 = vmatpush1.bf16.msra.mxu0 %v5833_v54  ;;  %4504 = vmatprep.subr.bf16.mxu1 %v5838_v55  ;;  %v5919_v54 = vld [vmem:[%s6930_s6 + $0xac4] ss:$8 sps:$4 sm:$0xff]   ;;  %v5914_v55 = vld [vmem:[%s6930_s6 + $0x4c0] ss:$8 sps:$4 sm:$0xff]  }
 0x29e   : > { %4750 = vmatprep.subr.bf16.mxu0 %v5841_v56  ;;  %v5917_v56 = vld [vmem:[%s6930_s6 + $0xac0] ss:$8 sps:$4 sm:$0xff]  }
 0x2a0   : > { %4505 = vmatpush1.bf16.msra.mxu1 %v5836_v45  ;;  %v5922_v45 = vld [vmem:[%s6930_s6 + $0x4d4] ss:$8 sps:$4 sm:$0xff]  }
 0x2a1   : > { %4751 = vmatpush1.bf16.msra.mxu0 %v5839_v35  ;;  %4515 = vmatprep.subr.bf16.mxu1 %v5844_v58  ;;  %v5925_v35 = vld [vmem:[%s6930_s6 + $0xad4] ss:$8 sps:$4 sm:$0xff]   ;;  %v5920_v58 = vld [vmem:[%s6930_s6 + $0x4d0] ss:$8 sps:$4 sm:$0xff]  }
 0x2a2   : > { %4761 = vmatprep.subr.bf16.mxu0 %v5847_v59  ;;  %v5923_v59 = vld [vmem:[%s6930_s6 + $0xad0] ss:$8 sps:$4 sm:$0xff]  }
 0x2a3   : > { %4507 = vmatmul.mubr.bf16.vlgmr.msra.gmra.mrb[0].mxu1 %v2248_v62  ;;  %v5934_v62 = vld [vmem:[%s6930_s6 + $0x4f4] ss:$8 sps:$4 sm:$0xff]  }
 0x2a4   : > { %4753 = vmatmul.mubr.bf16.vlgmr.msra.gmra.mrb[0].mxu0 %v2345_v63  ;;  %4516 = vmatpush1.bf16.msra.mxu1 %v5842_v32  ;;  %v5928_v32 = vld [vmem:[%s6930_s6 + $0x4e4] ss:$8 sps:$4 sm:$0xff]   ;;  %v5937_v63 = vld [vmem:[%s6930_s6 + $0xaf4] ss:$8 sps:$4 sm:$0xff]  }
 0x2a5   : > { %4762 = vmatpush1.bf16.msra.mxu0 %v5845_v61  ;;  %4517 = vmatprep.subr.bf16.mxu1 %v5850_v0  ;;  %v5929_v61 = vld [vmem:[%s6930_s6 + $0xae0] ss:$8 sps:$4 sm:$0xff]   ;;  %v5932_v0 = vld [vmem:[%s6930_s6 + $0x4f0] ss:$8 sps:$4 sm:$0xff]  }
 0x2a6   : > { %4763 = vmatprep.subr.bf16.mxu0 %v5853_v1  ;;  %4547 = vmatprep.mubr.bf16.mxu1 %v7293_v2  ;;  %v5935_v1 = vld [vmem:[%s6930_s6 + $0xaf0] ss:$8 sps:$4 sm:$0xff]  }
 0x2a7   : > { %4793 = vmatprep.mubr.bf16.mxu0 %v7296_v3 }
 0x2a8   : > { %4518 = vmatpush1.bf16.msra.mxu1 %v5848_v52  ;;  %v5940_v52 = vld [vmem:[%s6930_s6 + $0x504] ss:$8 sps:$4 sm:$0xff]  }
 0x2a9   : > { %4764 = vmatpush1.bf16.msra.mxu0 %v5851_v53  ;;  %4519 = vmatprep.subr.bf16.mxu1 %v5856_v4  ;;  %v5944_v53 = vld [vmem:[%s6930_s6 + $0xb04] ss:$8 sps:$4 sm:$0xff]   ;;  %v7362_v4 = vrot.slane %v7271_v57, %v6935_v18  ;;  %v2298_v57 = vcombine.high %v7293_v2, %v7293_v2 }
 0x2aa   : > { %4765 = vmatprep.subr.bf16.mxu0 %v5859_v5  ;;  %v7366_v5 = vrot.slane %v7274_v38, %v6935_v18  ;;  %v5945_v38 = vld [vmem:[%s6930_s6 + $0x510] ss:$8 sps:$4 sm:$0xff]   ;;  %v5953_v2 = vld [vmem:[%s6930_s6 + $0x524] ss:$8 sps:$4 sm:$0xff]  }
 0x2ac   : > { %4520 = vmatpush1.bf16.msra.mxu1 %v5854_v6  ;;  %v5938_v6 = vld [vmem:[%s6930_s6 + $0x500] ss:$8 sps:$4 sm:$0xff]  }
 0x2ad   : > { %4766 = vmatpush1.bf16.msra.mxu0 %v5857_v7  ;;  %4521 = vmatprep.subr.bf16.mxu1 %v5862_v8  ;;  %v5942_v7 = vld [vmem:[%s6930_s6 + $0xb00] ss:$8 sps:$4 sm:$0xff]   ;;  %v5947_v8 = vld [vmem:[%s6930_s6 + $0x514] ss:$8 sps:$4 sm:$0xff]  }
 0x2ae   : > { %4767 = vmatprep.subr.bf16.mxu0 %v5865_v9  ;;  %v5950_v9 = vld [vmem:[%s6930_s6 + $0xb14] ss:$8 sps:$4 sm:$0xff]  }
 0x2b0   : > { %4522 = vmatpush1.bf16.msra.mxu1 %v5860_v10  ;;  %v2348_v10 = vcombine.high %v7296_v3, %v7296_v3  ;;  %v5951_v3 = vld [vmem:[%s6930_s6 + $0x520] ss:$8 sps:$4 sm:$0xff]  }
 0x2b1   : > { %4768 = vmatpush1.bf16.msra.mxu0 %v5863_v11  ;;  %4523 = vmatprep.subr.bf16.mxu1 %v5868_v14  ;;  %v5948_v11 = vld [vmem:[%s6930_s6 + $0xb10] ss:$8 sps:$4 sm:$0xff]   ;;  %v5956_v14 = vld [vmem:[%s6930_s6 + $0xb24] ss:$8 sps:$4 sm:$0xff]  }
 0x2b2   : > { %4769 = vmatprep.subr.bf16.mxu0 %v5871_v15  ;;  %v5954_v15 = vld [vmem:[%s6930_s6 + $0xb20] ss:$8 sps:$4 sm:$0xff]  }
 0x2b4   : > { %4524 = vmatpush1.bf16.msra.mxu1 %v5866_v16  ;;  %v5959_v16 = vld [vmem:[%s6930_s6 + $0x534] ss:$8 sps:$4 sm:$0xff]  }
 0x2b5   : > { %4770 = vmatpush1.bf16.msra.mxu0 %v5869_v17  ;;  %4525 = vmatprep.subr.bf16.mxu1 %v5874_v19  ;;  %v5962_v17 = vld [vmem:[%s6930_s6 + $0xb34] ss:$8 sps:$4 sm:$0xff]   ;;  %v5957_v19 = vld [vmem:[%s6930_s6 + $0x530] ss:$8 sps:$4 sm:$0xff]  }
 0x2b6   : > { %4771 = vmatprep.subr.bf16.mxu0 %v5877_v20  ;;  %v5960_v20 = vld [vmem:[%s6930_s6 + $0xb30] ss:$8 sps:$4 sm:$0xff]  }
 0x2b8   : > { %4526 = vmatpush1.bf16.msra.mxu1 %v5872_v21  ;;  %v5965_v21 = vld [vmem:[%s6930_s6 + $0x544] ss:$8 sps:$4 sm:$0xff]  }
 0x2b9   : > { %4772 = vmatpush1.bf16.msra.mxu0 %v5875_v24  ;;  %4527 = vmatprep.subr.bf16.mxu1 %v5880_v25  ;;  %v5968_v24 = vld [vmem:[%s6930_s6 + $0xb44] ss:$8 sps:$4 sm:$0xff]   ;;  %v5963_v25 = vld [vmem:[%s6930_s6 + $0x540] ss:$8 sps:$4 sm:$0xff]  }
 0x2ba   : > { %4773 = vmatprep.subr.bf16.mxu0 %v5883_v26  ;;  %v5966_v26 = vld [vmem:[%s6930_s6 + $0xb40] ss:$8 sps:$4 sm:$0xff]  }
 0x2bc   : > { %4528 = vmatpush1.bf16.msra.mxu1 %v5878_v27  ;;  %v5971_v27 = vld [vmem:[%s6930_s6 + $0x554] ss:$8 sps:$4 sm:$0xff]  }
 0x2bd   : > { %4774 = vmatpush1.bf16.msra.mxu0 %v5881_v28  ;;  %4529 = vmatprep.subr.bf16.mxu1 %v5886_v29  ;;  %v5974_v28 = vld [vmem:[%s6930_s6 + $0xb54] ss:$8 sps:$4 sm:$0xff]   ;;  %v5969_v29 = vld [vmem:[%s6930_s6 + $0x550] ss:$8 sps:$4 sm:$0xff]  }
 0x2be   : > { %4775 = vmatprep.subr.bf16.mxu0 %v5889_v30  ;;  %v5972_v30 = vld [vmem:[%s6930_s6 + $0xb50] ss:$8 sps:$4 sm:$0xff]  }
 0x2c0   : > { %4530 = vmatpush1.bf16.msra.mxu1 %v5884_v31  ;;  %v5977_v31 = vld [vmem:[%s6930_s6 + $0x564] ss:$8 sps:$4 sm:$0xff]  }
 0x2c1   : > { %4776 = vmatpush1.bf16.msra.mxu0 %v5887_v36  ;;  %4531 = vmatprep.subr.bf16.mxu1 %v5892_v37  ;;  %v5980_v36 = vld [vmem:[%s6930_s6 + $0xb64] ss:$8 sps:$4 sm:$0xff]   ;;  %v5975_v37 = vld [vmem:[%s6930_s6 + $0x560] ss:$8 sps:$4 sm:$0xff]  }
 0x2c2   : > { %4777 = vmatprep.subr.bf16.mxu0 %v5895_v22  ;;  %v5978_v22 = vld [vmem:[%s6930_s6 + $0xb60] ss:$8 sps:$4 sm:$0xff]  }
 0x2c4   : > { %4532 = vmatpush1.bf16.msra.mxu1 %v5890_v23  ;;  %v5983_v23 = vld [vmem:[%s6930_s6 + $0x574] ss:$8 sps:$4 sm:$0xff]  }
 0x2c5   : > { %4778 = vmatpush1.bf16.msra.mxu0 %v5893_v13  ;;  %4533 = vmatprep.subr.bf16.mxu1 %v5898_v39  ;;  %v5986_v13 = vld [vmem:[%s6930_s6 + $0xb74] ss:$8 sps:$4 sm:$0xff]   ;;  %v5981_v39 = vld [vmem:[%s6930_s6 + $0x570] ss:$8 sps:$4 sm:$0xff]  }
 0x2c6   : > { %4779 = vmatprep.subr.bf16.mxu0 %v5901_v40  ;;  %v5984_v40 = vld [vmem:[%s6930_s6 + $0xb70] ss:$8 sps:$4 sm:$0xff]  }
 0x2c8   : > { %4534 = vmatpush1.bf16.msra.mxu1 %v5896_v33  ;;  %v5989_v33 = vld [vmem:[%s6930_s6 + $0x584] ss:$8 sps:$4 sm:$0xff]  }
 0x2c9   : > { %4780 = vmatpush1.bf16.msra.mxu0 %v5899_v34  ;;  %4535 = vmatprep.subr.bf16.mxu1 %v5904_v41  ;;  %v5992_v34 = vld [vmem:[%s6930_s6 + $0xb84] ss:$8 sps:$4 sm:$0xff]   ;;  %v5987_v41 = vld [vmem:[%s6930_s6 + $0x580] ss:$8 sps:$4 sm:$0xff]  }
 0x2ca   : > { %4781 = vmatprep.subr.bf16.mxu0 %v5907_v42  ;;  %v5990_v42 = vld [vmem:[%s6930_s6 + $0xb80] ss:$8 sps:$4 sm:$0xff]  }
 0x2cc   : > { %4536 = vmatpush1.bf16.msra.mxu1 %v5902_v43  ;;  %v5995_v43 = vld [vmem:[%s6930_s6 + $0x594] ss:$8 sps:$4 sm:$0xff]  }
 0x2cd   : > { %4782 = vmatpush1.bf16.msra.mxu0 %v5905_v44  ;;  %4537 = vmatprep.subr.bf16.mxu1 %v5910_v46  ;;  %v5998_v44 = vld [vmem:[%s6930_s6 + $0xb94] ss:$8 sps:$4 sm:$0xff]   ;;  %v5993_v46 = vld [vmem:[%s6930_s6 + $0x590] ss:$8 sps:$4 sm:$0xff]  }
 0x2ce   : > { %4783 = vmatprep.subr.bf16.mxu0 %v5913_v47  ;;  %v5996_v47 = vld [vmem:[%s6930_s6 + $0xb90] ss:$8 sps:$4 sm:$0xff]  }
 0x2d0   : > { %4538 = vmatpush1.bf16.msra.mxu1 %v5908_v48  ;;  %v6001_v48 = vld [vmem:[%s6930_s6 + $0x5a4] ss:$8 sps:$4 sm:$0xff]  }
 0x2d1   : > { %4784 = vmatpush1.bf16.msra.mxu0 %v5911_v49  ;;  %4539 = vmatprep.subr.bf16.mxu1 %v5916_v50  ;;  %v6004_v49 = vld [vmem:[%s6930_s6 + $0xba4] ss:$8 sps:$4 sm:$0xff]   ;;  %v5999_v50 = vld [vmem:[%s6930_s6 + $0x5a0] ss:$8 sps:$4 sm:$0xff]  }
 0x2d2   : > { %4785 = vmatprep.subr.bf16.mxu0 %v5919_v54  ;;  %v6002_v54 = vld [vmem:[%s6930_s6 + $0xba0] ss:$8 sps:$4 sm:$0xff]  }
 0x2d4   : > { %4540 = vmatpush1.bf16.msra.mxu1 %v5914_v55  ;;  %v6007_v55 = vld [vmem:[%s6930_s6 + $0x5b4] ss:$8 sps:$4 sm:$0xff]  }
 0x2d5   : > { %4786 = vmatpush1.bf16.msra.mxu0 %v5917_v56  ;;  %4541 = vmatprep.subr.bf16.mxu1 %v5922_v45  ;;  %v6010_v56 = vld [vmem:[%s6930_s6 + $0xbb4] ss:$8 sps:$4 sm:$0xff]   ;;  %v6005_v45 = vld [vmem:[%s6930_s6 + $0x5b0] ss:$8 sps:$4 sm:$0xff]  }
 0x2d6   : > { %4787 = vmatprep.subr.bf16.mxu0 %v5925_v35  ;;  %v6008_v35 = vld [vmem:[%s6930_s6 + $0xbb0] ss:$8 sps:$4 sm:$0xff]  }
 0x2d8   : > { %4542 = vmatpush1.bf16.msra.mxu1 %v5920_v58  ;;  %v6013_v58 = vld [vmem:[%s6930_s6 + $0x5c4] ss:$8 sps:$4 sm:$0xff]  }
 0x2d9   : > { %4788 = vmatpush1.bf16.msra.mxu0 %v5923_v59  ;;  %4543 = vmatprep.subr.bf16.mxu1 %v5928_v32  ;;  %v6016_v59 = vld [vmem:[%s6930_s6 + $0xbc4] ss:$8 sps:$4 sm:$0xff]   ;;  %v6011_v32 = vld [vmem:[%s6930_s6 + $0x5c0] ss:$8 sps:$4 sm:$0xff]  }
 0x2da   : > { %4789 = vmatprep.subr.bf16.mxu0 %v5931_v51  ;;  %v6014_v51 = vld [vmem:[%s6930_s6 + $0xbc0] ss:$8 sps:$4 sm:$0xff]  }
 0x2dc   : > { %4544 = vmatpush1.bf16.msra.mxu1 %v5926_v60  ;;  %v6019_v60 = vld [vmem:[%s6930_s6 + $0x5d4] ss:$8 sps:$4 sm:$0xff]  }
 0x2dd   : > { %4790 = vmatpush1.bf16.msra.mxu0 %v5929_v61  ;;  %4545 = vmatprep.subr.bf16.mxu1 %v5934_v62  ;;  %v6022_v61 = vld [vmem:[%s6930_s6 + $0xbd4] ss:$8 sps:$4 sm:$0xff]   ;;  %v6017_v62 = vld [vmem:[%s6930_s6 + $0x5d0] ss:$8 sps:$4 sm:$0xff]  }
 0x2de   : > { %4791 = vmatprep.subr.bf16.mxu0 %v5937_v63  ;;  %v6020_v63 = vld [vmem:[%s6930_s6 + $0xbd0] ss:$8 sps:$4 sm:$0xff]  }
 0x2e0   : > { %4546 = vmatpush1.bf16.msra.mxu1 %v5932_v0  ;;  %v6025_v0 = vld [vmem:[%s6930_s6 + $0x5e4] ss:$8 sps:$4 sm:$0xff]  }
 0x2e1   : > { %4792 = vmatpush1.bf16.msra.mxu0 %v5935_v1  ;;  %4556 = vmatprep.subr.bf16.mxu1 %v5940_v52  ;;  %v6028_v1 = vld [vmem:[%s6930_s6 + $0xbe4] ss:$8 sps:$4 sm:$0xff]   ;;  %v6023_v52 = vld [vmem:[%s6930_s6 + $0x5e0] ss:$8 sps:$4 sm:$0xff]  }
 0x2e2   : > { %4802 = vmatprep.subr.bf16.mxu0 %v5944_v53  ;;  %v6026_v53 = vld [vmem:[%s6930_s6 + $0xbe0] ss:$8 sps:$4 sm:$0xff]  }
 0x2e3   : > { %4548 = vmatmul.mubr.bf16.vlgmr.msra.gmra.mrb[0].mxu1 %v7362_v4 }
 0x2e4   : > { %4794 = vmatmul.mubr.bf16.vlgmr.msra.gmra.mrb[0].mxu0 %v7366_v5  ;;  %4557 = vmatpush1.bf16.msra.mxu1 %v5938_v6  ;;  %v6031_v6 = vld [vmem:[%s6930_s6 + $0x5f4] ss:$8 sps:$4 sm:$0xff]  }
 0x2e5   : > { %4803 = vmatpush1.bf16.msra.mxu0 %v5942_v7  ;;  %4558 = vmatprep.subr.bf16.mxu1 %v5947_v8  ;;  %v6034_v7 = vld [vmem:[%s6930_s6 + $0xbf4] ss:$8 sps:$4 sm:$0xff]   ;;  %v6029_v8 = vld [vmem:[%s6930_s6 + $0x5f0] ss:$8 sps:$4 sm:$0xff]  }
 0x2e6   : > { %4804 = vmatprep.subr.bf16.mxu0 %v5950_v9  ;;  %4588 = vmatprep.mubr.bf16.mxu1 %v2298_v57  ;;  %v6032_v9 = vld [vmem:[%s6930_s6 + $0xbf0] ss:$8 sps:$4 sm:$0xff]   ;;  %v6037_v57 = vld [vmem:[%s6930_s6 + $0xc04] ss:$8 sps:$4 sm:$0xff]  }
 0x2e7   : > { %4834 = vmatprep.mubr.bf16.mxu0 %v2348_v10  ;;  %v2296_v10 = vcombine.high %v7362_v4, %v7362_v4  ;;  %v6043_v4 = vld [vmem:[%s6930_s6 + $0xc24] ss:$8 sps:$4 sm:$0xff]  }
 0x2e8   : > { %4559 = vmatpush1.bf16.msra.mxu1 %v5945_v38  ;;  %v2346_v38 = vcombine.high %v7366_v5, %v7366_v5  ;;  %v6046_v5 = vld [vmem:[%s6930_s6 + $0xc34] ss:$8 sps:$4 sm:$0xff]  }
 0x2e9   : > { %4805 = vmatpush1.bf16.msra.mxu0 %v5948_v11  ;;  %4560 = vmatprep.subr.bf16.mxu1 %v5953_v2  ;;  %v6035_v11 = vld [vmem:[%s6930_s6 + $0xc00] ss:$8 sps:$4 sm:$0xff]   ;;  %v6040_v2 = vld [vmem:[%s6930_s6 + $0xc14] ss:$8 sps:$4 sm:$0xff]  }
 0x2ea   : > { %4806 = vmatprep.subr.bf16.mxu0 %v5956_v14  ;;  %v6038_v14 = vld [vmem:[%s6930_s6 + $0xc10] ss:$8 sps:$4 sm:$0xff]  }
 0x2ec   : > { %4561 = vmatpush1.bf16.msra.mxu1 %v5951_v3  ;;  %v6074_v3 = vmov 0  }
 0x2ed   : > { %4807 = vmatpush1.bf16.msra.mxu0 %v5954_v15  ;;  %4562 = vmatprep.subr.bf16.mxu1 %v5959_v16  ;;  %v6041_v15 = vld [vmem:[%s6930_s6 + $0xc20] ss:$8 sps:$4 sm:$0xff]   ;;  %v6044_v16 = vld [vmem:[%s6930_s6 + $0xc30] ss:$8 sps:$4 sm:$0xff]  }
 0x2ee   : > { %4808 = vmatprep.subr.bf16.mxu0 %v5962_v17  ;;  %v4981_v17 = vld.sshfl [vmem:[%s7473_s0 + $0x18] sm:$0x1 pattern:$0x75316420] }
 0x2f0   : > { %4563 = vmatpush1.bf16.msra.mxu1 %v5957_v19  ;;  %v2362_v19 = vrot.slane %v4981_v17, %v6935_v18 }
 0x2f1   : > { %4809 = vmatpush1.bf16.msra.mxu0 %v5960_v20  ;;  %4564 = vmatprep.subr.bf16.mxu1 %v5965_v21 }
 0x2f2   : > { %4810 = vmatprep.subr.bf16.mxu0 %v5968_v24 }
 0x2f4   : > { %4565 = vmatpush1.bf16.msra.mxu1 %v5963_v25 }
 0x2f5   : > { %4811 = vmatpush1.bf16.msra.mxu0 %v5966_v26  ;;  %4566 = vmatprep.subr.bf16.mxu1 %v5971_v27  ;;  %v2190_v26 = vsub.s32 0, %v6923_v12  ;;  %v2186_v27 = vld [vmem:[%s1782_s21] sm:$0x3] }
 0x2f6   : > { %4812 = vmatprep.subr.bf16.mxu0 %v5974_v28  ;;  %v2194_v28 = vsub.s32 1, %v6923_v12 }
 0x2f8   : > { %4567 = vmatpush1.bf16.msra.mxu1 %v5969_v29  ;;  %v2191_v29 = vrot.slane %v2186_v27, %v2190_v26 }
 0x2f9   : > { %4813 = vmatpush1.bf16.msra.mxu0 %v5972_v30  ;;  %4568 = vmatprep.subr.bf16.mxu1 %v5977_v31  ;;  %v2195_v30 = vrot.slane %v2186_v27, %v2194_v28 }
 0x2fa   : > { %4814 = vmatprep.subr.bf16.mxu0 %v5980_v36 }
 0x2fc   : > { %4569 = vmatpush1.bf16.msra.mxu1 %v5975_v37 }
 0x2fd   : > { %4815 = vmatpush1.bf16.msra.mxu0 %v5978_v22  ;;  %4570 = vmatprep.subr.bf16.mxu1 %v5983_v23 }
 0x2fe   : > { %4816 = vmatprep.subr.bf16.mxu0 %v5986_v13 }
 0x300   : > { %4571 = vmatpush1.bf16.msra.mxu1 %v5981_v39 }
 0x301   : > { %4817 = vmatpush1.bf16.msra.mxu0 %v5984_v40  ;;  %4572 = vmatprep.subr.bf16.mxu1 %v5989_v33 }
 0x302   : > { %4818 = vmatprep.subr.bf16.mxu0 %v5992_v34 }
 0x304   : > { %4573 = vmatpush1.bf16.msra.mxu1 %v5987_v41 }
 0x305   : > { %4819 = vmatpush1.bf16.msra.mxu0 %v5990_v42  ;;  %4574 = vmatprep.subr.bf16.mxu1 %v5995_v43 }
 0x306   : > { %4820 = vmatprep.subr.bf16.mxu0 %v5998_v44 }
 0x308   : > { %4575 = vmatpush1.bf16.msra.mxu1 %v5993_v46 }
 0x309   : > { %4821 = vmatpush1.bf16.msra.mxu0 %v5996_v47  ;;  %4576 = vmatprep.subr.bf16.mxu1 %v6001_v48 }
 0x30a   : > { %4822 = vmatprep.subr.bf16.mxu0 %v6004_v49 }
 0x30c   : > { %4577 = vmatpush1.bf16.msra.mxu1 %v5999_v50 }
 0x30d   : > { %4823 = vmatpush1.bf16.msra.mxu0 %v6002_v54  ;;  %4578 = vmatprep.subr.bf16.mxu1 %v6007_v55 }
 0x30e   : > { %4824 = vmatprep.subr.bf16.mxu0 %v6010_v56 }
 0x310   : > { %4579 = vmatpush1.bf16.msra.mxu1 %v6005_v45 }
 0x311   : > { %4825 = vmatpush1.bf16.msra.mxu0 %v6008_v35  ;;  %4580 = vmatprep.subr.bf16.mxu1 %v6013_v58 }
 0x312   : > { %4826 = vmatprep.subr.bf16.mxu0 %v6016_v59 }
 0x314   : > { %4581 = vmatpush1.bf16.msra.mxu1 %v6011_v32 }
 0x315   : > { %4827 = vmatpush1.bf16.msra.mxu0 %v6014_v51  ;;  %4582 = vmatprep.subr.bf16.mxu1 %v6019_v60 }
 0x316   : > { %4828 = vmatprep.subr.bf16.mxu0 %v6022_v61 }
 0x318   : > { %4583 = vmatpush1.bf16.msra.mxu1 %v6017_v62 }
 0x319   : > { %4829 = vmatpush1.bf16.msra.mxu0 %v6020_v63  ;;  %4584 = vmatprep.subr.bf16.mxu1 %v6025_v0 }
 0x31a   : > { %4830 = vmatprep.subr.bf16.mxu0 %v6028_v1 }
 0x31c   : > { %4585 = vmatpush1.bf16.msra.mxu1 %v6023_v52 }
 0x31d   : > { %4831 = vmatpush1.bf16.msra.mxu0 %v6026_v53  ;;  %4586 = vmatprep.subr.bf16.mxu1 %v6031_v6 }
 0x31e   : > { %4832 = vmatprep.subr.bf16.mxu0 %v6034_v7 }
 0x320   : > { %4587 = vmatpush1.bf16.msra.mxu1 %v6029_v8 }
 0x321   : > { %4833 = vmatpush1.bf16.msra.mxu0 %v6032_v9 }
 0x322   : > { %4843 = vmatprep.subr.bf16.mxu0 %v6037_v57 }
 0x323   : > { %4589 = vmatmul.mubr.bf16.vlgmr.msra.gmra.mrb[0].mxu1 %v2296_v10 }
 0x324   : > { %4835 = vmatmul.mubr.bf16.vlgmr.msra.gmra.mrb[0].mxu0 %v2346_v38 }
 0x325   : > { %4844 = vmatpush1.bf16.msra.mxu0 %v6035_v11  ;;  %4875 = vmatprep.mubr.bf16.mxu0 %v6074_v3 }
 0x326   : > { %4845 = vmatprep.subr.bf16.mxu0 %v6040_v2 }
 0x329   : > { %4846 = vmatpush1.bf16.msra.mxu0 %v6038_v14 }
 0x32a   : > { %4847 = vmatprep.subr.bf16.mxu0 %v6043_v4 }
 0x32d   : > { %4848 = vmatpush1.bf16.msra.mxu0 %v6041_v15 }
 0x32e   : > { %4849 = vmatprep.subr.bf16.mxu0 %v6046_v5 }
 0x331   : > { %4850 = vmatpush1.bf16.msra.mxu0 %v6044_v16 }
 0x334   : > { %5374 = vmatmul.mubr.msk.bf16.vlgmr.msra.gmra.mrb[0].mxu0 %vm4347_vm0, %v2362_v19 }
 0x3f6   : > { %v4590_v20 = vpop.f32.mrb[0].mxu1 }
 0x3f7   : > { %v4592_v21 = vpop.f32.mrb[1].mxu1  ;;  %v5380_v31 = vadd.f32 %v4590_v20, %v2191_v29 }
 0x3f8   : > { %v4594_v24 = vpop.f32.mrb[2].mxu1  ;;  %v5382_v36 = vadd.f32 %v4592_v21, %v2195_v30 }
 0x3f9   : > { %v4595_v25 = vpop.f32.mrb[3].mxu1 }
 0x407   : > { %v4877_v37 = vpop.f32.mrb[0].mxu0 }
 0x408   : > { %v5381_v22 = vadd.f32 %v5380_v31, %v4877_v37  ;;  %v4879_v23 = vpop.f32.mrb[1].mxu0 }
 0x409   : > { %v5383_v13 = vadd.f32 %v5382_v36, %v4879_v23  ;;  %v4881_v39 = vpop.f32.mrb[2].mxu0 }
 0x40a   : > { %v4884_v40 = vmax.f32 %v5381_v22, 0.0  ;;  %v4882_v33 = vpop.f32.mrb[3].mxu0 }
 0x40b   : > { %v4885_v34 = vmax.f32 %v5383_v13, 0.0 }
 0x40d   : > { %v5375_v41 = vpack.c.bf16 %v4885_v34, %v4884_v40 }
 0x40f   : > { %v4897_v42 = vrot.slane %v5375_v41, %v6935_v18 }
 0x411   : > { %5376 = vst.sshfl [vmem:[%s1787_s22] sm:$0x5 pattern:$0x73625140] %v4897_v42 }
 0x412 PF: > { %p10_p9 = scmp.ge.s32.totalorder %s6112_s16, 6   ;;  %s7477_s12 = smov %s6067_s13 }
 0x413   : > { %s7478_s13 = smov %s6121_s19  ;;  %s7479_s14 = smov %s6112_s16 }
 0x414   :  { %12 = sbr.rel (!%p10_p9) target bundleno = 2 (0x2), region = 108 }

</bundles_post_ra>
